<compile_context>
chip_gen: v7x
topology: tpu7x:2x2x1
jax: 0.10.0
libtpu: 0.0.40
codegen_flags: <defaults>
</compile_context>

<pallas_src>
import numpy as np
import jax
import jax.numpy as jnp
from jax import lax
from jax.experimental import pallas as pl
from jax.experimental.pallas import tpu as pltpu

EPS = 1e-6
INV_SQRT2 = 0.7071067811865475
SQRT_2_OVER_PI = 0.7978845608028654

# bf16 operands for the two MXU matmuls (accumulation stays f32).
MATMUL_DTYPE = jnp.bfloat16

# torch nn.GELU() default is exact (erf). Flip to True only if the bundle shows the
# VPU saturated; tanh runs on the EUP but deviates ~1e-3 from torch's exact GELU.
USE_TANH_GELU = False


def _gelu(h):
    if USE_TANH_GELU:
        return 0.5 * h * (1.0 + jnp.tanh(SQRT_2_OVER_PI * (h + 0.044715 * h * h * h)))
    # Exact GELU: erf via Abramowitz-Stegun 7.1.26 (|err| <= 1.5e-7). Uses only
    # exp/mul/add/select so it lowers on every TPU generation; exp lands on the EUP.
    z = h * INV_SQRT2
    az = jnp.abs(z)
    t = 1.0 / (1.0 + 0.3275911 * az)
    poly = ((((1.061405429 * t - 1.453152027) * t + 1.421413741) * t
             - 0.284496736) * t + 0.254829592) * t
    erf_abs = 1.0 - poly * jnp.exp(-az * az)
    erf_z = jnp.where(z >= 0.0, erf_abs, -erf_abs)
    return 0.5 * h * (1.0 + erf_z)


def _make_kernel(W, TH):
    """Kernel closure over the image width W (for roll shifts) and token chunk TH."""

    def kernel(x_ref, wdw_ref, bdw_ref, rowm_ref, colm_ref,
               lnw_ref, lnb_ref, w1_ref, b1_ref, w2_ref, b2_ref, g_ref,
               o_ref, dw_ref):
        C, HW = dw_ref.shape

        # ---------------- depthwise 7x7 conv, lane-dense (C, HW) ----------------
        x_cf = x_ref[...].astype(jnp.float32)        # (C, HW); also the residual
        w_all = wdw_ref[...].astype(jnp.float32)     # (C, 49) per-channel taps
        rowm = rowm_ref[...]                         # (7, HW) 0/1 row-validity masks
        colm = colm_ref[...]                         # (7, HW) 0/1 col-validity masks

        acc = None
        for ky in range(7):
            dy = ky - 3
            for kx in range(7):
                dx = kx - 3
                s = dy * W + dx                      # flattened source offset
                shifted = x_cf if s == 0 else pltpu.roll(x_cf, (-s) % HW, axis=1)
                m = rowm[ky:ky + 1, :] * colm[kx:kx + 1, :]     # (1, HW) zero-pad mask
                tap = w_all[:, ky * 7 + kx:ky * 7 + kx + 1]     # (C, 1) tap weight
                contrib = (shifted * m) * tap
                acc = contrib if acc is None else acc + contrib
        # single store, no zero-init of the scratch
        dw_ref[...] = acc + bdw_ref[...]

        # --------- LayerNorm + MLP + layer-scale + residual, per token chunk ----
        lnw = lnw_ref[...]                            # (C, 1)
        lnb = lnb_ref[...]                            # (C, 1)
        b1 = b1_ref[...]                              # (4C, 1)
        b2 = b2_ref[...]                              # (C, 1)
        g = g_ref[...]                                # (C, 1)
        for c in range(HW // TH):
            sl = pl.ds(c * TH, TH)                    # static, 128-aligned lane chunk
            xv = dw_ref[:, sl]                        # (C, TH) f32
            mu = jnp.mean(xv, axis=0, keepdims=True)  # LN over channels (sublane reduce)
            xc = xv - mu
            var = jnp.mean(xc * xc, axis=0, keepdims=True)
            xn = xc * lax.rsqrt(var + EPS) * lnw + lnb

            h = jnp.dot(w1_ref[...], xn.astype(w1_ref.dtype),      # (4C, TH)
                        preferred_element_type=jnp.float32) + b1
            h = _gelu(h)
            y = jnp.dot(w2_ref[...], h.astype(w2_ref.dtype),       # (C, TH)
                        preferred_element_type=jnp.float32)
            y = (y + b2) * g
            out = x_ref[:, sl].astype(jnp.float32) + y             # pre-dwconv residual
            o_ref[:, sl] = out.astype(o_ref.dtype)

    return kernel


def convnext_block_forward(xmeta, params, *, token_chunk=512):
    """Public wrapper: NCHW in, NCHW out, meta passed through untouched."""
    x_nchw, meta = xmeta
    N, C, H, W = x_nchw.shape
    HW = H * W
    H4 = params["w1"].shape[1]
    assert C % 8 == 0 and HW % 128 == 0, "need C%8==0 and H*W%128==0 for lane-dense tiles"

    TH = min(HW, token_chunk)
    while HW % TH:
        TH -= 128
    assert TH >= 128 and TH % 128 == 0

    f32 = jnp.float32
    x2 = x_nchw.reshape(N, C, HW)                          # free reshape of contiguous NCHW
    w_dw_cf = params["w_dw"].reshape(49, C).T.astype(f32)  # (C, 49) channels-first taps
    w1t = params["w1"].T.astype(MATMUL_DTYPE)              # (4C, C)  == torch pwconv1.weight
    w2t = params["w2"].T.astype(MATMUL_DTYPE)              # (C, 4C)  == torch pwconv2.weight

    # Zero-padding validity masks for the 49 taps, built host-side (constants).
    pos = np.arange(HW, dtype=np.int64)
    row, col = pos // W, pos % W
    row_mask = np.stack([((row + dy >= 0) & (row + dy < H)) for dy in range(-3, 4)]
                        ).astype(np.float32)               # (7, HW)
    col_mask = np.stack([((col + dx >= 0) & (col + dx < W)) for dx in range(-3, 4)]
                        ).astype(np.float32)               # (7, HW)

    def wspec(shape):
        # constant-index blocks: single-buffer (they never change between grid steps)
        return pl.BlockSpec(shape, lambda n: (0,) * len(shape),
                            pipeline_mode=pl.Buffered(1))

    kernel = _make_kernel(W, TH)

    out2 = pl.pallas_call(
        kernel,
        out_shape=jax.ShapeDtypeStruct((N, C, HW), x_nchw.dtype),
        grid_spec=pltpu.PrefetchScalarGridSpec(
            num_scalar_prefetch=0,
            grid=(N,),                                     # keep batch >=2 / even for v7x
            in_specs=[
                pl.BlockSpec((None, C, HW), lambda n: (n, 0, 0)),   # x, one image per step
                wspec((C, 49)),                                     # dwconv weights
                wspec((C, 1)),                                      # dwconv bias
                wspec((7, HW)),                                     # row pad masks
                wspec((7, HW)),                                     # col pad masks
                wspec((C, 1)),                                      # LN weight
                wspec((C, 1)),                                      # LN bias
                wspec((H4, C)),                                     # pwconv1 W (bf16)
                wspec((H4, 1)),                                     # pwconv1 b
                wspec((C, H4)),                                     # pwconv2 W (bf16)
                wspec((C, 1)),                                      # pwconv2 b
                wspec((C, 1)),                                      # gamma
            ],
            out_specs=pl.BlockSpec((None, C, HW), lambda n: (n, 0, 0)),
            scratch_shapes=[pltpu.VMEM((C, HW), jnp.float32)],      # dwconv output
        ),
        compiler_params=pltpu.CompilerParams(
            dimension_semantics=("parallel",),
            vmem_limit_bytes=64 * 1024 * 1024,
        ),
    )(x2, w_dw_cf,
      params["b_dw"].reshape(C, 1).astype(f32),
      jnp.asarray(row_mask), jnp.asarray(col_mask),
      params["ln_w"].reshape(C, 1).astype(f32),
      params["ln_b"].reshape(C, 1).astype(f32),
      w1t, params["b1"].reshape(H4, 1).astype(f32),
      w2t, params["b2"].reshape(C, 1).astype(f32),
      params["gamma"].reshape(C, 1).astype(f32))

    return out2.reshape(N, C, H, W), meta


# ----------------------------------------------------------------------------
# Pure-JAX reference (PyTorch semantics) for validation
# ----------------------------------------------------------------------------
def reference_forward(x_nchw, p):
    x = jnp.transpose(x_nchw, (0, 2, 3, 1))
    C = x.shape[-1]
    rhs = p["w_dw"].reshape(7, 7, 1, C)
    dw = lax.conv_general_dilated(
        x, rhs, window_strides=(1, 1), padding=[(3, 3), (3, 3)],
        dimension_numbers=("NHWC", "HWIO", "NHWC"),
        feature_group_count=C) + p["b_dw"]
    mu = dw.mean(-1, keepdims=True)
    var = ((dw - mu) ** 2).mean(-1, keepdims=True)
    xn = (dw - mu) / jnp.sqrt(var + EPS) * p["ln_w"] + p["ln_b"]
    h = jax.nn.gelu(xn @ p["w1"] + p["b1"], approximate=False)
    y = (h @ p["w2"] + p["b2"]) * p["gamma"]
    return jnp.transpose(x + y, (0, 3, 1, 2))


if __name__ == "__main__":
    # Small shapes consistent with the module: dim=32, spatial 16x16, batch 2.
    N, C, H, W = 2, 32, 16, 16
    HID = 4 * C
    layer_scale_init_value = 0.1   # >0 so the gamma path is actually exercised

    key = jax.random.PRNGKey(0)
    ks = jax.random.split(key, 10)

    params = {
        # dwconv weight: torch (C,1,7,7) -> stored here as (7,7,C)
        "w_dw": jax.random.normal(ks[0], (7, 7, C), jnp.float32) * 0.1,
        "b_dw": jax.random.normal(ks[1], (C,), jnp.float32) * 0.1,
        "ln_w": 1.0 + 0.1 * jax.random.normal(ks[2], (C,), jnp.float32),
        "ln_b": 0.1 * jax.random.normal(ks[3], (C,), jnp.float32),
        # pwconv1: torch Linear(C, 4C) -> weight.T stored as (C, 4C)
        "w1": jax.random.normal(ks[4], (C, HID), jnp.float32) * 0.05,
        "b1": jax.random.normal(ks[5], (HID,), jnp.float32) * 0.05,
        # pwconv2: torch Linear(4C, C) -> weight.T stored as (4C, C)
        "w2": jax.random.normal(ks[6], (HID, C), jnp.float32) * 0.05,
        "b2": jax.random.normal(ks[7], (C,), jnp.float32) * 0.05,
        "gamma": layer_scale_init_value * jnp.ones((C,), jnp.float32),
    }

    x = jax.random.normal(ks[8], (N, C, H, W), jnp.float32)
    meta = None  # passed through untouched, as in the PyTorch module

    out, meta_out = convnext_block_forward((x, meta), params)
    out = jax.block_until_ready(out)

    ref = reference_forward(x, params)
    assert out.shape == (N, C, H, W)
    err = float(jnp.max(jnp.abs(out - ref)))
    # bf16 MXU operands (f32 accumulation): tolerance loosened vs. a pure-f32 run.
    assert err < 2e-3, f"max abs err = {err}"

    print("KERNEL_OK")
</pallas_src>

<mosaic_0001>
module attributes {stable_mosaic.version = 11 : i64} {
  func.func @kernel(%arg0: i32, %arg1: memref<1x32x256xf32, #tpu.memory_space<vmem>>, %arg2: memref<32x49xf32, #tpu.memory_space<vmem>>, %arg3: memref<32x1xf32, #tpu.memory_space<vmem>>, %arg4: memref<7x256xf32, #tpu.memory_space<vmem>>, %arg5: memref<7x256xf32, #tpu.memory_space<vmem>>, %arg6: memref<32x1xf32, #tpu.memory_space<vmem>>, %arg7: memref<32x1xf32, #tpu.memory_space<vmem>>, %arg8: memref<128x32xbf16, #tpu.memory_space<vmem>>, %arg9: memref<128x1xf32, #tpu.memory_space<vmem>>, %arg10: memref<32x128xbf16, #tpu.memory_space<vmem>>, %arg11: memref<32x1xf32, #tpu.memory_space<vmem>>, %arg12: memref<32x1xf32, #tpu.memory_space<vmem>>, %arg13: memref<1x32x256xf32, #tpu.memory_space<vmem>>, %arg14: memref<32x256xf32, #tpu.memory_space<vmem>>) attributes {dimension_semantics = [#tpu.dimension_semantics<parallel>], iteration_bounds = array<i64: 2>, scalar_prefetch = 0 : i64, scratch_operands = 1 : i64, tpu.core_type = #tpu.core_type<tc>, window_params = [{transform_indices = @transform_0, window_bounds = array<i64: 1, 32, 256>}, {pipeline_mode = #tpu.pipeline_mode<synchronous>, transform_indices = @transform_1, window_bounds = array<i64: 32, 49>}, {pipeline_mode = #tpu.pipeline_mode<synchronous>, transform_indices = @transform_2, window_bounds = array<i64: 32, 1>}, {pipeline_mode = #tpu.pipeline_mode<synchronous>, transform_indices = @transform_3, window_bounds = array<i64: 7, 256>}, {pipeline_mode = #tpu.pipeline_mode<synchronous>, transform_indices = @transform_4, window_bounds = array<i64: 7, 256>}, {pipeline_mode = #tpu.pipeline_mode<synchronous>, transform_indices = @transform_5, window_bounds = array<i64: 32, 1>}, {pipeline_mode = #tpu.pipeline_mode<synchronous>, transform_indices = @transform_6, window_bounds = array<i64: 32, 1>}, {pipeline_mode = #tpu.pipeline_mode<synchronous>, transform_indices = @transform_7, window_bounds = array<i64: 128, 32>}, {pipeline_mode = #tpu.pipeline_mode<synchronous>, transform_indices = @transform_8, window_bounds = array<i64: 128, 1>}, {pipeline_mode = #tpu.pipeline_mode<synchronous>, transform_indices = @transform_9, window_bounds = array<i64: 32, 128>}, {pipeline_mode = #tpu.pipeline_mode<synchronous>, transform_indices = @transform_10, window_bounds = array<i64: 32, 1>}, {pipeline_mode = #tpu.pipeline_mode<synchronous>, transform_indices = @transform_11, window_bounds = array<i64: 32, 1>}, {transform_indices = @transform_12, window_bounds = array<i64: 1, 32, 256>}]} {
    %c0 = arith.constant 0 : index
    %c0_0 = arith.constant 0 : index
    %c0_1 = arith.constant 0 : index
    %0 = vector.load %arg1[%c0, %c0_0, %c0_1] : memref<1x32x256xf32, #tpu.memory_space<vmem>>, vector<1x32x256xf32>
    %1 = vector.shape_cast %0 : vector<1x32x256xf32> to vector<32x256xf32>
    %c0_2 = arith.constant 0 : index
    %c0_3 = arith.constant 0 : index
    %2 = vector.load %arg2[%c0_2, %c0_3] : memref<32x49xf32, #tpu.memory_space<vmem>>, vector<32x49xf32>
    %c0_4 = arith.constant 0 : index
    %c0_5 = arith.constant 0 : index
    %3 = vector.load %arg4[%c0_4, %c0_5] : memref<7x256xf32, #tpu.memory_space<vmem>>, vector<7x256xf32>
    %c0_6 = arith.constant 0 : index
    %c0_7 = arith.constant 0 : index
    %4 = vector.load %arg5[%c0_6, %c0_7] : memref<7x256xf32, #tpu.memory_space<vmem>>, vector<7x256xf32>
    %c51_i32 = arith.constant 51 : i32
    %5 = tpu.dynamic_rotate %1 by %c51_i32 dim 1 : vector<32x256xf32>, i32 -> vector<32x256xf32>
    %6 = vector.extract_strided_slice %3 {offsets = [0, 0], sizes = [1, 256], strides = [1, 1]} : vector<7x256xf32> to vector<1x256xf32>
    %7 = vector.extract_strided_slice %4 {offsets = [0, 0], sizes = [1, 256], strides = [1, 1]} : vector<7x256xf32> to vector<1x256xf32>
    %8 = arith.mulf %6, %7 : vector<1x256xf32>
    %9 = vector.extract_strided_slice %2 {offsets = [0, 0], sizes = [32, 1], strides = [1, 1]} : vector<32x49xf32> to vector<32x1xf32>
    %10 = vector.broadcast %8 : vector<1x256xf32> to vector<32x256xf32>
    %11 = arith.mulf %5, %10 : vector<32x256xf32>
    %12 = vector.broadcast %9 : vector<32x1xf32> to vector<32x256xf32>
    %13 = arith.mulf %11, %12 : vector<32x256xf32>
    %c50_i32 = arith.constant 50 : i32
    %14 = tpu.dynamic_rotate %1 by %c50_i32 dim 1 : vector<32x256xf32>, i32 -> vector<32x256xf32>
    %15 = vector.extract_strided_slice %3 {offsets = [0, 0], sizes = [1, 256], strides = [1, 1]} : vector<7x256xf32> to vector<1x256xf32>
    %16 = vector.extract_strided_slice %4 {offsets = [1, 0], sizes = [1, 256], strides = [1, 1]} : vector<7x256xf32> to vector<1x256xf32>
    %17 = arith.mulf %15, %16 : vector<1x256xf32>
    %18 = vector.extract_strided_slice %2 {offsets = [0, 1], sizes = [32, 1], strides = [1, 1]} : vector<32x49xf32> to vector<32x1xf32>
    %19 = vector.broadcast %17 : vector<1x256xf32> to vector<32x256xf32>
    %20 = arith.mulf %14, %19 : vector<32x256xf32>
    %21 = vector.broadcast %18 : vector<32x1xf32> to vector<32x256xf32>
    %22 = arith.mulf %20, %21 : vector<32x256xf32>
    %23 = arith.addf %13, %22 : vector<32x256xf32>
    %c49_i32 = arith.constant 49 : i32
    %24 = tpu.dynamic_rotate %1 by %c49_i32 dim 1 : vector<32x256xf32>, i32 -> vector<32x256xf32>
    %25 = vector.extract_strided_slice %3 {offsets = [0, 0], sizes = [1, 256], strides = [1, 1]} : vector<7x256xf32> to vector<1x256xf32>
    %26 = vector.extract_strided_slice %4 {offsets = [2, 0], sizes = [1, 256], strides = [1, 1]} : vector<7x256xf32> to vector<1x256xf32>
    %27 = arith.mulf %25, %26 : vector<1x256xf32>
    %28 = vector.extract_strided_slice %2 {offsets = [0, 2], sizes = [32, 1], strides = [1, 1]} : vector<32x49xf32> to vector<32x1xf32>
    %29 = vector.broadcast %27 : vector<1x256xf32> to vector<32x256xf32>
    %30 = arith.mulf %24, %29 : vector<32x256xf32>
    %31 = vector.broadcast %28 : vector<32x1xf32> to vector<32x256xf32>
    %32 = arith.mulf %30, %31 : vector<32x256xf32>
    %33 = arith.addf %23, %32 : vector<32x256xf32>
    %c48_i32 = arith.constant 48 : i32
    %34 = tpu.dynamic_rotate %1 by %c48_i32 dim 1 : vector<32x256xf32>, i32 -> vector<32x256xf32>
    %35 = vector.extract_strided_slice %3 {offsets = [0, 0], sizes = [1, 256], strides = [1, 1]} : vector<7x256xf32> to vector<1x256xf32>
    %36 = vector.extract_strided_slice %4 {offsets = [3, 0], sizes = [1, 256], strides = [1, 1]} : vector<7x256xf32> to vector<1x256xf32>
    %37 = arith.mulf %35, %36 : vector<1x256xf32>
    %38 = vector.extract_strided_slice %2 {offsets = [0, 3], sizes = [32, 1], strides = [1, 1]} : vector<32x49xf32> to vector<32x1xf32>
    %39 = vector.broadcast %37 : vector<1x256xf32> to vector<32x256xf32>
    %40 = arith.mulf %34, %39 : vector<32x256xf32>
    %41 = vector.broadcast %38 : vector<32x1xf32> to vector<32x256xf32>
    %42 = arith.mulf %40, %41 : vector<32x256xf32>
    %43 = arith.addf %33, %42 : vector<32x256xf32>
    %c47_i32 = arith.constant 47 : i32
    %44 = tpu.dynamic_rotate %1 by %c47_i32 dim 1 : vector<32x256xf32>, i32 -> vector<32x256xf32>
    %45 = vector.extract_strided_slice %3 {offsets = [0, 0], sizes = [1, 256], strides = [1, 1]} : vector<7x256xf32> to vector<1x256xf32>
    %46 = vector.extract_strided_slice %4 {offsets = [4, 0], sizes = [1, 256], strides = [1, 1]} : vector<7x256xf32> to vector<1x256xf32>
    %47 = arith.mulf %45, %46 : vector<1x256xf32>
    %48 = vector.extract_strided_slice %2 {offsets = [0, 4], sizes = [32, 1], strides = [1, 1]} : vector<32x49xf32> to vector<32x1xf32>
    %49 = vector.broadcast %47 : vector<1x256xf32> to vector<32x256xf32>
    %50 = arith.mulf %44, %49 : vector<32x256xf32>
    %51 = vector.broadcast %48 : vector<32x1xf32> to vector<32x256xf32>
    %52 = arith.mulf %50, %51 : vector<32x256xf32>
    %53 = arith.addf %43, %52 : vector<32x256xf32>
    %c46_i32 = arith.constant 46 : i32
    %54 = tpu.dynamic_rotate %1 by %c46_i32 dim 1 : vector<32x256xf32>, i32 -> vector<32x256xf32>
    %55 = vector.extract_strided_slice %3 {offsets = [0, 0], sizes = [1, 256], strides = [1, 1]} : vector<7x256xf32> to vector<1x256xf32>
    %56 = vector.extract_strided_slice %4 {offsets = [5, 0], sizes = [1, 256], strides = [1, 1]} : vector<7x256xf32> to vector<1x256xf32>
    %57 = arith.mulf %55, %56 : vector<1x256xf32>
    %58 = vector.extract_strided_slice %2 {offsets = [0, 5], sizes = [32, 1], strides = [1, 1]} : vector<32x49xf32> to vector<32x1xf32>
    %59 = vector.broadcast %57 : vector<1x256xf32> to vector<32x256xf32>
    %60 = arith.mulf %54, %59 : vector<32x256xf32>
    %61 = vector.broadcast %58 : vector<32x1xf32> to vector<32x256xf32>
    %62 = arith.mulf %60, %61 : vector<32x256xf32>
    %63 = arith.addf %53, %62 : vector<32x256xf32>
    %c45_i32 = arith.constant 45 : i32
    %64 = tpu.dynamic_rotate %1 by %c45_i32 dim 1 : vector<32x256xf32>, i32 -> vector<32x256xf32>
    %65 = vector.extract_strided_slice %3 {offsets = [0, 0], sizes = [1, 256], strides = [1, 1]} : vector<7x256xf32> to vector<1x256xf32>
    %66 = vector.extract_strided_slice %4 {offsets = [6, 0], sizes = [1, 256], strides = [1, 1]} : vector<7x256xf32> to vector<1x256xf32>
    %67 = arith.mulf %65, %66 : vector<1x256xf32>
    %68 = vector.extract_strided_slice %2 {offsets = [0, 6], sizes = [32, 1], strides = [1, 1]} : vector<32x49xf32> to vector<32x1xf32>
    %69 = vector.broadcast %67 : vector<1x256xf32> to vector<32x256xf32>
    %70 = arith.mulf %64, %69 : vector<32x256xf32>
    %71 = vector.broadcast %68 : vector<32x1xf32> to vector<32x256xf32>
    %72 = arith.mulf %70, %71 : vector<32x256xf32>
    %73 = arith.addf %63, %72 : vector<32x256xf32>
    %c35_i32 = arith.constant 35 : i32
    %74 = tpu.dynamic_rotate %1 by %c35_i32 dim 1 : vector<32x256xf32>, i32 -> vector<32x256xf32>
    %75 = vector.extract_strided_slice %3 {offsets = [1, 0], sizes = [1, 256], strides = [1, 1]} : vector<7x256xf32> to vector<1x256xf32>
    %76 = vector.extract_strided_slice %4 {offsets = [0, 0], sizes = [1, 256], strides = [1, 1]} : vector<7x256xf32> to vector<1x256xf32>
    %77 = arith.mulf %75, %76 : vector<1x256xf32>
    %78 = vector.extract_strided_slice %2 {offsets = [0, 7], sizes = [32, 1], strides = [1, 1]} : vector<32x49xf32> to vector<32x1xf32>
    %79 = vector.broadcast %77 : vector<1x256xf32> to vector<32x256xf32>
    %80 = arith.mulf %74, %79 : vector<32x256xf32>
    %81 = vector.broadcast %78 : vector<32x1xf32> to vector<32x256xf32>
    %82 = arith.mulf %80, %81 : vector<32x256xf32>
    %83 = arith.addf %73, %82 : vector<32x256xf32>
    %c34_i32 = arith.constant 34 : i32
    %84 = tpu.dynamic_rotate %1 by %c34_i32 dim 1 : vector<32x256xf32>, i32 -> vector<32x256xf32>
    %85 = vector.extract_strided_slice %3 {offsets = [1, 0], sizes = [1, 256], strides = [1, 1]} : vector<7x256xf32> to vector<1x256xf32>
    %86 = vector.extract_strided_slice %4 {offsets = [1, 0], sizes = [1, 256], strides = [1, 1]} : vector<7x256xf32> to vector<1x256xf32>
    %87 = arith.mulf %85, %86 : vector<1x256xf32>
    %88 = vector.extract_strided_slice %2 {offsets = [0, 8], sizes = [32, 1], strides = [1, 1]} : vector<32x49xf32> to vector<32x1xf32>
    %89 = vector.broadcast %87 : vector<1x256xf32> to vector<32x256xf32>
    %90 = arith.mulf %84, %89 : vector<32x256xf32>
    %91 = vector.broadcast %88 : vector<32x1xf32> to vector<32x256xf32>
    %92 = arith.mulf %90, %91 : vector<32x256xf32>
    %93 = arith.addf %83, %92 : vector<32x256xf32>
    %c33_i32 = arith.constant 33 : i32
    %94 = tpu.dynamic_rotate %1 by %c33_i32 dim 1 : vector<32x256xf32>, i32 -> vector<32x256xf32>
    %95 = vector.extract_strided_slice %3 {offsets = [1, 0], sizes = [1, 256], strides = [1, 1]} : vector<7x256xf32> to vector<1x256xf32>
    %96 = vector.extract_strided_slice %4 {offsets = [2, 0], sizes = [1, 256], strides = [1, 1]} : vector<7x256xf32> to vector<1x256xf32>
    %97 = arith.mulf %95, %96 : vector<1x256xf32>
    %98 = vector.extract_strided_slice %2 {offsets = [0, 9], sizes = [32, 1], strides = [1, 1]} : vector<32x49xf32> to vector<32x1xf32>
    %99 = vector.broadcast %97 : vector<1x256xf32> to vector<32x256xf32>
    %100 = arith.mulf %94, %99 : vector<32x256xf32>
    %101 = vector.broadcast %98 : vector<32x1xf32> to vector<32x256xf32>
    %102 = arith.mulf %100, %101 : vector<32x256xf32>
    %103 = arith.addf %93, %102 : vector<32x256xf32>
    %c32_i32 = arith.constant 32 : i32
    %104 = tpu.dynamic_rotate %1 by %c32_i32 dim 1 : vector<32x256xf32>, i32 -> vector<32x256xf32>
    %105 = vector.extract_strided_slice %3 {offsets = [1, 0], sizes = [1, 256], strides = [1, 1]} : vector<7x256xf32> to vector<1x256xf32>
    %106 = vector.extract_strided_slice %4 {offsets = [3, 0], sizes = [1, 256], strides = [1, 1]} : vector<7x256xf32> to vector<1x256xf32>
    %107 = arith.mulf %105, %106 : vector<1x256xf32>
    %108 = vector.extract_strided_slice %2 {offsets = [0, 10], sizes = [32, 1], strides = [1, 1]} : vector<32x49xf32> to vector<32x1xf32>
    %109 = vector.broadcast %107 : vector<1x256xf32> to vector<32x256xf32>
    %110 = arith.mulf %104, %109 : vector<32x256xf32>
    %111 = vector.broadcast %108 : vector<32x1xf32> to vector<32x256xf32>
    %112 = arith.mulf %110, %111 : vector<32x256xf32>
    %113 = arith.addf %103, %112 : vector<32x256xf32>
    %c31_i32 = arith.constant 31 : i32
    %114 = tpu.dynamic_rotate %1 by %c31_i32 dim 1 : vector<32x256xf32>, i32 -> vector<32x256xf32>
    %115 = vector.extract_strided_slice %3 {offsets = [1, 0], sizes = [1, 256], strides = [1, 1]} : vector<7x256xf32> to vector<1x256xf32>
    %116 = vector.extract_strided_slice %4 {offsets = [4, 0], sizes = [1, 256], strides = [1, 1]} : vector<7x256xf32> to vector<1x256xf32>
    %117 = arith.mulf %115, %116 : vector<1x256xf32>
    %118 = vector.extract_strided_slice %2 {offsets = [0, 11], sizes = [32, 1], strides = [1, 1]} : vector<32x49xf32> to vector<32x1xf32>
    %119 = vector.broadcast %117 : vector<1x256xf32> to vector<32x256xf32>
    %120 = arith.mulf %114, %119 : vector<32x256xf32>
    %121 = vector.broadcast %118 : vector<32x1xf32> to vector<32x256xf32>
    %122 = arith.mulf %120, %121 : vector<32x256xf32>
    %123 = arith.addf %113, %122 : vector<32x256xf32>
    %c30_i32 = arith.constant 30 : i32
    %124 = tpu.dynamic_rotate %1 by %c30_i32 dim 1 : vector<32x256xf32>, i32 -> vector<32x256xf32>
    %125 = vector.extract_strided_slice %3 {offsets = [1, 0], sizes = [1, 256], strides = [1, 1]} : vector<7x256xf32> to vector<1x256xf32>
    %126 = vector.extract_strided_slice %4 {offsets = [5, 0], sizes = [1, 256], strides = [1, 1]} : vector<7x256xf32> to vector<1x256xf32>
    %127 = arith.mulf %125, %126 : vector<1x256xf32>
    %128 = vector.extract_strided_slice %2 {offsets = [0, 12], sizes = [32, 1], strides = [1, 1]} : vector<32x49xf32> to vector<32x1xf32>
    %129 = vector.broadcast %127 : vector<1x256xf32> to vector<32x256xf32>
    %130 = arith.mulf %124, %129 : vector<32x256xf32>
    %131 = vector.broadcast %128 : vector<32x1xf32> to vector<32x256xf32>
    %132 = arith.mulf %130, %131 : vector<32x256xf32>
    %133 = arith.addf %123, %132 : vector<32x256xf32>
    %c29_i32 = arith.constant 29 : i32
    %134 = tpu.dynamic_rotate %1 by %c29_i32 dim 1 : vector<32x256xf32>, i32 -> vector<32x256xf32>
    %135 = vector.extract_strided_slice %3 {offsets = [1, 0], sizes = [1, 256], strides = [1, 1]} : vector<7x256xf32> to vector<1x256xf32>
    %136 = vector.extract_strided_slice %4 {offsets = [6, 0], sizes = [1, 256], strides = [1, 1]} : vector<7x256xf32> to vector<1x256xf32>
    %137 = arith.mulf %135, %136 : vector<1x256xf32>
    %138 = vector.extract_strided_slice %2 {offsets = [0, 13], sizes = [32, 1], strides = [1, 1]} : vector<32x49xf32> to vector<32x1xf32>
    %139 = vector.broadcast %137 : vector<1x256xf32> to vector<32x256xf32>
    %140 = arith.mulf %134, %139 : vector<32x256xf32>
    %141 = vector.broadcast %138 : vector<32x1xf32> to vector<32x256xf32>
    %142 = arith.mulf %140, %141 : vector<32x256xf32>
    %143 = arith.addf %133, %142 : vector<32x256xf32>
    %c19_i32 = arith.constant 19 : i32
    %144 = tpu.dynamic_rotate %1 by %c19_i32 dim 1 : vector<32x256xf32>, i32 -> vector<32x256xf32>
    %145 = vector.extract_strided_slice %3 {offsets = [2, 0], sizes = [1, 256], strides = [1, 1]} : vector<7x256xf32> to vector<1x256xf32>
    %146 = vector.extract_strided_slice %4 {offsets = [0, 0], sizes = [1, 256], strides = [1, 1]} : vector<7x256xf32> to vector<1x256xf32>
    %147 = arith.mulf %145, %146 : vector<1x256xf32>
    %148 = vector.extract_strided_slice %2 {offsets = [0, 14], sizes = [32, 1], strides = [1, 1]} : vector<32x49xf32> to vector<32x1xf32>
    %149 = vector.broadcast %147 : vector<1x256xf32> to vector<32x256xf32>
    %150 = arith.mulf %144, %149 : vector<32x256xf32>
    %151 = vector.broadcast %148 : vector<32x1xf32> to vector<32x256xf32>
    %152 = arith.mulf %150, %151 : vector<32x256xf32>
    %153 = arith.addf %143, %152 : vector<32x256xf32>
    %c18_i32 = arith.constant 18 : i32
    %154 = tpu.dynamic_rotate %1 by %c18_i32 dim 1 : vector<32x256xf32>, i32 -> vector<32x256xf32>
    %155 = vector.extract_strided_slice %3 {offsets = [2, 0], sizes = [1, 256], strides = [1, 1]} : vector<7x256xf32> to vector<1x256xf32>
    %156 = vector.extract_strided_slice %4 {offsets = [1, 0], sizes = [1, 256], strides = [1, 1]} : vector<7x256xf32> to vector<1x256xf32>
    %157 = arith.mulf %155, %156 : vector<1x256xf32>
    %158 = vector.extract_strided_slice %2 {offsets = [0, 15], sizes = [32, 1], strides = [1, 1]} : vector<32x49xf32> to vector<32x1xf32>
    %159 = vector.broadcast %157 : vector<1x256xf32> to vector<32x256xf32>
    %160 = arith.mulf %154, %159 : vector<32x256xf32>
    %161 = vector.broadcast %158 : vector<32x1xf32> to vector<32x256xf32>
    %162 = arith.mulf %160, %161 : vector<32x256xf32>
    %163 = arith.addf %153, %162 : vector<32x256xf32>
    %c17_i32 = arith.constant 17 : i32
    %164 = tpu.dynamic_rotate %1 by %c17_i32 dim 1 : vector<32x256xf32>, i32 -> vector<32x256xf32>
    %165 = vector.extract_strided_slice %3 {offsets = [2, 0], sizes = [1, 256], strides = [1, 1]} : vector<7x256xf32> to vector<1x256xf32>
    %166 = vector.extract_strided_slice %4 {offsets = [2, 0], sizes = [1, 256], strides = [1, 1]} : vector<7x256xf32> to vector<1x256xf32>
    %167 = arith.mulf %165, %166 : vector<1x256xf32>
    %168 = vector.extract_strided_slice %2 {offsets = [0, 16], sizes = [32, 1], strides = [1, 1]} : vector<32x49xf32> to vector<32x1xf32>
    %169 = vector.broadcast %167 : vector<1x256xf32> to vector<32x256xf32>
    %170 = arith.mulf %164, %169 : vector<32x256xf32>
    %171 = vector.broadcast %168 : vector<32x1xf32> to vector<32x256xf32>
    %172 = arith.mulf %170, %171 : vector<32x256xf32>
    %173 = arith.addf %163, %172 : vector<32x256xf32>
    %c16_i32 = arith.constant 16 : i32
    %174 = tpu.dynamic_rotate %1 by %c16_i32 dim 1 : vector<32x256xf32>, i32 -> vector<32x256xf32>
    %175 = vector.extract_strided_slice %3 {offsets = [2, 0], sizes = [1, 256], strides = [1, 1]} : vector<7x256xf32> to vector<1x256xf32>
    %176 = vector.extract_strided_slice %4 {offsets = [3, 0], sizes = [1, 256], strides = [1, 1]} : vector<7x256xf32> to vector<1x256xf32>
    %177 = arith.mulf %175, %176 : vector<1x256xf32>
    %178 = vector.extract_strided_slice %2 {offsets = [0, 17], sizes = [32, 1], strides = [1, 1]} : vector<32x49xf32> to vector<32x1xf32>
    %179 = vector.broadcast %177 : vector<1x256xf32> to vector<32x256xf32>
    %180 = arith.mulf %174, %179 : vector<32x256xf32>
    %181 = vector.broadcast %178 : vector<32x1xf32> to vector<32x256xf32>
    %182 = arith.mulf %180, %181 : vector<32x256xf32>
    %183 = arith.addf %173, %182 : vector<32x256xf32>
    %c15_i32 = arith.constant 15 : i32
    %184 = tpu.dynamic_rotate %1 by %c15_i32 dim 1 : vector<32x256xf32>, i32 -> vector<32x256xf32>
    %185 = vector.extract_strided_slice %3 {offsets = [2, 0], sizes = [1, 256], strides = [1, 1]} : vector<7x256xf32> to vector<1x256xf32>
    %186 = vector.extract_strided_slice %4 {offsets = [4, 0], sizes = [1, 256], strides = [1, 1]} : vector<7x256xf32> to vector<1x256xf32>
    %187 = arith.mulf %185, %186 : vector<1x256xf32>
    %188 = vector.extract_strided_slice %2 {offsets = [0, 18], sizes = [32, 1], strides = [1, 1]} : vector<32x49xf32> to vector<32x1xf32>
    %189 = vector.broadcast %187 : vector<1x256xf32> to vector<32x256xf32>
    %190 = arith.mulf %184, %189 : vector<32x256xf32>
    %191 = vector.broadcast %188 : vector<32x1xf32> to vector<32x256xf32>
    %192 = arith.mulf %190, %191 : vector<32x256xf32>
    %193 = arith.addf %183, %192 : vector<32x256xf32>
    %c14_i32 = arith.constant 14 : i32
    %194 = tpu.dynamic_rotate %1 by %c14_i32 dim 1 : vector<32x256xf32>, i32 -> vector<32x256xf32>
    %195 = vector.extract_strided_slice %3 {offsets = [2, 0], sizes = [1, 256], strides = [1, 1]} : vector<7x256xf32> to vector<1x256xf32>
    %196 = vector.extract_strided_slice %4 {offsets = [5, 0], sizes = [1, 256], strides = [1, 1]} : vector<7x256xf32> to vector<1x256xf32>
    %197 = arith.mulf %195, %196 : vector<1x256xf32>
    %198 = vector.extract_strided_slice %2 {offsets = [0, 19], sizes = [32, 1], strides = [1, 1]} : vector<32x49xf32> to vector<32x1xf32>
    %199 = vector.broadcast %197 : vector<1x256xf32> to vector<32x256xf32>
    %200 = arith.mulf %194, %199 : vector<32x256xf32>
    %201 = vector.broadcast %198 : vector<32x1xf32> to vector<32x256xf32>
    %202 = arith.mulf %200, %201 : vector<32x256xf32>
    %203 = arith.addf %193, %202 : vector<32x256xf32>
    %c13_i32 = arith.constant 13 : i32
    %204 = tpu.dynamic_rotate %1 by %c13_i32 dim 1 : vector<32x256xf32>, i32 -> vector<32x256xf32>
    %205 = vector.extract_strided_slice %3 {offsets = [2, 0], sizes = [1, 256], strides = [1, 1]} : vector<7x256xf32> to vector<1x256xf32>
    %206 = vector.extract_strided_slice %4 {offsets = [6, 0], sizes = [1, 256], strides = [1, 1]} : vector<7x256xf32> to vector<1x256xf32>
    %207 = arith.mulf %205, %206 : vector<1x256xf32>
    %208 = vector.extract_strided_slice %2 {offsets = [0, 20], sizes = [32, 1], strides = [1, 1]} : vector<32x49xf32> to vector<32x1xf32>
    %209 = vector.broadcast %207 : vector<1x256xf32> to vector<32x256xf32>
    %210 = arith.mulf %204, %209 : vector<32x256xf32>
    %211 = vector.broadcast %208 : vector<32x1xf32> to vector<32x256xf32>
    %212 = arith.mulf %210, %211 : vector<32x256xf32>
    %213 = arith.addf %203, %212 : vector<32x256xf32>
    %c3_i32 = arith.constant 3 : i32
    %214 = tpu.dynamic_rotate %1 by %c3_i32 dim 1 : vector<32x256xf32>, i32 -> vector<32x256xf32>
    %215 = vector.extract_strided_slice %3 {offsets = [3, 0], sizes = [1, 256], strides = [1, 1]} : vector<7x256xf32> to vector<1x256xf32>
    %216 = vector.extract_strided_slice %4 {offsets = [0, 0], sizes = [1, 256], strides = [1, 1]} : vector<7x256xf32> to vector<1x256xf32>
    %217 = arith.mulf %215, %216 : vector<1x256xf32>
    %218 = vector.extract_strided_slice %2 {offsets = [0, 21], sizes = [32, 1], strides = [1, 1]} : vector<32x49xf32> to vector<32x1xf32>
    %219 = vector.broadcast %217 : vector<1x256xf32> to vector<32x256xf32>
    %220 = arith.mulf %214, %219 : vector<32x256xf32>
    %221 = vector.broadcast %218 : vector<32x1xf32> to vector<32x256xf32>
    %222 = arith.mulf %220, %221 : vector<32x256xf32>
    %223 = arith.addf %213, %222 : vector<32x256xf32>
    %c2_i32 = arith.constant 2 : i32
    %224 = tpu.dynamic_rotate %1 by %c2_i32 dim 1 : vector<32x256xf32>, i32 -> vector<32x256xf32>
    %225 = vector.extract_strided_slice %3 {offsets = [3, 0], sizes = [1, 256], strides = [1, 1]} : vector<7x256xf32> to vector<1x256xf32>
    %226 = vector.extract_strided_slice %4 {offsets = [1, 0], sizes = [1, 256], strides = [1, 1]} : vector<7x256xf32> to vector<1x256xf32>
    %227 = arith.mulf %225, %226 : vector<1x256xf32>
    %228 = vector.extract_strided_slice %2 {offsets = [0, 22], sizes = [32, 1], strides = [1, 1]} : vector<32x49xf32> to vector<32x1xf32>
    %229 = vector.broadcast %227 : vector<1x256xf32> to vector<32x256xf32>
    %230 = arith.mulf %224, %229 : vector<32x256xf32>
    %231 = vector.broadcast %228 : vector<32x1xf32> to vector<32x256xf32>
    %232 = arith.mulf %230, %231 : vector<32x256xf32>
    %233 = arith.addf %223, %232 : vector<32x256xf32>
    %c1_i32 = arith.constant 1 : i32
    %234 = tpu.dynamic_rotate %1 by %c1_i32 dim 1 : vector<32x256xf32>, i32 -> vector<32x256xf32>
    %235 = vector.extract_strided_slice %3 {offsets = [3, 0], sizes = [1, 256], strides = [1, 1]} : vector<7x256xf32> to vector<1x256xf32>
    %236 = vector.extract_strided_slice %4 {offsets = [2, 0], sizes = [1, 256], strides = [1, 1]} : vector<7x256xf32> to vector<1x256xf32>
    %237 = arith.mulf %235, %236 : vector<1x256xf32>
    %238 = vector.extract_strided_slice %2 {offsets = [0, 23], sizes = [32, 1], strides = [1, 1]} : vector<32x49xf32> to vector<32x1xf32>
    %239 = vector.broadcast %237 : vector<1x256xf32> to vector<32x256xf32>
    %240 = arith.mulf %234, %239 : vector<32x256xf32>
    %241 = vector.broadcast %238 : vector<32x1xf32> to vector<32x256xf32>
    %242 = arith.mulf %240, %241 : vector<32x256xf32>
    %243 = arith.addf %233, %242 : vector<32x256xf32>
    %244 = vector.extract_strided_slice %3 {offsets = [3, 0], sizes = [1, 256], strides = [1, 1]} : vector<7x256xf32> to vector<1x256xf32>
    %245 = vector.extract_strided_slice %4 {offsets = [3, 0], sizes = [1, 256], strides = [1, 1]} : vector<7x256xf32> to vector<1x256xf32>
    %246 = arith.mulf %244, %245 : vector<1x256xf32>
    %247 = vector.extract_strided_slice %2 {offsets = [0, 24], sizes = [32, 1], strides = [1, 1]} : vector<32x49xf32> to vector<32x1xf32>
    %248 = vector.broadcast %246 : vector<1x256xf32> to vector<32x256xf32>
    %249 = arith.mulf %1, %248 : vector<32x256xf32>
    %250 = vector.broadcast %247 : vector<32x1xf32> to vector<32x256xf32>
    %251 = arith.mulf %249, %250 : vector<32x256xf32>
    %252 = arith.addf %243, %251 : vector<32x256xf32>
    %c255_i32 = arith.constant 255 : i32
    %253 = tpu.dynamic_rotate %1 by %c255_i32 dim 1 : vector<32x256xf32>, i32 -> vector<32x256xf32>
    %254 = vector.extract_strided_slice %3 {offsets = [3, 0], sizes = [1, 256], strides = [1, 1]} : vector<7x256xf32> to vector<1x256xf32>
    %255 = vector.extract_strided_slice %4 {offsets = [4, 0], sizes = [1, 256], strides = [1, 1]} : vector<7x256xf32> to vector<1x256xf32>
    %256 = arith.mulf %254, %255 : vector<1x256xf32>
    %257 = vector.extract_strided_slice %2 {offsets = [0, 25], sizes = [32, 1], strides = [1, 1]} : vector<32x49xf32> to vector<32x1xf32>
    %258 = vector.broadcast %256 : vector<1x256xf32> to vector<32x256xf32>
    %259 = arith.mulf %253, %258 : vector<32x256xf32>
    %260 = vector.broadcast %257 : vector<32x1xf32> to vector<32x256xf32>
    %261 = arith.mulf %259, %260 : vector<32x256xf32>
    %262 = arith.addf %252, %261 : vector<32x256xf32>
    %c254_i32 = arith.constant 254 : i32
    %263 = tpu.dynamic_rotate %1 by %c254_i32 dim 1 : vector<32x256xf32>, i32 -> vector<32x256xf32>
    %264 = vector.extract_strided_slice %3 {offsets = [3, 0], sizes = [1, 256], strides = [1, 1]} : vector<7x256xf32> to vector<1x256xf32>
    %265 = vector.extract_strided_slice %4 {offsets = [5, 0], sizes = [1, 256], strides = [1, 1]} : vector<7x256xf32> to vector<1x256xf32>
    %266 = arith.mulf %264, %265 : vector<1x256xf32>
    %267 = vector.extract_strided_slice %2 {offsets = [0, 26], sizes = [32, 1], strides = [1, 1]} : vector<32x49xf32> to vector<32x1xf32>
    %268 = vector.broadcast %266 : vector<1x256xf32> to vector<32x256xf32>
    %269 = arith.mulf %263, %268 : vector<32x256xf32>
    %270 = vector.broadcast %267 : vector<32x1xf32> to vector<32x256xf32>
    %271 = arith.mulf %269, %270 : vector<32x256xf32>
    %272 = arith.addf %262, %271 : vector<32x256xf32>
    %c253_i32 = arith.constant 253 : i32
    %273 = tpu.dynamic_rotate %1 by %c253_i32 dim 1 : vector<32x256xf32>, i32 -> vector<32x256xf32>
    %274 = vector.extract_strided_slice %3 {offsets = [3, 0], sizes = [1, 256], strides = [1, 1]} : vector<7x256xf32> to vector<1x256xf32>
    %275 = vector.extract_strided_slice %4 {offsets = [6, 0], sizes = [1, 256], strides = [1, 1]} : vector<7x256xf32> to vector<1x256xf32>
    %276 = arith.mulf %274, %275 : vector<1x256xf32>
    %277 = vector.extract_strided_slice %2 {offsets = [0, 27], sizes = [32, 1], strides = [1, 1]} : vector<32x49xf32> to vector<32x1xf32>
    %278 = vector.broadcast %276 : vector<1x256xf32> to vector<32x256xf32>
    %279 = arith.mulf %273, %278 : vector<32x256xf32>
    %280 = vector.broadcast %277 : vector<32x1xf32> to vector<32x256xf32>
    %281 = arith.mulf %279, %280 : vector<32x256xf32>
    %282 = arith.addf %272, %281 : vector<32x256xf32>
    %c243_i32 = arith.constant 243 : i32
    %283 = tpu.dynamic_rotate %1 by %c243_i32 dim 1 : vector<32x256xf32>, i32 -> vector<32x256xf32>
    %284 = vector.extract_strided_slice %3 {offsets = [4, 0], sizes = [1, 256], strides = [1, 1]} : vector<7x256xf32> to vector<1x256xf32>
    %285 = vector.extract_strided_slice %4 {offsets = [0, 0], sizes = [1, 256], strides = [1, 1]} : vector<7x256xf32> to vector<1x256xf32>
    %286 = arith.mulf %284, %285 : vector<1x256xf32>
    %287 = vector.extract_strided_slice %2 {offsets = [0, 28], sizes = [32, 1], strides = [1, 1]} : vector<32x49xf32> to vector<32x1xf32>
    %288 = vector.broadcast %286 : vector<1x256xf32> to vector<32x256xf32>
    %289 = arith.mulf %283, %288 : vector<32x256xf32>
    %290 = vector.broadcast %287 : vector<32x1xf32> to vector<32x256xf32>
    %291 = arith.mulf %289, %290 : vector<32x256xf32>
    %292 = arith.addf %282, %291 : vector<32x256xf32>
    %c242_i32 = arith.constant 242 : i32
    %293 = tpu.dynamic_rotate %1 by %c242_i32 dim 1 : vector<32x256xf32>, i32 -> vector<32x256xf32>
    %294 = vector.extract_strided_slice %3 {offsets = [4, 0], sizes = [1, 256], strides = [1, 1]} : vector<7x256xf32> to vector<1x256xf32>
    %295 = vector.extract_strided_slice %4 {offsets = [1, 0], sizes = [1, 256], strides = [1, 1]} : vector<7x256xf32> to vector<1x256xf32>
    %296 = arith.mulf %294, %295 : vector<1x256xf32>
    %297 = vector.extract_strided_slice %2 {offsets = [0, 29], sizes = [32, 1], strides = [1, 1]} : vector<32x49xf32> to vector<32x1xf32>
    %298 = vector.broadcast %296 : vector<1x256xf32> to vector<32x256xf32>
    %299 = arith.mulf %293, %298 : vector<32x256xf32>
    %300 = vector.broadcast %297 : vector<32x1xf32> to vector<32x256xf32>
    %301 = arith.mulf %299, %300 : vector<32x256xf32>
    %302 = arith.addf %292, %301 : vector<32x256xf32>
    %c241_i32 = arith.constant 241 : i32
    %303 = tpu.dynamic_rotate %1 by %c241_i32 dim 1 : vector<32x256xf32>, i32 -> vector<32x256xf32>
    %304 = vector.extract_strided_slice %3 {offsets = [4, 0], sizes = [1, 256], strides = [1, 1]} : vector<7x256xf32> to vector<1x256xf32>
    %305 = vector.extract_strided_slice %4 {offsets = [2, 0], sizes = [1, 256], strides = [1, 1]} : vector<7x256xf32> to vector<1x256xf32>
    %306 = arith.mulf %304, %305 : vector<1x256xf32>
    %307 = vector.extract_strided_slice %2 {offsets = [0, 30], sizes = [32, 1], strides = [1, 1]} : vector<32x49xf32> to vector<32x1xf32>
    %308 = vector.broadcast %306 : vector<1x256xf32> to vector<32x256xf32>
    %309 = arith.mulf %303, %308 : vector<32x256xf32>
    %310 = vector.broadcast %307 : vector<32x1xf32> to vector<32x256xf32>
    %311 = arith.mulf %309, %310 : vector<32x256xf32>
    %312 = arith.addf %302, %311 : vector<32x256xf32>
    %c240_i32 = arith.constant 240 : i32
    %313 = tpu.dynamic_rotate %1 by %c240_i32 dim 1 : vector<32x256xf32>, i32 -> vector<32x256xf32>
    %314 = vector.extract_strided_slice %3 {offsets = [4, 0], sizes = [1, 256], strides = [1, 1]} : vector<7x256xf32> to vector<1x256xf32>
    %315 = vector.extract_strided_slice %4 {offsets = [3, 0], sizes = [1, 256], strides = [1, 1]} : vector<7x256xf32> to vector<1x256xf32>
    %316 = arith.mulf %314, %315 : vector<1x256xf32>
    %317 = vector.extract_strided_slice %2 {offsets = [0, 31], sizes = [32, 1], strides = [1, 1]} : vector<32x49xf32> to vector<32x1xf32>
    %318 = vector.broadcast %316 : vector<1x256xf32> to vector<32x256xf32>
    %319 = arith.mulf %313, %318 : vector<32x256xf32>
    %320 = vector.broadcast %317 : vector<32x1xf32> to vector<32x256xf32>
    %321 = arith.mulf %319, %320 : vector<32x256xf32>
    %322 = arith.addf %312, %321 : vector<32x256xf32>
    %c239_i32 = arith.constant 239 : i32
    %323 = tpu.dynamic_rotate %1 by %c239_i32 dim 1 : vector<32x256xf32>, i32 -> vector<32x256xf32>
    %324 = vector.extract_strided_slice %3 {offsets = [4, 0], sizes = [1, 256], strides = [1, 1]} : vector<7x256xf32> to vector<1x256xf32>
    %325 = vector.extract_strided_slice %4 {offsets = [4, 0], sizes = [1, 256], strides = [1, 1]} : vector<7x256xf32> to vector<1x256xf32>
    %326 = arith.mulf %324, %325 : vector<1x256xf32>
    %327 = vector.extract_strided_slice %2 {offsets = [0, 32], sizes = [32, 1], strides = [1, 1]} : vector<32x49xf32> to vector<32x1xf32>
    %328 = vector.broadcast %326 : vector<1x256xf32> to vector<32x256xf32>
    %329 = arith.mulf %323, %328 : vector<32x256xf32>
    %330 = vector.broadcast %327 : vector<32x1xf32> to vector<32x256xf32>
    %331 = arith.mulf %329, %330 : vector<32x256xf32>
    %332 = arith.addf %322, %331 : vector<32x256xf32>
    %c238_i32 = arith.constant 238 : i32
    %333 = tpu.dynamic_rotate %1 by %c238_i32 dim 1 : vector<32x256xf32>, i32 -> vector<32x256xf32>
    %334 = vector.extract_strided_slice %3 {offsets = [4, 0], sizes = [1, 256], strides = [1, 1]} : vector<7x256xf32> to vector<1x256xf32>
    %335 = vector.extract_strided_slice %4 {offsets = [5, 0], sizes = [1, 256], strides = [1, 1]} : vector<7x256xf32> to vector<1x256xf32>
    %336 = arith.mulf %334, %335 : vector<1x256xf32>
    %337 = vector.extract_strided_slice %2 {offsets = [0, 33], sizes = [32, 1], strides = [1, 1]} : vector<32x49xf32> to vector<32x1xf32>
    %338 = vector.broadcast %336 : vector<1x256xf32> to vector<32x256xf32>
    %339 = arith.mulf %333, %338 : vector<32x256xf32>
    %340 = vector.broadcast %337 : vector<32x1xf32> to vector<32x256xf32>
    %341 = arith.mulf %339, %340 : vector<32x256xf32>
    %342 = arith.addf %332, %341 : vector<32x256xf32>
    %c237_i32 = arith.constant 237 : i32
    %343 = tpu.dynamic_rotate %1 by %c237_i32 dim 1 : vector<32x256xf32>, i32 -> vector<32x256xf32>
    %344 = vector.extract_strided_slice %3 {offsets = [4, 0], sizes = [1, 256], strides = [1, 1]} : vector<7x256xf32> to vector<1x256xf32>
    %345 = vector.extract_strided_slice %4 {offsets = [6, 0], sizes = [1, 256], strides = [1, 1]} : vector<7x256xf32> to vector<1x256xf32>
    %346 = arith.mulf %344, %345 : vector<1x256xf32>
    %347 = vector.extract_strided_slice %2 {offsets = [0, 34], sizes = [32, 1], strides = [1, 1]} : vector<32x49xf32> to vector<32x1xf32>
    %348 = vector.broadcast %346 : vector<1x256xf32> to vector<32x256xf32>
    %349 = arith.mulf %343, %348 : vector<32x256xf32>
    %350 = vector.broadcast %347 : vector<32x1xf32> to vector<32x256xf32>
    %351 = arith.mulf %349, %350 : vector<32x256xf32>
    %352 = arith.addf %342, %351 : vector<32x256xf32>
    %c227_i32 = arith.constant 227 : i32
    %353 = tpu.dynamic_rotate %1 by %c227_i32 dim 1 : vector<32x256xf32>, i32 -> vector<32x256xf32>
    %354 = vector.extract_strided_slice %3 {offsets = [5, 0], sizes = [1, 256], strides = [1, 1]} : vector<7x256xf32> to vector<1x256xf32>
    %355 = vector.extract_strided_slice %4 {offsets = [0, 0], sizes = [1, 256], strides = [1, 1]} : vector<7x256xf32> to vector<1x256xf32>
    %356 = arith.mulf %354, %355 : vector<1x256xf32>
    %357 = vector.extract_strided_slice %2 {offsets = [0, 35], sizes = [32, 1], strides = [1, 1]} : vector<32x49xf32> to vector<32x1xf32>
    %358 = vector.broadcast %356 : vector<1x256xf32> to vector<32x256xf32>
    %359 = arith.mulf %353, %358 : vector<32x256xf32>
    %360 = vector.broadcast %357 : vector<32x1xf32> to vector<32x256xf32>
    %361 = arith.mulf %359, %360 : vector<32x256xf32>
    %362 = arith.addf %352, %361 : vector<32x256xf32>
    %c226_i32 = arith.constant 226 : i32
    %363 = tpu.dynamic_rotate %1 by %c226_i32 dim 1 : vector<32x256xf32>, i32 -> vector<32x256xf32>
    %364 = vector.extract_strided_slice %3 {offsets = [5, 0], sizes = [1, 256], strides = [1, 1]} : vector<7x256xf32> to vector<1x256xf32>
    %365 = vector.extract_strided_slice %4 {offsets = [1, 0], sizes = [1, 256], strides = [1, 1]} : vector<7x256xf32> to vector<1x256xf32>
    %366 = arith.mulf %364, %365 : vector<1x256xf32>
    %367 = vector.extract_strided_slice %2 {offsets = [0, 36], sizes = [32, 1], strides = [1, 1]} : vector<32x49xf32> to vector<32x1xf32>
    %368 = vector.broadcast %366 : vector<1x256xf32> to vector<32x256xf32>
    %369 = arith.mulf %363, %368 : vector<32x256xf32>
    %370 = vector.broadcast %367 : vector<32x1xf32> to vector<32x256xf32>
    %371 = arith.mulf %369, %370 : vector<32x256xf32>
    %372 = arith.addf %362, %371 : vector<32x256xf32>
    %c225_i32 = arith.constant 225 : i32
    %373 = tpu.dynamic_rotate %1 by %c225_i32 dim 1 : vector<32x256xf32>, i32 -> vector<32x256xf32>
    %374 = vector.extract_strided_slice %3 {offsets = [5, 0], sizes = [1, 256], strides = [1, 1]} : vector<7x256xf32> to vector<1x256xf32>
    %375 = vector.extract_strided_slice %4 {offsets = [2, 0], sizes = [1, 256], strides = [1, 1]} : vector<7x256xf32> to vector<1x256xf32>
    %376 = arith.mulf %374, %375 : vector<1x256xf32>
    %377 = vector.extract_strided_slice %2 {offsets = [0, 37], sizes = [32, 1], strides = [1, 1]} : vector<32x49xf32> to vector<32x1xf32>
    %378 = vector.broadcast %376 : vector<1x256xf32> to vector<32x256xf32>
    %379 = arith.mulf %373, %378 : vector<32x256xf32>
    %380 = vector.broadcast %377 : vector<32x1xf32> to vector<32x256xf32>
    %381 = arith.mulf %379, %380 : vector<32x256xf32>
    %382 = arith.addf %372, %381 : vector<32x256xf32>
    %c224_i32 = arith.constant 224 : i32
    %383 = tpu.dynamic_rotate %1 by %c224_i32 dim 1 : vector<32x256xf32>, i32 -> vector<32x256xf32>
    %384 = vector.extract_strided_slice %3 {offsets = [5, 0], sizes = [1, 256], strides = [1, 1]} : vector<7x256xf32> to vector<1x256xf32>
    %385 = vector.extract_strided_slice %4 {offsets = [3, 0], sizes = [1, 256], strides = [1, 1]} : vector<7x256xf32> to vector<1x256xf32>
    %386 = arith.mulf %384, %385 : vector<1x256xf32>
    %387 = vector.extract_strided_slice %2 {offsets = [0, 38], sizes = [32, 1], strides = [1, 1]} : vector<32x49xf32> to vector<32x1xf32>
    %388 = vector.broadcast %386 : vector<1x256xf32> to vector<32x256xf32>
    %389 = arith.mulf %383, %388 : vector<32x256xf32>
    %390 = vector.broadcast %387 : vector<32x1xf32> to vector<32x256xf32>
    %391 = arith.mulf %389, %390 : vector<32x256xf32>
    %392 = arith.addf %382, %391 : vector<32x256xf32>
    %c223_i32 = arith.constant 223 : i32
    %393 = tpu.dynamic_rotate %1 by %c223_i32 dim 1 : vector<32x256xf32>, i32 -> vector<32x256xf32>
    %394 = vector.extract_strided_slice %3 {offsets = [5, 0], sizes = [1, 256], strides = [1, 1]} : vector<7x256xf32> to vector<1x256xf32>
    %395 = vector.extract_strided_slice %4 {offsets = [4, 0], sizes = [1, 256], strides = [1, 1]} : vector<7x256xf32> to vector<1x256xf32>
    %396 = arith.mulf %394, %395 : vector<1x256xf32>
    %397 = vector.extract_strided_slice %2 {offsets = [0, 39], sizes = [32, 1], strides = [1, 1]} : vector<32x49xf32> to vector<32x1xf32>
    %398 = vector.broadcast %396 : vector<1x256xf32> to vector<32x256xf32>
    %399 = arith.mulf %393, %398 : vector<32x256xf32>
    %400 = vector.broadcast %397 : vector<32x1xf32> to vector<32x256xf32>
    %401 = arith.mulf %399, %400 : vector<32x256xf32>
    %402 = arith.addf %392, %401 : vector<32x256xf32>
    %c222_i32 = arith.constant 222 : i32
    %403 = tpu.dynamic_rotate %1 by %c222_i32 dim 1 : vector<32x256xf32>, i32 -> vector<32x256xf32>
    %404 = vector.extract_strided_slice %3 {offsets = [5, 0], sizes = [1, 256], strides = [1, 1]} : vector<7x256xf32> to vector<1x256xf32>
    %405 = vector.extract_strided_slice %4 {offsets = [5, 0], sizes = [1, 256], strides = [1, 1]} : vector<7x256xf32> to vector<1x256xf32>
    %406 = arith.mulf %404, %405 : vector<1x256xf32>
    %407 = vector.extract_strided_slice %2 {offsets = [0, 40], sizes = [32, 1], strides = [1, 1]} : vector<32x49xf32> to vector<32x1xf32>
    %408 = vector.broadcast %406 : vector<1x256xf32> to vector<32x256xf32>
    %409 = arith.mulf %403, %408 : vector<32x256xf32>
    %410 = vector.broadcast %407 : vector<32x1xf32> to vector<32x256xf32>
    %411 = arith.mulf %409, %410 : vector<32x256xf32>
    %412 = arith.addf %402, %411 : vector<32x256xf32>
    %c221_i32 = arith.constant 221 : i32
    %413 = tpu.dynamic_rotate %1 by %c221_i32 dim 1 : vector<32x256xf32>, i32 -> vector<32x256xf32>
    %414 = vector.extract_strided_slice %3 {offsets = [5, 0], sizes = [1, 256], strides = [1, 1]} : vector<7x256xf32> to vector<1x256xf32>
    %415 = vector.extract_strided_slice %4 {offsets = [6, 0], sizes = [1, 256], strides = [1, 1]} : vector<7x256xf32> to vector<1x256xf32>
    %416 = arith.mulf %414, %415 : vector<1x256xf32>
    %417 = vector.extract_strided_slice %2 {offsets = [0, 41], sizes = [32, 1], strides = [1, 1]} : vector<32x49xf32> to vector<32x1xf32>
    %418 = vector.broadcast %416 : vector<1x256xf32> to vector<32x256xf32>
    %419 = arith.mulf %413, %418 : vector<32x256xf32>
    %420 = vector.broadcast %417 : vector<32x1xf32> to vector<32x256xf32>
    %421 = arith.mulf %419, %420 : vector<32x256xf32>
    %422 = arith.addf %412, %421 : vector<32x256xf32>
    %c211_i32 = arith.constant 211 : i32
    %423 = tpu.dynamic_rotate %1 by %c211_i32 dim 1 : vector<32x256xf32>, i32 -> vector<32x256xf32>
    %424 = vector.extract_strided_slice %3 {offsets = [6, 0], sizes = [1, 256], strides = [1, 1]} : vector<7x256xf32> to vector<1x256xf32>
    %425 = vector.extract_strided_slice %4 {offsets = [0, 0], sizes = [1, 256], strides = [1, 1]} : vector<7x256xf32> to vector<1x256xf32>
    %426 = arith.mulf %424, %425 : vector<1x256xf32>
    %427 = vector.extract_strided_slice %2 {offsets = [0, 42], sizes = [32, 1], strides = [1, 1]} : vector<32x49xf32> to vector<32x1xf32>
    %428 = vector.broadcast %426 : vector<1x256xf32> to vector<32x256xf32>
    %429 = arith.mulf %423, %428 : vector<32x256xf32>
    %430 = vector.broadcast %427 : vector<32x1xf32> to vector<32x256xf32>
    %431 = arith.mulf %429, %430 : vector<32x256xf32>
    %432 = arith.addf %422, %431 : vector<32x256xf32>
    %c210_i32 = arith.constant 210 : i32
    %433 = tpu.dynamic_rotate %1 by %c210_i32 dim 1 : vector<32x256xf32>, i32 -> vector<32x256xf32>
    %434 = vector.extract_strided_slice %3 {offsets = [6, 0], sizes = [1, 256], strides = [1, 1]} : vector<7x256xf32> to vector<1x256xf32>
    %435 = vector.extract_strided_slice %4 {offsets = [1, 0], sizes = [1, 256], strides = [1, 1]} : vector<7x256xf32> to vector<1x256xf32>
    %436 = arith.mulf %434, %435 : vector<1x256xf32>
    %437 = vector.extract_strided_slice %2 {offsets = [0, 43], sizes = [32, 1], strides = [1, 1]} : vector<32x49xf32> to vector<32x1xf32>
    %438 = vector.broadcast %436 : vector<1x256xf32> to vector<32x256xf32>
    %439 = arith.mulf %433, %438 : vector<32x256xf32>
    %440 = vector.broadcast %437 : vector<32x1xf32> to vector<32x256xf32>
    %441 = arith.mulf %439, %440 : vector<32x256xf32>
    %442 = arith.addf %432, %441 : vector<32x256xf32>
    %c209_i32 = arith.constant 209 : i32
    %443 = tpu.dynamic_rotate %1 by %c209_i32 dim 1 : vector<32x256xf32>, i32 -> vector<32x256xf32>
    %444 = vector.extract_strided_slice %3 {offsets = [6, 0], sizes = [1, 256], strides = [1, 1]} : vector<7x256xf32> to vector<1x256xf32>
    %445 = vector.extract_strided_slice %4 {offsets = [2, 0], sizes = [1, 256], strides = [1, 1]} : vector<7x256xf32> to vector<1x256xf32>
    %446 = arith.mulf %444, %445 : vector<1x256xf32>
    %447 = vector.extract_strided_slice %2 {offsets = [0, 44], sizes = [32, 1], strides = [1, 1]} : vector<32x49xf32> to vector<32x1xf32>
    %448 = vector.broadcast %446 : vector<1x256xf32> to vector<32x256xf32>
    %449 = arith.mulf %443, %448 : vector<32x256xf32>
    %450 = vector.broadcast %447 : vector<32x1xf32> to vector<32x256xf32>
    %451 = arith.mulf %449, %450 : vector<32x256xf32>
    %452 = arith.addf %442, %451 : vector<32x256xf32>
    %c208_i32 = arith.constant 208 : i32
    %453 = tpu.dynamic_rotate %1 by %c208_i32 dim 1 : vector<32x256xf32>, i32 -> vector<32x256xf32>
    %454 = vector.extract_strided_slice %3 {offsets = [6, 0], sizes = [1, 256], strides = [1, 1]} : vector<7x256xf32> to vector<1x256xf32>
    %455 = vector.extract_strided_slice %4 {offsets = [3, 0], sizes = [1, 256], strides = [1, 1]} : vector<7x256xf32> to vector<1x256xf32>
    %456 = arith.mulf %454, %455 : vector<1x256xf32>
    %457 = vector.extract_strided_slice %2 {offsets = [0, 45], sizes = [32, 1], strides = [1, 1]} : vector<32x49xf32> to vector<32x1xf32>
    %458 = vector.broadcast %456 : vector<1x256xf32> to vector<32x256xf32>
    %459 = arith.mulf %453, %458 : vector<32x256xf32>
    %460 = vector.broadcast %457 : vector<32x1xf32> to vector<32x256xf32>
    %461 = arith.mulf %459, %460 : vector<32x256xf32>
    %462 = arith.addf %452, %461 : vector<32x256xf32>
    %c207_i32 = arith.constant 207 : i32
    %463 = tpu.dynamic_rotate %1 by %c207_i32 dim 1 : vector<32x256xf32>, i32 -> vector<32x256xf32>
    %464 = vector.extract_strided_slice %3 {offsets = [6, 0], sizes = [1, 256], strides = [1, 1]} : vector<7x256xf32> to vector<1x256xf32>
    %465 = vector.extract_strided_slice %4 {offsets = [4, 0], sizes = [1, 256], strides = [1, 1]} : vector<7x256xf32> to vector<1x256xf32>
    %466 = arith.mulf %464, %465 : vector<1x256xf32>
    %467 = vector.extract_strided_slice %2 {offsets = [0, 46], sizes = [32, 1], strides = [1, 1]} : vector<32x49xf32> to vector<32x1xf32>
    %468 = vector.broadcast %466 : vector<1x256xf32> to vector<32x256xf32>
    %469 = arith.mulf %463, %468 : vector<32x256xf32>
    %470 = vector.broadcast %467 : vector<32x1xf32> to vector<32x256xf32>
    %471 = arith.mulf %469, %470 : vector<32x256xf32>
    %472 = arith.addf %462, %471 : vector<32x256xf32>
    %c206_i32 = arith.constant 206 : i32
    %473 = tpu.dynamic_rotate %1 by %c206_i32 dim 1 : vector<32x256xf32>, i32 -> vector<32x256xf32>
    %474 = vector.extract_strided_slice %3 {offsets = [6, 0], sizes = [1, 256], strides = [1, 1]} : vector<7x256xf32> to vector<1x256xf32>
    %475 = vector.extract_strided_slice %4 {offsets = [5, 0], sizes = [1, 256], strides = [1, 1]} : vector<7x256xf32> to vector<1x256xf32>
    %476 = arith.mulf %474, %475 : vector<1x256xf32>
    %477 = vector.extract_strided_slice %2 {offsets = [0, 47], sizes = [32, 1], strides = [1, 1]} : vector<32x49xf32> to vector<32x1xf32>
    %478 = vector.broadcast %476 : vector<1x256xf32> to vector<32x256xf32>
    %479 = arith.mulf %473, %478 : vector<32x256xf32>
    %480 = vector.broadcast %477 : vector<32x1xf32> to vector<32x256xf32>
    %481 = arith.mulf %479, %480 : vector<32x256xf32>
    %482 = arith.addf %472, %481 : vector<32x256xf32>
    %c205_i32 = arith.constant 205 : i32
    %483 = tpu.dynamic_rotate %1 by %c205_i32 dim 1 : vector<32x256xf32>, i32 -> vector<32x256xf32>
    %484 = vector.extract_strided_slice %3 {offsets = [6, 0], sizes = [1, 256], strides = [1, 1]} : vector<7x256xf32> to vector<1x256xf32>
    %485 = vector.extract_strided_slice %4 {offsets = [6, 0], sizes = [1, 256], strides = [1, 1]} : vector<7x256xf32> to vector<1x256xf32>
    %486 = arith.mulf %484, %485 : vector<1x256xf32>
    %487 = vector.extract_strided_slice %2 {offsets = [0, 48], sizes = [32, 1], strides = [1, 1]} : vector<32x49xf32> to vector<32x1xf32>
    %488 = vector.broadcast %486 : vector<1x256xf32> to vector<32x256xf32>
    %489 = arith.mulf %483, %488 : vector<32x256xf32>
    %490 = vector.broadcast %487 : vector<32x1xf32> to vector<32x256xf32>
    %491 = arith.mulf %489, %490 : vector<32x256xf32>
    %492 = arith.addf %482, %491 : vector<32x256xf32>
    %c0_8 = arith.constant 0 : index
    %c0_9 = arith.constant 0 : index
    %493 = vector.load %arg3[%c0_8, %c0_9] : memref<32x1xf32, #tpu.memory_space<vmem>>, vector<32x1xf32>
    %494 = vector.broadcast %493 : vector<32x1xf32> to vector<32x256xf32>
    %495 = arith.addf %492, %494 : vector<32x256xf32>
    %c0_10 = arith.constant 0 : index
    %c0_11 = arith.constant 0 : index
    %496 = vector.load %arg14[%c0_10, %c0_11] : memref<32x256xf32, #tpu.memory_space<vmem>>, vector<32x256xf32>
    tpu.vector_store %arg14[%c0_10, %c0_11], %495 {strides = array<i32>} : memref<32x256xf32, #tpu.memory_space<vmem>>, vector<32x256xf32>,
    %c0_12 = arith.constant 0 : index
    %c0_13 = arith.constant 0 : index
    %497 = vector.load %arg6[%c0_12, %c0_13] : memref<32x1xf32, #tpu.memory_space<vmem>>, vector<32x1xf32>
    %c0_14 = arith.constant 0 : index
    %c0_15 = arith.constant 0 : index
    %498 = vector.load %arg7[%c0_14, %c0_15] : memref<32x1xf32, #tpu.memory_space<vmem>>, vector<32x1xf32>
    %c0_16 = arith.constant 0 : index
    %c0_17 = arith.constant 0 : index
    %499 = vector.load %arg9[%c0_16, %c0_17] : memref<128x1xf32, #tpu.memory_space<vmem>>, vector<128x1xf32>
    %c0_18 = arith.constant 0 : index
    %c0_19 = arith.constant 0 : index
    %500 = vector.load %arg11[%c0_18, %c0_19] : memref<32x1xf32, #tpu.memory_space<vmem>>, vector<32x1xf32>
    %c0_20 = arith.constant 0 : index
    %c0_21 = arith.constant 0 : index
    %501 = vector.load %arg12[%c0_20, %c0_21] : memref<32x1xf32, #tpu.memory_space<vmem>>, vector<32x1xf32>
    %c0_22 = arith.constant 0 : index
    %c0_23 = arith.constant 0 : index
    %502 = vector.load %arg14[%c0_22, %c0_23] : memref<32x256xf32, #tpu.memory_space<vmem>>, vector<32x256xf32>
    %cst = arith.constant dense<0.000000e+00> : vector<256xf32>
    %503 = vector.multi_reduction <add>, %502, %cst [0] : vector<32x256xf32> to vector<256xf32>
    %504 = vector.shape_cast %503 : vector<256xf32> to vector<1x256xf32>
    %cst_24 = arith.constant 3.200000e+01 : f32
    %505 = vector.broadcast %cst_24 : f32 to vector<1x256xf32>
    %506 = arith.divf %504, %505 : vector<1x256xf32>
    %507 = vector.broadcast %506 : vector<1x256xf32> to vector<32x256xf32>
    %508 = arith.subf %502, %507 : vector<32x256xf32>
    %509 = arith.mulf %508, %508 : vector<32x256xf32>
    %cst_25 = arith.constant dense<0.000000e+00> : vector<256xf32>
    %510 = vector.multi_reduction <add>, %509, %cst_25 [0] : vector<32x256xf32> to vector<256xf32>
    %511 = vector.shape_cast %510 : vector<256xf32> to vector<1x256xf32>
    %cst_26 = arith.constant 3.200000e+01 : f32
    %512 = vector.broadcast %cst_26 : f32 to vector<1x256xf32>
    %513 = arith.divf %511, %512 : vector<1x256xf32>
    %cst_27 = arith.constant 9.99999997E-7 : f32
    %514 = vector.broadcast %cst_27 : f32 to vector<1x256xf32>
    %515 = arith.addf %513, %514 : vector<1x256xf32>
    %516 = math.rsqrt %515 : vector<1x256xf32>
    %517 = vector.broadcast %516 : vector<1x256xf32> to vector<32x256xf32>
    %518 = arith.mulf %508, %517 : vector<32x256xf32>
    %519 = vector.broadcast %497 : vector<32x1xf32> to vector<32x256xf32>
    %520 = arith.mulf %518, %519 : vector<32x256xf32>
    %521 = vector.broadcast %498 : vector<32x1xf32> to vector<32x256xf32>
    %522 = arith.addf %520, %521 : vector<32x256xf32>
    %c0_28 = arith.constant 0 : index
    %c0_29 = arith.constant 0 : index
    %523 = vector.load %arg8[%c0_28, %c0_29] : memref<128x32xbf16, #tpu.memory_space<vmem>>, vector<128x32xbf16>
    %524 = arith.truncf %522 : vector<32x256xf32> to vector<32x256xbf16>
    %cst_30 = arith.constant dense<0.000000e+00> : vector<128x256xf32>
    %525 = tpu.matmul %523, %524, %cst_30 {dimension_numbers = #tpu.dot_dimension_numbers<[1], [0], [0], [1], [0, 0, 1, 1], [], []>} : vector<128x32xbf16>, vector<32x256xbf16>, vector<128x256xf32> -> vector<128x256xf32>
    %526 = vector.broadcast %499 : vector<128x1xf32> to vector<128x256xf32>
    %527 = arith.addf %525, %526 : vector<128x256xf32>
    %cst_31 = arith.constant 0.707106769 : f32
    %528 = vector.broadcast %cst_31 : f32 to vector<128x256xf32>
    %529 = arith.mulf %527, %528 : vector<128x256xf32>
    %530 = math.absf %529 : vector<128x256xf32>
    %cst_32 = arith.constant 0.327591091 : f32
    %531 = vector.broadcast %cst_32 : f32 to vector<128x256xf32>
    %532 = arith.mulf %531, %530 : vector<128x256xf32>
    %cst_33 = arith.constant 1.000000e+00 : f32
    %533 = vector.broadcast %cst_33 : f32 to vector<128x256xf32>
    %534 = arith.addf %533, %532 : vector<128x256xf32>
    %cst_34 = arith.constant 1.000000e+00 : f32
    %535 = vector.broadcast %cst_34 : f32 to vector<128x256xf32>
    %536 = arith.divf %535, %534 : vector<128x256xf32>
    %cst_35 = arith.constant 1.06140542 : f32
    %537 = vector.broadcast %cst_35 : f32 to vector<128x256xf32>
    %538 = arith.mulf %537, %536 : vector<128x256xf32>
    %cst_36 = arith.constant 1.45315206 : f32
    %539 = vector.broadcast %cst_36 : f32 to vector<128x256xf32>
    %540 = arith.subf %538, %539 : vector<128x256xf32>
    %541 = arith.mulf %540, %536 : vector<128x256xf32>
    %cst_37 = arith.constant 1.42141378 : f32
    %542 = vector.broadcast %cst_37 : f32 to vector<128x256xf32>
    %543 = arith.addf %541, %542 : vector<128x256xf32>
    %544 = arith.mulf %543, %536 : vector<128x256xf32>
    %cst_38 = arith.constant 0.284496725 : f32
    %545 = vector.broadcast %cst_38 : f32 to vector<128x256xf32>
    %546 = arith.subf %544, %545 : vector<128x256xf32>
    %547 = arith.mulf %546, %536 : vector<128x256xf32>
    %cst_39 = arith.constant 0.254829586 : f32
    %548 = vector.broadcast %cst_39 : f32 to vector<128x256xf32>
    %549 = arith.addf %547, %548 : vector<128x256xf32>
    %550 = arith.mulf %549, %536 : vector<128x256xf32>
    %cst_40 = arith.constant 0.000000e+00 : f32
    %551 = vector.broadcast %cst_40 : f32 to vector<128x256xf32>
    %552 = arith.subf %551, %530 : vector<128x256xf32>
    %553 = arith.mulf %552, %530 : vector<128x256xf32>
    %554 = math.exp %553 : vector<128x256xf32>
    %555 = arith.mulf %550, %554 : vector<128x256xf32>
    %cst_41 = arith.constant 1.000000e+00 : f32
    %556 = vector.broadcast %cst_41 : f32 to vector<128x256xf32>
    %557 = arith.subf %556, %555 : vector<128x256xf32>
    %cst_42 = arith.constant 0.000000e+00 : f32
    %558 = vector.broadcast %cst_42 : f32 to vector<128x256xf32>
    %559 = arith.cmpf oge, %529, %558 : vector<128x256xf32>
    %cst_43 = arith.constant 0.000000e+00 : f32
    %560 = vector.broadcast %cst_43 : f32 to vector<128x256xf32>
    %561 = arith.subf %560, %557 : vector<128x256xf32>
    %562 = arith.select %559, %557, %561 : vector<128x256xi1>, vector<128x256xf32>
    %cst_44 = arith.constant 5.000000e-01 : f32
    %563 = vector.broadcast %cst_44 : f32 to vector<128x256xf32>
    %564 = arith.mulf %563, %527 : vector<128x256xf32>
    %cst_45 = arith.constant 1.000000e+00 : f32
    %565 = vector.broadcast %cst_45 : f32 to vector<128x256xf32>
    %566 = arith.addf %565, %562 : vector<128x256xf32>
    %567 = arith.mulf %564, %566 : vector<128x256xf32>
    %c0_46 = arith.constant 0 : index
    %c0_47 = arith.constant 0 : index
    %568 = vector.load %arg10[%c0_46, %c0_47] : memref<32x128xbf16, #tpu.memory_space<vmem>>, vector<32x128xbf16>
    %569 = arith.truncf %567 : vector<128x256xf32> to vector<128x256xbf16>
    %cst_48 = arith.constant dense<0.000000e+00> : vector<32x256xf32>
    %570 = tpu.matmul %568, %569, %cst_48 {dimension_numbers = #tpu.dot_dimension_numbers<[1], [0], [0], [1], [0, 0, 1, 1], [], []>} : vector<32x128xbf16>, vector<128x256xbf16>, vector<32x256xf32> -> vector<32x256xf32>
    %571 = vector.broadcast %500 : vector<32x1xf32> to vector<32x256xf32>
    %572 = arith.addf %570, %571 : vector<32x256xf32>
    %573 = vector.broadcast %501 : vector<32x1xf32> to vector<32x256xf32>
    %574 = arith.mulf %572, %573 : vector<32x256xf32>
    %c0_49 = arith.constant 0 : index
    %c0_50 = arith.constant 0 : index
    %c0_51 = arith.constant 0 : index
    %575 = vector.load %arg1[%c0_49, %c0_50, %c0_51] : memref<1x32x256xf32, #tpu.memory_space<vmem>>, vector<1x32x256xf32>
    %576 = vector.shape_cast %575 : vector<1x32x256xf32> to vector<32x256xf32>
    %577 = arith.addf %576, %574 : vector<32x256xf32>
    %c0_52 = arith.constant 0 : index
    %c0_53 = arith.constant 0 : index
    %c0_54 = arith.constant 0 : index
    %578 = vector.load %arg13[%c0_52, %c0_53, %c0_54] : memref<1x32x256xf32, #tpu.memory_space<vmem>>, vector<1x32x256xf32>
    %579 = vector.shape_cast %578 : vector<1x32x256xf32> to vector<32x256xf32>
    %580 = vector.shape_cast %577 : vector<32x256xf32> to vector<1x32x256xf32>
    tpu.vector_store %arg13[%c0_52, %c0_53, %c0_54], %580 {strides = array<i32>} : memref<1x32x256xf32, #tpu.memory_space<vmem>>, vector<1x32x256xf32>,
    return
  }
  func.func @transform_0(%arg0: i32) -> (i32, i32, i32) {
    %c0_i32 = arith.constant 0 : i32
    %c0_i32_0 = arith.constant 0 : i32
    %c0_i32_1 = arith.constant 0 : i32
    return %arg0, %c0_i32, %c0_i32_0 : i32, i32, i32
  }
  func.func @transform_1(%arg0: i32) -> (i32, i32) {
    %c0_i32 = arith.constant 0 : i32
    %c0_i32_0 = arith.constant 0 : i32
    %c0_i32_1 = arith.constant 0 : i32
    return %c0_i32, %c0_i32_0 : i32, i32
  }
  func.func @transform_2(%arg0: i32) -> (i32, i32) {
    %c0_i32 = arith.constant 0 : i32
    %c0_i32_0 = arith.constant 0 : i32
    %c0_i32_1 = arith.constant 0 : i32
    return %c0_i32, %c0_i32_0 : i32, i32
  }
  func.func @transform_3(%arg0: i32) -> (i32, i32) {
    %c0_i32 = arith.constant 0 : i32
    %c0_i32_0 = arith.constant 0 : i32
    %c0_i32_1 = arith.constant 0 : i32
    return %c0_i32, %c0_i32_0 : i32, i32
  }
  func.func @transform_4(%arg0: i32) -> (i32, i32) {
    %c0_i32 = arith.constant 0 : i32
    %c0_i32_0 = arith.constant 0 : i32
    %c0_i32_1 = arith.constant 0 : i32
    return %c0_i32, %c0_i32_0 : i32, i32
  }
  func.func @transform_5(%arg0: i32) -> (i32, i32) {
    %c0_i32 = arith.constant 0 : i32
    %c0_i32_0 = arith.constant 0 : i32
    %c0_i32_1 = arith.constant 0 : i32
    return %c0_i32, %c0_i32_0 : i32, i32
  }
  func.func @transform_6(%arg0: i32) -> (i32, i32) {
    %c0_i32 = arith.constant 0 : i32
    %c0_i32_0 = arith.constant 0 : i32
    %c0_i32_1 = arith.constant 0 : i32
    return %c0_i32, %c0_i32_0 : i32, i32
  }
  func.func @transform_7(%arg0: i32) -> (i32, i32) {
    %c0_i32 = arith.constant 0 : i32
    %c0_i32_0 = arith.constant 0 : i32
    %c0_i32_1 = arith.constant 0 : i32
    return %c0_i32, %c0_i32_0 : i32, i32
  }
  func.func @transform_8(%arg0: i32) -> (i32, i32) {
    %c0_i32 = arith.constant 0 : i32
    %c0_i32_0 = arith.constant 0 : i32
    %c0_i32_1 = arith.constant 0 : i32
    return %c0_i32, %c0_i32_0 : i32, i32
  }
  func.func @transform_9(%arg0: i32) -> (i32, i32) {
    %c0_i32 = arith.constant 0 : i32
    %c0_i32_0 = arith.constant 0 : i32
    %c0_i32_1 = arith.constant 0 : i32
    return %c0_i32, %c0_i32_0 : i32, i32
  }
  func.func @transform_10(%arg0: i32) -> (i32, i32) {
    %c0_i32 = arith.constant 0 : i32
    %c0_i32_0 = arith.constant 0 : i32
    %c0_i32_1 = arith.constant 0 : i32
    return %c0_i32, %c0_i32_0 : i32, i32
  }
  func.func @transform_11(%arg0: i32) -> (i32, i32) {
    %c0_i32 = arith.constant 0 : i32
    %c0_i32_0 = arith.constant 0 : i32
    %c0_i32_1 = arith.constant 0 : i32
    return %c0_i32, %c0_i32_0 : i32, i32
  }
  func.func @transform_12(%arg0: i32) -> (i32, i32, i32) {
    %c0_i32 = arith.constant 0 : i32
    %c0_i32_0 = arith.constant 0 : i32
    %c0_i32_1 = arith.constant 0 : i32
    return %arg0, %c0_i32, %c0_i32_0 : i32, i32, i32
  }
}

</mosaic_0001>

<bundles_post_ra>
// kernel: tpu_custom_call.1
= control target key start
LH: loop header
LB: loop body
LE: loop exit
PB: predicated region body
PF: predicated region fallthrough
CT: control target
= control target key end

     0   :  { %s14207_s0 = inlined_call_operand.hbm [shape: f32[2,32,256], index: 0, kind: input, shape index: {}]   ;;  %s14208_s1 = inlined_call_operand.hbm [shape: f32[32,49], index: 1, kind: input, shape index: {}]   ;;  %s14209_s2 = inlined_call_operand.hbm [shape: f32[32,1], index: 2, kind: input, shape index: {}]   ;;  %s14210_s3 = inlined_call_operand.hbm [shape: f32[7,256], index: 3, kind: input, shape index: {}]   ;;  %s14211_s4 = inlined_call_operand.hbm [shape: f32[7,256], index: 4, kind: input, shape index: {}]   ;;  %s14212_s5 = inlined_call_operand.hbm [shape: f32[32,1], index: 5, kind: input, shape index: {}]   ;;  %s14213_s6 = inlined_call_operand.hbm [shape: f32[32,1], index: 6, kind: input, shape index: {}]   ;;  %s14214_s7 = inlined_call_operand.hbm [shape: bf16[128,32], index: 7, kind: input, shape index: {}]   ;;  %s14215_s8 = inlined_call_operand.hbm [shape: f32[128,1], index: 8, kind: input, shape index: {}]   ;;  %s14216_s9 = inlined_call_operand.hbm [shape: bf16[32,128], index: 9, kind: input, shape index: {}]   ;;  %s14217_s10 = inlined_call_operand.hbm [shape: f32[32,1], index: 10, kind: input, shape index: {}]   ;;  %s14218_s11 = inlined_call_operand.hbm [shape: f32[32,1], index: 11, kind: input, shape index: {}]   ;;  %s14219_s12 = inlined_call_operand.hbm [shape: f32[2,32,256], index: 12, kind: output, shape index: {}]  }
   0x1   :  { %14889 = sst [smem:[#allocation447_spill]] %s14207_s0 }
   0x2   :  { %14890 = sst [smem:[#allocation448_spill]] %s14208_s1 }
   0x3   :  { %14891 = sst [smem:[#allocation449_spill]] %s14209_s2 }
   0x4   :  { %14892 = sst [smem:[#allocation450_spill]] %s14219_s12 }
   0x5   :  { %17 = vsyncpa [#allocation4], 0 }
   0x6   :  { %19 = vsyncpa [#allocation4 + $0x1], 0 }
   0x7   :  { %20 = vsyncpa [#allocation7], 0 }
   0x8   :  { %21 = vsyncpa [#allocation10], 0 }
   0x9   :  { %22 = vsyncpa [#allocation13], 0 }
   0xa   :  { %23 = vsyncpa [#allocation16], 0 }
   0xb   :  { %24 = vsyncpa [#allocation19], 0 }
   0xc   :  { %25 = vsyncpa [#allocation22], 0 }
   0xd   :  { %26 = vsyncpa [#allocation5], 0 }
   0xe   :  { %28 = vsyncpa [#allocation5 + $0x1], 0  ;;  %s7181_s21 = smov 0   ;;  %s7183_s22 = smov 0  }
   0xf   :  { %s7185_s23 = smov 0   ;;  %s7187_s24 = smov 0  }
  0x10 LB: > { %s6999_s25 = smov [#allocation6]   ;;  %s7202_s27 = sadd.s32 4294967295, %s6997_s24   ;;  %s6997_s24 = sphi %s7187_s24, %s16218_s24   ;;  %s6993_s23 = sphi %s7185_s23, %s16217_s23   ;;  %s6989_s22 = sphi %s7183_s22, %s16216_s22   ;;  %s6985_s21 = sphi %s7181_s21, %s16215_s21  }
  0x11   : > { %s334_s26 = sshll.u32 %s6999_s25, 4  ;;  %14893 = sst [smem:[#allocation32_spill]] %s7202_s27  ;;  %s7207_s26 = int_to_ptr.vmem [resolvable:$true] %s334_s26 }
  0x12   : > { %p5898_p0 = scmp.ge.s32.totalorder %s6997_s24, 1  ;;  %p14226_p1 = scmp.eq.s32.totalorder %s7202_s27, 0 }
  0x13   : > { %p322_p2 = scmp.lt.s32.totalorder %s6997_s24, 3  ;;  %s7000_s29 = smov [#allocation9]  }
  0x14   : > { %s361_s30 = sshll.u32 %s7000_s29, 4  ;;  %s7001_s14 = smov [#allocation12]   ;;  %s7222_s30 = int_to_ptr.vmem [resolvable:$true] %s361_s30 }
  0x15   : > { %p7209_p3 = pnand %p5898_p0, %p322_p2  ;;  %s382_s15 = sshll.u32 %s7001_s14, 4  ;;  %s7224_s15 = int_to_ptr.vmem [resolvable:$true] %s382_s15 }
  0x16   : > { %s14897_s1 = sld [smem:[#allocation448_spill]] }
  0x17   : > { %s14894_s28 = scalar_select %p7209_p3, 1, 0 }
  0x18   : > { %p6065_p5 = pneg %p7209_p3 }
  0x19   : > { %14895 = sst [smem:[#allocation33_spill]] %s14894_s28 }
  0x1a   : > { %p7218_p6 = pnand %p6065_p5, %p14226_p1 }
  0x1c   : > { %s6569_s18 = scalar_lea.hbm %s14897_s1, 512  ;;  %p7234_p8 = pneg %p7218_p6 }
  0x1d   : > { %p6570_p7 = scmp.ne.s32.totalorder %s14897_s1, %s6569_s18  ;;  %p6576_p11 = scmp.lt.u32.totalorder %s6569_s18, %s14897_s1 }
  0x1f   : > { %p6572_p9 = pnand %p7234_p8, %p6570_p7 }
  0x21   : > { %p6573_p10 = pneg %p6572_p9 }
  0x23   : > { %p6578_p12 = pnand %p6576_p11, %p6573_p10 }
  0x25   : > { %6581 = shalt.err (!%p6578_p12)
}
  0x26   : > { %s6582_s16 = scalar_lea.vmem %s7207_s26, 512  ;;  %p6590_p5 = scmp.lt.s32.totalorder %s7207_s26, %s7207_s26 }
  0x27   : > { %p6583_p13 = scmp.ne.s32.totalorder %s7207_s26, %s6582_s16  ;;  %p6591_p4 = scmp.lt.s32.totalorder %s6582_s16, %s6582_s16 }
  0x29   : > { %p6585_p0 = pnand %p6583_p13, %p7234_p8  ;;  %p6592_p7 = por %p6591_p4, %p6590_p5 }
  0x2b   : > { %p6586_p2 = pneg %p6585_p0 }
  0x2d   : > { %p6593_p9 = pnand %p6592_p7, %p6586_p2 }
  0x2f   : > { %6596 = shalt.err (!%p6593_p9)
}
  0x30   : > { %s14228_s17 = smov 128   ;;  %s14230_s18 = smov 8  }
  0x31   : > { %6068 = dma.hbm_to_vmem [thread:$0]  (!%p7218_p6), %s14897_s1, 512, %s7207_s26, [#allocation7], %s14228_s17, %s14228_s17, %s14230_s18  }
  0x32   : > { %s6597_s16 = scalar_lea.hbm %s14210_s3, 256 }
  0x33   : > { %p6598_p4 = scmp.ne.s32.totalorder %s14210_s3, %s6597_s16  ;;  %p6604_p12 = scmp.lt.u32.totalorder %s6597_s16, %s14210_s3 }
  0x35   : > { %p6600_p10 = pnand %p6598_p4, %p7234_p8 }
  0x37   : > { %p6601_p11 = pneg %p6600_p10 }
  0x39   : > { %p6606_p13 = pnand %p6604_p12, %p6601_p11 }
  0x3b   : > { %6609 = shalt.err (!%p6606_p13)
}
  0x3c   : > { %s6610_s26 = scalar_lea.vmem %s7222_s30, 256  ;;  %p6618_p7 = scmp.lt.s32.totalorder %s7222_s30, %s7222_s30 }
  0x3d   : > { %p6611_p0 = scmp.ne.s32.totalorder %s7222_s30, %s6610_s26  ;;  %p6619_p9 = scmp.lt.s32.totalorder %s6610_s26, %s6610_s26 }
  0x3f   : > { %p6613_p2 = pnand %p6611_p0, %p7234_p8  ;;  %p6620_p4 = por %p6619_p9, %p6618_p7 }
  0x41   : > { %p6614_p5 = pneg %p6613_p2 }
  0x43   : > { %p6621_p10 = pnand %p6620_p4, %p6614_p5 }
  0x45   : > { %6624 = shalt.err (!%p6621_p10)
}
  0x46   : > { %6074 = dma.hbm_to_vmem [thread:$0]  (!%p7218_p6), %s14210_s3, 256, %s7222_s30, [#allocation10]  }
  0x47   : > { %s6625_s19 = scalar_lea.hbm %s14212_s5, 512 }
  0x48   : > { %p6626_p11 = scmp.ne.s32.totalorder %s14212_s5, %s6625_s19  ;;  %p6632_p0 = scmp.lt.u32.totalorder %s6625_s19, %s14212_s5 }
  0x4a   : > { %p6628_p12 = pnand %p6626_p11, %p7234_p8 }
  0x4c   : > { %p6629_p13 = pneg %p6628_p12 }
  0x4e   : > { %p6634_p2 = pnand %p6632_p0, %p6629_p13 }
  0x50   : > { %6637 = shalt.err (!%p6634_p2)
}
  0x51   : > { %s6638_s30 = scalar_lea.vmem %s7224_s15, 512  ;;  %p6646_p4 = scmp.lt.s32.totalorder %s7224_s15, %s7224_s15 }
  0x52   : > { %p6639_p5 = scmp.ne.s32.totalorder %s7224_s15, %s6638_s30  ;;  %p6647_p10 = scmp.lt.s32.totalorder %s6638_s30, %s6638_s30 }
  0x54   : > { %p6641_p7 = pnand %p6639_p5, %p7234_p8  ;;  %p6648_p11 = por %p6647_p10, %p6646_p4 }
  0x56   : > { %p6642_p9 = pneg %p6641_p7 }
  0x58   : > { %p6649_p12 = pnand %p6648_p11, %p6642_p9 }
  0x5a   : > { %6652 = shalt.err (!%p6649_p12)
}
  0x5b   : > { %6080 = dma.hbm_to_vmem [thread:$0]  (!%p7218_p6), %s14212_s5, 512, %s7224_s15, [#allocation13], %s14228_s17, %s14228_s17, %s14230_s18  }
  0x5c   : > { %s7004_s12 = smov [#allocation15]   ;;  %s6653_s20 = scalar_lea.hbm %s14214_s7, 1024 }
  0x5d   : > { %s408_s27 = sshll.u32 %s7004_s12, 4  ;;  %p6654_p13 = scmp.ne.s32.totalorder %s14214_s7, %s6653_s20  ;;  %s409_s27 = int_to_ptr.vmem [resolvable:$true] %s408_s27 }
  0x5e   : > { %p6660_p5 = scmp.lt.u32.totalorder %s6653_s20, %s14214_s7 }
  0x5f   : > { %p6656_p0 = pnand %p6654_p13, %p7234_p8 }
  0x61   : > { %p6657_p2 = pneg %p6656_p0 }
  0x63   : > { %p6662_p7 = pnand %p6660_p5, %p6657_p2 }
  0x65   : > { %6665 = shalt.err (!%p6662_p7)
}
  0x66   : > { %s6666_s15 = scalar_lea.vmem %s409_s27, 1024  ;;  %p6674_p11 = scmp.lt.s32.totalorder %s409_s27, %s409_s27 }
  0x67   : > { %p6667_p9 = scmp.ne.s32.totalorder %s409_s27, %s6666_s15  ;;  %p6675_p12 = scmp.lt.s32.totalorder %s6666_s15, %s6666_s15 }
  0x69   : > { %p6669_p4 = pnand %p6667_p9, %p7234_p8  ;;  %p6676_p1 = por %p6675_p12, %p6674_p11 }
  0x6b   : > { %p6670_p10 = pneg %p6669_p4 }
  0x6d   : > { %p6677_p3 = pnand %p6676_p1, %p6670_p10 }
  0x6f   : > { %6680 = shalt.err (!%p6677_p3)
}
  0x70   : > { %s7005_s26 = smov 64   ;;  %s7006_s0 = smov 4  }
  0x71   : > { %6086 = dma.hbm_to_vmem [thread:$0]  (!%p7218_p6), %s14214_s7, 1024, %s409_s27, [#allocation16], %s7005_s26, %s7005_s26, %s7006_s0  }
  0x72   : > { %s7007_s19 = smov [#allocation18]   ;;  %s7008_s29 = smov [#allocation8]  }
  0x73   : > { %s434_s20 = sshll.u32 %s7007_s19, 4  ;;  %s347_s14 = sshll.u32 %s7008_s29, 4  ;;  %s435_s20 = int_to_ptr.vmem [resolvable:$true] %s434_s20  ;;  %s7325_s14 = int_to_ptr.vmem [resolvable:$true] %s347_s14 }
  0x74   : > { %s6681_s15 = scalar_lea.hbm %s14216_s9, 256 }
  0x75   : > { %p6682_p1 = scmp.ne.s32.totalorder %s14216_s9, %s6681_s15  ;;  %p6688_p0 = scmp.lt.u32.totalorder %s6681_s15, %s14216_s9 }
  0x77   : > { %p6684_p3 = pnand %p6682_p1, %p7234_p8 }
  0x79   : > { %p6685_p13 = pneg %p6684_p3 }
  0x7b   : > { %p6690_p2 = pnand %p6688_p0, %p6685_p13 }
  0x7d   : > { %6693 = shalt.err (!%p6690_p2)
}
  0x7e   : > { %s6694_s28 = scalar_lea.vmem %s435_s20, 256  ;;  %p6702_p4 = scmp.lt.s32.totalorder %s435_s20, %s435_s20 }
  0x7f   : > { %p6695_p5 = scmp.ne.s32.totalorder %s435_s20, %s6694_s28  ;;  %p6703_p10 = scmp.lt.s32.totalorder %s6694_s28, %s6694_s28 }
  0x81   : > { %p6697_p7 = pnand %p6695_p5, %p7234_p8  ;;  %p6704_p11 = por %p6703_p10, %p6702_p4 }
  0x83   : > { %p6698_p9 = pneg %p6697_p7 }
  0x85   : > { %p6705_p12 = pnand %p6704_p11, %p6698_p9 }
  0x87   : > { %6708 = shalt.err (!%p6705_p12)
}
  0x88   : > { %6092 = dma.hbm_to_vmem [thread:$0]  (!%p7218_p6), %s14216_s9, 256, %s435_s20, [#allocation19], %s7005_s26, %s7005_s26, %s7006_s0  }
  0x89   : > { %s14899_s2 = sld [smem:[#allocation449_spill]] }
  0x8f   : > { %s6709_s16 = scalar_lea.hbm %s14899_s2, 512 }
  0x90   : > { %p6710_p1 = scmp.ne.s32.totalorder %s14899_s2, %s6709_s16  ;;  %p6716_p0 = scmp.lt.u32.totalorder %s6709_s16, %s14899_s2 }
  0x92   : > { %p6712_p3 = pnand %p6710_p1, %p7234_p8 }
  0x94   : > { %p6713_p13 = pneg %p6712_p3 }
  0x96   : > { %p6718_p2 = pnand %p6716_p0, %p6713_p13 }
  0x98   : > { %6721 = shalt.err (!%p6718_p2)
}
  0x99   : > { %s6722_s26 = scalar_lea.vmem %s7325_s14, 512  ;;  %p6730_p4 = scmp.lt.s32.totalorder %s7325_s14, %s7325_s14 }
  0x9a   : > { %p6723_p5 = scmp.ne.s32.totalorder %s7325_s14, %s6722_s26  ;;  %p6731_p10 = scmp.lt.s32.totalorder %s6722_s26, %s6722_s26 }
  0x9c   : > { %p6725_p7 = pnand %p6723_p5, %p7234_p8  ;;  %p6732_p11 = por %p6731_p10, %p6730_p4 }
  0x9e   : > { %p6726_p9 = pneg %p6725_p7 }
  0xa0   : > { %p6733_p12 = pnand %p6732_p11, %p6726_p9 }
  0xa2   : > { %6736 = shalt.err (!%p6733_p12)
}
  0xa3   : > { %s14900_s0 = smov 8   ;;  %s14901_s20 = smov 128  }
  0xa4   : > { %6071 = dma.hbm_to_vmem [thread:$0]  (!%p7218_p6), %s14899_s2, 512, %s7325_s14, [#allocation7], %s14901_s20, %s14901_s20, %s14900_s0  }
  0xa5   : > { %s7009_s18 = smov [#allocation11]   ;;  %s7010_s29 = smov [#allocation14]  }
  0xa6   : > { %s372_s19 = sshll.u32 %s7009_s18, 4  ;;  %s395_s16 = sshll.u32 %s7010_s29, 4  ;;  %s373_s19 = int_to_ptr.vmem [resolvable:$true] %s372_s19  ;;  %s7371_s16 = int_to_ptr.vmem [resolvable:$true] %s395_s16 }
  0xa7   : > { %s6737_s12 = scalar_lea.hbm %s14211_s4, 256 }
  0xa8   : > { %p6738_p1 = scmp.ne.s32.totalorder %s14211_s4, %s6737_s12  ;;  %p6744_p0 = scmp.lt.u32.totalorder %s6737_s12, %s14211_s4 }
  0xaa   : > { %p6740_p3 = pnand %p6738_p1, %p7234_p8 }
  0xac   : > { %p6741_p13 = pneg %p6740_p3 }
  0xae   : > { %p6746_p2 = pnand %p6744_p0, %p6741_p13 }
  0xb0   : > { %6749 = shalt.err (!%p6746_p2)
}
  0xb1   : > { %s6750_s17 = scalar_lea.vmem %s373_s19, 256  ;;  %p6758_p4 = scmp.lt.s32.totalorder %s373_s19, %s373_s19 }
  0xb2   : > { %p6751_p5 = scmp.ne.s32.totalorder %s373_s19, %s6750_s17  ;;  %p6759_p10 = scmp.lt.s32.totalorder %s6750_s17, %s6750_s17 }
  0xb4   : > { %p6753_p7 = pnand %p6751_p5, %p7234_p8  ;;  %p6760_p11 = por %p6759_p10, %p6758_p4 }
  0xb6   : > { %p6754_p9 = pneg %p6753_p7 }
  0xb8   : > { %p6761_p12 = pnand %p6760_p11, %p6754_p9 }
  0xba   : > { %6764 = shalt.err (!%p6761_p12)
}
  0xbb   : > { %6077 = dma.hbm_to_vmem [thread:$0]  (!%p7218_p6), %s14211_s4, 256, %s373_s19, [#allocation10]  }
  0xbc   : > { %s6765_s12 = scalar_lea.hbm %s14213_s6, 512 }
  0xbd   : > { %p6766_p1 = scmp.ne.s32.totalorder %s14213_s6, %s6765_s12  ;;  %p6772_p0 = scmp.lt.u32.totalorder %s6765_s12, %s14213_s6 }
  0xbf   : > { %p6768_p3 = pnand %p6766_p1, %p7234_p8 }
  0xc1   : > { %p6769_p13 = pneg %p6768_p3 }
  0xc3   : > { %p6774_p2 = pnand %p6772_p0, %p6769_p13 }
  0xc5   : > { %6777 = shalt.err (!%p6774_p2)
}
  0xc6   : > { %s6778_s19 = scalar_lea.vmem %s7371_s16, 512  ;;  %p6786_p4 = scmp.lt.s32.totalorder %s7371_s16, %s7371_s16 }
  0xc7   : > { %p6779_p5 = scmp.ne.s32.totalorder %s7371_s16, %s6778_s19  ;;  %p6787_p10 = scmp.lt.s32.totalorder %s6778_s19, %s6778_s19 }
  0xc9   : > { %p6781_p7 = pnand %p6779_p5, %p7234_p8  ;;  %p6788_p11 = por %p6787_p10, %p6786_p4 }
  0xcb   : > { %p6782_p9 = pneg %p6781_p7 }
  0xcd   : > { %p6789_p12 = pnand %p6788_p11, %p6782_p9 }
  0xcf   : > { %6792 = shalt.err (!%p6789_p12)
}
  0xd0   : > { %6083 = dma.hbm_to_vmem [thread:$0]  (!%p7218_p6), %s14213_s6, 512, %s7371_s16, [#allocation13], %s14901_s20, %s14901_s20, %s14900_s0  }
  0xd1   : > { %s7011_s29 = smov [#allocation17]   ;;  %s7012_s15 = smov [#allocation20]  }
  0xd2   : > { %s421_s30 = sshll.u32 %s7011_s29, 4  ;;  %s447_s12 = sshll.u32 %s7012_s15, 4  ;;  %s422_s30 = int_to_ptr.vmem [resolvable:$true] %s421_s30  ;;  %s7417_s12 = int_to_ptr.vmem [resolvable:$true] %s447_s12 }
  0xd3   : > { %s6793_s28 = scalar_lea.hbm %s14215_s8, 2048 }
  0xd4   : > { %p6794_p1 = scmp.ne.s32.totalorder %s14215_s8, %s6793_s28  ;;  %p6800_p0 = scmp.lt.u32.totalorder %s6793_s28, %s14215_s8 }
  0xd6   : > { %p6796_p3 = pnand %p6794_p1, %p7234_p8 }
  0xd8   : > { %p6797_p13 = pneg %p6796_p3 }
  0xda   : > { %p6802_p2 = pnand %p6800_p0, %p6797_p13 }
  0xdc   : > { %6805 = shalt.err (!%p6802_p2)
}
  0xdd   : > { %s6806_s18 = scalar_lea.vmem %s422_s30, 2048  ;;  %p6814_p4 = scmp.lt.s32.totalorder %s422_s30, %s422_s30 }
  0xde   : > { %p6807_p5 = scmp.ne.s32.totalorder %s422_s30, %s6806_s18  ;;  %p6815_p10 = scmp.lt.s32.totalorder %s6806_s18, %s6806_s18 }
  0xe0   : > { %p6809_p7 = pnand %p6807_p5, %p7234_p8  ;;  %p6816_p11 = por %p6815_p10, %p6814_p4 }
  0xe2   : > { %p6810_p9 = pneg %p6809_p7 }
  0xe4   : > { %p6817_p12 = pnand %p6816_p11, %p6810_p9 }
  0xe6   : > { %6820 = shalt.err (!%p6817_p12)
}
  0xe7   : > { %6089 = dma.hbm_to_vmem [thread:$0]  (!%p7218_p6), %s14215_s8, 2048, %s422_s30, [#allocation16], %s14901_s20, %s14901_s20, %s14900_s0  }
  0xe8   : > { %s6821_s28 = scalar_lea.hbm %s14217_s10, 512 }
  0xe9   : > { %p6822_p1 = scmp.ne.s32.totalorder %s14217_s10, %s6821_s28  ;;  %p6828_p0 = scmp.lt.u32.totalorder %s6821_s28, %s14217_s10 }
  0xeb   : > { %p6824_p3 = pnand %p6822_p1, %p7234_p8 }
  0xed   : > { %p6825_p13 = pneg %p6824_p3 }
  0xef   : > { %p6830_p2 = pnand %p6828_p0, %p6825_p13 }
  0xf1   : > { %6833 = shalt.err (!%p6830_p2)
}
  0xf2   : > { %s6834_s30 = scalar_lea.vmem %s7417_s12, 512  ;;  %p6842_p4 = scmp.lt.s32.totalorder %s7417_s12, %s7417_s12 }
  0xf3   : > { %p6835_p5 = scmp.ne.s32.totalorder %s7417_s12, %s6834_s30  ;;  %p6843_p10 = scmp.lt.s32.totalorder %s6834_s30, %s6834_s30 }
  0xf5   : > { %p6837_p7 = pnand %p6835_p5, %p7234_p8  ;;  %p6844_p11 = por %p6843_p10, %p6842_p4 }
  0xf7   : > { %p6838_p9 = pneg %p6837_p7 }
  0xf9   : > { %p6845_p12 = pnand %p6844_p11, %p6838_p9 }
  0xfb   : > { %6848 = shalt.err (!%p6845_p12)
}
  0xfc   : > { %6095 = dma.hbm_to_vmem [thread:$0]  (!%p7218_p6), %s14217_s10, 512, %s7417_s12, [#allocation19], %s14901_s20, %s14901_s20, %s14900_s0  }
  0xfd   : > { %s7013_s15 = smov [#allocation21]   ;;  %s6849_s14 = scalar_lea.hbm %s14218_s11, 512 }
  0xfe   : > { %s460_s27 = sshll.u32 %s7013_s15, 4  ;;  %p6850_p1 = scmp.ne.s32.totalorder %s14218_s11, %s6849_s14  ;;  %s461_s27 = int_to_ptr.vmem [resolvable:$true] %s460_s27 }
  0xff   : > { %p6856_p0 = scmp.lt.u32.totalorder %s6849_s14, %s14218_s11 }
 0x100   : > { %p6852_p3 = pnand %p6850_p1, %p7234_p8 }
 0x102   : > { %p6853_p13 = pneg %p6852_p3 }
 0x104   : > { %p6858_p2 = pnand %p6856_p0, %p6853_p13 }
 0x106   : > { %6861 = shalt.err (!%p6858_p2)
}
 0x107   : > { %s6862_s12 = scalar_lea.vmem %s461_s27, 512  ;;  %p6870_p4 = scmp.lt.s32.totalorder %s461_s27, %s461_s27 }
 0x108   : > { %p6863_p5 = scmp.ne.s32.totalorder %s461_s27, %s6862_s12  ;;  %p6871_p10 = scmp.lt.s32.totalorder %s6862_s12, %s6862_s12 }
 0x10a   : > { %p6865_p7 = pnand %p6863_p5, %p7234_p8  ;;  %p6872_p11 = por %p6871_p10, %p6870_p4 }
 0x10c   : > { %p6866_p9 = pneg %p6865_p7 }
 0x10e   : > { %p6873_p12 = pnand %p6872_p11, %p6866_p9 }
 0x110   : > { %6876 = shalt.err (!%p6873_p12)
}
 0x111   : > { %s14902_s25 = sld [smem:[#allocation32_spill]]  ;;  %s5897_s13 = sadd.s32 4294967294, %s6997_s24  }
 0x112   : > { %6098 = dma.hbm_to_vmem [thread:$0]  (!%p7218_p6), %s14218_s11, 512, %s461_s27, [#allocation22], %s14901_s20, %s14901_s20, %s14900_s0  }
 0x113   : > { %s7489_s15 = sadd.s32 1, %s6997_s24   ;;  %s41_s26 = sadd.s32 1, %s6993_s23 }
 0x114   : > { %s38_s28 = ssub.s32 %s6997_s24, %s7489_s15  ;;  %p48_p8 = scmp.ne.s32.totalorder %s6993_s23, %s6989_s22 }
 0x115   : > { %p39_p1 = scmp.eq.s32.totalorder %s38_s28, 0  ;;  %p49_p3 = scmp.eq.s32.totalorder %s6997_s24, 0 }
 0x116   : > { %p54_p13 = scmp.ne.s32.totalorder %s6989_s22, %s6985_s21  ;;  %p315_p9 = scmp.eq.s32.totalorder %s5897_s13, 1 }
 0x117   : > { %p309_p0 = scmp.eq.s32.totalorder %s14902_s25, 1  ;;  %p50_p2 = por %p49_p3, %p48_p8 }
 0x118   : > { %s7501_s14 = scalar_select %p39_p1, %s6993_s23, %s41_s26  }
 0x119   : > { %p14903_p5 = scmp.eq.s32.totalorder %s14902_s25, 0  ;;  %p7509_p6 = por %p309_p0, %p48_p8 }
 0x11a   : > { %p6118_p4 = scmp.lt.s32.totalorder %s6997_s24, 2  ;;  %s474_s20 = sand.u32 1, %s6993_s23  }
 0x11b   : > { %p7505_p7 = por %p14903_p5, %p54_p13  ;;  %p7515_p10 = por %p315_p9, %p54_p13 }
 0x11c   : > { %s14905_s0 = scalar_select %p7509_p6, 1, 0 }
 0x11d   : > { %s14906_s27 = scalar_select %p7515_p10, 1, 0 }
 0x11e   : > { %s5911_s17 = sshll.u32 %s474_s20, 6  ;;  %s6015_s16 = sshll.u32 %s6997_s24, 10 }
 0x11f   : > { %s14907_s18 = sld [smem:[#allocation447_spill]]  ;;  %s478_s25 = scalar_lea.vmem [#allocation3], %s5911_s17 }
 0x120   : > { %s485_s26 = sshll.u32 %s478_s25, 4  ;;  %p7525_p11 = pnand %p6118_p4, %p50_p2  ;;  %s7529_s26 = int_to_ptr.vmem [resolvable:$true] %s485_s26 }
 0x121   : > { %s7531_s28 = scalar_lea.sflag [#allocation4], %s474_s20 }
 0x122   : > { %p6879_p8 = pneg %p7525_p11 }
 0x125   : > { %s7523_s29 = scalar_lea.hbm %s14907_s18, %s6015_s16  ;;  %s6882_s30 = scalar_lea.hbm %s14907_s18, 2048 }
 0x126   : > { %s6877_s1 = scalar_lea.hbm %s7523_s29, 1024  ;;  %p6883_p13 = scmp.lt.u32.totalorder %s7523_s29, %s14907_s18 }
 0x127   : > { %p6878_p12 = scmp.ne.s32.totalorder %s7523_s29, %s6877_s1  ;;  %p6884_p0 = scmp.lt.u32.totalorder %s6882_s30, %s6877_s1 }
 0x128   : > { %p6886_p5 = scmp.lt.u32.totalorder %s6877_s1, %s7523_s29 }
 0x129   : > { %p6880_p1 = pnand %p6879_p8, %p6878_p12  ;;  %p6885_p2 = por %p6884_p0, %p6883_p13 }
 0x12b   : > { %p6881_p3 = pneg %p6880_p1  ;;  %p6887_p9 = por %p6886_p5, %p6885_p2 }
 0x12d   : > { %p6888_p4 = pnand %p6887_p9, %p6881_p3 }
 0x12f   : > { %6891 = shalt.err (!%p6888_p4)
}
 0x130   : > { %s6892_s20 = scalar_lea.vmem %s7529_s26, 1024  ;;  %s7014_s17 = smov [#allocation3]  }
 0x131   : > { %p6893_p12 = scmp.ne.s32.totalorder %s7529_s26, %s6892_s20  ;;  %s6897_s16 = sshll.u32 %s7014_s17, 4  ;;  %s6898_s16 = int_to_ptr.vmem [resolvable:$false] %s6897_s16 }
 0x132   : > { %s6899_s12 = scalar_lea.vmem %s6898_s16, 2048  ;;  %p6900_p6 = scmp.lt.s32.totalorder %s7529_s26, %s6898_s16 }
 0x133   : > { %p6895_p1 = pnand %p6893_p12, %p6879_p8  ;;  %p6901_p13 = scmp.lt.s32.totalorder %s6899_s12, %s6892_s20 }
 0x135   : > { %p6896_p10 = pneg %p6895_p1  ;;  %p6902_p0 = por %p6901_p13, %p6900_p6 }
 0x137   : > { %p6903_p2 = pnand %p6902_p0, %p6896_p10 }
 0x139   : > { %6906 = shalt.err (!%p6903_p2)
}
 0x13a   : > { %s7015_s1 = smov 256   ;;  %s7016_s30 = smov 16  }
 0x13b   : > { %6102 = dma.hbm_to_vmem [thread:$0]  (!%p7525_p11), %s7523_s29, 1024, %s7529_s26, %s7531_s28, %s7015_s1, %s7015_s1, %s7016_s30  }
 0x13c   : > { %s14909_s25 = sld [smem:[#allocation33_spill]] }
 0x142   : > { %p14910_p8 = scmp.ne.s32.totalorder %s14909_s25, 0 }
 0x144   : > { %497 = sbr.rel (%p14910_p8) target bundleno = 2602 (0xa2a), region = 68 }
 0x14b   : > { %s7562_s17 = sand.u32 1, %s6989_s22  }
 0x14c   : > { %s14579_s20 = sshll.u32 %s7562_s17, 6  ;;  %s500_s16 = scalar_lea.sflag [#allocation4], %s7562_s17 }
 0x14d   : > { %s7568_s12 = scalar_lea.vmem [#allocation3], %s14579_s20 }
 0x14e   : > { %6952 = dma.done.wait (%p7505_p7), %s500_s16, 1024  }
 0x14f   : > { %6954 = vsyncadd (%p7505_p7), %s500_s16, 4294966272  ;;  %s14911_s29 = sld [smem:[#allocation32_spill]] }
 0x155   : > { %p14912_p6 = scmp.eq.s32.totalorder %s14911_s29, 0 }
 0x157   : > { %6956 = dma.done.wait (%p14912_p6), [#allocation7], 1024   ;;  %p14913_p10 = pmov %p14912_p6 }
 0x158   : > { %p14914_p11 = pmov %p14912_p6 }
 0x159   : > { %6958 = vsyncadd (%p14913_p10), [#allocation7], 4294966272 }
 0x15a   : > { %6960 = dma.done.wait (%p14914_p11), [#allocation10], 512   ;;  %p14915_p3 = pmov %p14912_p6 }
 0x15c   : > { %6962 = vsyncadd (%p14915_p3), [#allocation10], 4294966784  ;;  %p14916_p5 = pmov %p14915_p3 }
 0x15d   : > { %p14917_p9 = pmov %p14915_p3 }
 0x15e   : > { %6964 = dma.done.wait (%p14916_p5), [#allocation13], 1024  }
 0x15f   : > { %6966 = vsyncadd (%p14917_p9), [#allocation13], 4294966272  ;;  %p14918_p7 = pmov %p14915_p3 }
 0x160   : > { %p14919_p4 = pmov %p14915_p3 }
 0x161   : > { %6968 = dma.done.wait (%p14918_p7), [#allocation16], 3072  }
 0x162   : > { %6970 = vsyncadd (%p14919_p4), [#allocation16], 4294964224  ;;  %p14920_p12 = pmov %p14915_p3 }
 0x163   : > { %p14921_p1 = pmov %p14915_p3 }
 0x164   : > { %6972 = dma.done.wait (%p14920_p12), [#allocation19], 768  }
 0x165   : > { %6974 = vsyncadd (%p14921_p1), [#allocation19], 4294966528  ;;  %p14922_p13 = pmov %p14921_p1 }
 0x166   : > { %p14923_p0 = pmov %p14921_p1 }
 0x167   : > { %6976 = dma.done.wait (%p14922_p13), [#allocation22], 512  }
 0x168   : > { %6978 = vsyncadd (%p14923_p0), [#allocation22], 4294966784  ;;  %v14233_v0 = vmov 0   ;;  %v7603_v1 = vld [vmem:[%s7568_s12 + $0x20] sm:$0xff]  ;;  %s7018_s19 = smov 51   ;;  %v7611_v3 = vld [vmem:[%s7568_s12 + $0x30] sm:$0xff] }
 0x169   : > { %6279 = vset.pattern.permute.xlu1 %v14233_v0  ;;  %6278 = vset.pattern.permute.xlu0 %v14233_v0  ;;  %v7606_v2 = vld [vmem:[%s7568_s12] sm:$0xff]  ;;  %v7614_v4 = vld [vmem:[%s7568_s12 + $0x10] sm:$0xff]  ;;  %v7619_v5 = vld [vmem:[%s7568_s12 + $0x18] sm:$0xff]  ;;  %s7019_s26 = smov 50   ;;  %v7020_v13 = vmov 1   ;;  %s7021_s13 = smov 49  }
 0x16a   : > { %4603 = vmatprep.mubr.bf16.mxu0 %v14233_v0  ;;  %5632 = vmatprep.mubr.bf16.mxu1 %v14233_v0  ;;  %v7622_v6 = vld [vmem:[%s7568_s12 + $0x8] sm:$0xff]  ;;  %v7625_v7 = vld [vmem:[%s7568_s12 + $0x38] sm:$0xff]  ;;  %v7636_v10 = vld [vmem:[#allocation6] sm:$0xff]  ;;  %v7022_v14 = vmov 2   ;;  %s7023_s28 = smov 48   ;;  %v7024_v15 = vmov 3  }
 0x16b   : > { %609 = vrot.lane.b32.xlu1 %v7603_v1, %s7018_s19  ;;  %605 = vrot.lane.b32.xlu0 %v7606_v2, %s7018_s19  ;;  %v7628_v8 = vld [vmem:[%s7568_s12 + $0x28] sm:$0xff]  ;;  %v7640_v11 = vld [vmem:[#allocation6 + $0x10] sm:$0xff]  ;;  %v7642_v12 = vld [vmem:[#allocation6 + $0x18] sm:$0xff]  ;;  %s7025_s1 = smov 47   ;;  %v7026_v16 = vmov 4   ;;  %s7027_s30 = smov 46  }
 0x16c   : > { %v7634_v9 = vld [vmem:[#allocation6 + $0x8] sm:$0xff]  ;;  %v7028_v17 = vmov 5   ;;  %s7029_s25 = smov 45   ;;  %v7030_v24 = vmov 6   ;;  %s7031_s16 = smov 35   ;;  %v7032_v35 = vmov 7  }
 0x16d   : > { %v7034_v46 = vmov 8   ;;  %v7036_v59 = vmov 9   ;;  %s7095_s20 = smov 95   ;;  %p16210_p8 = scmp.ne.s32.totalorder %s14905_s0, 0 }
 0x16f   : > { %611 = vrot.lane.b32.xlu1 %v7611_v3, %s7018_s19  ;;  %607 = vrot.lane.b32.xlu0 %v7614_v4, %s7018_s19 }
 0x173   : > { %615 = vrot.lane.b32.xlu1 %v7619_v5, %s7018_s19  ;;  %613 = vrot.lane.b32.xlu0 %v7622_v6, %s7018_s19 }
 0x177   : > { %619 = vrot.lane.b32.xlu1 %v7625_v7, %s7018_s19  ;;  %617 = vrot.lane.b32.xlu0 %v7628_v8, %s7018_s19  ;;  %s7033_s19 = smov 34  }
 0x17b   : > { %657 = vperm.xlu1 %6279, %v7634_v9   ;;  %652 = vperm.xlu0 %6278, %v7636_v10  }
 0x17f   : > { %662 = vperm.xlu1 %6279, %v7640_v11   ;;  %667 = vperm.xlu0 %6278, %v7642_v12  }
 0x183   : > { %678 = vrot.lane.b32.xlu1 %v7606_v2, %s7019_s26  ;;  %680 = vrot.lane.b32.xlu0 %v7614_v4, %s7019_s26 }
 0x184   : > { %6280 = vset.pattern.permute.xlu1 %v7020_v13  ;;  %6281 = vset.pattern.permute.xlu0 %v7020_v13 }
 0x187   : > { %682 = vrot.lane.b32.xlu1 %v7603_v1, %s7019_s26  ;;  %684 = vrot.lane.b32.xlu0 %v7611_v3, %s7019_s26 }
 0x18b   : > { %686 = vrot.lane.b32.xlu1 %v7622_v6, %s7019_s26  ;;  %688 = vrot.lane.b32.xlu0 %v7619_v5, %s7019_s26 }
 0x18f   : > { %690 = vrot.lane.b32.xlu1 %v7628_v8, %s7019_s26  ;;  %692 = vrot.lane.b32.xlu0 %v7625_v7, %s7019_s26  ;;  %s7035_s26 = smov 33  }
 0x193   : > { %728 = vperm.xlu1 %6280, %v7636_v10   ;;  %732 = vperm.xlu0 %6281, %v7634_v9  }
 0x197   : > { %736 = vperm.xlu1 %6280, %v7640_v11   ;;  %759 = vrot.lane.b32.xlu0 %v7606_v2, %s7021_s13 }
 0x198   : > { %6282 = vset.pattern.permute.xlu0 %v7022_v14 }
 0x19b   : > { %740 = vperm.xlu1 %6280, %v7642_v12   ;;  %763 = vrot.lane.b32.xlu0 %v7603_v1, %s7021_s13 }
 0x19f   : > { %761 = vrot.lane.b32.xlu1 %v7614_v4, %s7021_s13  ;;  %767 = vrot.lane.b32.xlu0 %v7622_v6, %s7021_s13 }
 0x1a0   : > { %6283 = vset.pattern.permute.xlu1 %v7022_v14 }
 0x1a3   : > { %765 = vrot.lane.b32.xlu1 %v7611_v3, %s7021_s13  ;;  %771 = vrot.lane.b32.xlu0 %v7628_v8, %s7021_s13 }
 0x1a7   : > { %769 = vrot.lane.b32.xlu1 %v7619_v5, %s7021_s13  ;;  %807 = vperm.xlu0 %6282, %v7636_v10  }
 0x1ab   : > { %773 = vrot.lane.b32.xlu1 %v7625_v7, %s7021_s13  ;;  %819 = vperm.xlu0 %6282, %v7642_v12   ;;  %s7037_s13 = smov 32  }
 0x1af   : > { %811 = vperm.xlu1 %6283, %v7634_v9   ;;  %840 = vrot.lane.b32.xlu0 %v7614_v4, %s7023_s28 }
 0x1b0   : > { %6285 = vset.pattern.permute.xlu0 %v7024_v15 }
 0x1b3   : > { %815 = vperm.xlu1 %6283, %v7640_v11   ;;  %844 = vrot.lane.b32.xlu0 %v7611_v3, %s7023_s28 }
 0x1b7   : > { %838 = vrot.lane.b32.xlu1 %v7606_v2, %s7023_s28  ;;  %848 = vrot.lane.b32.xlu0 %v7619_v5, %s7023_s28 }
 0x1b8   : > { %6284 = vset.pattern.permute.xlu1 %v7024_v15 }
 0x1bb   : > { %842 = vrot.lane.b32.xlu1 %v7603_v1, %s7023_s28  ;;  %852 = vrot.lane.b32.xlu0 %v7625_v7, %s7023_s28 }
 0x1bf   : > { %846 = vrot.lane.b32.xlu1 %v7622_v6, %s7023_s28  ;;  %890 = vperm.xlu0 %6285, %v7634_v9  }
 0x1c3   : > { %850 = vrot.lane.b32.xlu1 %v7628_v8, %s7023_s28  ;;  %917 = vrot.lane.b32.xlu0 %v7606_v2, %s7025_s1  ;;  %s7039_s28 = smov 31  }
 0x1c4   : > { %6286 = vset.pattern.permute.xlu0 %v7026_v16 }
 0x1c7   : > { %886 = vperm.xlu1 %6284, %v7636_v10   ;;  %921 = vrot.lane.b32.xlu0 %v7603_v1, %s7025_s1 }
 0x1cb   : > { %894 = vperm.xlu1 %6284, %v7640_v11   ;;  %925 = vrot.lane.b32.xlu0 %v7622_v6, %s7025_s1 }
 0x1cf   : > { %898 = vperm.xlu1 %6284, %v7642_v12   ;;  %929 = vrot.lane.b32.xlu0 %v7628_v8, %s7025_s1 }
 0x1d3   : > { %919 = vrot.lane.b32.xlu1 %v7614_v4, %s7025_s1  ;;  %965 = vperm.xlu0 %6286, %v7636_v10  }
 0x1d4   : > { %6287 = vset.pattern.permute.xlu1 %v7026_v16 }
 0x1d7   : > { %923 = vrot.lane.b32.xlu1 %v7611_v3, %s7025_s1  ;;  %977 = vperm.xlu0 %6286, %v7642_v12  }
 0x1db   : > { %927 = vrot.lane.b32.xlu1 %v7619_v5, %s7025_s1  ;;  %998 = vrot.lane.b32.xlu0 %v7614_v4, %s7027_s30 }
 0x1dc   : > { %6289 = vset.pattern.permute.xlu0 %v7028_v17 }
 0x1dd   : > { %v7696_v18 = vpop.permute.xlu1 %609  ;;  %v7698_v19 = vpop.permute.xlu0 %605 }
 0x1df   : > { %931 = vrot.lane.b32.xlu1 %v7625_v7, %s7025_s1  ;;  %1002 = vrot.lane.b32.xlu0 %v7611_v3, %s7027_s30  ;;  %s7041_s1 = smov 30  }
 0x1e1   : > { %v7702_v20 = vpop.permute.xlu1 %611  ;;  %v7704_v21 = vpop.permute.xlu0 %607 }
 0x1e3   : > { %969 = vperm.xlu1 %6287, %v7634_v9   ;;  %1006 = vrot.lane.b32.xlu0 %v7619_v5, %s7027_s30 }
 0x1e5   : > { %v7709_v22 = vpop.permute.xlu1 %615  ;;  %v7711_v23 = vpop.permute.xlu0 %613 }
 0x1e7   : > { %973 = vperm.xlu1 %6287, %v7640_v11   ;;  %1010 = vrot.lane.b32.xlu0 %v7625_v7, %s7027_s30 }
 0x1e9   : > { %v7718_v25 = vpop.permute.xlu1 %619  ;;  %v7720_v26 = vpop.permute.xlu0 %617 }
 0x1eb   : > { %996 = vrot.lane.b32.xlu1 %v7606_v2, %s7027_s30  ;;  %1048 = vperm.xlu0 %6289, %v7634_v9  }
 0x1ec   : > { %6288 = vset.pattern.permute.xlu1 %v7028_v17 }
 0x1ef   : > { %1000 = vrot.lane.b32.xlu1 %v7603_v1, %s7027_s30  ;;  %1075 = vrot.lane.b32.xlu0 %v7606_v2, %s7029_s25 }
 0x1f0   : > { %6290 = vset.pattern.permute.xlu0 %v7030_v24 }
 0x1f3   : > { %1004 = vrot.lane.b32.xlu1 %v7622_v6, %s7027_s30  ;;  %1079 = vrot.lane.b32.xlu0 %v7603_v1, %s7029_s25 }
 0x1f7   : > { %1008 = vrot.lane.b32.xlu1 %v7628_v8, %s7027_s30  ;;  %1083 = vrot.lane.b32.xlu0 %v7622_v6, %s7029_s25  ;;  %s7043_s30 = smov 29  }
 0x1fa   : > { %v7725_v27 = vpop.permute.xlu1 %657  ;;  %v7727_v28 = vpop.permute.xlu0 %652 }
 0x1fb   : > { %1044 = vperm.xlu1 %6288, %v7636_v10   ;;  %1087 = vrot.lane.b32.xlu0 %v7628_v8, %s7029_s25 }
 0x1fe   : > { %v7732_v29 = vpop.permute.xlu1 %662  ;;  %v7734_v30 = vpop.permute.xlu0 %667 }
 0x1ff   : > { %1052 = vperm.xlu1 %6288, %v7640_v11   ;;  %1123 = vperm.xlu0 %6290, %v7636_v10  }
 0x202   : > { %v7738_v31 = vpop.permute.xlu1 %678  ;;  %v7740_v32 = vpop.permute.xlu0 %680 }
 0x203   : > { %1056 = vperm.xlu1 %6288, %v7642_v12   ;;  %1135 = vperm.xlu0 %6290, %v7642_v12  }
 0x206   : > { %v7744_v33 = vpop.permute.xlu1 %682  ;;  %v7746_v34 = vpop.permute.xlu0 %684 }
 0x207   : > { %1077 = vrot.lane.b32.xlu1 %v7614_v4, %s7029_s25  ;;  %1156 = vrot.lane.b32.xlu0 %v7614_v4, %s7031_s16 }
 0x208   : > { %6291 = vset.pattern.permute.xlu1 %v7030_v24  ;;  %6293 = vset.pattern.permute.xlu0 %v7032_v35 }
 0x20a   : > { %v7752_v36 = vpop.permute.xlu1 %686  ;;  %v7754_v37 = vpop.permute.xlu0 %688 }
 0x20b   : > { %1081 = vrot.lane.b32.xlu1 %v7611_v3, %s7029_s25  ;;  %1160 = vrot.lane.b32.xlu0 %v7611_v3, %s7031_s16 }
 0x20e   : > { %v7760_v38 = vpop.permute.xlu1 %690  ;;  %v7762_v39 = vpop.permute.xlu0 %692 }
 0x20f   : > { %1085 = vrot.lane.b32.xlu1 %v7619_v5, %s7029_s25  ;;  %1164 = vrot.lane.b32.xlu0 %v7619_v5, %s7031_s16 }
 0x212   : > { %v7768_v40 = vpop.permute.xlu1 %728  ;;  %v7770_v41 = vpop.permute.xlu0 %732 }
 0x213   : > { %1089 = vrot.lane.b32.xlu1 %v7625_v7, %s7029_s25  ;;  %1168 = vrot.lane.b32.xlu0 %v7625_v7, %s7031_s16  ;;  %s7045_s25 = smov 19  }
 0x216   : > { %v7776_v42 = vpop.permute.xlu1 %736  ;;  %v7778_v43 = vpop.permute.xlu0 %759 }
 0x217   : > { %1127 = vperm.xlu1 %6291, %v7634_v9   ;;  %1206 = vperm.xlu0 %6293, %v7634_v9  }
 0x21a   : > { %v7782_v44 = vpop.permute.xlu1 %740  ;;  %v7784_v45 = vpop.permute.xlu0 %763 }
 0x21b   : > { %1131 = vperm.xlu1 %6291, %v7640_v11   ;;  %1233 = vrot.lane.b32.xlu0 %v7606_v2, %s7033_s19 }
 0x21c   : > { %6294 = vset.pattern.permute.xlu0 %v7034_v46 }
 0x21e   : > { %v7789_v47 = vpop.permute.xlu1 %761  ;;  %v7791_v48 = vpop.permute.xlu0 %767 }
 0x21f   : > { %1154 = vrot.lane.b32.xlu1 %v7606_v2, %s7031_s16  ;;  %1237 = vrot.lane.b32.xlu0 %v7603_v1, %s7033_s19 }
 0x220   : > { %6292 = vset.pattern.permute.xlu1 %v7032_v35  ;;  %v7038_v35 = vmov 10  }
 0x222   : > { %v7797_v49 = vpop.permute.xlu1 %765  ;;  %v7799_v50 = vpop.permute.xlu0 %771 }
 0x223   : > { %1158 = vrot.lane.b32.xlu1 %v7603_v1, %s7031_s16  ;;  %1241 = vrot.lane.b32.xlu0 %v7622_v6, %s7033_s19 }
 0x226   : > { %v7805_v51 = vpop.permute.xlu1 %769  ;;  %v7807_v52 = vpop.permute.xlu0 %807 }
 0x227   : > { %14924 = vst [vmem:[#allocation34_spill] sm:$0xff] %v7805_v51  ;;  %14925 = vst [vmem:[#allocation35_spill] sm:$0xff] %v7807_v52  ;;  %1162 = vrot.lane.b32.xlu1 %v7622_v6, %s7031_s16  ;;  %1245 = vrot.lane.b32.xlu0 %v7628_v8, %s7033_s19 }
 0x22a   : > { %v7813_v53 = vpop.permute.xlu1 %773  ;;  %v7815_v54 = vpop.permute.xlu0 %819 }
 0x22b   : > { %14926 = vst [vmem:[#allocation36_spill] sm:$0xff] %v7815_v54  ;;  %1166 = vrot.lane.b32.xlu1 %v7628_v8, %s7031_s16  ;;  %1275 = vperm.xlu0 %6294, %v7636_v10   ;;  %s7047_s16 = smov 18   ;;  %v9358_v54 = vld [vmem:[#allocation6] sm:$0xff] }
 0x22c   : > { %15343 = vst [vmem:[#allocation428_spill] sm:$0xff] %v9358_v54 }
 0x22e   : > { %v7820_v55 = vpop.permute.xlu1 %811  ;;  %v7822_v56 = vpop.permute.xlu0 %840 }
 0x22f   : > { %14927 = vst [vmem:[#allocation37_spill] sm:$0xff] %v7820_v55  ;;  %14928 = vst [vmem:[#allocation38_spill] sm:$0xff] %v7822_v56  ;;  %1202 = vperm.xlu1 %6292, %v7636_v10   ;;  %1287 = vperm.xlu0 %6294, %v7642_v12   ;;  %v9304_v55 = vld [vmem:[#allocation6 + $0x10] sm:$0xff] }
 0x230   : > { %15332 = vst [vmem:[#allocation418_spill] sm:$0xff] %v9304_v55 }
 0x232   : > { %v7826_v57 = vpop.permute.xlu1 %815  ;;  %v7828_v58 = vpop.permute.xlu0 %844 }
 0x233   : > { %14929 = vst [vmem:[#allocation39_spill] sm:$0xff] %v7826_v57  ;;  %14930 = vst [vmem:[#allocation40_spill] sm:$0xff] %v7828_v58  ;;  %1210 = vperm.xlu1 %6292, %v7640_v11   ;;  %1308 = vrot.lane.b32.xlu0 %v7614_v4, %s7035_s26 }
 0x234   : > { %6297 = vset.pattern.permute.xlu0 %v7036_v59 }
 0x236   : > { %v7833_v60 = vpop.permute.xlu1 %838  ;;  %v7835_v61 = vpop.permute.xlu0 %848 }
 0x237   : > { %14931 = vst [vmem:[#allocation41_spill] sm:$0xff] %v7833_v60  ;;  %14932 = vst [vmem:[#allocation42_spill] sm:$0xff] %v7835_v61  ;;  %1214 = vperm.xlu1 %6292, %v7642_v12   ;;  %1312 = vrot.lane.b32.xlu0 %v7611_v3, %s7035_s26 }
 0x23a   : > { %v7840_v62 = vpop.permute.xlu1 %842  ;;  %v7842_v63 = vpop.permute.xlu0 %852 }
 0x23b   : > { %14933 = vst [vmem:[#allocation43_spill] sm:$0xff] %v7840_v62  ;;  %14934 = vst [vmem:[#allocation44_spill] sm:$0xff] %v7842_v63  ;;  %1235 = vrot.lane.b32.xlu1 %v7614_v4, %s7033_s19  ;;  %1316 = vrot.lane.b32.xlu0 %v7619_v5, %s7035_s26 }
 0x23c   : > { %6295 = vset.pattern.permute.xlu1 %v7034_v46 }
 0x23e   : > { %v7848_v13 = vpop.permute.xlu1 %846  ;;  %v7850_v14 = vpop.permute.xlu0 %890 }
 0x23f   : > { %14935 = vst [vmem:[#allocation45_spill] sm:$0xff] %v7848_v13  ;;  %14936 = vst [vmem:[#allocation46_spill] sm:$0xff] %v7850_v14  ;;  %1239 = vrot.lane.b32.xlu1 %v7611_v3, %s7033_s19  ;;  %1320 = vrot.lane.b32.xlu0 %v7625_v7, %s7035_s26 }
 0x242   : > { %v7856_v15 = vpop.permute.xlu1 %850  ;;  %v7858_v16 = vpop.permute.xlu0 %917 }
 0x243   : > { %14937 = vst [vmem:[#allocation47_spill] sm:$0xff] %v7856_v15  ;;  %14938 = vst [vmem:[#allocation48_spill] sm:$0xff] %v7858_v16  ;;  %1243 = vrot.lane.b32.xlu1 %v7619_v5, %s7033_s19  ;;  %1352 = vperm.xlu0 %6297, %v7634_v9  }
 0x246   : > { %v7863_v17 = vpop.permute.xlu1 %886  ;;  %v7865_v24 = vpop.permute.xlu0 %921 }
 0x247   : > { %14939 = vst [vmem:[#allocation49_spill] sm:$0xff] %v7863_v17  ;;  %14940 = vst [vmem:[#allocation50_spill] sm:$0xff] %v7865_v24  ;;  %1247 = vrot.lane.b32.xlu1 %v7625_v7, %s7033_s19  ;;  %1379 = vrot.lane.b32.xlu0 %v7606_v2, %s7037_s13  ;;  %s7049_s19 = smov 17  }
 0x248   : > { %6298 = vset.pattern.permute.xlu0 %v7038_v35 }
 0x24a   : > { %v7871_v46 = vpop.permute.xlu1 %894  ;;  %v7873_v0 = vpop.permute.xlu0 %925 }
 0x24b   : > { %14941 = vst [vmem:[#allocation51_spill] sm:$0xff] %v7871_v46  ;;  %14942 = vst [vmem:[#allocation52_spill] sm:$0xff] %v7873_v0  ;;  %1279 = vperm.xlu1 %6295, %v7634_v9   ;;  %1383 = vrot.lane.b32.xlu0 %v7603_v1, %s7037_s13 }
 0x24e   : > { %v7878_v16 = vpop.permute.xlu1 %898  ;;  %v7880_v24 = vpop.permute.xlu0 %929 }
 0x24f   : > { %14943 = vst [vmem:[#allocation53_spill] sm:$0xff] %v7878_v16  ;;  %14944 = vst [vmem:[#allocation54_spill] sm:$0xff] %v7880_v24  ;;  %1283 = vperm.xlu1 %6295, %v7640_v11   ;;  %1387 = vrot.lane.b32.xlu0 %v7622_v6, %s7037_s13 }
 0x252   : > { %v7885_v17 = vpop.permute.xlu1 %919  ;;  %v7887_v14 = vpop.permute.xlu0 %965 }
 0x253   : > { %14945 = vst [vmem:[#allocation55_spill] sm:$0xff] %v7885_v17  ;;  %14946 = vst [vmem:[#allocation56_spill] sm:$0xff] %v7887_v14  ;;  %1306 = vrot.lane.b32.xlu1 %v7606_v2, %s7035_s26  ;;  %1391 = vrot.lane.b32.xlu0 %v7628_v8, %s7037_s13 }
 0x254   : > { %6296 = vset.pattern.permute.xlu1 %v7036_v59 }
 0x256   : > { %v7893_v46 = vpop.permute.xlu1 %923  ;;  %v7895_v16 = vpop.permute.xlu0 %977 }
 0x257   : > { %14947 = vst [vmem:[#allocation57_spill] sm:$0xff] %v7893_v46  ;;  %14948 = vst [vmem:[#allocation58_spill] sm:$0xff] %v7895_v16  ;;  %1310 = vrot.lane.b32.xlu1 %v7603_v1, %s7035_s26  ;;  %1421 = vperm.xlu0 %6298, %v7636_v10   ;;  %v7040_v16 = vmov 11  }
 0x25a   : > { %v7900_v24 = vpop.permute.xlu1 %927  ;;  %v7902_v17 = vpop.permute.xlu0 %998 }
 0x25b   : > { %14949 = vst [vmem:[#allocation59_spill] sm:$0xff] %v7900_v24  ;;  %14950 = vst [vmem:[#allocation60_spill] sm:$0xff] %v7902_v17  ;;  %1314 = vrot.lane.b32.xlu1 %v7622_v6, %s7035_s26  ;;  %1433 = vperm.xlu0 %6298, %v7642_v12  }
 0x25e   : > { %v7907_v14 = vpop.permute.xlu1 %931  ;;  %v7909_v59 = vpop.permute.xlu0 %1002 }
 0x25f   : > { %14951 = vst [vmem:[#allocation61_spill] sm:$0xff] %v7907_v14  ;;  %14952 = vst [vmem:[#allocation62_spill] sm:$0xff] %v7909_v59  ;;  %1318 = vrot.lane.b32.xlu1 %v7628_v8, %s7035_s26  ;;  %1454 = vrot.lane.b32.xlu0 %v7614_v4, %s7039_s28  ;;  %s14562_s26 = smov 16  }
 0x260   : > { %6301 = vset.pattern.permute.xlu0 %v7040_v16 }
 0x262   : > { %v7915_v24 = vpop.permute.xlu1 %969  ;;  %v7917_v17 = vpop.permute.xlu0 %1006 }
 0x263   : > { %14953 = vst [vmem:[#allocation63_spill] sm:$0xff] %v7915_v24  ;;  %14954 = vst [vmem:[#allocation64_spill] sm:$0xff] %v7917_v17  ;;  %1348 = vperm.xlu1 %6296, %v7636_v10   ;;  %1458 = vrot.lane.b32.xlu0 %v7611_v3, %s7039_s28 }
 0x266   : > { %v7922_v46 = vpop.permute.xlu1 %973  ;;  %v7924_v59 = vpop.permute.xlu0 %1010 }
 0x267   : > { %14955 = vst [vmem:[#allocation65_spill] sm:$0xff] %v7922_v46  ;;  %14956 = vst [vmem:[#allocation66_spill] sm:$0xff] %v7924_v59  ;;  %1356 = vperm.xlu1 %6296, %v7640_v11   ;;  %1462 = vrot.lane.b32.xlu0 %v7619_v5, %s7039_s28 }
 0x26a   : > { %v7929_v14 = vpop.permute.xlu1 %996  ;;  %v7931_v0 = vpop.permute.xlu0 %1048 }
 0x26b   : > { %14957 = vst [vmem:[#allocation67_spill] sm:$0xff] %v7929_v14  ;;  %14958 = vst [vmem:[#allocation68_spill] sm:$0xff] %v7931_v0  ;;  %1360 = vperm.xlu1 %6296, %v7642_v12   ;;  %1466 = vrot.lane.b32.xlu0 %v7625_v7, %s7039_s28 }
 0x26e   : > { %v7936_v24 = vpop.permute.xlu1 %1000  ;;  %v7938_v17 = vpop.permute.xlu0 %1075 }
 0x26f   : > { %14959 = vst [vmem:[#allocation69_spill] sm:$0xff] %v7936_v24  ;;  %14960 = vst [vmem:[#allocation70_spill] sm:$0xff] %v7938_v17  ;;  %1381 = vrot.lane.b32.xlu1 %v7614_v4, %s7037_s13  ;;  %1498 = vperm.xlu0 %6301, %v7634_v9   ;;  %v7042_v24 = vmov 12  }
 0x270   : > { %6299 = vset.pattern.permute.xlu1 %v7038_v35 }
 0x272   : > { %v7943_v59 = vpop.permute.xlu1 %1004  ;;  %v7945_v46 = vpop.permute.xlu0 %1079 }
 0x273   : > { %14961 = vst [vmem:[#allocation71_spill] sm:$0xff] %v7943_v59  ;;  %14962 = vst [vmem:[#allocation72_spill] sm:$0xff] %v7945_v46  ;;  %1385 = vrot.lane.b32.xlu1 %v7611_v3, %s7037_s13  ;;  %1525 = vrot.lane.b32.xlu0 %v7606_v2, %s7041_s1  ;;  %v9276_v59 = vld [vmem:[%s7568_s12 + $0x8] sm:$0xff] }
 0x274   : > { %6302 = vset.pattern.permute.xlu0 %v7042_v24  ;;  %15325 = vst [vmem:[#allocation411_spill] sm:$0xff] %v9276_v59 }
 0x276   : > { %v7951_v17 = vpop.permute.xlu1 %1008  ;;  %v7953_v0 = vpop.permute.xlu0 %1083 }
 0x277   : > { %14963 = vst [vmem:[#allocation73_spill] sm:$0xff] %v7951_v17  ;;  %14964 = vst [vmem:[#allocation74_spill] sm:$0xff] %v7953_v0  ;;  %1389 = vrot.lane.b32.xlu1 %v7619_v5, %s7037_s13  ;;  %1529 = vrot.lane.b32.xlu0 %v7603_v1, %s7041_s1 }
 0x27a   : > { %v7959_v35 = vpop.permute.xlu1 %1044  ;;  %v7961_v46 = vpop.permute.xlu0 %1087 }
 0x27b   : > { %14965 = vst [vmem:[#allocation75_spill] sm:$0xff] %v7959_v35  ;;  %14966 = vst [vmem:[#allocation76_spill] sm:$0xff] %v7961_v46  ;;  %1393 = vrot.lane.b32.xlu1 %v7625_v7, %s7037_s13  ;;  %1533 = vrot.lane.b32.xlu0 %v7622_v6, %s7041_s1  ;;  %s7053_s13 = smov 15  }
 0x27e   : > { %v7967_v14 = vpop.permute.xlu1 %1052  ;;  %v7969_v17 = vpop.permute.xlu0 %1123 }
 0x27f   : > { %14967 = vst [vmem:[#allocation77_spill] sm:$0xff] %v7967_v14  ;;  %14968 = vst [vmem:[#allocation78_spill] sm:$0xff] %v7969_v17  ;;  %1425 = vperm.xlu1 %6299, %v7634_v9   ;;  %1537 = vrot.lane.b32.xlu0 %v7628_v8, %s7041_s1 }
 0x282   : > { %v7974_v0 = vpop.permute.xlu1 %1056  ;;  %v7977_v46 = vpop.permute.xlu0 %1135 }
 0x283   : > { %14969 = vst [vmem:[#allocation79_spill] sm:$0xff] %v7974_v0  ;;  %1429 = vperm.xlu1 %6299, %v7640_v11   ;;  %14970 = vst [vmem:[#allocation80_spill] sm:$0xff] %v7977_v46  ;;  %1567 = vperm.xlu0 %6302, %v7636_v10   ;;  %v7044_v46 = vmov 13  }
 0x286   : > { %v7980_v35 = vpop.permute.xlu1 %1077  ;;  %v7984_v14 = vpop.permute.xlu0 %1156 }
 0x287   : > { %14971 = vst [vmem:[#allocation81_spill] sm:$0xff] %v7980_v35  ;;  %1452 = vrot.lane.b32.xlu1 %v7606_v2, %s7039_s28  ;;  %14972 = vst [vmem:[#allocation82_spill] sm:$0xff] %v7984_v14  ;;  %1579 = vperm.xlu0 %6302, %v7642_v12  }
 0x288   : > { %6300 = vset.pattern.permute.xlu1 %v7040_v16 }
 0x28a   : > { %v7987_v17 = vpop.permute.xlu1 %1081  ;;  %v7991_v0 = vpop.permute.xlu0 %1160 }
 0x28b   : > { %14973 = vst [vmem:[#allocation83_spill] sm:$0xff] %v7987_v17  ;;  %1456 = vrot.lane.b32.xlu1 %v7603_v1, %s7039_s28  ;;  %14974 = vst [vmem:[#allocation84_spill] sm:$0xff] %v7991_v0  ;;  %1600 = vrot.lane.b32.xlu0 %v7614_v4, %s7043_s30 }
 0x28c   : > { %6305 = vset.pattern.permute.xlu0 %v7044_v46 }
 0x28e   : > { %v7995_v35 = vpop.permute.xlu1 %1085  ;;  %v7999_v16 = vpop.permute.xlu0 %1164 }
 0x28f   : > { %14975 = vst [vmem:[#allocation85_spill] sm:$0xff] %v7995_v35  ;;  %1460 = vrot.lane.b32.xlu1 %v7622_v6, %s7039_s28  ;;  %14976 = vst [vmem:[#allocation86_spill] sm:$0xff] %v7999_v16  ;;  %1604 = vrot.lane.b32.xlu0 %v7611_v3, %s7043_s30 }
 0x292   : > { %v8003_v14 = vpop.permute.xlu1 %1089  ;;  %v8007_v0 = vpop.permute.xlu0 %1168 }
 0x293   : > { %14977 = vst [vmem:[#allocation87_spill] sm:$0xff] %v8003_v14  ;;  %1464 = vrot.lane.b32.xlu1 %v7628_v8, %s7039_s28  ;;  %14978 = vst [vmem:[#allocation88_spill] sm:$0xff] %v8007_v0  ;;  %1608 = vrot.lane.b32.xlu0 %v7619_v5, %s7043_s30  ;;  %s7055_s28 = smov 14  }
 0x296   : > { %v8011_v17 = vpop.permute.xlu1 %1127  ;;  %v8014_v35 = vpop.permute.xlu0 %1206 }
 0x297   : > { %14979 = vst [vmem:[#allocation89_spill] sm:$0xff] %v8011_v17  ;;  %1494 = vperm.xlu1 %6300, %v7636_v10   ;;  %14980 = vst [vmem:[#allocation90_spill] sm:$0xff] %v8014_v35  ;;  %1612 = vrot.lane.b32.xlu0 %v7625_v7, %s7043_s30  ;;  %v14282_v35 = vmov 14  }
 0x29a   : > { %v8018_v16 = vpop.permute.xlu1 %1131  ;;  %v8021_v14 = vpop.permute.xlu0 %1233 }
 0x29b   : > { %14981 = vst [vmem:[#allocation91_spill] sm:$0xff] %v8018_v16  ;;  %1502 = vperm.xlu1 %6300, %v7640_v11   ;;  %14982 = vst [vmem:[#allocation92_spill] sm:$0xff] %v8021_v14  ;;  %1644 = vperm.xlu0 %6305, %v7634_v9  }
 0x29e   : > { %v8024_v0 = vpop.permute.xlu1 %1154  ;;  %v8027_v17 = vpop.permute.xlu0 %1237 }
 0x29f   : > { %14983 = vst [vmem:[#allocation93_spill] sm:$0xff] %v8024_v0  ;;  %1506 = vperm.xlu1 %6300, %v7642_v12   ;;  %14984 = vst [vmem:[#allocation94_spill] sm:$0xff] %v8027_v17  ;;  %1671 = vrot.lane.b32.xlu0 %v7606_v2, %s7045_s25 }
 0x2a0   : > { %6306 = vset.pattern.permute.xlu0 %v14282_v35 }
 0x2a2   : > { %v8032_v16 = vpop.permute.xlu1 %1158  ;;  %v8036_v14 = vpop.permute.xlu0 %1241 }
 0x2a3   : > { %14985 = vst [vmem:[#allocation95_spill] sm:$0xff] %v8032_v16  ;;  %1527 = vrot.lane.b32.xlu1 %v7614_v4, %s7041_s1  ;;  %14986 = vst [vmem:[#allocation96_spill] sm:$0xff] %v8036_v14  ;;  %1675 = vrot.lane.b32.xlu0 %v7603_v1, %s7045_s25 }
 0x2a4   : > { %6303 = vset.pattern.permute.xlu1 %v7042_v24 }
 0x2a6   : > { %v8040_v0 = vpop.permute.xlu1 %1162  ;;  %v8044_v17 = vpop.permute.xlu0 %1245 }
 0x2a7   : > { %14987 = vst [vmem:[#allocation97_spill] sm:$0xff] %v8040_v0  ;;  %1531 = vrot.lane.b32.xlu1 %v7611_v3, %s7041_s1  ;;  %14988 = vst [vmem:[#allocation98_spill] sm:$0xff] %v8044_v17  ;;  %1679 = vrot.lane.b32.xlu0 %v7622_v6, %s7045_s25 }
 0x2aa   : > { %v8048_v35 = vpop.permute.xlu1 %1166  ;;  %v8052_v16 = vpop.permute.xlu0 %1275 }
 0x2ab   : > { %14989 = vst [vmem:[#allocation99_spill] sm:$0xff] %v8048_v35  ;;  %1535 = vrot.lane.b32.xlu1 %v7619_v5, %s7041_s1  ;;  %14990 = vst [vmem:[#allocation100_spill] sm:$0xff] %v8052_v16  ;;  %1683 = vrot.lane.b32.xlu0 %v7628_v8, %s7045_s25 }
 0x2ae   : > { %v8056_v24 = vpop.permute.xlu1 %1202  ;;  %v8060_v14 = vpop.permute.xlu0 %1287 }
 0x2af   : > { %14991 = vst [vmem:[#allocation101_spill] sm:$0xff] %v8056_v24  ;;  %1539 = vrot.lane.b32.xlu1 %v7625_v7, %s7041_s1  ;;  %14992 = vst [vmem:[#allocation102_spill] sm:$0xff] %v8060_v14  ;;  %1713 = vperm.xlu0 %6306, %v7636_v10   ;;  %v14294_v14 = vmov 15   ;;  %s7057_s1 = smov 13  }
 0x2b2   : > { %v8063_v17 = vpop.permute.xlu1 %1210  ;;  %v8066_v35 = vpop.permute.xlu0 %1308 }
 0x2b3   : > { %14993 = vst [vmem:[#allocation103_spill] sm:$0xff] %v8063_v17  ;;  %1571 = vperm.xlu1 %6303, %v7634_v9   ;;  %14994 = vst [vmem:[#allocation104_spill] sm:$0xff] %v8066_v35  ;;  %1725 = vperm.xlu0 %6306, %v7642_v12  }
 0x2b6   : > { %v8069_v16 = vpop.permute.xlu1 %1214  ;;  %v8072_v24 = vpop.permute.xlu0 %1312 }
 0x2b7   : > { %14995 = vst [vmem:[#allocation105_spill] sm:$0xff] %v8069_v16  ;;  %1575 = vperm.xlu1 %6303, %v7640_v11   ;;  %14996 = vst [vmem:[#allocation106_spill] sm:$0xff] %v8072_v24  ;;  %1746 = vrot.lane.b32.xlu0 %v7614_v4, %s7047_s16 }
 0x2b8   : > { %6309 = vset.pattern.permute.xlu0 %v14294_v14 }
 0x2ba   : > { %v8077_v17 = vpop.permute.xlu1 %1235  ;;  %v8081_v35 = vpop.permute.xlu0 %1316 }
 0x2bb   : > { %14997 = vst [vmem:[#allocation107_spill] sm:$0xff] %v8077_v17  ;;  %1598 = vrot.lane.b32.xlu1 %v7606_v2, %s7043_s30  ;;  %14998 = vst [vmem:[#allocation108_spill] sm:$0xff] %v8081_v35  ;;  %1750 = vrot.lane.b32.xlu0 %v7611_v3, %s7047_s16 }
 0x2bc   : > { %6304 = vset.pattern.permute.xlu1 %v7044_v46 }
 0x2be   : > { %v8085_v16 = vpop.permute.xlu1 %1239  ;;  %v8089_v24 = vpop.permute.xlu0 %1320 }
 0x2bf   : > { %14999 = vst [vmem:[#allocation109_spill] sm:$0xff] %v8085_v16  ;;  %1602 = vrot.lane.b32.xlu1 %v7603_v1, %s7043_s30  ;;  %15000 = vst [vmem:[#allocation110_spill] sm:$0xff] %v8089_v24  ;;  %1754 = vrot.lane.b32.xlu0 %v7619_v5, %s7047_s16 }
 0x2c2   : > { %v8093_v14 = vpop.permute.xlu1 %1243  ;;  %v8097_v35 = vpop.permute.xlu0 %1352 }
 0x2c3   : > { %15001 = vst [vmem:[#allocation111_spill] sm:$0xff] %v8093_v14  ;;  %1606 = vrot.lane.b32.xlu1 %v7622_v6, %s7043_s30  ;;  %15002 = vst [vmem:[#allocation112_spill] sm:$0xff] %v8097_v35  ;;  %1758 = vrot.lane.b32.xlu0 %v7625_v7, %s7047_s16  ;;  %v14305_v35 = vmov 16  }
 0x2c6   : > { %v8101_v46 = vpop.permute.xlu1 %1247  ;;  %v8105_v16 = vpop.permute.xlu0 %1379 }
 0x2c7   : > { %15003 = vst [vmem:[#allocation113_spill] sm:$0xff] %v8101_v46  ;;  %1610 = vrot.lane.b32.xlu1 %v7628_v8, %s7043_s30  ;;  %15004 = vst [vmem:[#allocation114_spill] sm:$0xff] %v8105_v16  ;;  %1790 = vperm.xlu0 %6309, %v7634_v9   ;;  %s7059_s30 = smov 3  }
 0x2ca   : > { %v8108_v24 = vpop.permute.xlu1 %1279  ;;  %v8111_v14 = vpop.permute.xlu0 %1383 }
 0x2cb   : > { %15005 = vst [vmem:[#allocation115_spill] sm:$0xff] %v8108_v24  ;;  %1640 = vperm.xlu1 %6304, %v7636_v10   ;;  %15006 = vst [vmem:[#allocation116_spill] sm:$0xff] %v8111_v14  ;;  %1817 = vrot.lane.b32.xlu0 %v7606_v2, %s7049_s19 }
 0x2cc   : > { %6310 = vset.pattern.permute.xlu0 %v14305_v35 }
 0x2ce   : > { %v8116_v46 = vpop.permute.xlu1 %1283  ;;  %v8119_v16 = vpop.permute.xlu0 %1387 }
 0x2cf   : > { %15007 = vst [vmem:[#allocation117_spill] sm:$0xff] %v8116_v46  ;;  %1648 = vperm.xlu1 %6304, %v7640_v11   ;;  %15008 = vst [vmem:[#allocation118_spill] sm:$0xff] %v8119_v16  ;;  %1821 = vrot.lane.b32.xlu0 %v7603_v1, %s7049_s19  ;;  %v15013_v46 = vmov 14  }
 0x2d2   : > { %v8123_v24 = vpop.permute.xlu1 %1306  ;;  %v8126_v14 = vpop.permute.xlu0 %1391 }
 0x2d3   : > { %15009 = vst [vmem:[#allocation119_spill] sm:$0xff] %v8123_v24  ;;  %1652 = vperm.xlu1 %6304, %v7642_v12   ;;  %15010 = vst [vmem:[#allocation120_spill] sm:$0xff] %v8126_v14  ;;  %1825 = vrot.lane.b32.xlu0 %v7622_v6, %s7049_s19 }
 0x2d6   : > { %v8130_v17 = vpop.permute.xlu1 %1310  ;;  %v8134_v35 = vpop.permute.xlu0 %1421 }
 0x2d7   : > { %15011 = vst [vmem:[#allocation121_spill] sm:$0xff] %v8130_v17  ;;  %1673 = vrot.lane.b32.xlu1 %v7614_v4, %s7045_s25  ;;  %15012 = vst [vmem:[#allocation122_spill] sm:$0xff] %v8134_v35  ;;  %1829 = vrot.lane.b32.xlu0 %v7628_v8, %s7049_s19 }
 0x2d8   : > { %6307 = vset.pattern.permute.xlu1 %v15013_v46 }
 0x2da   : > { %v8139_v16 = vpop.permute.xlu1 %1314  ;;  %v8143_v14 = vpop.permute.xlu0 %1433 }
 0x2db   : > { %15014 = vst [vmem:[#allocation123_spill] sm:$0xff] %v8139_v16  ;;  %1677 = vrot.lane.b32.xlu1 %v7611_v3, %s7045_s25  ;;  %15015 = vst [vmem:[#allocation124_spill] sm:$0xff] %v8143_v14  ;;  %1859 = vperm.xlu0 %6310, %v7636_v10   ;;  %v14318_v14 = vmov 17  }
 0x2de   : > { %v8146_v17 = vpop.permute.xlu1 %1318  ;;  %v8150_v35 = vpop.permute.xlu0 %1454 }
 0x2df   : > { %15016 = vst [vmem:[#allocation125_spill] sm:$0xff] %v8146_v17  ;;  %1681 = vrot.lane.b32.xlu1 %v7619_v5, %s7045_s25  ;;  %15017 = vst [vmem:[#allocation126_spill] sm:$0xff] %v8150_v35  ;;  %1871 = vperm.xlu0 %6310, %v7642_v12  }
 0x2e2   : > { %v8153_v46 = vpop.permute.xlu1 %1348  ;;  %v8157_v16 = vpop.permute.xlu0 %1458 }
 0x2e3   : > { %15018 = vst [vmem:[#allocation127_spill] sm:$0xff] %v8153_v46  ;;  %1685 = vrot.lane.b32.xlu1 %v7625_v7, %s7045_s25  ;;  %15019 = vst [vmem:[#allocation128_spill] sm:$0xff] %v8157_v16  ;;  %1892 = vrot.lane.b32.xlu0 %v7614_v4, %s14562_s26  ;;  %s7061_s25 = smov 2  }
 0x2e4   : > { %6313 = vset.pattern.permute.xlu0 %v14318_v14 }
 0x2e6   : > { %v8162_v17 = vpop.permute.xlu1 %1356  ;;  %v8165_v35 = vpop.permute.xlu0 %1462 }
 0x2e7   : > { %15020 = vst [vmem:[#allocation129_spill] sm:$0xff] %v8162_v17  ;;  %1717 = vperm.xlu1 %6307, %v7634_v9   ;;  %15021 = vst [vmem:[#allocation130_spill] sm:$0xff] %v8165_v35  ;;  %1896 = vrot.lane.b32.xlu0 %v7611_v3, %s14562_s26  ;;  %v15026_v35 = vmov 15   ;;  %v15041_v17 = vmov 16  }
 0x2ea   : > { %v8169_v46 = vpop.permute.xlu1 %1360  ;;  %v8172_v16 = vpop.permute.xlu0 %1466 }
 0x2eb   : > { %15022 = vst [vmem:[#allocation131_spill] sm:$0xff] %v8169_v46  ;;  %1721 = vperm.xlu1 %6307, %v7640_v11   ;;  %15023 = vst [vmem:[#allocation132_spill] sm:$0xff] %v8172_v16  ;;  %1900 = vrot.lane.b32.xlu0 %v7619_v5, %s14562_s26 }
 0x2ee   : > { %v8176_v24 = vpop.permute.xlu1 %1381  ;;  %v8180_v14 = vpop.permute.xlu0 %1498 }
 0x2ef   : > { %15024 = vst [vmem:[#allocation133_spill] sm:$0xff] %v8176_v24  ;;  %1744 = vrot.lane.b32.xlu1 %v7606_v2, %s7047_s16  ;;  %15025 = vst [vmem:[#allocation134_spill] sm:$0xff] %v8180_v14  ;;  %1904 = vrot.lane.b32.xlu0 %v7625_v7, %s14562_s26 }
 0x2f0   : > { %6308 = vset.pattern.permute.xlu1 %v15026_v35  ;;  %v14328_v35 = vmov 18  }
 0x2f2   : > { %v8185_v46 = vpop.permute.xlu1 %1385  ;;  %v8189_v16 = vpop.permute.xlu0 %1525 }
 0x2f3   : > { %15027 = vst [vmem:[#allocation135_spill] sm:$0xff] %v8185_v46  ;;  %1748 = vrot.lane.b32.xlu1 %v7603_v1, %s7047_s16  ;;  %15028 = vst [vmem:[#allocation136_spill] sm:$0xff] %v8189_v16  ;;  %1936 = vperm.xlu0 %6313, %v7634_v9  }
 0x2f6   : > { %v8192_v24 = vpop.permute.xlu1 %1389  ;;  %v8196_v14 = vpop.permute.xlu0 %1529 }
 0x2f7   : > { %15029 = vst [vmem:[#allocation137_spill] sm:$0xff] %v8192_v24  ;;  %1752 = vrot.lane.b32.xlu1 %v7622_v6, %s7047_s16  ;;  %15030 = vst [vmem:[#allocation138_spill] sm:$0xff] %v8196_v14  ;;  %1963 = vrot.lane.b32.xlu0 %v7606_v2, %s7053_s13 }
 0x2f8   : > { %6314 = vset.pattern.permute.xlu0 %v14328_v35 }
 0x2fa   : > { %v8201_v46 = vpop.permute.xlu1 %1393  ;;  %v8205_v16 = vpop.permute.xlu0 %1533 }
 0x2fb   : > { %15031 = vst [vmem:[#allocation139_spill] sm:$0xff] %v8201_v46  ;;  %1756 = vrot.lane.b32.xlu1 %v7628_v8, %s7047_s16  ;;  %15032 = vst [vmem:[#allocation140_spill] sm:$0xff] %v8205_v16  ;;  %1967 = vrot.lane.b32.xlu0 %v7603_v1, %s7053_s13  ;;  %s7063_s16 = smov 1  }
 0x2fe   : > { %v8209_v24 = vpop.permute.xlu1 %1425  ;;  %v8212_v14 = vpop.permute.xlu0 %1537 }
 0x2ff   : > { %15033 = vst [vmem:[#allocation141_spill] sm:$0xff] %v8209_v24  ;;  %1786 = vperm.xlu1 %6308, %v7636_v10   ;;  %15034 = vst [vmem:[#allocation142_spill] sm:$0xff] %v8212_v14  ;;  %1971 = vrot.lane.b32.xlu0 %v7622_v6, %s7053_s13 }
 0x302   : > { %v8216_v35 = vpop.permute.xlu1 %1429  ;;  %v8219_v46 = vpop.permute.xlu0 %1567 }
 0x303   : > { %15035 = vst [vmem:[#allocation143_spill] sm:$0xff] %v8216_v35  ;;  %1794 = vperm.xlu1 %6308, %v7640_v11   ;;  %15036 = vst [vmem:[#allocation144_spill] sm:$0xff] %v8219_v46  ;;  %1975 = vrot.lane.b32.xlu0 %v7628_v8, %s7053_s13 }
 0x306   : > { %v8223_v16 = vpop.permute.xlu1 %1452  ;;  %v8226_v24 = vpop.permute.xlu0 %1579 }
 0x307   : > { %15037 = vst [vmem:[#allocation145_spill] sm:$0xff] %v8223_v16  ;;  %1798 = vperm.xlu1 %6308, %v7642_v12   ;;  %15038 = vst [vmem:[#allocation146_spill] sm:$0xff] %v8226_v24  ;;  %2005 = vperm.xlu0 %6314, %v7636_v10   ;;  %v14341_v24 = vmov 19  }
 0x30a   : > { %v8229_v14 = vpop.permute.xlu1 %1456  ;;  %v8233_v35 = vpop.permute.xlu0 %1600 }
 0x30b   : > { %15039 = vst [vmem:[#allocation147_spill] sm:$0xff] %v8229_v14  ;;  %1819 = vrot.lane.b32.xlu1 %v7614_v4, %s7049_s19  ;;  %15040 = vst [vmem:[#allocation148_spill] sm:$0xff] %v8233_v35  ;;  %2017 = vperm.xlu0 %6314, %v7642_v12  }
 0x30c   : > { %6311 = vset.pattern.permute.xlu1 %v15041_v17 }
 0x30e   : > { %v8237_v46 = vpop.permute.xlu1 %1460  ;;  %v8241_v16 = vpop.permute.xlu0 %1604 }
 0x30f   : > { %15042 = vst [vmem:[#allocation149_spill] sm:$0xff] %v8237_v46  ;;  %1823 = vrot.lane.b32.xlu1 %v7611_v3, %s7049_s19  ;;  %15043 = vst [vmem:[#allocation150_spill] sm:$0xff] %v8241_v16  ;;  %2038 = vrot.lane.b32.xlu0 %v7614_v4, %s7055_s28 }
 0x310   : > { %6317 = vset.pattern.permute.xlu0 %v14341_v24 }
 0x312   : > { %v8246_v14 = vpop.permute.xlu1 %1464  ;;  %v8250_v17 = vpop.permute.xlu0 %1608 }
 0x313   : > { %15044 = vst [vmem:[#allocation151_spill] sm:$0xff] %v8246_v14  ;;  %1827 = vrot.lane.b32.xlu1 %v7619_v5, %s7049_s19  ;;  %15045 = vst [vmem:[#allocation152_spill] sm:$0xff] %v8250_v17  ;;  %2042 = vrot.lane.b32.xlu0 %v7611_v3, %s7055_s28 }
 0x316   : > { %v8254_v35 = vpop.permute.xlu1 %1494  ;;  %v8258_v16 = vpop.permute.xlu0 %1612 }
 0x317   : > { %15046 = vst [vmem:[#allocation153_spill] sm:$0xff] %v8254_v35  ;;  %1831 = vrot.lane.b32.xlu1 %v7625_v7, %s7049_s19  ;;  %15047 = vst [vmem:[#allocation154_spill] sm:$0xff] %v8258_v16  ;;  %2046 = vrot.lane.b32.xlu0 %v7619_v5, %s7055_s28  ;;  %v8474_v35 = vld [vmem:[#allocation6 + $0x8] sm:$0xff]  ;;  %s7066_s19 = smov 127  }
 0x31a   : > { %v8262_v24 = vpop.permute.xlu1 %1502  ;;  %v8265_v14 = vpop.permute.xlu0 %1644 }
 0x31b   : > { %15048 = vst [vmem:[#allocation155_spill] sm:$0xff] %v8262_v24  ;;  %1863 = vperm.xlu1 %6311, %v7634_v9   ;;  %15049 = vst [vmem:[#allocation156_spill] sm:$0xff] %v8265_v14  ;;  %2050 = vrot.lane.b32.xlu0 %v7625_v7, %s7055_s28  ;;  %v15054_v24 = vmov 17  }
 0x31e   : > { %v8269_v3 = vpop.permute.xlu1 %1506  ;;  %v8272_v17 = vpop.permute.xlu0 %1671 }
 0x31f   : > { %15050 = vst [vmem:[#allocation157_spill] sm:$0xff] %v8269_v3  ;;  %1867 = vperm.xlu1 %6311, %v7640_v11   ;;  %15051 = vst [vmem:[#allocation158_spill] sm:$0xff] %v8272_v17  ;;  %2082 = vperm.xlu0 %6317, %v7634_v9   ;;  %v14350_v3 = vmov 20  }
 0x322   : > { %v8275_v16 = vpop.permute.xlu1 %1527  ;;  %v8279_v5 = vpop.permute.xlu0 %1675 }
 0x323   : > { %15052 = vst [vmem:[#allocation159_spill] sm:$0xff] %v8275_v16  ;;  %1890 = vrot.lane.b32.xlu1 %v7606_v2, %s14562_s26  ;;  %15053 = vst [vmem:[#allocation160_spill] sm:$0xff] %v8279_v5  ;;  %2109 = vrot.lane.b32.xlu0 %v7606_v2, %s7057_s1 }
 0x324   : > { %6312 = vset.pattern.permute.xlu1 %v15054_v24  ;;  %6318 = vset.pattern.permute.xlu0 %v14350_v3 }
 0x326   : > { %v8285_v14 = vpop.permute.xlu1 %1531  ;;  %v8289_v17 = vpop.permute.xlu0 %1679 }
 0x327   : > { %15055 = vst [vmem:[#allocation161_spill] sm:$0xff] %v8285_v14  ;;  %1894 = vrot.lane.b32.xlu1 %v7603_v1, %s14562_s26  ;;  %15056 = vst [vmem:[#allocation162_spill] sm:$0xff] %v8289_v17  ;;  %2113 = vrot.lane.b32.xlu0 %v7603_v1, %s7057_s1  ;;  %v8432_v14 = vld [vmem:[#allocation6 + $0x18] sm:$0xff] }
 0x32a   : > { %v8293_v5 = vpop.permute.xlu1 %1535  ;;  %v8297_v24 = vpop.permute.xlu0 %1683 }
 0x32b   : > { %15057 = vst [vmem:[#allocation163_spill] sm:$0xff] %v8293_v5  ;;  %1898 = vrot.lane.b32.xlu1 %v7622_v6, %s14562_s26  ;;  %15058 = vst [vmem:[#allocation164_spill] sm:$0xff] %v8297_v24  ;;  %2117 = vrot.lane.b32.xlu0 %v7622_v6, %s7057_s1 }
 0x32e   : > { %v8301_v2 = vpop.permute.xlu1 %1539  ;;  %v8305_v3 = vpop.permute.xlu0 %1713 }
 0x32f   : > { %15059 = vst [vmem:[#allocation165_spill] sm:$0xff] %v8301_v2  ;;  %1902 = vrot.lane.b32.xlu1 %v7628_v8, %s14562_s26  ;;  %15060 = vst [vmem:[#allocation166_spill] sm:$0xff] %v8305_v3  ;;  %2121 = vrot.lane.b32.xlu0 %v7628_v8, %s7057_s1  ;;  %v15082_v2 = vmov 19   ;;  %s7093_s26 = smov 96  }
 0x332   : > { %v8309_v1 = vpop.permute.xlu1 %1571  ;;  %v8312_v17 = vpop.permute.xlu0 %1725 }
 0x333   : > { %15061 = vst [vmem:[#allocation167_spill] sm:$0xff] %v8309_v1  ;;  %1932 = vperm.xlu1 %6312, %v7636_v10   ;;  %15062 = vst [vmem:[#allocation168_spill] sm:$0xff] %v8312_v17  ;;  %2151 = vperm.xlu0 %6318, %v7636_v10   ;;  %v14358_v10 = vmov 21  }
 0x336   : > { %v8315_v6 = vpop.permute.xlu1 %1575  ;;  %v8318_v24 = vpop.permute.xlu0 %1746 }
 0x337   : > { %15063 = vst [vmem:[#allocation169_spill] sm:$0xff] %v8315_v6  ;;  %1940 = vperm.xlu1 %6312, %v7640_v11   ;;  %15064 = vst [vmem:[#allocation170_spill] sm:$0xff] %v8318_v24  ;;  %2163 = vperm.xlu0 %6318, %v7642_v12   ;;  %v8332_v6 = vld [vmem:[%s7568_s12 + $0x10] sm:$0xff] }
 0x33a   : > { %v8321_v3 = vpop.permute.xlu1 %1598  ;;  %v8324_v8 = vpop.permute.xlu0 %1750 }
 0x33b   : > { %15065 = vst [vmem:[#allocation171_spill] sm:$0xff] %v8321_v3  ;;  %1944 = vperm.xlu1 %6312, %v7642_v12   ;;  %15066 = vst [vmem:[#allocation172_spill] sm:$0xff] %v8324_v8  ;;  %2184 = vrot.lane.b32.xlu0 %v7614_v4, %s7059_s30  ;;  %v15069_v12 = vmov 18   ;;  %v8340_v8 = vld [vmem:[%s7568_s12 + $0x30] sm:$0xff]  ;;  %v8366_v3 = vld [vmem:[%s7568_s12 + $0x38] sm:$0xff] }
 0x33c   : > { %6321 = vset.pattern.permute.xlu0 %v14358_v10 }
 0x33e   : > { %v8329_v17 = vpop.permute.xlu1 %1602  ;;  %v8336_v24 = vpop.permute.xlu0 %1754 }
 0x33f   : > { %15067 = vst [vmem:[#allocation173_spill] sm:$0xff] %v8329_v17  ;;  %1965 = vrot.lane.b32.xlu1 %v8332_v6, %s7053_s13  ;;  %15068 = vst [vmem:[#allocation174_spill] sm:$0xff] %v8336_v24  ;;  %2188 = vrot.lane.b32.xlu0 %v8340_v8, %s7059_s30  ;;  %v8351_v17 = vld [vmem:[%s7568_s12 + $0x18] sm:$0xff] }
 0x340   : > { %6315 = vset.pattern.permute.xlu1 %v15069_v12 }
 0x342   : > { %v8344_v4 = vpop.permute.xlu1 %1606  ;;  %v8348_v10 = vpop.permute.xlu0 %1758 }
 0x343   : > { %15070 = vst [vmem:[#allocation175_spill] sm:$0xff] %v8344_v4  ;;  %1969 = vrot.lane.b32.xlu1 %v8340_v8, %s7053_s13  ;;  %15071 = vst [vmem:[#allocation176_spill] sm:$0xff] %v8348_v10  ;;  %2192 = vrot.lane.b32.xlu0 %v8351_v17, %s7059_s30 }
 0x346   : > { %v8355_v24 = vpop.permute.xlu1 %1610  ;;  %v8359_v12 = vpop.permute.xlu0 %1790 }
 0x347   : > { %15072 = vst [vmem:[#allocation177_spill] sm:$0xff] %v8355_v24  ;;  %1973 = vrot.lane.b32.xlu1 %v8351_v17, %s7053_s13  ;;  %15073 = vst [vmem:[#allocation178_spill] sm:$0xff] %v8359_v12  ;;  %2196 = vrot.lane.b32.xlu0 %v7625_v7, %s7059_s30  ;;  %v8379_v7 = vld [vmem:[%s7568_s12] sm:$0xff] }
 0x34a   : > { %v8363_v4 = vpop.permute.xlu1 %1640  ;;  %v8370_v10 = vpop.permute.xlu0 %1817 }
 0x34b   : > { %15074 = vst [vmem:[#allocation179_spill] sm:$0xff] %v8363_v4  ;;  %1977 = vrot.lane.b32.xlu1 %v8366_v3, %s7053_s13  ;;  %15075 = vst [vmem:[#allocation180_spill] sm:$0xff] %v8370_v10  ;;  %2228 = vperm.xlu0 %6321, %v7634_v9   ;;  %v14372_v4 = vmov 22   ;;  %s7068_s13 = smov 126  }
 0x34e   : > { %v8373_v24 = vpop.permute.xlu1 %1648  ;;  %v8376_v12 = vpop.permute.xlu0 %1821 }
 0x34f   : > { %15076 = vst [vmem:[#allocation181_spill] sm:$0xff] %v8373_v24  ;;  %2009 = vperm.xlu1 %6315, %v7634_v9   ;;  %15077 = vst [vmem:[#allocation182_spill] sm:$0xff] %v8376_v12  ;;  %2255 = vrot.lane.b32.xlu0 %v8379_v7, %s7061_s25  ;;  %v8390_v9 = vld [vmem:[%s7568_s12 + $0x20] sm:$0xff] }
 0x350   : > { %6322 = vset.pattern.permute.xlu0 %v14372_v4  ;;  %v8402_v4 = vld [vmem:[%s7568_s12 + $0x8] sm:$0xff] }
 0x352   : > { %v8384_v10 = vpop.permute.xlu1 %1652  ;;  %v8387_v24 = vpop.permute.xlu0 %1825 }
 0x353   : > { %15078 = vst [vmem:[#allocation183_spill] sm:$0xff] %v8384_v10  ;;  %2013 = vperm.xlu1 %6315, %v7640_v11   ;;  %15079 = vst [vmem:[#allocation184_spill] sm:$0xff] %v8387_v24  ;;  %2259 = vrot.lane.b32.xlu0 %v8390_v9, %s7061_s25  ;;  %v8423_v24 = vld [vmem:[#allocation6] sm:$0xff] }
 0x356   : > { %v8394_v12 = vpop.permute.xlu1 %1673  ;;  %v8398_v1 = vpop.permute.xlu0 %1829 }
 0x357   : > { %15080 = vst [vmem:[#allocation185_spill] sm:$0xff] %v8394_v12  ;;  %2036 = vrot.lane.b32.xlu1 %v8379_v7, %s7055_s28  ;;  %15081 = vst [vmem:[#allocation186_spill] sm:$0xff] %v8398_v1  ;;  %2263 = vrot.lane.b32.xlu0 %v8402_v4, %s7061_s25  ;;  %v8413_v12 = vld [vmem:[%s7568_s12 + $0x28] sm:$0xff] }
 0x358   : > { %6316 = vset.pattern.permute.xlu1 %v15082_v2 }
 0x35a   : > { %v8406_v11 = vpop.permute.xlu1 %1677  ;;  %v8410_v10 = vpop.permute.xlu0 %1859 }
 0x35b   : > { %15083 = vst [vmem:[#allocation187_spill] sm:$0xff] %v8406_v11  ;;  %2040 = vrot.lane.b32.xlu1 %v8390_v9, %s7055_s28  ;;  %15084 = vst [vmem:[#allocation188_spill] sm:$0xff] %v8410_v10  ;;  %2267 = vrot.lane.b32.xlu0 %v8413_v12, %s7061_s25 }
 0x35e   : > { %v8417_v1 = vpop.permute.xlu1 %1681  ;;  %v8421_v2 = vpop.permute.xlu0 %1871 }
 0x35f   : > { %15085 = vst [vmem:[#allocation189_spill] sm:$0xff] %v8417_v1  ;;  %2044 = vrot.lane.b32.xlu1 %v8402_v4, %s7055_s28  ;;  %15086 = vst [vmem:[#allocation190_spill] sm:$0xff] %v8421_v2  ;;  %2297 = vperm.xlu0 %6322, %v8423_v24  }
 0x362   : > { %v8426_v11 = vpop.permute.xlu1 %1685  ;;  %v8430_v10 = vpop.permute.xlu0 %1892 }
 0x363   : > { %15087 = vst [vmem:[#allocation191_spill] sm:$0xff] %v8426_v11  ;;  %2048 = vrot.lane.b32.xlu1 %v8413_v12, %s7055_s28  ;;  %15088 = vst [vmem:[#allocation192_spill] sm:$0xff] %v8430_v10  ;;  %2309 = vperm.xlu0 %6322, %v8432_v14   ;;  %v14388_v11 = vmov 23   ;;  %v8445_v10 = vld [vmem:[#allocation6 + $0x10] sm:$0xff]  ;;  %s7070_s28 = smov 125  }
 0x366   : > { %v8435_v1 = vpop.permute.xlu1 %1717  ;;  %v8438_v2 = vpop.permute.xlu0 %1896 }
 0x367   : > { %15089 = vst [vmem:[#allocation193_spill] sm:$0xff] %v8435_v1  ;;  %2078 = vperm.xlu1 %6316, %v8423_v24   ;;  %15090 = vst [vmem:[#allocation194_spill] sm:$0xff] %v8438_v2  ;;  %2330 = vrot.lane.b32.xlu0 %v8332_v6, %s7063_s16 }
 0x368   : > { %6325 = vset.pattern.permute.xlu0 %v14388_v11 }
 0x36a   : > { %v8443_v5 = vpop.permute.xlu1 %1721  ;;  %v8448_v16 = vpop.permute.xlu0 %1900 }
 0x36b   : > { %15091 = vst [vmem:[#allocation195_spill] sm:$0xff] %v8443_v5  ;;  %2086 = vperm.xlu1 %6316, %v8445_v10   ;;  %15092 = vst [vmem:[#allocation196_spill] sm:$0xff] %v8448_v16  ;;  %2334 = vrot.lane.b32.xlu0 %v8340_v8, %s7063_s16  ;;  %v15097_v16 = vmov 20  }
 0x36e   : > { %v8452_v1 = vpop.permute.xlu1 %1744  ;;  %v8455_v2 = vpop.permute.xlu0 %1904 }
 0x36f   : > { %15093 = vst [vmem:[#allocation197_spill] sm:$0xff] %v8452_v1  ;;  %2090 = vperm.xlu1 %6316, %v8432_v14   ;;  %15094 = vst [vmem:[#allocation198_spill] sm:$0xff] %v8455_v2  ;;  %2338 = vrot.lane.b32.xlu0 %v8351_v17, %s7063_s16 }
 0x372   : > { %v8459_v11 = vpop.permute.xlu1 %1748  ;;  %v8463_v5 = vpop.permute.xlu0 %1936 }
 0x373   : > { %15095 = vst [vmem:[#allocation199_spill] sm:$0xff] %v8459_v11  ;;  %2111 = vrot.lane.b32.xlu1 %v8332_v6, %s7057_s1  ;;  %15096 = vst [vmem:[#allocation200_spill] sm:$0xff] %v8463_v5  ;;  %2342 = vrot.lane.b32.xlu0 %v8366_v3, %s7063_s16  ;;  %v14400_v5 = vmov 24  }
 0x374   : > { %6319 = vset.pattern.permute.xlu1 %v15097_v16 }
 0x376   : > { %v8468_v1 = vpop.permute.xlu1 %1752  ;;  %v8472_v2 = vpop.permute.xlu0 %1963 }
 0x377   : > { %15098 = vst [vmem:[#allocation201_spill] sm:$0xff] %v8468_v1  ;;  %2115 = vrot.lane.b32.xlu1 %v8340_v8, %s7057_s1  ;;  %15099 = vst [vmem:[#allocation202_spill] sm:$0xff] %v8472_v2  ;;  %2374 = vperm.xlu0 %6325, %v8474_v35  }
 0x37a   : > { %v8477_v11 = vpop.permute.xlu1 %1756  ;;  %v8481_v16 = vpop.permute.xlu0 %1967 }
 0x37b   : > { %15100 = vst [vmem:[#allocation203_spill] sm:$0xff] %v8477_v11  ;;  %2119 = vrot.lane.b32.xlu1 %v8351_v17, %s7057_s1  ;;  %15101 = vst [vmem:[#allocation204_spill] sm:$0xff] %v8481_v16  ;;  %6326 = vset.pattern.permute.xlu0 %v14400_v5  ;;  %v14406_v16 = vmov 25  }
 0x37c   : > { %2418 = vperm.xlu0 %6326, %v8423_v24  }
 0x37e   : > { %v8485_v1 = vpop.permute.xlu1 %1786  ;;  %v8489_v2 = vpop.permute.xlu0 %1971 }
 0x37f   : > { %15102 = vst [vmem:[#allocation205_spill] sm:$0xff] %v8485_v1  ;;  %2123 = vrot.lane.b32.xlu1 %v8366_v3, %s7057_s1  ;;  %15103 = vst [vmem:[#allocation206_spill] sm:$0xff] %v8489_v2  ;;  %v15110_v1 = vmov 21   ;;  %s7072_s1 = smov 115  }
 0x380   : > { %2430 = vperm.xlu0 %6326, %v8432_v14  }
 0x382   : > { %v8492_v11 = vpop.permute.xlu1 %1794  ;;  %v8495_v46 = vpop.permute.xlu0 %1975 }
 0x383   : > { %15104 = vst [vmem:[#allocation207_spill] sm:$0xff] %v8492_v11  ;;  %2155 = vperm.xlu1 %6319, %v8474_v35   ;;  %15105 = vst [vmem:[#allocation208_spill] sm:$0xff] %v8495_v46 }
 0x384   : > { %2451 = vrot.lane.b32.xlu0 %v8332_v6, %s7066_s19 }
 0x385   : > { %6329 = vset.pattern.permute.xlu0 %v14406_v16 }
 0x386   : > { %v8499_v5 = vpop.permute.xlu1 %1798  ;;  %v8503_v2 = vpop.permute.xlu0 %2005 }
 0x387   : > { %15106 = vst [vmem:[#allocation209_spill] sm:$0xff] %v8499_v5  ;;  %2159 = vperm.xlu1 %6319, %v8445_v10   ;;  %15107 = vst [vmem:[#allocation210_spill] sm:$0xff] %v8503_v2 }
 0x388   : > { %2455 = vrot.lane.b32.xlu0 %v8340_v8, %s7066_s19 }
 0x38a   : > { %v8507_v11 = vpop.permute.xlu1 %1819  ;;  %v8511_v46 = vpop.permute.xlu0 %2017 }
 0x38b   : > { %15108 = vst [vmem:[#allocation211_spill] sm:$0xff] %v8507_v11  ;;  %2182 = vrot.lane.b32.xlu1 %v8379_v7, %s7059_s30  ;;  %15109 = vst [vmem:[#allocation212_spill] sm:$0xff] %v8511_v46 }
 0x38c   : > { %6320 = vset.pattern.permute.xlu1 %v15110_v1  ;;  %2459 = vrot.lane.b32.xlu0 %v8351_v17, %s7066_s19 }
 0x38e   : > { %v8516_v16 = vpop.permute.xlu1 %1823  ;;  %v8520_v2 = vpop.permute.xlu0 %2038 }
 0x38f   : > { %15111 = vst [vmem:[#allocation213_spill] sm:$0xff] %v8516_v16  ;;  %2186 = vrot.lane.b32.xlu1 %v8390_v9, %s7059_s30  ;;  %15112 = vst [vmem:[#allocation214_spill] sm:$0xff] %v8520_v2 }
 0x390   : > { %2463 = vrot.lane.b32.xlu0 %v8366_v3, %s7066_s19 }
 0x392   : > { %v8524_v5 = vpop.permute.xlu1 %1827  ;;  %v8528_v46 = vpop.permute.xlu0 %2042 }
 0x393   : > { %15113 = vst [vmem:[#allocation215_spill] sm:$0xff] %v8524_v5  ;;  %2190 = vrot.lane.b32.xlu1 %v8402_v4, %s7059_s30  ;;  %15114 = vst [vmem:[#allocation216_spill] sm:$0xff] %v8528_v46  ;;  %v14417_v5 = vmov 26  }
 0x394   : > { %2495 = vperm.xlu0 %6329, %v8474_v35  }
 0x396   : > { %v8531_v1 = vpop.permute.xlu1 %1831  ;;  %v8535_v11 = vpop.permute.xlu0 %2046 }
 0x397   : > { %15115 = vst [vmem:[#allocation217_spill] sm:$0xff] %v8531_v1  ;;  %2194 = vrot.lane.b32.xlu1 %v8413_v12, %s7059_s30  ;;  %15116 = vst [vmem:[#allocation218_spill] sm:$0xff] %v8535_v11  ;;  %s7074_s30 = smov 114  }
 0x398   : > { %2522 = vrot.lane.b32.xlu0 %v8379_v7, %s7068_s13 }
 0x399   : > { %6330 = vset.pattern.permute.xlu0 %v14417_v5 }
 0x39a   : > { %v8539_v2 = vpop.permute.xlu1 %1863  ;;  %v8543_v46 = vpop.permute.xlu0 %2050 }
 0x39b   : > { %15117 = vst [vmem:[#allocation219_spill] sm:$0xff] %v8539_v2  ;;  %2224 = vperm.xlu1 %6320, %v8423_v24   ;;  %15118 = vst [vmem:[#allocation220_spill] sm:$0xff] %v8543_v46 }
 0x39c   : > { %2526 = vrot.lane.b32.xlu0 %v8390_v9, %s7068_s13 }
 0x39e   : > { %v8547_v1 = vpop.permute.xlu1 %1867  ;;  %v8550_v11 = vpop.permute.xlu0 %2082 }
 0x39f   : > { %15119 = vst [vmem:[#allocation221_spill] sm:$0xff] %v8547_v1  ;;  %2232 = vperm.xlu1 %6320, %v8445_v10   ;;  %15120 = vst [vmem:[#allocation222_spill] sm:$0xff] %v8550_v11  ;;  %v15125_v11 = vmov 22  }
 0x3a0   : > { %2530 = vrot.lane.b32.xlu0 %v8402_v4, %s7068_s13 }
 0x3a2   : > { %v8554_v2 = vpop.permute.xlu1 %1890  ;;  %v8557_v5 = vpop.permute.xlu0 %2109 }
 0x3a3   : > { %15121 = vst [vmem:[#allocation223_spill] sm:$0xff] %v8554_v2  ;;  %2236 = vperm.xlu1 %6320, %v8432_v14   ;;  %15122 = vst [vmem:[#allocation224_spill] sm:$0xff] %v8557_v5 }
 0x3a4   : > { %2534 = vrot.lane.b32.xlu0 %v8413_v12, %s7068_s13 }
 0x3a6   : > { %v8561_v46 = vpop.permute.xlu1 %1894  ;;  %v8565_v1 = vpop.permute.xlu0 %2113 }
 0x3a7   : > { %15123 = vst [vmem:[#allocation225_spill] sm:$0xff] %v8561_v46  ;;  %2257 = vrot.lane.b32.xlu1 %v8332_v6, %s7061_s25  ;;  %15124 = vst [vmem:[#allocation226_spill] sm:$0xff] %v8565_v1  ;;  %v14430_v1 = vmov 27  }
 0x3a8   : > { %6323 = vset.pattern.permute.xlu1 %v15125_v11  ;;  %2564 = vperm.xlu0 %6330, %v8423_v24  }
 0x3aa   : > { %v8569_v16 = vpop.permute.xlu1 %1898  ;;  %v8573_v5 = vpop.permute.xlu0 %2117 }
 0x3ab   : > { %15126 = vst [vmem:[#allocation227_spill] sm:$0xff] %v8569_v16  ;;  %2261 = vrot.lane.b32.xlu1 %v8340_v8, %s7061_s25  ;;  %15127 = vst [vmem:[#allocation228_spill] sm:$0xff] %v8573_v5 }
 0x3ac   : > { %2576 = vperm.xlu0 %6330, %v8432_v14  }
 0x3ae   : > { %v8576_v2 = vpop.permute.xlu1 %1902  ;;  %v8580_v46 = vpop.permute.xlu0 %2121 }
 0x3af   : > { %15128 = vst [vmem:[#allocation229_spill] sm:$0xff] %v8576_v2  ;;  %2265 = vrot.lane.b32.xlu1 %v8351_v17, %s7061_s25  ;;  %15129 = vst [vmem:[#allocation230_spill] sm:$0xff] %v8580_v46 }
 0x3b0   : > { %2597 = vrot.lane.b32.xlu0 %v8332_v6, %s7070_s28 }
 0x3b1   : > { %6333 = vset.pattern.permute.xlu0 %v14430_v1 }
 0x3b2   : > { %v8584_v11 = vpop.permute.xlu1 %1932  ;;  %v8589_v5 = vpop.permute.xlu0 %2151 }
 0x3b3   : > { %15130 = vst [vmem:[#allocation231_spill] sm:$0xff] %v8584_v11  ;;  %2269 = vrot.lane.b32.xlu1 %v8366_v3, %s7061_s25  ;;  %15131 = vst [vmem:[#allocation232_spill] sm:$0xff] %v8589_v5  ;;  %s7076_s25 = smov 113  }
 0x3b4   : > { %2601 = vrot.lane.b32.xlu0 %v8340_v8, %s7070_s28 }
 0x3b6   : > { %v8593_v2 = vpop.permute.xlu1 %1940  ;;  %v8596_v46 = vpop.permute.xlu0 %2163 }
 0x3b7   : > { %15132 = vst [vmem:[#allocation233_spill] sm:$0xff] %v8593_v2  ;;  %2301 = vperm.xlu1 %6323, %v8474_v35   ;;  %15133 = vst [vmem:[#allocation234_spill] sm:$0xff] %v8596_v46  ;;  %v15138_v46 = vmov 23  }
 0x3b8   : > { %2605 = vrot.lane.b32.xlu0 %v8351_v17, %s7070_s28 }
 0x3ba   : > { %v8600_v11 = vpop.permute.xlu1 %1944  ;;  %v8603_v1 = vpop.permute.xlu0 %2184 }
 0x3bb   : > { %15134 = vst [vmem:[#allocation235_spill] sm:$0xff] %v8600_v11  ;;  %2305 = vperm.xlu1 %6323, %v8445_v10   ;;  %15135 = vst [vmem:[#allocation236_spill] sm:$0xff] %v8603_v1 }
 0x3bc   : > { %2609 = vrot.lane.b32.xlu0 %v8366_v3, %s7070_s28 }
 0x3be   : > { %v8607_v5 = vpop.permute.xlu1 %1965  ;;  %v8611_v2 = vpop.permute.xlu0 %2188 }
 0x3bf   : > { %15136 = vst [vmem:[#allocation237_spill] sm:$0xff] %v8607_v5  ;;  %2328 = vrot.lane.b32.xlu1 %v8379_v7, %s7063_s16  ;;  %15137 = vst [vmem:[#allocation238_spill] sm:$0xff] %v8611_v2  ;;  %v14441_v5 = vmov 28  }
 0x3c0   : > { %6324 = vset.pattern.permute.xlu1 %v15138_v46  ;;  %2641 = vperm.xlu0 %6333, %v8474_v35  }
 0x3c2   : > { %v8615_v16 = vpop.permute.xlu1 %1969  ;;  %v8619_v1 = vpop.permute.xlu0 %2192 }
 0x3c3   : > { %15139 = vst [vmem:[#allocation239_spill] sm:$0xff] %v8615_v16  ;;  %2332 = vrot.lane.b32.xlu1 %v8390_v9, %s7063_s16  ;;  %15140 = vst [vmem:[#allocation240_spill] sm:$0xff] %v8619_v1 }
 0x3c4   : > { %2668 = vrot.lane.b32.xlu0 %v8379_v7, %s7072_s1 }
 0x3c5   : > { %6334 = vset.pattern.permute.xlu0 %v14441_v5 }
 0x3c6   : > { %v8623_v11 = vpop.permute.xlu1 %1973  ;;  %v8628_v46 = vpop.permute.xlu0 %2196 }
 0x3c7   : > { %15141 = vst [vmem:[#allocation241_spill] sm:$0xff] %v8623_v11  ;;  %2336 = vrot.lane.b32.xlu1 %v8402_v4, %s7063_s16  ;;  %15142 = vst [vmem:[#allocation242_spill] sm:$0xff] %v8628_v46  ;;  %v15152_v11 = vmov 24  }
 0x3c8   : > { %2672 = vrot.lane.b32.xlu0 %v8390_v9, %s7072_s1 }
 0x3ca   : > { %v8632_v2 = vpop.permute.xlu1 %1977  ;;  %v8636_v1 = vpop.permute.xlu0 %2228 }
 0x3cb   : > { %15143 = vst [vmem:[#allocation243_spill] sm:$0xff] %v8632_v2  ;;  %2340 = vrot.lane.b32.xlu1 %v8413_v12, %s7063_s16  ;;  %15144 = vst [vmem:[#allocation244_spill] sm:$0xff] %v8636_v1  ;;  %s7079_s16 = smov 112  }
 0x3cc   : > { %2676 = vrot.lane.b32.xlu0 %v8402_v4, %s7072_s1 }
 0x3ce   : > { %v8640_v16 = vpop.permute.xlu1 %2009  ;;  %v8643_v5 = vpop.permute.xlu0 %2255 }
 0x3cf   : > { %15145 = vst [vmem:[#allocation245_spill] sm:$0xff] %v8640_v16  ;;  %2370 = vperm.xlu1 %6324, %v8423_v24   ;;  %15146 = vst [vmem:[#allocation246_spill] sm:$0xff] %v8643_v5 }
 0x3d0   : > { %2680 = vrot.lane.b32.xlu0 %v8413_v12, %s7072_s1 }
 0x3d2   : > { %v8647_v46 = vpop.permute.xlu1 %2013  ;;  %v8650_v2 = vpop.permute.xlu0 %2259 }
 0x3d3   : > { %15147 = vst [vmem:[#allocation247_spill] sm:$0xff] %v8647_v46  ;;  %2378 = vperm.xlu1 %6324, %v8445_v10   ;;  %15148 = vst [vmem:[#allocation248_spill] sm:$0xff] %v8650_v2  ;;  %v14454_v46 = vmov 29  }
 0x3d4   : > { %2710 = vperm.xlu0 %6334, %v8423_v24  }
 0x3d6   : > { %v8653_v1 = vpop.permute.xlu1 %2036  ;;  %v8656_v16 = vpop.permute.xlu0 %2263 }
 0x3d7   : > { %15149 = vst [vmem:[#allocation249_spill] sm:$0xff] %v8653_v1  ;;  %2382 = vperm.xlu1 %6324, %v8432_v14   ;;  %15150 = vst [vmem:[#allocation250_spill] sm:$0xff] %v8656_v16 }
 0x3d8   : > { %2722 = vperm.xlu0 %6334, %v8432_v14  }
 0x3da   : > { %v8659_v5 = vpop.permute.xlu1 %2040  ;;  %v8662_v0 = vpop.permute.xlu0 %2267 }
 0x3db   : > { %15151 = vst [vmem:[#allocation251_spill] sm:$0xff] %v8659_v5  ;;  %6327 = vset.pattern.permute.xlu1 %v15152_v11  ;;  %15153 = vst [vmem:[#allocation252_spill] sm:$0xff] %v8662_v0  ;;  %v15158_v5 = vmov 25  }
 0x3dc   : > { %2422 = vperm.xlu1 %6327, %v8474_v35   ;;  %2743 = vrot.lane.b32.xlu0 %v8332_v6, %s7074_s30 }
 0x3dd   : > { %6337 = vset.pattern.permute.xlu0 %v14454_v46 }
 0x3de   : > { %v8667_v2 = vpop.permute.xlu1 %2044  ;;  %v8670_v16 = vpop.permute.xlu0 %2297 }
 0x3df   : > { %15154 = vst [vmem:[#allocation253_spill] sm:$0xff] %v8667_v2  ;;  %15155 = vst [vmem:[#allocation254_spill] sm:$0xff] %v8670_v16 }
 0x3e0   : > { %2426 = vperm.xlu1 %6327, %v8445_v10   ;;  %2747 = vrot.lane.b32.xlu0 %v8340_v8, %s7074_s30 }
 0x3e2   : > { %v8675_v11 = vpop.permute.xlu1 %2048  ;;  %v8677_v0 = vpop.permute.xlu0 %2309 }
 0x3e3   : > { %15156 = vst [vmem:[#allocation255_spill] sm:$0xff] %v8675_v11  ;;  %15157 = vst [vmem:[#allocation256_spill] sm:$0xff] %v8677_v0 }
 0x3e4   : > { %2449 = vrot.lane.b32.xlu1 %v8379_v7, %s7066_s19  ;;  %2751 = vrot.lane.b32.xlu0 %v8351_v17, %s7074_s30 }
 0x3e5   : > { %6328 = vset.pattern.permute.xlu1 %v15158_v5 }
 0x3e6   : > { %v8684_v46 = vpop.permute.xlu1 %2078  ;;  %v8686_v16 = vpop.permute.xlu0 %2330 }
 0x3e7   : > { %15159 = vst [vmem:[#allocation257_spill] sm:$0xff] %v8684_v46  ;;  %15160 = vst [vmem:[#allocation258_spill] sm:$0xff] %v8686_v16 }
 0x3e8   : > { %2453 = vrot.lane.b32.xlu1 %v8390_v9, %s7066_s19  ;;  %2755 = vrot.lane.b32.xlu0 %v8366_v3, %s7074_s30 }
 0x3ea   : > { %v8692_v11 = vpop.permute.xlu1 %2086  ;;  %v8694_v0 = vpop.permute.xlu0 %2334 }
 0x3eb   : > { %15161 = vst [vmem:[#allocation259_spill] sm:$0xff] %v8692_v11  ;;  %15162 = vst [vmem:[#allocation260_spill] sm:$0xff] %v8694_v0  ;;  %v14465_v11 = vmov 30  }
 0x3ec   : > { %2457 = vrot.lane.b32.xlu1 %v8402_v4, %s7066_s19  ;;  %2787 = vperm.xlu0 %6337, %v8474_v35  }
 0x3ee   : > { %v8699_v5 = vpop.permute.xlu1 %2090  ;;  %v8701_v46 = vpop.permute.xlu0 %2338 }
 0x3ef   : > { %15163 = vst [vmem:[#allocation261_spill] sm:$0xff] %v8699_v5  ;;  %15164 = vst [vmem:[#allocation262_spill] sm:$0xff] %v8701_v46 }
 0x3f0   : > { %2461 = vrot.lane.b32.xlu1 %v8413_v12, %s7066_s19  ;;  %2814 = vrot.lane.b32.xlu0 %v8379_v7, %s7076_s25  ;;  %s7081_s19 = smov 111  }
 0x3f1   : > { %6338 = vset.pattern.permute.xlu0 %v14465_v11 }
 0x3f2   : > { %v8707_v16 = vpop.permute.xlu1 %2111  ;;  %v8710_v0 = vpop.permute.xlu0 %2342 }
 0x3f3   : > { %15165 = vst [vmem:[#allocation263_spill] sm:$0xff] %v8707_v16  ;;  %15166 = vst [vmem:[#allocation264_spill] sm:$0xff] %v8710_v0 }
 0x3f4   : > { %2491 = vperm.xlu1 %6328, %v8423_v24   ;;  %2818 = vrot.lane.b32.xlu0 %v8390_v9, %s7076_s25 }
 0x3f6   : > { %v8715_v5 = vpop.permute.xlu1 %2115  ;;  %v8718_v46 = vpop.permute.xlu0 %2374 }
 0x3f7   : > { %15167 = vst [vmem:[#allocation265_spill] sm:$0xff] %v8715_v5  ;;  %15168 = vst [vmem:[#allocation266_spill] sm:$0xff] %v8718_v46  ;;  %v15173_v46 = vmov 26  }
 0x3f8   : > { %2499 = vperm.xlu1 %6328, %v8445_v10   ;;  %2822 = vrot.lane.b32.xlu0 %v8402_v4, %s7076_s25 }
 0x3fa   : > { %v8722_v16 = vpop.permute.xlu1 %2119 }
 0x3fb   : > { %15169 = vst [vmem:[#allocation267_spill] sm:$0xff] %v8722_v16  ;;  %v8725_v11 = vpop.permute.xlu0 %2418  ;;  %v14477_v16 = vmov 31  }
 0x3fc   : > { %2503 = vperm.xlu1 %6328, %v8432_v14   ;;  %15170 = vst [vmem:[#allocation268_spill] sm:$0xff] %v8725_v11  ;;  %2826 = vrot.lane.b32.xlu0 %v8413_v12, %s7076_s25 }
 0x3fe   : > { %v8729_v0 = vpop.permute.xlu1 %2123 }
 0x3ff   : > { %15171 = vst [vmem:[#allocation269_spill] sm:$0xff] %v8729_v0  ;;  %v8733_v5 = vpop.permute.xlu0 %2430 }
 0x400   : > { %2524 = vrot.lane.b32.xlu1 %v8332_v6, %s7068_s13  ;;  %15172 = vst [vmem:[#allocation270_spill] sm:$0xff] %v8733_v5  ;;  %2856 = vperm.xlu0 %6338, %v8423_v24  }
 0x401   : > { %6331 = vset.pattern.permute.xlu1 %v15173_v46 }
 0x402   : > { %v8737_v2 = vpop.permute.xlu1 %2155 }
 0x403   : > { %15174 = vst [vmem:[#allocation271_spill] sm:$0xff] %v8737_v2  ;;  %v8741_v11 = vpop.permute.xlu0 %2451 }
 0x404   : > { %2528 = vrot.lane.b32.xlu1 %v8340_v8, %s7068_s13  ;;  %15175 = vst [vmem:[#allocation272_spill] sm:$0xff] %v8741_v11  ;;  %6340 = vset.pattern.permute.xlu0 %v14477_v16 }
 0x405   : > { %2929 = vperm.xlu0 %6340, %v8423_v24  }
 0x406   : > { %v8744_v0 = vpop.permute.xlu1 %2159 }
 0x407   : > { %15176 = vst [vmem:[#allocation273_spill] sm:$0xff] %v8744_v0  ;;  %v8749_v46 = vpop.permute.xlu0 %2455 }
 0x408   : > { %2532 = vrot.lane.b32.xlu1 %v8351_v17, %s7068_s13  ;;  %15177 = vst [vmem:[#allocation274_spill] sm:$0xff] %v8749_v46 }
 0x409   : > { %2937 = vperm.xlu0 %6340, %v8445_v10  }
 0x40a   : > { %v8751_v5 = vpop.permute.xlu1 %2182 }
 0x40b   : > { %15178 = vst [vmem:[#allocation275_spill] sm:$0xff] %v8751_v5  ;;  %v8756_v11 = vpop.permute.xlu0 %2459 }
 0x40c   : > { %2536 = vrot.lane.b32.xlu1 %v8366_v3, %s7068_s13  ;;  %15179 = vst [vmem:[#allocation276_spill] sm:$0xff] %v8756_v11  ;;  %v14486_v11 = vmov 32   ;;  %s7083_s13 = smov 110  }
 0x40d   : > { %2895 = vrot.lane.b32.xlu0 %v8402_v4, %s7079_s16 }
 0x40e   : > { %v8758_v2 = vpop.permute.xlu1 %2186 }
 0x40f   : > { %15180 = vst [vmem:[#allocation277_spill] sm:$0xff] %v8758_v2  ;;  %v8763_v16 = vpop.permute.xlu0 %2463 }
 0x410   : > { %2568 = vperm.xlu1 %6331, %v8474_v35   ;;  %15181 = vst [vmem:[#allocation278_spill] sm:$0xff] %v8763_v16  ;;  %v15186_v16 = vmov 27  }
 0x411   : > { %2941 = vperm.xlu0 %6340, %v8432_v14  }
 0x412   : > { %v8765_v46 = vpop.permute.xlu1 %2190 }
 0x413   : > { %15182 = vst [vmem:[#allocation279_spill] sm:$0xff] %v8765_v46  ;;  %v8769_v0 = vpop.permute.xlu0 %2495 }
 0x414   : > { %2572 = vperm.xlu1 %6331, %v8445_v10   ;;  %15183 = vst [vmem:[#allocation280_spill] sm:$0xff] %v8769_v0 }
 0x415   : > { %6344 = vset.pattern.permute.xlu0 %v14486_v11 }
 0x416   : > { %v8771_v5 = vpop.permute.xlu1 %2194  ;;  %3006 = vperm.xlu0 %6344, %v8474_v35  }
 0x417   : > { %15184 = vst [vmem:[#allocation281_spill] sm:$0xff] %v8771_v5  ;;  %v8777_v2 = vpop.permute.xlu0 %2522 }
 0x418   : > { %2595 = vrot.lane.b32.xlu1 %v8379_v7, %s7070_s28  ;;  %15185 = vst [vmem:[#allocation282_spill] sm:$0xff] %v8777_v2 }
 0x419   : > { %6332 = vset.pattern.permute.xlu1 %v15186_v16 }
 0x41a   : > { %v8780_v46 = vpop.permute.xlu1 %2224  ;;  %2960 = vrot.lane.b32.xlu0 %v8379_v7, %s7081_s19 }
 0x41b   : > { %15187 = vst [vmem:[#allocation283_spill] sm:$0xff] %v8780_v46  ;;  %v8786_v0 = vpop.permute.xlu0 %2526 }
 0x41c   : > { %2599 = vrot.lane.b32.xlu1 %v8390_v9, %s7070_s28  ;;  %15188 = vst [vmem:[#allocation284_spill] sm:$0xff] %v8786_v0 }
 0x41e   : > { %v8788_v11 = vpop.permute.xlu1 %2232  ;;  %2968 = vrot.lane.b32.xlu0 %v8402_v4, %s7081_s19 }
 0x41f   : > { %15189 = vst [vmem:[#allocation285_spill] sm:$0xff] %v8788_v11  ;;  %v8794_v16 = vpop.permute.xlu0 %2530  ;;  %v14495_v11 = vmov 33  }
 0x420   : > { %2603 = vrot.lane.b32.xlu1 %v8402_v4, %s7070_s28  ;;  %15190 = vst [vmem:[#allocation286_spill] sm:$0xff] %v8794_v16 }
 0x422   : > { %v8796_v2 = vpop.permute.xlu1 %2236  ;;  %3014 = vperm.xlu0 %6344, %v8432_v14  }
 0x423   : > { %15191 = vst [vmem:[#allocation287_spill] sm:$0xff] %v8796_v2  ;;  %v8801_v46 = vpop.permute.xlu0 %2534 }
 0x424   : > { %2607 = vrot.lane.b32.xlu1 %v8413_v12, %s7070_s28  ;;  %15192 = vst [vmem:[#allocation288_spill] sm:$0xff] %v8801_v46  ;;  %s7085_s28 = smov 109  }
 0x426   : > { %v8803_v0 = vpop.permute.xlu1 %2257  ;;  %6346 = vset.pattern.permute.xlu0 %v14495_v11 }
 0x427   : > { %15193 = vst [vmem:[#allocation289_spill] sm:$0xff] %v8803_v0  ;;  %v8807_v5 = vpop.permute.xlu0 %2564  ;;  %3079 = vperm.xlu0 %6346, %v8474_v35  }
 0x428   : > { %2637 = vperm.xlu1 %6332, %v8423_v24   ;;  %15194 = vst [vmem:[#allocation290_spill] sm:$0xff] %v8807_v5 }
 0x42a   : > { %v8810_v16 = vpop.permute.xlu1 %2261 }
 0x42b   : > { %15195 = vst [vmem:[#allocation291_spill] sm:$0xff] %v8810_v16  ;;  %v8813_v2 = vpop.permute.xlu0 %2576  ;;  %2964 = vrot.lane.b32.xlu0 %v8390_v9, %s7081_s19 }
 0x42c   : > { %2645 = vperm.xlu1 %6332, %v8445_v10   ;;  %15196 = vst [vmem:[#allocation292_spill] sm:$0xff] %v8813_v2  ;;  %v15201_v2 = vmov 28  }
 0x42e   : > { %v8817_v46 = vpop.permute.xlu1 %2265 }
 0x42f   : > { %15197 = vst [vmem:[#allocation293_spill] sm:$0xff] %v8817_v46  ;;  %v8820_v11 = vpop.permute.xlu0 %2597  ;;  %3033 = vrot.lane.b32.xlu0 %v8379_v7, %s7083_s13  ;;  %v14507_v46 = vmov 34  }
 0x430   : > { %2649 = vperm.xlu1 %6332, %v8432_v14   ;;  %15198 = vst [vmem:[#allocation294_spill] sm:$0xff] %v8820_v11 }
 0x432   : > { %v8824_v5 = vpop.permute.xlu1 %2269 }
 0x433   : > { %15199 = vst [vmem:[#allocation295_spill] sm:$0xff] %v8824_v5  ;;  %v8828_v16 = vpop.permute.xlu0 %2601  ;;  %3041 = vrot.lane.b32.xlu0 %v8402_v4, %s7083_s13 }
 0x434   : > { %2670 = vrot.lane.b32.xlu1 %v8332_v6, %s7072_s1  ;;  %15200 = vst [vmem:[#allocation296_spill] sm:$0xff] %v8828_v16 }
 0x435   : > { %6335 = vset.pattern.permute.xlu1 %v15201_v2 }
 0x436   : > { %v8833_v0 = vpop.permute.xlu1 %2301 }
 0x437   : > { %15202 = vst [vmem:[#allocation297_spill] sm:$0xff] %v8833_v0  ;;  %v8837_v11 = vpop.permute.xlu0 %2605  ;;  %3087 = vperm.xlu0 %6346, %v8432_v14  }
 0x438   : > { %2674 = vrot.lane.b32.xlu1 %v8340_v8, %s7072_s1  ;;  %15203 = vst [vmem:[#allocation298_spill] sm:$0xff] %v8837_v11 }
 0x43a   : > { %v8840_v5 = vpop.permute.xlu1 %2305 }
 0x43b   : > { %15204 = vst [vmem:[#allocation299_spill] sm:$0xff] %v8840_v5  ;;  %v8844_v16 = vpop.permute.xlu0 %2609  ;;  %6348 = vset.pattern.permute.xlu0 %v14507_v46 }
 0x43c   : > { %2678 = vrot.lane.b32.xlu1 %v8351_v17, %s7072_s1  ;;  %15205 = vst [vmem:[#allocation300_spill] sm:$0xff] %v8844_v16  ;;  %3152 = vperm.xlu0 %6348, %v8474_v35  }
 0x43e   : > { %v8848_v2 = vpop.permute.xlu1 %2328 }
 0x43f   : > { %15206 = vst [vmem:[#allocation301_spill] sm:$0xff] %v8848_v2  ;;  %v8852_v11 = vpop.permute.xlu0 %2641 }
 0x440   : > { %2682 = vrot.lane.b32.xlu1 %v8366_v3, %s7072_s1  ;;  %15207 = vst [vmem:[#allocation302_spill] sm:$0xff] %v8852_v11  ;;  %3037 = vrot.lane.b32.xlu0 %v8390_v9, %s7083_s13  ;;  %s7087_s1 = smov 99  }
 0x442   : > { %v8856_v5 = vpop.permute.xlu1 %2332 }
 0x443   : > { %15208 = vst [vmem:[#allocation303_spill] sm:$0xff] %v8856_v5  ;;  %v8859_v16 = vpop.permute.xlu0 %2668 }
 0x444   : > { %2714 = vperm.xlu1 %6335, %v8474_v35   ;;  %15209 = vst [vmem:[#allocation304_spill] sm:$0xff] %v8859_v16  ;;  %3106 = vrot.lane.b32.xlu0 %v8379_v7, %s7085_s28  ;;  %v15214_v16 = vmov 29  }
 0x446   : > { %v8863_v46 = vpop.permute.xlu1 %2336 }
 0x447   : > { %15210 = vst [vmem:[#allocation305_spill] sm:$0xff] %v8863_v46  ;;  %v8866_v2 = vpop.permute.xlu0 %2672  ;;  %v14518_v46 = vmov 35  }
 0x448   : > { %2718 = vperm.xlu1 %6335, %v8445_v10   ;;  %15211 = vst [vmem:[#allocation306_spill] sm:$0xff] %v8866_v2  ;;  %3114 = vrot.lane.b32.xlu0 %v8402_v4, %s7085_s28 }
 0x44a   : > { %v8870_v11 = vpop.permute.xlu1 %2340 }
 0x44b   : > { %15212 = vst [vmem:[#allocation307_spill] sm:$0xff] %v8870_v11  ;;  %v8874_v5 = vpop.permute.xlu0 %2676 }
 0x44c   : > { %2741 = vrot.lane.b32.xlu1 %v8379_v7, %s7074_s30  ;;  %15213 = vst [vmem:[#allocation308_spill] sm:$0xff] %v8874_v5  ;;  %3160 = vperm.xlu0 %6348, %v8432_v14  }
 0x44d   : > { %6336 = vset.pattern.permute.xlu1 %v15214_v16 }
 0x44e   : > { %v8878_v0 = vpop.permute.xlu1 %2370 }
 0x44f   : > { %15215 = vst [vmem:[#allocation309_spill] sm:$0xff] %v8878_v0  ;;  %v8882_v2 = vpop.permute.xlu0 %2680  ;;  %v14529_v0 = vmov 36  }
 0x450   : > { %2745 = vrot.lane.b32.xlu1 %v8390_v9, %s7074_s30  ;;  %15216 = vst [vmem:[#allocation310_spill] sm:$0xff] %v8882_v2  ;;  %6350 = vset.pattern.permute.xlu0 %v14518_v46 }
 0x451   : > { %3225 = vperm.xlu0 %6350, %v8474_v35  }
 0x452   : > { %v8885_v11 = vpop.permute.xlu1 %2378 }
 0x453   : > { %15217 = vst [vmem:[#allocation311_spill] sm:$0xff] %v8885_v11  ;;  %v8890_v16 = vpop.permute.xlu0 %2710 }
 0x454   : > { %2749 = vrot.lane.b32.xlu1 %v8402_v4, %s7074_s30  ;;  %15218 = vst [vmem:[#allocation312_spill] sm:$0xff] %v8890_v16 }
 0x455   : > { %3110 = vrot.lane.b32.xlu0 %v8390_v9, %s7085_s28 }
 0x456   : > { %v8892_v5 = vpop.permute.xlu1 %2382 }
 0x457   : > { %15219 = vst [vmem:[#allocation313_spill] sm:$0xff] %v8892_v5  ;;  %v8898_v2 = vpop.permute.xlu0 %2722 }
 0x458   : > { %2753 = vrot.lane.b32.xlu1 %v8413_v12, %s7074_s30  ;;  %15220 = vst [vmem:[#allocation314_spill] sm:$0xff] %v8898_v2  ;;  %s7089_s30 = smov 98  }
 0x459   : > { %3179 = vrot.lane.b32.xlu0 %v8379_v7, %s7087_s1 }
 0x45b   : > { %v8902_v46 = vpop.permute.xlu1 %2422  ;;  %v8905_v11 = vpop.permute.xlu0 %2743 }
 0x45c   : > { %15221 = vst [vmem:[#allocation315_spill] sm:$0xff] %v8902_v46  ;;  %2783 = vperm.xlu1 %6336, %v8423_v24   ;;  %15222 = vst [vmem:[#allocation316_spill] sm:$0xff] %v8905_v11 }
 0x45d   : > { %3187 = vrot.lane.b32.xlu0 %v8402_v4, %s7087_s1 }
 0x45f   : > { %v8909_v16 = vpop.permute.xlu1 %2426  ;;  %v8912_v5 = vpop.permute.xlu0 %2747 }
 0x460   : > { %15223 = vst [vmem:[#allocation317_spill] sm:$0xff] %v8909_v16  ;;  %2791 = vperm.xlu1 %6336, %v8445_v10   ;;  %15224 = vst [vmem:[#allocation318_spill] sm:$0xff] %v8912_v5  ;;  %v15229_v5 = vmov 30  }
 0x461   : > { %3233 = vperm.xlu0 %6350, %v8432_v14  }
 0x463   : > { %v8915_v2 = vpop.permute.xlu1 %2449  ;;  %v8918_v46 = vpop.permute.xlu0 %2751 }
 0x464   : > { %15225 = vst [vmem:[#allocation319_spill] sm:$0xff] %v8915_v2  ;;  %2795 = vperm.xlu1 %6336, %v8432_v14   ;;  %15226 = vst [vmem:[#allocation320_spill] sm:$0xff] %v8918_v46 }
 0x465   : > { %6352 = vset.pattern.permute.xlu0 %v14529_v0 }
 0x466   : > { %3298 = vperm.xlu0 %6352, %v8474_v35  }
 0x467   : > { %v8921_v11 = vpop.permute.xlu1 %2453  ;;  %v8926_v16 = vpop.permute.xlu0 %2755 }
 0x468   : > { %15227 = vst [vmem:[#allocation321_spill] sm:$0xff] %v8921_v11  ;;  %2816 = vrot.lane.b32.xlu1 %v8332_v6, %s7076_s25  ;;  %15228 = vst [vmem:[#allocation322_spill] sm:$0xff] %v8926_v16 }
 0x469   : > { %6339 = vset.pattern.permute.xlu1 %v15229_v5 }
 0x46a   : > { %3183 = vrot.lane.b32.xlu0 %v8390_v9, %s7087_s1 }
 0x46b   : > { %v8929_v1 = vpop.permute.xlu1 %2457  ;;  %v8935_v0 = vpop.permute.xlu0 %2787 }
 0x46c   : > { %15230 = vst [vmem:[#allocation323_spill] sm:$0xff] %v8929_v1  ;;  %2820 = vrot.lane.b32.xlu1 %v8340_v8, %s7076_s25  ;;  %15231 = vst [vmem:[#allocation324_spill] sm:$0xff] %v8935_v0 }
 0x46e   : > { %3252 = vrot.lane.b32.xlu0 %v8379_v7, %s7089_s30 }
 0x46f   : > { %v8937_v11 = vpop.permute.xlu1 %2461  ;;  %v8941_v46 = vpop.permute.xlu0 %2814 }
 0x470   : > { %15232 = vst [vmem:[#allocation325_spill] sm:$0xff] %v8937_v11  ;;  %2824 = vrot.lane.b32.xlu1 %v8351_v17, %s7076_s25  ;;  %15233 = vst [vmem:[#allocation326_spill] sm:$0xff] %v8941_v46 }
 0x472   : > { %3260 = vrot.lane.b32.xlu0 %v8402_v4, %s7089_s30 }
 0x473   : > { %v8943_v16 = vpop.permute.xlu1 %2491  ;;  %v8947_v2 = vpop.permute.xlu0 %2818 }
 0x474   : > { %15234 = vst [vmem:[#allocation327_spill] sm:$0xff] %v8943_v16  ;;  %2828 = vrot.lane.b32.xlu1 %v8366_v3, %s7076_s25  ;;  %15235 = vst [vmem:[#allocation328_spill] sm:$0xff] %v8947_v2  ;;  %v15241_v16 = vmov 31   ;;  %s7091_s25 = smov 97  }
 0x476   : > { %3306 = vperm.xlu0 %6352, %v8432_v14  }
 0x477   : > { %v8951_v1 = vpop.permute.xlu1 %2499  ;;  %v8954_v0 = vpop.permute.xlu0 %2822 }
 0x478   : > { %15236 = vst [vmem:[#allocation329_spill] sm:$0xff] %v8951_v1  ;;  %2860 = vperm.xlu1 %6339, %v8474_v35   ;;  %15237 = vst [vmem:[#allocation330_spill] sm:$0xff] %v8954_v0  ;;  %v14546_v0 = vmov 37  }
 0x47a   : > { %6354 = vset.pattern.permute.xlu0 %v14546_v0 }
 0x47b   : > { %v8958_v46 = vpop.permute.xlu1 %2503  ;;  %v8961_v11 = vpop.permute.xlu0 %2826  ;;  %3371 = vperm.xlu0 %6354, %v8474_v35  }
 0x47c   : > { %15238 = vst [vmem:[#allocation331_spill] sm:$0xff] %v8958_v46  ;;  %2864 = vperm.xlu1 %6339, %v8445_v10   ;;  %15239 = vst [vmem:[#allocation332_spill] sm:$0xff] %v8961_v11 }
 0x47f   : > { %v8964_v2 = vpop.permute.xlu1 %2524  ;;  %v8968_v1 = vpop.permute.xlu0 %2856  ;;  %3256 = vrot.lane.b32.xlu0 %v8390_v9, %s7089_s30 }
 0x480   : > { %15240 = vst [vmem:[#allocation333_spill] sm:$0xff] %v8964_v2  ;;  %6341 = vset.pattern.permute.xlu1 %v15241_v16  ;;  %15242 = vst [vmem:[#allocation334_spill] sm:$0xff] %v8968_v1  ;;  %v15247_v1 = vmov 32  }
 0x481   : > { %2933 = vperm.xlu1 %6341, %v8474_v35  }
 0x483   : > { %v8972_v46 = vpop.permute.xlu1 %2528  ;;  %3325 = vrot.lane.b32.xlu0 %v8379_v7, %s7091_s25 }
 0x484   : > { %15243 = vst [vmem:[#allocation335_spill] sm:$0xff] %v8972_v46  ;;  %v8975_v11 = vpop.permute.xlu0 %2929 }
 0x485   : > { %6342 = vset.pattern.permute.xlu1 %v15229_v5  ;;  %15244 = vst [vmem:[#allocation336_spill] sm:$0xff] %v8975_v11 }
 0x486   : > { %2868 = vperm.xlu1 %6342, %v8432_v14  }
 0x487   : > { %v8980_v16 = vpop.permute.xlu1 %2532  ;;  %3333 = vrot.lane.b32.xlu0 %v8402_v4, %s7091_s25 }
 0x488   : > { %15245 = vst [vmem:[#allocation337_spill] sm:$0xff] %v8980_v16  ;;  %v8982_v2 = vpop.permute.xlu0 %2937 }
 0x489   : > { %15246 = vst [vmem:[#allocation338_spill] sm:$0xff] %v8982_v2 }
 0x48a   : > { %6343 = vset.pattern.permute.xlu1 %v15247_v1 }
 0x48b   : > { %3002 = vperm.xlu1 %6343, %v8423_v24   ;;  %v8986_v0 = vpop.permute.xlu1 %2536  ;;  %3379 = vperm.xlu0 %6354, %v8432_v14  }
 0x48c   : > { %15248 = vst [vmem:[#allocation339_spill] sm:$0xff] %v8986_v0  ;;  %v8988_v46 = vpop.permute.xlu0 %2895 }
 0x48d   : > { %15249 = vst [vmem:[#allocation340_spill] sm:$0xff] %v8988_v46 }
 0x48f   : > { %2887 = vrot.lane.b32.xlu1 %v8379_v7, %s7079_s16  ;;  %v8992_v5 = vpop.permute.xlu1 %2568 }
 0x490   : > { %15250 = vst [vmem:[#allocation341_spill] sm:$0xff] %v8992_v5  ;;  %v8994_v11 = vpop.permute.xlu0 %2941 }
 0x491   : > { %15251 = vst [vmem:[#allocation342_spill] sm:$0xff] %v8994_v11 }
 0x493   : > { %2889 = vrot.lane.b32.xlu1 %v8332_v6, %s7079_s16  ;;  %v9000_v1 = vpop.permute.xlu1 %2572 }
 0x494   : > { %15252 = vst [vmem:[#allocation343_spill] sm:$0xff] %v9000_v1  ;;  %v14560_v1 = vmov 38  }
 0x495   : > { %v9002_v2 = vpop.permute.xlu0 %3006  ;;  %6356 = vset.pattern.permute.xlu0 %v14560_v1 }
 0x496   : > { %15253 = vst [vmem:[#allocation344_spill] sm:$0xff] %v9002_v2  ;;  %v15258_v2 = vmov 33   ;;  %3444 = vperm.xlu0 %6356, %v8474_v35  }
 0x497   : > { %2897 = vrot.lane.b32.xlu1 %v8351_v17, %s7079_s16  ;;  %v9008_v46 = vpop.permute.xlu1 %2595 }
 0x498   : > { %15254 = vst [vmem:[#allocation345_spill] sm:$0xff] %v9008_v46 }
 0x499   : > { %v9010_v11 = vpop.permute.xlu0 %2960 }
 0x49a   : > { %15255 = vst [vmem:[#allocation346_spill] sm:$0xff] %v9010_v11  ;;  %3329 = vrot.lane.b32.xlu0 %v8390_v9, %s7091_s25 }
 0x49b   : > { %3010 = vperm.xlu1 %6343, %v8445_v10   ;;  %v9014_v5 = vpop.permute.xlu1 %2599 }
 0x49c   : > { %15256 = vst [vmem:[#allocation347_spill] sm:$0xff] %v9014_v5 }
 0x49d   : > { %v9016_v0 = vpop.permute.xlu0 %2968 }
 0x49e   : > { %15257 = vst [vmem:[#allocation348_spill] sm:$0xff] %v9016_v0  ;;  %3398 = vrot.lane.b32.xlu0 %v8379_v7, %s7093_s26 }
 0x49f   : > { %6345 = vset.pattern.permute.xlu1 %v15258_v2  ;;  %v9020_v16 = vpop.permute.xlu1 %2603 }
 0x4a0   : > { %15259 = vst [vmem:[#allocation349_spill] sm:$0xff] %v9020_v16  ;;  %3075 = vperm.xlu1 %6345, %v8423_v24   ;;  %v14575_v16 = vmov 39  }
 0x4a1   : > { %v9024_v11 = vpop.permute.xlu0 %3014 }
 0x4a2   : > { %15260 = vst [vmem:[#allocation350_spill] sm:$0xff] %v9024_v11  ;;  %3406 = vrot.lane.b32.xlu0 %v8402_v4, %s7093_s26 }
 0x4a3   : > { %v9026_v46 = vpop.permute.xlu1 %2607 }
 0x4a4   : > { %15261 = vst [vmem:[#allocation351_spill] sm:$0xff] %v9026_v46  ;;  %2891 = vrot.lane.b32.xlu1 %v8390_v9, %s7079_s16 }
 0x4a6   : > { %v9034_v1 = vpop.permute.xlu0 %3079  ;;  %3452 = vperm.xlu0 %6356, %v8432_v14  }
 0x4a7   : > { %v9032_v0 = vpop.permute.xlu1 %2637  ;;  %15263 = vst [vmem:[#allocation353_spill] sm:$0xff] %v9034_v1 }
 0x4a8   : > { %15262 = vst [vmem:[#allocation352_spill] sm:$0xff] %v9032_v0  ;;  %2899 = vrot.lane.b32.xlu1 %v8413_v12, %s7079_s16 }
 0x4aa   : > { %v9040_v5 = vpop.permute.xlu0 %2964  ;;  %6358 = vset.pattern.permute.xlu0 %v14575_v16 }
 0x4ab   : > { %v9038_v2 = vpop.permute.xlu1 %2645  ;;  %15265 = vst [vmem:[#allocation355_spill] sm:$0xff] %v9040_v5  ;;  %3517 = vperm.xlu0 %6358, %v8474_v35  }
 0x4ac   : > { %15264 = vst [vmem:[#allocation354_spill] sm:$0xff] %v9038_v2  ;;  %2962 = vrot.lane.b32.xlu1 %v8332_v6, %s7081_s19 }
 0x4ae   : > { %v9048_v46 = vpop.permute.xlu0 %3033 }
 0x4af   : > { %v9046_v11 = vpop.permute.xlu1 %2649  ;;  %15267 = vst [vmem:[#allocation357_spill] sm:$0xff] %v9048_v46  ;;  %3402 = vrot.lane.b32.xlu0 %v8390_v9, %s7093_s26 }
 0x4b0   : > { %15266 = vst [vmem:[#allocation356_spill] sm:$0xff] %v9046_v11  ;;  %2970 = vrot.lane.b32.xlu1 %v8351_v17, %s7081_s19  ;;  %v15272_v11 = vmov 34  }
 0x4b2   : > { %v9056_v5 = vpop.permute.xlu0 %3041 }
 0x4b3   : > { %v9054_v1 = vpop.permute.xlu1 %2670  ;;  %15269 = vst [vmem:[#allocation359_spill] sm:$0xff] %v9056_v5  ;;  %3471 = vrot.lane.b32.xlu0 %v8379_v7, %s7095_s20 }
 0x4b4   : > { %15268 = vst [vmem:[#allocation358_spill] sm:$0xff] %v9054_v1  ;;  %3083 = vperm.xlu1 %6345, %v8445_v10  }
 0x4b6   : > { %v9062_v0 = vpop.permute.xlu0 %3087 }
 0x4b7   : > { %v9060_v2 = vpop.permute.xlu1 %2674  ;;  %15271 = vst [vmem:[#allocation361_spill] sm:$0xff] %v9062_v0  ;;  %3479 = vrot.lane.b32.xlu0 %v8402_v4, %s7095_s20 }
 0x4b8   : > { %15270 = vst [vmem:[#allocation360_spill] sm:$0xff] %v9060_v2  ;;  %6347 = vset.pattern.permute.xlu1 %v15272_v11 }
 0x4b9   : > { %3148 = vperm.xlu1 %6347, %v8423_v24  }
 0x4bb   : > { %v9066_v46 = vpop.permute.xlu1 %2678  ;;  %v9069_v1 = vpop.permute.xlu0 %3152  ;;  %3525 = vperm.xlu0 %6358, %v8432_v14  }
 0x4bc   : > { %15273 = vst [vmem:[#allocation362_spill] sm:$0xff] %v9066_v46  ;;  %15274 = vst [vmem:[#allocation363_spill] sm:$0xff] %v9069_v1 }
 0x4bd   : > { %2893 = vrot.lane.b32.xlu1 %v8340_v8, %s7079_s16 }
 0x4bf   : > { %v9074_v5 = vpop.permute.xlu1 %2682  ;;  %v9076_v2 = vpop.permute.xlu0 %3037 }
 0x4c0   : > { %15275 = vst [vmem:[#allocation364_spill] sm:$0xff] %v9074_v5  ;;  %15276 = vst [vmem:[#allocation365_spill] sm:$0xff] %v9076_v2 }
 0x4c1   : > { %2901 = vrot.lane.b32.xlu1 %v8366_v3, %s7079_s16  ;;  %s7097_s16 = smov 94  }
 0x4c3   : > { %v9082_v11 = vpop.permute.xlu1 %2714  ;;  %v9084_v16 = vpop.permute.xlu0 %3106 }
 0x4c4   : > { %15277 = vst [vmem:[#allocation366_spill] sm:$0xff] %v9082_v11  ;;  %15278 = vst [vmem:[#allocation367_spill] sm:$0xff] %v9084_v16  ;;  %v15286_v11 = vmov 35  }
 0x4c5   : > { %2972 = vrot.lane.b32.xlu1 %v8413_v12, %s7081_s19 }
 0x4c7   : > { %v9088_v0 = vpop.permute.xlu1 %2718  ;;  %v9090_v1 = vpop.permute.xlu0 %3114 }
 0x4c8   : > { %15279 = vst [vmem:[#allocation368_spill] sm:$0xff] %v9088_v0  ;;  %15280 = vst [vmem:[#allocation369_spill] sm:$0xff] %v9090_v1 }
 0x4c9   : > { %3035 = vrot.lane.b32.xlu1 %v8332_v6, %s7083_s13 }
 0x4cb   : > { %v9094_v2 = vpop.permute.xlu1 %2741  ;;  %v9098_v5 = vpop.permute.xlu0 %3160 }
 0x4cc   : > { %15281 = vst [vmem:[#allocation370_spill] sm:$0xff] %v9094_v2  ;;  %15282 = vst [vmem:[#allocation371_spill] sm:$0xff] %v9098_v5 }
 0x4cd   : > { %3043 = vrot.lane.b32.xlu1 %v8351_v17, %s7083_s13 }
 0x4cf   : > { %v9102_v16 = vpop.permute.xlu1 %2745 }
 0x4d0   : > { %15283 = vst [vmem:[#allocation372_spill] sm:$0xff] %v9102_v16  ;;  %v9107_v1 = vpop.permute.xlu0 %3225  ;;  %v14590_v16 = vmov 40  }
 0x4d1   : > { %3156 = vperm.xlu1 %6347, %v8445_v10   ;;  %15284 = vst [vmem:[#allocation373_spill] sm:$0xff] %v9107_v1  ;;  %6360 = vset.pattern.permute.xlu0 %v14590_v16 }
 0x4d2   : > { %3590 = vperm.xlu0 %6360, %v8474_v35  }
 0x4d3   : > { %v9109_v0 = vpop.permute.xlu1 %2749 }
 0x4d4   : > { %15285 = vst [vmem:[#allocation374_spill] sm:$0xff] %v9109_v0  ;;  %v9116_v2 = vpop.permute.xlu0 %3110 }
 0x4d5   : > { %6349 = vset.pattern.permute.xlu1 %v15286_v11  ;;  %15288 = vst [vmem:[#allocation376_spill] sm:$0xff] %v9116_v2 }
 0x4d6   : > { %3221 = vperm.xlu1 %6349, %v8423_v24   ;;  %3475 = vrot.lane.b32.xlu0 %v8390_v9, %s7095_s20 }
 0x4d7   : > { %v9114_v5 = vpop.permute.xlu1 %2753 }
 0x4d8   : > { %15287 = vst [vmem:[#allocation375_spill] sm:$0xff] %v9114_v5  ;;  %v9124_v0 = vpop.permute.xlu0 %3179 }
 0x4d9   : > { %15290 = vst [vmem:[#allocation378_spill] sm:$0xff] %v9124_v0 }
 0x4da   : > { %2966 = vrot.lane.b32.xlu1 %v8340_v8, %s7081_s19  ;;  %3544 = vrot.lane.b32.xlu0 %v8379_v7, %s7097_s16 }
 0x4db   : > { %v9122_v1 = vpop.permute.xlu1 %2783 }
 0x4dc   : > { %15289 = vst [vmem:[#allocation377_spill] sm:$0xff] %v9122_v1  ;;  %v9136_v2 = vpop.permute.xlu0 %3187 }
 0x4dd   : > { %15293 = vst [vmem:[#allocation381_spill] sm:$0xff] %v9136_v2 }
 0x4de   : > { %2974 = vrot.lane.b32.xlu1 %v8366_v3, %s7081_s19  ;;  %3552 = vrot.lane.b32.xlu0 %v8402_v4, %s7097_s16  ;;  %s7099_s19 = smov 93  }
 0x4df   : > { %v9130_v11 = vpop.permute.xlu1 %2791 }
 0x4e0   : > { %15291 = vst [vmem:[#allocation379_spill] sm:$0xff] %v9130_v11  ;;  %v9142_v0 = vpop.permute.xlu0 %3233 }
 0x4e1   : > { %15295 = vst [vmem:[#allocation383_spill] sm:$0xff] %v9142_v0  ;;  %v15299_v0 = vmov 36  }
 0x4e2   : > { %3045 = vrot.lane.b32.xlu1 %v8413_v12, %s7083_s13  ;;  %3598 = vperm.xlu0 %6360, %v8432_v14  }
 0x4e3   : > { %v9134_v16 = vpop.permute.xlu1 %2795 }
 0x4e4   : > { %15292 = vst [vmem:[#allocation380_spill] sm:$0xff] %v9134_v16 }
 0x4e5   : > { %v9152_v16 = vpop.permute.xlu0 %3298 }
 0x4e6   : > { %3108 = vrot.lane.b32.xlu1 %v8332_v6, %s7085_s28  ;;  %15297 = vst [vmem:[#allocation385_spill] sm:$0xff] %v9152_v16 }
 0x4e7   : > { %v9140_v5 = vpop.permute.xlu1 %2816 }
 0x4e8   : > { %15294 = vst [vmem:[#allocation382_spill] sm:$0xff] %v9140_v5 }
 0x4e9   : > { %v9162_v1 = vpop.permute.xlu0 %3183 }
 0x4ea   : > { %3116 = vrot.lane.b32.xlu1 %v8351_v17, %s7085_s28  ;;  %15301 = vst [vmem:[#allocation388_spill] sm:$0xff] %v9162_v1 }
 0x4eb   : > { %v9148_v11 = vpop.permute.xlu1 %2820 }
 0x4ec   : > { %15296 = vst [vmem:[#allocation384_spill] sm:$0xff] %v9148_v11  ;;  %v14603_v11 = vmov 41  }
 0x4ed   : > { %6362 = vset.pattern.permute.xlu0 %v14603_v11 }
 0x4ee   : > { %3229 = vperm.xlu1 %6349, %v8445_v10   ;;  %3663 = vperm.xlu0 %6362, %v8474_v35  }
 0x4ef   : > { %v9155_v2 = vpop.permute.xlu1 %2824 }
 0x4f0   : > { %15298 = vst [vmem:[#allocation386_spill] sm:$0xff] %v9155_v2  ;;  %v9170_v2 = vpop.permute.xlu0 %3252 }
 0x4f1   : > { %15303 = vst [vmem:[#allocation390_spill] sm:$0xff] %v9170_v2 }
 0x4f2   : > { %6351 = vset.pattern.permute.xlu1 %v15299_v0  ;;  %3548 = vrot.lane.b32.xlu0 %v8390_v9, %s7097_s16 }
 0x4f3   : > { %3294 = vperm.xlu1 %6351, %v8423_v24   ;;  %v9160_v5 = vpop.permute.xlu1 %2828 }
 0x4f4   : > { %15300 = vst [vmem:[#allocation387_spill] sm:$0xff] %v9160_v5  ;;  %v9180_v11 = vpop.permute.xlu0 %3260  ;;  %v9257_v5 = vld [vmem:[#allocation9] sm:$0x7f] }
 0x4f5   : > { %15305 = vst [vmem:[#allocation392_spill] sm:$0xff] %v9180_v11 }
 0x4f6   : > { %3617 = vrot.lane.b32.xlu0 %v8379_v7, %s7099_s19 }
 0x4f7   : > { %3039 = vrot.lane.b32.xlu1 %v8340_v8, %s7083_s13  ;;  %v9167_v16 = vpop.permute.xlu1 %2860 }
 0x4f8   : > { %15302 = vst [vmem:[#allocation389_spill] sm:$0xff] %v9167_v16  ;;  %v9186_v1 = vpop.permute.xlu0 %3306 }
 0x4f9   : > { %15307 = vst [vmem:[#allocation394_spill] sm:$0xff] %v9186_v1  ;;  %v15312_v1 = vmov 37  }
 0x4fa   : > { %3625 = vrot.lane.b32.xlu0 %v8402_v4, %s7099_s19  ;;  %v9213_v4 = vld [vmem:[%s7568_s12 + $0x30] sm:$0xff] }
 0x4fb   : > { %3047 = vrot.lane.b32.xlu1 %v8366_v3, %s7083_s13  ;;  %v9174_v0 = vpop.permute.xlu1 %2864  ;;  %s7101_s13 = smov 83  }
 0x4fc   : > { %15304 = vst [vmem:[#allocation391_spill] sm:$0xff] %v9174_v0  ;;  %v9194_v3 = vpop.permute.xlu0 %3371  ;;  %v9239_v0 = vld [vmem:[%s7568_s12 + $0x10] sm:$0xff] }
 0x4fd   : > { %15309 = vst [vmem:[#allocation396_spill] sm:$0xff] %v9194_v3  ;;  %v14609_v3 = vmov 42  }
 0x4fe   : > { %3671 = vperm.xlu0 %6362, %v8432_v14  }
 0x4ff   : > { %3118 = vrot.lane.b32.xlu1 %v8413_v12, %s7085_s28 }
 0x500   : > { %v9182_v8 = vpop.permute.xlu1 %2933  ;;  %v9205_v7 = vpop.permute.xlu0 %3256 }
 0x501   : > { %15306 = vst [vmem:[#allocation393_spill] sm:$0xff] %v9182_v8  ;;  %15313 = vst [vmem:[#allocation399_spill] sm:$0xff] %v9205_v7 }
 0x502   : > { %6364 = vset.pattern.permute.xlu0 %v14609_v3  ;;  %v621_v3 = vlaneseq }
 0x503   : > { %3181 = vrot.lane.b32.xlu1 %v8332_v6, %s7087_s1  ;;  %3736 = vperm.xlu0 %6364, %v8474_v35  }
 0x504   : > { %v9217_v14 = vpop.permute.xlu0 %3325 }
 0x505   : > { %v9188_v16 = vpop.permute.xlu1 %2868  ;;  %15315 = vst [vmem:[#allocation401_spill] sm:$0xff] %v9217_v14 }
 0x506   : > { %15308 = vst [vmem:[#allocation395_spill] sm:$0xff] %v9188_v16 }
 0x507   : > { %3189 = vrot.lane.b32.xlu1 %v8351_v17, %s7087_s1  ;;  %3621 = vrot.lane.b32.xlu0 %v8390_v9, %s7099_s19  ;;  %v9243_v9 = vld [vmem:[#allocation11] sm:$0x7f] }
 0x508   : > { %v9230_v35 = vpop.permute.xlu0 %3333  ;;  %v784_v14 = vrot.slane %v9243_v9, 2  ;;  %v863_v11 = vrot.slane %v9243_v9, 3  ;;  %v9282_v58 = vmul.f32 %v9243_v9, %v9257_v5  ;;  %v942_v13 = vrot.slane %v9243_v9, 4 }
 0x509   : > { %15318 = vst [vmem:[#allocation404_spill] sm:$0xff] %v9230_v35  ;;  %v9264_v35 = vld [vmem:[%s7568_s12 + $0x18] sm:$0xff] }
 0x50a   : > { %v9198_v8 = vpop.permute.xlu1 %3002  ;;  %15323 = vst [vmem:[#allocation409_spill] sm:$0xff] %v9264_v35  ;;  %15326 = vst [vmem:[#allocation412_spill] sm:$0xff] %v9282_v58  ;;  %v9300_v60 = vmul.f32 %v784_v14, %v9257_v5  ;;  %v9317_v14 = vld [vmem:[#allocation6 + $0x18] sm:$0xff] }
 0x50b   : > { %15310 = vst [vmem:[#allocation397_spill] sm:$0xff] %v9198_v8  ;;  %3302 = vperm.xlu1 %6351, %v8445_v10   ;;  %15336 = vst [vmem:[#allocation422_spill] sm:$0xff] %v9317_v14 }
 0x50c   : > { %v9236_v16 = vpop.permute.xlu0 %3379  ;;  %15331 = vst [vmem:[#allocation417_spill] sm:$0xff] %v9300_v60 }
 0x50d   : > { %15320 = vst [vmem:[#allocation406_spill] sm:$0xff] %v9236_v16  ;;  %v705_v16 = vrot.slane %v9243_v9, 1 }
 0x50e   : > { %v9202_v6 = vpop.permute.xlu1 %2887 }
 0x50f   : > { %15311 = vst [vmem:[#allocation398_spill] sm:$0xff] %v9202_v6  ;;  %6353 = vset.pattern.permute.xlu1 %v15312_v1 }
 0x510   : > { %3367 = vperm.xlu1 %6353, %v8423_v24   ;;  %v9224_v24 = vld [vmem:[%s7568_s12 + $0x38] sm:$0xff] }
 0x512   : > { %v9208_v17 = vpop.permute.xlu1 %2889 }
 0x513   : > { %15314 = vst [vmem:[#allocation400_spill] sm:$0xff] %v9208_v17  ;;  %v9246_v17 = vld [vmem:[%s7568_s12] sm:$0xff] }
 0x514   : > { %3112 = vrot.lane.b32.xlu1 %v9213_v4, %s7085_s28  ;;  %3690 = vrot.lane.b32.xlu0 %v9246_v17, %s7101_s13 }
 0x515   : > { %v9270_v6 = vpop.permute.xlu0 %3444 }
 0x516   : > { %v9219_v10 = vpop.permute.xlu1 %2897  ;;  %15324 = vst [vmem:[#allocation410_spill] sm:$0xff] %v9270_v6 }
 0x517   : > { %15316 = vst [vmem:[#allocation402_spill] sm:$0xff] %v9219_v10 }
 0x518   : > { %3120 = vrot.lane.b32.xlu1 %v9224_v24, %s7085_s28  ;;  %3698 = vrot.lane.b32.xlu0 %v9276_v59, %s7101_s13  ;;  %s7103_s28 = smov 82  }
 0x51a   : > { %v9228_v1 = vpop.permute.xlu1 %3010 }
 0x51b   : > { %15317 = vst [vmem:[#allocation403_spill] sm:$0xff] %v9228_v1  ;;  %v9252_v1 = vshrl.u32 %v621_v3, 7 }
 0x51c   : > { %3191 = vrot.lane.b32.xlu1 %v8413_v12, %s7087_s1  ;;  %v9250_v12 = vld [vmem:[#allocation11 + $0x8] sm:$0x7f]  ;;  %3744 = vperm.xlu0 %6364, %v9317_v14  }
 0x51d   : > { %15321 = vst [vmem:[#allocation407_spill] sm:$0xff] %v9252_v1  ;;  %v706_v8 = vrot.slane %v9250_v12, 1  ;;  %v785_v2 = vrot.slane %v9250_v12, 2  ;;  %v864_v46 = vrot.slane %v9250_v12, 3  ;;  %v9289_v62 = vsub.s32 0, %v9252_v1 }
 0x51e   : > { %v943_v57 = vrot.slane %v9250_v12, 4 }
 0x51f   : > { %v9234_v7 = vpop.permute.xlu1 %3075  ;;  %v9339_v14 = vrot.slane %v9300_v60, %v9289_v62  ;;  %v1022_v60 = vrot.slane %v9250_v12, 5 }
 0x520   : > { %15319 = vst [vmem:[#allocation405_spill] sm:$0xff] %v9234_v7  ;;  %3254 = vrot.lane.b32.xlu1 %v9239_v0, %s7089_s30  ;;  %v9259_v7 = vld [vmem:[#allocation9 + $0x8] sm:$0x7f] }
 0x521   : > { %v9286_v63 = vmul.f32 %v9250_v12, %v9259_v7  ;;  %v9297_v15 = vmul.f32 %v706_v8, %v9259_v7  ;;  %v9308_v56 = vmul.f32 %v785_v2, %v9259_v7  ;;  %v9315_v8 = vmul.f32 %v864_v46, %v9259_v7  ;;  %v9331_v46 = vpop.permute.xlu0 %3329 }
 0x522   : > { %15338 = vst [vmem:[#allocation424_spill] sm:$0xff] %v9331_v46 }
 0x523   : > { %v9255_v10 = vpop.permute.xlu1 %2891  ;;  %15327 = vst [vmem:[#allocation413_spill] sm:$0xff] %v9286_v63  ;;  %15330 = vst [vmem:[#allocation416_spill] sm:$0xff] %v9297_v15  ;;  %v9335_v61 = vrot.slane %v9297_v15, %v9289_v62  ;;  %v1021_v15 = vrot.slane %v9243_v9, 5 }
 0x524   : > { %15322 = vst [vmem:[#allocation408_spill] sm:$0xff] %v9255_v10  ;;  %3262 = vrot.lane.b32.xlu1 %v9264_v35, %s7089_s30  ;;  %v9272_v10 = vand.u32 127, %v621_v3  ;;  %v9292_v3 = vmul.f32 %v705_v16, %v9257_v5  ;;  %15333 = vst [vmem:[#allocation419_spill] sm:$0xff] %v9308_v56  ;;  %v9311_v16 = vmul.f32 %v863_v11, %v9257_v5 }
 0x525   : > { %15335 = vst [vmem:[#allocation421_spill] sm:$0xff] %v9315_v8 }
 0x526   : > { %15328 = vst [vmem:[#allocation414_spill] sm:$0xff] %v9292_v3  ;;  %15334 = vst [vmem:[#allocation420_spill] sm:$0xff] %v9311_v16  ;;  %vm623_vm0 = vcmp.lt.s32.totalorder %v9272_v10, 51  ;;  %vm694_vm1 = vcmp.lt.s32.totalorder %v9272_v10, 50  ;;  %v9327_v2 = vrot.slane %v9292_v3, %v9289_v62  ;;  %v15341_v3 = vmov 38  }
 0x527   : > { %v9294_v6 = vpop.permute.xlu1 %2899  ;;  %v9354_v46 = vrot.slane %v9311_v16, %v9289_v62  ;;  %v624_v16 = vsel %vm623_vm0, %v7698_v19, %v7711_v23  ;;  %vm775_vm2 = vcmp.lt.s32.totalorder %v9272_v10, 49  ;;  %vm854_vm3 = vcmp.lt.s32.totalorder %v9272_v10, 48 }
 0x528   : > { %15329 = vst [vmem:[#allocation415_spill] sm:$0xff] %v9294_v6  ;;  %3375 = vperm.xlu1 %6353, %v9304_v55   ;;  %v637_v6 = vrot.slane %v9282_v58, %v9289_v62  ;;  %v641_v55 = vrot.slane %v9286_v63, %v9289_v62  ;;  %v9342_v63 = vmul.f32 %v942_v13, %v9257_v5  ;;  %vm933_vm4 = vcmp.lt.s32.totalorder %v9272_v10, 47 }
 0x529   : > { %v9345_v58 = vmul.f32 %v943_v57, %v9259_v7  ;;  %15342 = vst [vmem:[#allocation427_spill] sm:$0xff] %v9354_v46  ;;  %v625_v57 = vsel %vm623_vm0, %v7704_v21, %v7709_v22  ;;  %v629_v13 = vsel %vm623_vm0, %v7709_v22, %v7704_v21  ;;  %v1101_v46 = vrot.slane %v9250_v12, 6 }
 0x52a   : > { %15339 = vst [vmem:[#allocation425_spill] sm:$0xff] %v9342_v63  ;;  %v14669_v21 = vmov 43   ;;  %v627_v22 = vsel %vm623_vm0, %v7702_v20, %v7718_v25  ;;  %vm1012_vm5 = vcmp.lt.s32.totalorder %v9272_v10, 46  ;;  %vm1091_vm6 = vcmp.lt.s32.totalorder %v9272_v10, 45 }
 0x52b   : > { %v9329_v11 = vpop.permute.xlu1 %2962  ;;  %15340 = vst [vmem:[#allocation426_spill] sm:$0xff] %v9345_v58  ;;  %6366 = vset.pattern.permute.xlu0 %v14669_v21  ;;  %v626_v21 = vsel %vm623_vm0, %v7696_v18, %v7720_v26  ;;  %vm1170_vm7 = vcmp.lt.s32.totalorder %v9272_v10, 35  ;;  %vm1249_vm8 = vcmp.lt.s32.totalorder %v9272_v10, 34  ;;  %vm1322_vm9 = vcmp.lt.s32.totalorder %v9272_v10, 33 }
 0x52c   : > { %15337 = vst [vmem:[#allocation423_spill] sm:$0xff] %v9329_v11  ;;  %6355 = vset.pattern.permute.xlu1 %v15341_v3  ;;  %v9350_v11 = vrot.slane %v9308_v56, %v9289_v62  ;;  %v9371_v3 = vrot.slane %v9315_v8, %v9289_v62  ;;  %v628_v56 = vsel %vm623_vm0, %v7711_v23, %v7698_v19  ;;  %vm1395_vm10 = vcmp.lt.s32.totalorder %v9272_v10, 32 }
 0x52d   : > { %3440 = vperm.xlu1 %6355, %v9358_v54   ;;  %v1100_v54 = vrot.slane %v9243_v9, 6  ;;  %v631_v8 = vsel %vm623_vm0, %v7718_v25, %v7702_v20  ;;  %v9396_v19 = vrot.slane %v9342_v63, %v9289_v62  ;;  %v9400_v23 = vrot.slane %v9345_v58, %v9289_v62  ;;  %v9422_v63 = vpop.permute.xlu0 %3398 }
 0x52e   : > { %15344 = vst [vmem:[#allocation429_spill] sm:$0xff] %v9371_v3  ;;  %v630_v20 = vsel %vm623_vm0, %v7720_v26, %v7696_v18  ;;  %v9415_v25 = vmul.f32 %v1021_v15, %v9257_v5  ;;  %v9418_v58 = vmul.f32 %v1022_v60, %v9259_v7  ;;  %15351 = vst [vmem:[#allocation436_spill] sm:$0xff] %v9422_v63  ;;  %vm1468_vm11 = vcmp.lt.s32.totalorder %v9272_v10, 31 }
 0x52f   : > { %v9383_v59 = vpop.permute.xlu1 %2970  ;;  %15346 = vst [vmem:[#allocation431_spill] sm:$0xff] %v9396_v19  ;;  %15347 = vst [vmem:[#allocation432_spill] sm:$0xff] %v9400_v23  ;;  %v644_v23 = vmul.f32 %v637_v6, %v629_v13  ;;  %v645_v19 = vmul.f32 %v641_v55, %v625_v57  ;;  %v643_v3 = vmul.f32 %v641_v55, %v624_v16  ;;  %v9441_v16 = vld [vmem:[%s7568_s12 + $0x20] sm:$0xff]  ;;  %vm1541_vm12 = vcmp.lt.s32.totalorder %v9272_v10, 30 }
 0x530   : > { %15345 = vst [vmem:[#allocation430_spill] sm:$0xff] %v9383_v59  ;;  %v9402_v59 = vld [vmem:[#allocation6 + $0x8] sm:$0xff]  ;;  %15349 = vst [vmem:[#allocation434_spill] sm:$0xff] %v9415_v25  ;;  %v648_v52 = vmul.f32 %v637_v6, %v631_v8  ;;  %v649_v18 = vmul.f32 %v641_v55, %v627_v22  ;;  %v9425_v26 = vmul.f32 %v1100_v54, %v9257_v5  ;;  %vm1614_vm13 = vcmp.lt.s32.totalorder %v9272_v10, 29 }
 0x531   : > { %15348 = vst [vmem:[#allocation433_spill] sm:$0xff] %v9402_v59  ;;  %3809 = vperm.xlu0 %6366, %v9402_v59   ;;  %15350 = vst [vmem:[#allocation435_spill] sm:$0xff] %v9418_v58  ;;  %3185 = vrot.lane.b32.xlu1 %v9213_v4, %s7087_s1  ;;  %v642_v59 = vmul.f32 %v637_v6, %v628_v56  ;;  %v9428_v15 = vmul.f32 %v1101_v46, %v9259_v7  ;;  %vm1687_vm14 = vcmp.lt.s32.totalorder %v9272_v10, 19 }
 0x532   : > { %15352 = vst [vmem:[#allocation437_spill] sm:$0xff] %v9425_v26  ;;  %v646_v35 = vmul.f32 %v637_v6, %v630_v20  ;;  %v647_v51 = vmul.f32 %v641_v55, %v626_v21  ;;  %v695_v13 = vsel %vm694_vm1, %v7738_v31, %v7752_v36  ;;  %v699_v56 = vsel %vm694_vm1, %v7752_v36, %v7738_v31 }
 0x533   : > { %15353 = vst [vmem:[#allocation438_spill] sm:$0xff] %v9428_v15  ;;  %v9430_v60 = vpop.permute.xlu1 %3083  ;;  %v696_v54 = vsel %vm694_vm1, %v7740_v32, %v7754_v37  ;;  %v700_v55 = vsel %vm694_vm1, %v7754_v37, %v7740_v32  ;;  %v9455_v6 = vrot.slane %v9415_v25, %v9289_v62  ;;  %v9459_v31 = vrot.slane %v9418_v58, %v9289_v62 }
 0x534   : > { %15354 = vst [vmem:[#allocation439_spill] sm:$0xff] %v9430_v60  ;;  %v672_v36 = vmul.f32 %v7725_v27, %v644_v23  ;;  %v673_v8 = vmul.f32 %v7725_v27, %v645_v19  ;;  %v670_v46 = vmul.f32 %v7727_v28, %v642_v59  ;;  %v671_v32 = vmul.f32 %v7727_v28, %v643_v3  ;;  %v9477_v23 = vpop.permute.xlu0 %3406 }
 0x535   : > { %3694 = vrot.lane.b32.xlu0 %v9441_v16, %s7101_s13  ;;  %3193 = vrot.lane.b32.xlu1 %v9224_v24, %s7087_s1  ;;  %v719_v37 = vmul.f32 %v9327_v2, %v699_v56  ;;  %v720_v57 = vmul.f32 %v9335_v61, %v695_v13  ;;  %v9471_v21 = vrot.slane %v9425_v26, %v9289_v62  ;;  %v1179_v56 = vrot.slane %v9243_v9, 7  ;;  %s7105_s1 = smov 81  }
 0x536   : > { %v9475_v22 = vrot.slane %v9428_v15, %v9289_v62  ;;  %15355 = vst [vmem:[#allocation440_spill] sm:$0xff] %v9477_v23  ;;  %v721_v27 = vmul.f32 %v9327_v2, %v700_v55  ;;  %v722_v59 = vmul.f32 %v9335_v61, %v696_v54  ;;  %v697_v28 = vsel %vm694_vm1, %v7744_v33, %v7760_v38  ;;  %v9498_v54 = vld [vmem:[%s7568_s12 + $0x28] sm:$0xff]  ;;  %v15402_v23 = vld [vmem:[#allocation414_spill] sm:$0xff] }
 0x537   : > { %v701_v3 = vsel %vm694_vm1, %v7760_v38, %v7744_v33  ;;  %v674_v62 = vmul.f32 %v7732_v29, %v646_v35  ;;  %v675_v20 = vmul.f32 %v7732_v29, %v647_v51  ;;  %v9494_v13 = vmul.f32 %v7734_v30, %v648_v52 }
 0x538   : > { %v9489_v19 = vpop.permute.xlu1 %3148  ;;  %v702_v33 = vsel %vm694_vm1, %v7762_v39, %v7746_v34  ;;  %v743_v38 = vmul.f32 %v7768_v40, %v719_v37  ;;  %v744_v35 = vmul.f32 %v7768_v40, %v720_v57  ;;  %v1180_v29 = vrot.slane %v9250_v12, 7  ;;  %v9517_v60 = vpop.permute.xlu0 %3452 }
 0x539   : > { %15356 = vst [vmem:[#allocation441_spill] sm:$0xff] %v9489_v19  ;;  %3264 = vrot.lane.b32.xlu1 %v9498_v54, %s7089_s30  ;;  %v677_v51 = vmul.f32 %v7734_v30, %v649_v18  ;;  %v723_v52 = vmul.f32 %v9327_v2, %v701_v3  ;;  %v724_v9 = vmul.f32 %v9335_v61, %v697_v28  ;;  %15357 = vst [vmem:[#allocation442_spill] sm:$0xff] %v9517_v60 }
 0x53a   : > { %v698_v55 = vsel %vm694_vm1, %v7746_v34, %v7762_v39  ;;  %v745_v37 = vmul.f32 %v7770_v41, %v721_v27  ;;  %v746_v40 = vmul.f32 %v7770_v41, %v722_v59  ;;  %v776_v30 = vsel %vm775_vm2, %v7778_v43, %v7791_v48  ;;  %3763 = vrot.lane.b32.xlu0 %v9246_v17, %s7103_s28 }
 0x53b   : > { %v780_v12 = vsel %vm775_vm2, %v7791_v48, %v7778_v43  ;;  %v725_v34 = vmul.f32 %v9327_v2, %v702_v33  ;;  %v783_v39 = vsel %vm775_vm2, %v7813_v53, %v7797_v49  ;;  %v9537_v41 = vmul.f32 %v1179_v56, %v9257_v5 }
 0x53c   : > { %v9529_v18 = vpop.permute.xlu1 %2893  ;;  %v9540_v57 = vsub.s32 1, %v9252_v1  ;;  %v726_v43 = vmul.f32 %v9335_v61, %v698_v55  ;;  %v751_v48 = vadd.f32 %v743_v38, %v670_v46  ;;  %v752_v27 = vadd.f32 %v744_v35, %v671_v32 }
 0x53d   : > { %15358 = vst [vmem:[#allocation443_spill] sm:$0xff] %v9529_v18  ;;  %15359 = vst [vmem:[#allocation444_spill] sm:$0xff] %v9537_v41  ;;  %3327 = vrot.lane.b32.xlu1 %v9239_v0, %s7091_s25  ;;  %v9546_v2 = vmul.f32 %v1180_v29, %v9259_v7  ;;  %v747_v59 = vmul.f32 %v7776_v42, %v723_v52  ;;  %v798_v28 = vmul.f32 %v9339_v14, %v780_v12 }
 0x53e   : > { %v799_v5 = vmul.f32 %v9350_v11, %v776_v30  ;;  %v779_v3 = vsel %vm775_vm2, %v7797_v49, %v7813_v53  ;;  %v753_v61 = vadd.f32 %v745_v37, %v672_v36  ;;  %v754_v46 = vadd.f32 %v746_v40, %v673_v8  ;;  %v15362_v49 = vld [vmem:[#allocation34_spill] sm:$0xff]  ;;  %v9576_v8 = vpop.permute.xlu0 %3517  ;;  %v15365_v37 = vld [vmem:[#allocation35_spill] sm:$0xff] }
 0x53f   : > { %15360 = vst [vmem:[#allocation445_spill] sm:$0xff] %v9546_v2  ;;  %v748_v7 = vmul.f32 %v7776_v42, %v724_v9  ;;  %v804_v32 = vmul.f32 %v9339_v14, %v783_v39  ;;  %v749_v33 = vmul.f32 %v7782_v44, %v725_v34  ;;  %v782_v38 = vsel %vm775_vm2, %v7799_v50, %v7784_v45  ;;  %v15363_v42 = vld [vmem:[#allocation409_spill] sm:$0xff]  ;;  %v15367_v34 = vld [vmem:[#allocation36_spill] sm:$0xff] }
 0x540   : > { %v9559_v56 = vpop.permute.xlu1 %2901  ;;  %v781_v53 = vsel %vm775_vm2, %v15362_v49, %v7789_v47  ;;  %v9572_v36 = vrot.slane %v9537_v41, %v9540_v57  ;;  %15364 = vst [vmem:[#allocation34_spill] sm:$0xff] %v9576_v8  ;;  %v750_v35 = vmul.f32 %v7782_v44, %v726_v43  ;;  %v778_v29 = vsel %vm775_vm2, %v7784_v45, %v7799_v50  ;;  %v15366_v45 = vld [vmem:[#allocation411_spill] sm:$0xff]  ;;  %v15434_v41 = vld [vmem:[#allocation76_spill] sm:$0xff] }
 0x541   : > { %15361 = vst [vmem:[#allocation446_spill] sm:$0xff] %v9559_v56  ;;  %3335 = vrot.lane.b32.xlu1 %v15363_v42, %s7091_s25  ;;  %v777_v52 = vsel %vm775_vm2, %v7789_v47, %v15362_v49  ;;  %v805_v9 = vmul.f32 %v9350_v11, %v779_v3  ;;  %v755_v55 = vadd.f32 %v747_v59, %v674_v62  ;;  %v15372_v49 = vld [vmem:[#allocation37_spill] sm:$0xff]  ;;  %vm1760_vm15 = vcmp.lt.s32.totalorder %v9272_v10, 18 }
 0x542   : > { %v822_v40 = vmul.f32 %v15365_v37, %v798_v28  ;;  %v823_v30 = vmul.f32 %v15365_v37, %v799_v5  ;;  %v9593_v44 = vrot.slane %v9546_v2, %v9540_v57  ;;  %3771 = vrot.lane.b32.xlu0 %v15366_v45, %s7103_s28  ;;  %v756_v50 = vadd.f32 %v748_v7, %v675_v20  ;;  %v15369_v28 = vld [vmem:[#allocation42_spill] sm:$0xff]  ;;  %v15373_v37 = vld [vmem:[#allocation412_spill] sm:$0xff]  ;;  %v9621_v8 = vpop.permute.xlu0 %3402 }
 0x543   : > { %v802_v12 = vmul.f32 %v9339_v14, %v782_v38  ;;  %v800_v47 = vmul.f32 %v9339_v14, %v781_v53  ;;  %v828_v62 = vmul.f32 %v15367_v34, %v804_v32  ;;  %v803_v43 = vmul.f32 %v9350_v11, %v778_v29  ;;  %v15370_v5 = vld [vmem:[#allocation38_spill] sm:$0xff]  ;;  %15374 = vst [vmem:[#allocation35_spill] sm:$0xff] %v9621_v8  ;;  %v15384_v8 = vld [vmem:[#allocation47_spill] sm:$0xff] }
 0x544   : > { %v9600_v39 = vpop.permute.xlu1 %2972  ;;  %v801_v59 = vmul.f32 %v9350_v11, %v777_v52  ;;  %v856_v3 = vsel %vm854_vm3, %v15370_v5, %v15369_v28  ;;  %v860_v20 = vsel %vm854_vm3, %v15369_v28, %v15370_v5  ;;  %v15371_v7 = vld [vmem:[#allocation418_spill] sm:$0xff]  ;;  %v757_v14 = vadd.f32 %v749_v33, %v9494_v13  ;;  %v15376_v13 = vld [vmem:[#allocation427_spill] sm:$0xff]  ;;  %v15377_v33 = vld [vmem:[#allocation429_spill] sm:$0xff] }
 0x545   : > { %15368 = vst [vmem:[#allocation409_spill] sm:$0xff] %v9600_v39  ;;  %3448 = vperm.xlu1 %6355, %v15371_v7   ;;  %v758_v32 = vadd.f32 %v750_v35, %v677_v51  ;;  %v829_v38 = vmul.f32 %v15367_v34, %v805_v9  ;;  %v824_v53 = vmul.f32 %v15372_v49, %v800_v47  ;;  %v15375_v28 = vld [vmem:[#allocation422_spill] sm:$0xff]  ;;  %v15378_v9 = vld [vmem:[#allocation413_spill] sm:$0xff]  ;;  %vm1833_vm0 = vcmp.lt.s32.totalorder %v9272_v10, 17 }
 0x546   : > { %v830_v11 = vadd.f32 %v822_v40, %v751_v48  ;;  %v831_v29 = vadd.f32 %v823_v30, %v752_v27  ;;  %v825_v52 = vmul.f32 %v15372_v49, %v801_v59  ;;  %v9619_v60 = vrot.slane %v15373_v37, %v9540_v57  ;;  %3817 = vperm.xlu0 %6366, %v15375_v28   ;;  %v15380_v40 = vld [vmem:[#allocation39_spill] sm:$0xff]  ;;  %v15381_v34 = vld [vmem:[#allocation45_spill] sm:$0xff]  ;;  %v15403_v37 = vld [vmem:[#allocation416_spill] sm:$0xff] }
 0x547   : > { %v9624_v5 = vadd.f32 %v828_v62, %v757_v14  ;;  %v879_v51 = vmul.f32 %v15376_v13, %v860_v20  ;;  %v880_v35 = vmul.f32 %v15377_v33, %v856_v3  ;;  %v9630_v48 = vrot.slane %v15378_v9, %v9540_v57  ;;  %v15382_v59 = vld [vmem:[#allocation41_spill] sm:$0xff] }
 0x548   : > { %v9632_v27 = vpop.permute.xlu1 %3035  ;;  %v826_v30 = vmul.f32 %v15380_v40, %v802_v12  ;;  %v827_v47 = vmul.f32 %v15380_v40, %v803_v43  ;;  %v855_v62 = vsel %vm854_vm3, %v15382_v59, %v15381_v34  ;;  %v859_v3 = vsel %vm854_vm3, %v15381_v34, %v15382_v59  ;;  %v15386_v40 = vld [vmem:[#allocation428_spill] sm:$0xff] }
 0x549   : > { %15379 = vst [vmem:[#allocation411_spill] sm:$0xff] %v9632_v27  ;;  %v15383_v20 = vmov 39   ;;  %v9645_v14 = vadd.f32 %v829_v38, %v758_v32  ;;  %v832_v49 = vadd.f32 %v824_v53, %v753_v61  ;;  %v15385_v27 = vld [vmem:[#allocation43_spill] sm:$0xff]  ;;  %v833_v34 = vadd.f32 %v825_v52, %v754_v46  ;;  %v15387_v59 = vld [vmem:[#allocation44_spill] sm:$0xff] }
 0x54a   : > { %6357 = vset.pattern.permute.xlu1 %v15383_v20  ;;  %v857_v12 = vsel %vm854_vm3, %v15385_v27, %v15384_v8  ;;  %v861_v43 = vsel %vm854_vm3, %v15384_v8, %v15385_v27  ;;  %v15388_v20 = vld [vmem:[#allocation40_spill] sm:$0xff]  ;;  %v877_v38 = vmul.f32 %v15376_v13, %v859_v3  ;;  %v878_v53 = vmul.f32 %v15377_v33, %v855_v62  ;;  %v15389_v8 = vld [vmem:[#allocation46_spill] sm:$0xff]  ;;  %v15392_v3 = vld [vmem:[#allocation433_spill] sm:$0xff] }
 0x54b   : > { %3513 = vperm.xlu1 %6357, %v15386_v40   ;;  %v858_v61 = vsel %vm854_vm3, %v15388_v20, %v15387_v59  ;;  %v862_v32 = vsel %vm854_vm3, %v15387_v59, %v15388_v20  ;;  %v903_v27 = vmul.f32 %v15389_v8, %v879_v51  ;;  %v904_v39 = vmul.f32 %v15389_v8, %v880_v35  ;;  %v9674_v59 = vpop.permute.xlu0 %3471  ;;  %v15393_v62 = vld [vmem:[#allocation49_spill] sm:$0xff]  ;;  %v15394_v35 = vld [vmem:[#allocation52_spill] sm:$0xff] }
 0x54c   : > { %v9669_v18 = vpop.permute.xlu1 %3043  ;;  %v14694_v46 = vmov 44   ;;  %v834_v52 = vadd.f32 %v826_v30, %v755_v55  ;;  %v835_v56 = vadd.f32 %v827_v47, %v756_v50  ;;  %v881_v19 = vmul.f32 %v15376_v13, %v861_v43  ;;  %15391 = vst [vmem:[#allocation42_spill] sm:$0xff] %v9674_v59  ;;  %v15395_v8 = vld [vmem:[#allocation48_spill] sm:$0xff]  ;;  %v15396_v47 = vld [vmem:[#allocation61_spill] sm:$0xff] }
 0x54d   : > { %15390 = vst [vmem:[#allocation36_spill] sm:$0xff] %v9669_v18  ;;  %6368 = vset.pattern.permute.xlu0 %v14694_v46  ;;  %v882_v63 = vmul.f32 %v15377_v33, %v857_v12  ;;  %v901_v20 = vmul.f32 %v15393_v62, %v877_v38  ;;  %v902_v51 = vmul.f32 %v15393_v62, %v878_v53  ;;  %v15397_v12 = vld [vmem:[#allocation57_spill] sm:$0xff]  ;;  %vm1906_vm1 = vcmp.lt.s32.totalorder %v9272_v10, 16 }
 0x54e   : > { %3882 = vperm.xlu0 %6368, %v15392_v3   ;;  %v934_v18 = vsel %vm933_vm4, %v15395_v8, %v15394_v35  ;;  %v938_v55 = vsel %vm933_vm4, %v15394_v35, %v15395_v8  ;;  %v883_v50 = vmul.f32 %v15376_v13, %v862_v32  ;;  %v884_v30 = vmul.f32 %v15377_v33, %v858_v61  ;;  %v15398_v35 = vld [vmem:[#allocation51_spill] sm:$0xff]  ;;  %v15401_v61 = vld [vmem:[#allocation432_spill] sm:$0xff] }
 0x54f   : > { %3258 = vrot.lane.b32.xlu1 %v9213_v4, %s7089_s30  ;;  %v937_v43 = vsel %vm933_vm4, %v15397_v12, %v15396_v47  ;;  %v941_v38 = vsel %vm933_vm4, %v15396_v47, %v15397_v12  ;;  %v911_v53 = vadd.f32 %v903_v27, %v832_v49  ;;  %v912_v62 = vadd.f32 %v904_v39, %v833_v34  ;;  %v15400_v13 = vld [vmem:[#allocation431_spill] sm:$0xff] }
 0x550   : > { %v905_v8 = vmul.f32 %v15398_v35, %v881_v19  ;;  %v906_v46 = vmul.f32 %v15398_v35, %v882_v63  ;;  %v9701_v59 = vpop.permute.xlu1 %3156  ;;  %v956_v33 = vmul.f32 %v15400_v13, %v938_v55  ;;  %v957_v32 = vmul.f32 %v15401_v61, %v934_v18  ;;  %v15404_v18 = vld [vmem:[#allocation53_spill] sm:$0xff]  ;;  %v15405_v55 = vld [vmem:[#allocation59_spill] sm:$0xff]  ;;  %v15410_v35 = vld [vmem:[#allocation56_spill] sm:$0xff] }
 0x551   : > { %15399 = vst [vmem:[#allocation38_spill] sm:$0xff] %v9701_v59  ;;  %v9707_v9 = vrot.slane %v15402_v23, %v9540_v57  ;;  %v9711_v2 = vrot.slane %v15403_v37, %v9540_v57  ;;  %v909_v19 = vadd.f32 %v901_v20, %v830_v11  ;;  %v910_v39 = vadd.f32 %v902_v51, %v831_v29  ;;  %v15406_v47 = vld [vmem:[#allocation55_spill] sm:$0xff]  ;;  %v9730_v29 = vpop.permute.xlu0 %3479  ;;  %v15411_v37 = vld [vmem:[#allocation64_spill] sm:$0xff] }
 0x552   : > { %3767 = vrot.lane.b32.xlu0 %v9441_v16, %s7103_s28  ;;  %v962_v63 = vmul.f32 %v15400_v13, %v941_v38  ;;  %v963_v49 = vmul.f32 %v15401_v61, %v937_v43  ;;  %v907_v34 = vmul.f32 %v15404_v18, %v883_v50  ;;  %v908_v27 = vmul.f32 %v15404_v18, %v884_v30  ;;  %v15408_v43 = vld [vmem:[#allocation54_spill] sm:$0xff] }
 0x553   : > { %3266 = vrot.lane.b32.xlu1 %v9224_v24, %s7089_s30  ;;  %v935_v12 = vsel %vm933_vm4, %v15406_v47, %v15405_v55  ;;  %v939_v11 = vsel %vm933_vm4, %v15405_v55, %v15406_v47  ;;  %15407 = vst [vmem:[#allocation418_spill] sm:$0xff] %v9730_v29  ;;  %v913_v20 = vadd.f32 %v905_v8, %v834_v52  ;;  %v15409_v38 = vld [vmem:[#allocation50_spill] sm:$0xff]  ;;  %v15412_v55 = vld [vmem:[#allocation60_spill] sm:$0xff]  ;;  %s7107_s30 = smov 80   ;;  %vm1979_vm2 = vcmp.lt.s32.totalorder %v9272_v10, 15 }
 0x554   : > { %v914_v51 = vadd.f32 %v906_v46, %v835_v56  ;;  %v936_v50 = vsel %vm933_vm4, %v15409_v38, %v15408_v43  ;;  %v940_v30 = vsel %vm933_vm4, %v15408_v43, %v15409_v38  ;;  %v980_v18 = vmul.f32 %v15410_v35, %v956_v33 }
 0x555   : > { %v981_v59 = vmul.f32 %v15410_v35, %v957_v32  ;;  %v1014_v52 = vsel %vm1012_vm5, %v15412_v55, %v15411_v37  ;;  %v1018_v56 = vsel %vm1012_vm5, %v15411_v37, %v15412_v55  ;;  %v9750_v46 = vpop.permute.xlu1 %3221  ;;  %v958_v8 = vmul.f32 %v15400_v13, %v939_v11  ;;  %v15414_v32 = vld [vmem:[#allocation58_spill] sm:$0xff]  ;;  %v15416_v11 = vld [vmem:[#allocation63_spill] sm:$0xff] }
 0x556   : > { %15413 = vst [vmem:[#allocation37_spill] sm:$0xff] %v9750_v46  ;;  %3836 = vrot.lane.b32.xlu0 %v9246_v17, %s7105_s1  ;;  %v959_v33 = vmul.f32 %v15401_v61, %v935_v12  ;;  %v986_v47 = vmul.f32 %v15414_v32, %v962_v63  ;;  %v987_v43 = vmul.f32 %v15414_v32, %v963_v49  ;;  %v9764_v46 = vpop.permute.xlu0 %3525  ;;  %vm3779_vm3 = vcmp.lt.s32.totalorder %v9272_v10, 82 }
 0x557   : > { %3337 = vrot.lane.b32.xlu1 %v9498_v54, %s7091_s25  ;;  %v915_v38 = vadd.f32 %v907_v34, %v9624_v5  ;;  %v916_v37 = vadd.f32 %v908_v27, %v9645_v14  ;;  %v960_v35 = vmul.f32 %v15400_v13, %v940_v30  ;;  %v961_v55 = vmul.f32 %v15401_v61, %v936_v50  ;;  %v15417_v5 = vld [vmem:[#allocation417_spill] sm:$0xff]  ;;  %v15418_v14 = vld [vmem:[#allocation419_spill] sm:$0xff] }
 0x558   : > { %15415 = vst [vmem:[#allocation422_spill] sm:$0xff] %v9764_v46  ;;  %v982_v29 = vmul.f32 %v15416_v11, %v958_v8  ;;  %v983_v12 = vmul.f32 %v15416_v11, %v959_v33  ;;  %v1037_v63 = vmul.f32 %v9455_v6, %v1018_v56  ;;  %v1038_v49 = vmul.f32 %v9459_v31, %v1014_v52  ;;  %v15420_v27 = vld [vmem:[#allocation71_spill] sm:$0xff]  ;;  %v15423_v8 = vld [vmem:[#allocation66_spill] sm:$0xff] }
 0x559   : > { %v988_v32 = vadd.f32 %v980_v18, %v909_v19  ;;  %v989_v23 = vadd.f32 %v981_v59, %v910_v39  ;;  %v9772_v34 = vrot.slane %v15417_v5, %v9540_v57  ;;  %v9776_v13 = vrot.slane %v15418_v14, %v9540_v57  ;;  %v9778_v61 = vpop.permute.xlu1 %2966  ;;  %v15421_v50 = vld [vmem:[#allocation67_spill] sm:$0xff]  ;;  %v15422_v18 = vld [vmem:[#allocation65_spill] sm:$0xff]  ;;  %v15424_v33 = vld [vmem:[#allocation62_spill] sm:$0xff] }
 0x55a   : > { %15419 = vst [vmem:[#allocation427_spill] sm:$0xff] %v9778_v61  ;;  %3844 = vrot.lane.b32.xlu0 %v15366_v45, %s7105_s1  ;;  %v1013_v30 = vsel %vm1012_vm5, %v15421_v50, %v15420_v27  ;;  %v1017_v59 = vsel %vm1012_vm5, %v15420_v27, %v15421_v50  ;;  %v9790_v19 = vadd.f32 %v986_v47, %v915_v38  ;;  %v15427_v46 = vld [vmem:[#allocation70_spill] sm:$0xff]  ;;  %vm2052_vm4 = vcmp.lt.s32.totalorder %v9272_v10, 14 }
 0x55b   : > { %v9792_v39 = vadd.f32 %v987_v43, %v916_v37  ;;  %3400 = vrot.lane.b32.xlu1 %v9239_v0, %s7093_s26  ;;  %v984_v52 = vmul.f32 %v15422_v18, %v960_v35  ;;  %v985_v56 = vmul.f32 %v15422_v18, %v961_v55  ;;  %v1016_v11 = vsel %vm1012_vm5, %v15424_v33, %v15423_v8  ;;  %v15425_v37 = vld [vmem:[#allocation68_spill] sm:$0xff]  ;;  %v15426_v18 = vld [vmem:[#allocation74_spill] sm:$0xff] }
 0x55c   : > { %v1020_v47 = vsel %vm1012_vm5, %v15423_v8, %v15424_v33  ;;  %v990_v38 = vadd.f32 %v982_v29, %v911_v53  ;;  %v991_v43 = vadd.f32 %v983_v12, %v912_v62  ;;  %v1061_v27 = vmul.f32 %v15425_v37, %v1037_v63  ;;  %v9820_v62 = vpop.permute.xlu0 %3590  ;;  %v15430_v63 = vld [vmem:[#allocation73_spill] sm:$0xff] }
 0x55d   : > { %v1062_v50 = vmul.f32 %v15425_v37, %v1038_v49  ;;  %v1035_v35 = vmul.f32 %v9455_v6, %v1017_v59  ;;  %v1036_v55 = vmul.f32 %v9459_v31, %v1013_v30  ;;  %v1092_v61 = vsel %vm1091_vm6, %v15427_v46, %v15426_v18  ;;  %v9818_v53 = vpop.permute.xlu1 %2974  ;;  %15429 = vst [vmem:[#allocation39_spill] sm:$0xff] %v9820_v62  ;;  %v15431_v49 = vld [vmem:[#allocation69_spill] sm:$0xff]  ;;  %v15432_v37 = vld [vmem:[#allocation75_spill] sm:$0xff] }
 0x55e   : > { %v1096_v8 = vsel %vm1091_vm6, %v15426_v18, %v15427_v46  ;;  %15428 = vst [vmem:[#allocation429_spill] sm:$0xff] %v9818_v53  ;;  %3890 = vperm.xlu0 %6368, %v15375_v28   ;;  %v1041_v29 = vmul.f32 %v9455_v6, %v1020_v47  ;;  %v1042_v12 = vmul.f32 %v9459_v31, %v1016_v11 }
 0x55f   : > { %v1015_v30 = vsel %vm1012_vm5, %v15431_v49, %v15430_v63  ;;  %v1019_v46 = vsel %vm1012_vm5, %v15430_v63, %v15431_v49  ;;  %3408 = vrot.lane.b32.xlu1 %v15363_v42, %s7093_s26  ;;  %v992_v59 = vadd.f32 %v984_v52, %v913_v20  ;;  %v993_v33 = vadd.f32 %v985_v56, %v914_v51  ;;  %v15433_v49 = vld [vmem:[#allocation72_spill] sm:$0xff]  ;;  %v15437_v56 = vld [vmem:[#allocation421_spill] sm:$0xff] }
 0x560   : > { %v1059_v18 = vmul.f32 %v15432_v37, %v1035_v35  ;;  %v1060_v47 = vmul.f32 %v15432_v37, %v1036_v55  ;;  %v9837_v11 = vadd.f32 %v1061_v27, %v990_v38  ;;  %v1114_v62 = vmul.f32 %v9471_v21, %v1096_v8  ;;  %v9869_v55 = vpop.permute.xlu0 %3475 }
 0x561   : > { %v1115_v53 = vmul.f32 %v9475_v22, %v1092_v61  ;;  %v9841_v14 = vadd.f32 %v1062_v50, %v991_v43  ;;  %v1039_v5 = vmul.f32 %v9455_v6, %v1019_v46  ;;  %v1040_v63 = vmul.f32 %v9459_v31, %v1015_v30  ;;  %v9849_v51 = vpop.permute.xlu1 %3045  ;;  %v15436_v6 = vld [vmem:[#allocation420_spill] sm:$0xff]  ;;  %v15439_v50 = vld [vmem:[#allocation77_spill] sm:$0xff]  ;;  %15440 = vst [vmem:[#allocation47_spill] sm:$0xff] %v9869_v55  ;;  %v15441_v30 = vld [vmem:[#allocation78_spill] sm:$0xff] }
 0x562   : > { %v1098_v20 = vsel %vm1091_vm6, %v15434_v41, %v15433_v49  ;;  %15435 = vst [vmem:[#allocation45_spill] sm:$0xff] %v9849_v51  ;;  %v14708_v52 = vmov 45   ;;  %v1094_v61 = vsel %vm1091_vm6, %v15433_v49, %v15434_v41  ;;  %v9859_v31 = vrot.slane %v15436_v6, %v9540_v57  ;;  %v15442_v49 = vld [vmem:[#allocation81_spill] sm:$0xff] }
 0x563   : > { %6370 = vset.pattern.permute.xlu0 %v14708_v52  ;;  %v9863_v38 = vrot.slane %v15437_v56, %v9540_v57  ;;  %3521 = vperm.xlu1 %6357, %v15371_v7   ;;  %v1067_v43 = vadd.f32 %v1059_v18, %v988_v32  ;;  %v1068_v27 = vadd.f32 %v1060_v47, %v989_v23  ;;  %v15443_v52 = vld [vmem:[#allocation85_spill] sm:$0xff]  ;;  %v15444_v23 = vld [vmem:[#allocation79_spill] sm:$0xff]  ;;  %vm2125_vm5 = vcmp.lt.s32.totalorder %v9272_v10, 13 }
 0x564   : > { %3955 = vperm.xlu0 %6370, %v15392_v3   ;;  %v1063_v35 = vmul.f32 %v15439_v50, %v1039_v5  ;;  %v1064_v41 = vmul.f32 %v15439_v50, %v1040_v63  ;;  %v1118_v8 = vmul.f32 %v9471_v21, %v1098_v20  ;;  %v1138_v46 = vmul.f32 %v15441_v30, %v1114_v62  ;;  %v15445_v47 = vld [vmem:[#allocation83_spill] sm:$0xff]  ;;  %v15448_v50 = vld [vmem:[#allocation82_spill] sm:$0xff] }
 0x565   : > { %15438 = vst [vmem:[#allocation41_spill] sm:$0xff] %v9863_v38  ;;  %v1139_v37 = vmul.f32 %v15441_v30, %v1115_v53  ;;  %v1097_v51 = vsel %vm1091_vm6, %v15443_v52, %v15442_v49  ;;  %v1119_v32 = vmul.f32 %v9475_v22, %v1094_v61  ;;  %v1065_v18 = vmul.f32 %v15444_v23, %v1041_v29  ;;  %v15446_v63 = vld [vmem:[#allocation87_spill] sm:$0xff]  ;;  %v9888_v53 = vpop.permute.xlu1 %3108  ;;  %v15449_v30 = vld [vmem:[#allocation86_spill] sm:$0xff] }
 0x566   : > { %v1093_v5 = vsel %vm1091_vm6, %v15442_v49, %v15443_v52  ;;  %v1099_v62 = vsel %vm1091_vm6, %v15446_v63, %v15445_v47  ;;  %15447 = vst [vmem:[#allocation43_spill] sm:$0xff] %v9888_v53  ;;  %v1066_v20 = vmul.f32 %v15444_v23, %v1042_v12  ;;  %v1176_v61 = vsel %vm1170_vm7, %v15449_v30, %v15448_v50 }
 0x567   : > { %v1095_v29 = vsel %vm1091_vm6, %v15445_v47, %v15446_v63  ;;  %v15450_v52 = vmov 40   ;;  %v1071_v49 = vadd.f32 %v1063_v35, %v992_v59  ;;  %v9903_v55 = vadd.f32 %v1064_v41, %v993_v33  ;;  %v15451_v33 = vld [vmem:[#allocation89_spill] sm:$0xff] }
 0x568   : > { %6359 = vset.pattern.permute.xlu1 %v15450_v52  ;;  %3840 = vrot.lane.b32.xlu0 %v9441_v16, %s7105_s1  ;;  %v1116_v12 = vmul.f32 %v9471_v21, %v1097_v51  ;;  %v1172_v23 = vsel %vm1170_vm7, %v15448_v50, %v15449_v30  ;;  %v1146_v47 = vadd.f32 %v1138_v46, %v1067_v43  ;;  %v15452_v51 = vld [vmem:[#allocation93_spill] sm:$0xff]  ;;  %v9922_v30 = vpop.permute.xlu0 %3544  ;;  %vm2198_vm6 = vcmp.lt.s32.totalorder %v9272_v10, 3 }
 0x569   : > { %3586 = vperm.xlu1 %6359, %v15386_v40   ;;  %v1147_v63 = vadd.f32 %v1139_v37, %v1068_v27  ;;  %v1117_v53 = vmul.f32 %v9475_v22, %v1093_v5  ;;  %v1120_v52 = vmul.f32 %v9471_v21, %v1099_v62  ;;  %v1195_v56 = vmul.f32 %v9572_v36, %v1176_v61  ;;  %v15453_v41 = vld [vmem:[#allocation97_spill] sm:$0xff]  ;;  %v9920_v50 = vpop.permute.xlu1 %3116  ;;  %v15458_v37 = vld [vmem:[#allocation84_spill] sm:$0xff] }
 0x56a   : > { %v1121_v59 = vmul.f32 %v9475_v22, %v1095_v29  ;;  %v1140_v35 = vmul.f32 %v15451_v33, %v1116_v12  ;;  %v1175_v6 = vsel %vm1170_vm7, %v15453_v41, %v15452_v51  ;;  %15454 = vst [vmem:[#allocation428_spill] sm:$0xff] %v9920_v50  ;;  %15455 = vst [vmem:[#allocation44_spill] sm:$0xff] %v9922_v30  ;;  %v15456_v46 = vld [vmem:[#allocation425_spill] sm:$0xff]  ;;  %v15459_v5 = vld [vmem:[#allocation88_spill] sm:$0xff] }
 0x56b   : > { %v1073_v43 = vadd.f32 %v1065_v18, %v9790_v19  ;;  %v1074_v27 = vadd.f32 %v1066_v20, %v9792_v39  ;;  %v1196_v21 = vmul.f32 %v9593_v44, %v1172_v23  ;;  %v9929_v22 = vrot.slane %v15456_v46, %v9540_v57  ;;  %v15460_v39 = vld [vmem:[#allocation92_spill] sm:$0xff]  ;;  %v15467_v46 = vld [vmem:[#allocation101_spill] sm:$0xff] }
 0x56c   : > { %3909 = vrot.lane.b32.xlu0 %v9246_v17, %s7107_s30  ;;  %v1178_v62 = vsel %vm1170_vm7, %v15459_v5, %v15458_v37  ;;  %v1141_v61 = vmul.f32 %v15451_v33, %v1117_v53  ;;  %v1171_v19 = vsel %vm1170_vm7, %v15452_v51, %v15453_v41  ;;  %v15461_v18 = vld [vmem:[#allocation96_spill] sm:$0xff]  ;;  %v1174_v53 = vsel %vm1170_vm7, %v15458_v37, %v15459_v5  ;;  %v15463_v33 = vld [vmem:[#allocation426_spill] sm:$0xff] }
 0x56d   : > { %15457 = vst [vmem:[#allocation40_spill] sm:$0xff] %v9929_v22  ;;  %v1254_v20 = vsel %vm1249_vm8, %v15461_v18, %v15460_v39  ;;  %3331 = vrot.lane.b32.xlu1 %v9213_v4, %s7091_s25  ;;  %v15462_v29 = vld [vmem:[#allocation80_spill] sm:$0xff]  ;;  %v1193_v23 = vmul.f32 %v9572_v36, %v1175_v6  ;;  %v9957_v51 = vrot.slane %v15463_v33, %v9540_v57  ;;  %v15465_v4 = vld [vmem:[#allocation90_spill] sm:$0xff]  ;;  %v9966_v37 = vpop.permute.xlu1 %3229 }
 0x56e   : > { %v1144_v12 = vmul.f32 %v15462_v29, %v1120_v52  ;;  %v1145_v41 = vmul.f32 %v15462_v29, %v1121_v59  ;;  %v1148_v50 = vadd.f32 %v1140_v35, %v9837_v11  ;;  %v1219_v30 = vmul.f32 %v15465_v4, %v1195_v56  ;;  %15466 = vst [vmem:[#allocation433_spill] sm:$0xff] %v9966_v37  ;;  %v15468_v59 = vld [vmem:[#allocation91_spill] sm:$0xff]  ;;  %v15472_v37 = vld [vmem:[#allocation94_spill] sm:$0xff] }
 0x56f   : > { %15464 = vst [vmem:[#allocation46_spill] sm:$0xff] %v9957_v51  ;;  %v1250_v52 = vsel %vm1249_vm8, %v15460_v39, %v15461_v18  ;;  %v1199_v6 = vmul.f32 %v9572_v36, %v1178_v62  ;;  %v1194_v5 = vmul.f32 %v9593_v44, %v1171_v19  ;;  %v1266_v33 = vmul.f32 %v9619_v60, %v1254_v20  ;;  %v15469_v39 = vld [vmem:[#allocation95_spill] sm:$0xff]  ;;  %v9983_v19 = vpop.permute.xlu0 %3552 }
 0x570   : > { %v1217_v51 = vmul.f32 %v15467_v46, %v1193_v23  ;;  %3917 = vrot.lane.b32.xlu0 %v15366_v45, %s7107_s30  ;;  %v1149_v11 = vadd.f32 %v1141_v61, %v9841_v14  ;;  %v1220_v56 = vmul.f32 %v15465_v4, %v1196_v21  ;;  %v1142_v35 = vmul.f32 %v15468_v59, %v1118_v8  ;;  %v15470_v18 = vld [vmem:[#allocation99_spill] sm:$0xff] }
 0x571   : > { %v1177_v62 = vsel %vm1170_vm7, %v15470_v18, %v15469_v39  ;;  %3339 = vrot.lane.b32.xlu1 %v9224_v24, %s7091_s25  ;;  %15471 = vst [vmem:[#allocation49_spill] sm:$0xff] %v9983_v19  ;;  %v1143_v20 = vmul.f32 %v15468_v59, %v1119_v32  ;;  %v1267_v29 = vmul.f32 %v9630_v48, %v1250_v52  ;;  %v15473_v19 = vld [vmem:[#allocation98_spill] sm:$0xff]  ;;  %v15474_v59 = vld [vmem:[#allocation100_spill] sm:$0xff]  ;;  %s7109_s25 = smov 79  }
 0x572   : > { %v1173_v14 = vsel %vm1170_vm7, %v15469_v39, %v15470_v18  ;;  %v1218_v8 = vmul.f32 %v15467_v46, %v1194_v5  ;;  %v1200_v21 = vmul.f32 %v9593_v44, %v1174_v53  ;;  %v9993_v61 = vadd.f32 %v1219_v30, %v1148_v50  ;;  %v10001_v38 = vpop.permute.xlu1 %3294  ;;  %v15477_v53 = vld [vmem:[#allocation103_spill] sm:$0xff]  ;;  %v15483_v18 = vld [vmem:[#allocation104_spill] sm:$0xff] }
 0x573   : > { %v1152_v23 = vadd.f32 %v1144_v12, %v1073_v43  ;;  %v1153_v4 = vadd.f32 %v1145_v41, %v1074_v27  ;;  %v1197_v24 = vmul.f32 %v9572_v36, %v1177_v62  ;;  %v1256_v32 = vsel %vm1249_vm8, %v15473_v19, %v15472_v37  ;;  %15475 = vst [vmem:[#allocation52_spill] sm:$0xff] %v10001_v38 }
 0x574   : > { %v1225_v52 = vadd.f32 %v1217_v51, %v1146_v47  ;;  %v1290_v22 = vmul.f32 %v15474_v59, %v1266_v33  ;;  %3963 = vperm.xlu0 %6370, %v15375_v28   ;;  %v10004_v46 = vadd.f32 %v1220_v56, %v1149_v11  ;;  %v1150_v50 = vadd.f32 %v1142_v35, %v1071_v49  ;;  %v10013_v47 = vpop.permute.xlu0 %3598  ;;  %v15478_v51 = vld [vmem:[#allocation105_spill] sm:$0xff]  ;;  %v15480_v35 = vld [vmem:[#allocation107_spill] sm:$0xff] }
 0x575   : > { %v1198_v30 = vmul.f32 %v9593_v44, %v1173_v14  ;;  %v1252_v36 = vsel %vm1249_vm8, %v15472_v37, %v15473_v19  ;;  %3410 = vrot.lane.b32.xlu1 %v9498_v54, %s7093_s26  ;;  %15476 = vst [vmem:[#allocation48_spill] sm:$0xff] %v10013_v47  ;;  %v1151_v43 = vadd.f32 %v1143_v20, %v9903_v55  ;;  %v14719_v56 = vmov 46   ;;  %v15484_v14 = vld [vmem:[#allocation109_spill] sm:$0xff] }
 0x576   : > { %v1226_v27 = vadd.f32 %v1218_v8, %v1147_v63  ;;  %v1291_v12 = vmul.f32 %v15474_v59, %v1267_v29  ;;  %v1221_v33 = vmul.f32 %v15477_v53, %v1197_v24  ;;  %v10019_v49 = vmul.f32 %v9619_v60, %v1256_v32  ;;  %v10036_v11 = vpop.permute.xlu1 %3039  ;;  %v15485_v8 = vld [vmem:[#allocation113_spill] sm:$0xff] }
 0x577   : > { %v1222_v44 = vmul.f32 %v15477_v53, %v1198_v30  ;;  %v1223_v41 = vmul.f32 %v15478_v51, %v1199_v6  ;;  %v10024_v37 = vmul.f32 %v9630_v48, %v1252_v36  ;;  %v10026_v5 = vadd.f32 %v1290_v22, %v1225_v52  ;;  %15479 = vst [vmem:[#allocation61_spill] sm:$0xff] %v10036_v11  ;;  %v15481_v6 = vld [vmem:[#allocation111_spill] sm:$0xff]  ;;  %v15482_v22 = vld [vmem:[#allocation108_spill] sm:$0xff]  ;;  %v15488_v53 = vld [vmem:[#allocation110_spill] sm:$0xff] }
 0x578   : > { %v10030_v55 = vrot.slane %v9415_v25, %v9540_v57  ;;  %v10034_v63 = vrot.slane %v9418_v58, %v9540_v57  ;;  %6372 = vset.pattern.permute.xlu0 %v14719_v56  ;;  %v1255_v39 = vsel %vm1249_vm8, %v15481_v6, %v15480_v35  ;;  %v1324_v62 = vsel %vm1322_vm9, %v15483_v18, %v15482_v22 }
 0x579   : > { %v1328_v57 = vsel %vm1322_vm9, %v15482_v22, %v15483_v18  ;;  %3473 = vrot.lane.b32.xlu1 %v9239_v0, %s7095_s20  ;;  %4028 = vperm.xlu0 %6372, %v15392_v3   ;;  %v10054_v19 = vadd.f32 %v1291_v12, %v1226_v27  ;;  %v10056_v20 = vadd.f32 %v1221_v33, %v1150_v50  ;;  %v10073_v50 = vpop.permute.xlu0 %3663  ;;  %v15487_v12 = vld [vmem:[#allocation106_spill] sm:$0xff]  ;;  %v10102_v22 = vsub.s32 2, %v9252_v1 }
 0x57a   : > { %v1251_v29 = vsel %vm1249_vm8, %v15480_v35, %v15481_v6  ;;  %v1257_v24 = vsel %vm1249_vm8, %v15485_v8, %v15484_v14  ;;  %v10066_v32 = vadd.f32 %v1222_v44, %v1151_v43  ;;  %v1224_v0 = vmul.f32 %v15478_v51, %v1200_v21  ;;  %15486 = vst [vmem:[#allocation57_spill] sm:$0xff] %v10073_v50  ;;  %v10082_v21 = vpop.permute.xlu1 %3047  ;;  %v15491_v6 = vld [vmem:[#allocation119_spill] sm:$0xff]  ;;  %v15525_v50 = vld [vmem:[#allocation149_spill] sm:$0xff] }
 0x57b   : > { %v1231_v52 = vadd.f32 %v1223_v41, %v1152_v23  ;;  %v1253_v59 = vsel %vm1249_vm8, %v15484_v14, %v15485_v8  ;;  %v1268_v30 = vmul.f32 %v9619_v60, %v1255_v39  ;;  %v1341_v36 = vmul.f32 %v9707_v9, %v1328_v57  ;;  %15489 = vst [vmem:[#allocation51_spill] sm:$0xff] %v10082_v21  ;;  %v15490_v41 = vld [vmem:[#allocation115_spill] sm:$0xff] }
 0x57c   : > { %v1342_v27 = vmul.f32 %v9711_v2, %v1324_v62  ;;  %v1330_v43 = vsel %vm1322_vm9, %v15488_v53, %v15487_v12  ;;  %v1269_v23 = vmul.f32 %v9630_v48, %v1251_v29  ;;  %v1272_v33 = vmul.f32 %v9619_v60, %v1257_v24  ;;  %v15492_v39 = vld [vmem:[#allocation123_spill] sm:$0xff]  ;;  %v15493_v29 = vld [vmem:[#allocation112_spill] sm:$0xff]  ;;  %v15494_v24 = vld [vmem:[#allocation114_spill] sm:$0xff] }
 0x57d   : > { %v1326_v44 = vsel %vm1322_vm9, %v15487_v12, %v15488_v53  ;;  %3481 = vrot.lane.b32.xlu1 %v15363_v42, %s7095_s20  ;;  %3913 = vrot.lane.b32.xlu0 %v9441_v16, %s7107_s30  ;;  %v1273_v51 = vmul.f32 %v9630_v48, %v1253_v59  ;;  %v1292_v35 = vmul.f32 %v15490_v41, %v1268_v30  ;;  %v15495_v59 = vld [vmem:[#allocation118_spill] sm:$0xff]  ;;  %vm2271_vm7 = vcmp.lt.s32.totalorder %v9272_v10, 2 }
 0x57e   : > { %v1327_v60 = vsel %vm1322_vm9, %v15492_v39, %v15491_v6  ;;  %v1232_v18 = vadd.f32 %v1224_v0, %v1153_v4  ;;  %v1345_v62 = vmul.f32 %v9707_v9, %v1330_v43  ;;  %v1293_v42 = vmul.f32 %v15490_v41, %v1269_v23  ;;  %v10117_v0 = vpop.permute.xlu1 %3118  ;;  %v15497_v30 = vld [vmem:[#allocation102_spill] sm:$0xff] }
 0x57f   : > { %v1323_v48 = vsel %vm1322_vm9, %v15491_v6, %v15492_v39  ;;  %v1346_v57 = vmul.f32 %v9711_v2, %v1326_v44  ;;  %v1365_v14 = vmul.f32 %v15493_v29, %v1341_v36  ;;  %v1366_v8 = vmul.f32 %v15493_v29, %v1342_v27  ;;  %15496 = vst [vmem:[#allocation431_spill] sm:$0xff] %v10117_v0  ;;  %v10126_v36 = vpop.permute.xlu0 %3548  ;;  %v15499_v6 = vld [vmem:[#allocation127_spill] sm:$0xff]  ;;  %v10336_v0 = vld [vmem:[%s7568_s12 + $0x10] sm:$0xff] }
 0x580   : > { %v1400_v4 = vsel %vm1395_vm10, %v15495_v59, %v15494_v24  ;;  %v1296_v12 = vmul.f32 %v15497_v30, %v1272_v33  ;;  %v1339_v53 = vmul.f32 %v9707_v9, %v1327_v60  ;;  %v1396_v43 = vsel %vm1395_vm10, %v15494_v24, %v15495_v59  ;;  %15498 = vst [vmem:[#allocation432_spill] sm:$0xff] %v10126_v36  ;;  %v15526_v36 = vld [vmem:[#allocation145_spill] sm:$0xff] }
 0x581   : > { %3594 = vperm.xlu1 %6359, %v15371_v7   ;;  %3982 = vrot.lane.b32.xlu0 %v9246_v17, %s7109_s25  ;;  %v1297_v27 = vmul.f32 %v15497_v30, %v1273_v51  ;;  %v1300_v23 = vadd.f32 %v1292_v35, %v9993_v61  ;;  %v1340_v33 = vmul.f32 %v9711_v2, %v1323_v48  ;;  %v15500_v17 = vld [vmem:[#allocation117_spill] sm:$0xff]  ;;  %vm3852_vm8 = vcmp.lt.s32.totalorder %v9272_v10, 81 }
 0x582   : > { %v10135_v44 = vrot.slane %v9425_v26, %v10102_v22  ;;  %v1301_v41 = vadd.f32 %v1293_v42, %v10004_v46  ;;  %v1412_v7 = vmul.f32 %v9772_v34, %v1400_v4  ;;  %v1363_v39 = vmul.f32 %v15499_v6, %v1339_v53  ;;  %v15501_v35 = vld [vmem:[#allocation121_spill] sm:$0xff]  ;;  %v10152_v42 = vpop.permute.xlu1 %3181  ;;  %v15505_v53 = vld [vmem:[#allocation120_spill] sm:$0xff] }
 0x583   : > { %v10142_v60 = vrot.slane %v9428_v15, %v10102_v22  ;;  %v1294_v51 = vmul.f32 %v15500_v17, %v10019_v49  ;;  %v1413_v61 = vmul.f32 %v9776_v13, %v1396_v43  ;;  %v15502_v48 = vld [vmem:[#allocation125_spill] sm:$0xff]  ;;  %v1364_v46 = vmul.f32 %v15499_v6, %v1340_v33  ;;  %15503 = vst [vmem:[#allocation53_spill] sm:$0xff] %v10152_v42  ;;  %v15506_v43 = vld [vmem:[#allocation116_spill] sm:$0xff] }
 0x584   : > { %v1329_v29 = vsel %vm1322_vm9, %v15502_v48, %v15501_v35  ;;  %v1295_v24 = vmul.f32 %v15500_v17, %v10024_v37  ;;  %v1325_v59 = vsel %vm1322_vm9, %v15501_v35, %v15502_v48  ;;  %v1304_v49 = vadd.f32 %v1296_v12, %v1231_v52  ;;  %v10180_v17 = vpop.permute.xlu0 %3617 }
 0x585   : > { %v15504_v4 = vmov 41   ;;  %3990 = vrot.lane.b32.xlu0 %v15366_v45, %s7109_s25  ;;  %v10164_v30 = vadd.f32 %v1365_v14, %v1300_v23  ;;  %v1398_v37 = vsel %vm1395_vm10, %v15506_v43, %v15505_v53  ;;  %v1402_v33 = vsel %vm1395_vm10, %v15505_v53, %v15506_v43  ;;  %v15507_v14 = vld [vmem:[#allocation122_spill] sm:$0xff]  ;;  %15508 = vst [vmem:[#allocation59_spill] sm:$0xff] %v10180_v17  ;;  %v15517_v53 = vld [vmem:[#allocation139_spill] sm:$0xff] }
 0x586   : > { %6361 = vset.pattern.permute.xlu1 %v15504_v4  ;;  %v1305_v52 = vadd.f32 %v1297_v27, %v1232_v18  ;;  %v10175_v12 = vadd.f32 %v1366_v8, %v1301_v41  ;;  %v1343_v6 = vmul.f32 %v9707_v9, %v1329_v29  ;;  %v1371_v45 = vadd.f32 %v1363_v39, %v10026_v5  ;;  %v15510_v27 = vld [vmem:[#allocation129_spill] sm:$0xff]  ;;  %v10385_v17 = vld [vmem:[%s7568_s12 + $0x18] sm:$0xff] }
 0x587   : > { %3659 = vperm.xlu1 %6361, %v15386_v40   ;;  %v1436_v23 = vmul.f32 %v15507_v14, %v1412_v7  ;;  %v1302_v35 = vadd.f32 %v1294_v51, %v10056_v20  ;;  %v1344_v48 = vmul.f32 %v9711_v2, %v1325_v59  ;;  %v1372_v4 = vadd.f32 %v1364_v46, %v10054_v19  ;;  %v10186_v40 = vpop.permute.xlu1 %3189  ;;  %v15511_v19 = vld [vmem:[#allocation444_spill] sm:$0xff]  ;;  %v15512_v7 = vld [vmem:[#allocation445_spill] sm:$0xff]  ;;  %v15515_v46 = vld [vmem:[#allocation130_spill] sm:$0xff] }
 0x588   : > { %v1437_v18 = vmul.f32 %v15507_v14, %v1413_v61  ;;  %15509 = vst [vmem:[#allocation55_spill] sm:$0xff] %v10186_v40  ;;  %v1303_v8 = vadd.f32 %v1295_v24, %v10066_v32  ;;  %v10190_v9 = vmul.f32 %v9772_v34, %v1402_v33  ;;  %v10193_v5 = vmul.f32 %v9776_v13, %v1398_v37  ;;  %v10207_v32 = vld [vmem:[%s7568_s12 + $0x30] sm:$0xff]  ;;  %v15513_v61 = vld [vmem:[#allocation131_spill] sm:$0xff] }
 0x589   : > { %v1367_v41 = vmul.f32 %v15510_v27, %v1343_v6  ;;  %4036 = vperm.xlu0 %6372, %v15375_v28   ;;  %v1368_v2 = vmul.f32 %v15510_v27, %v1344_v48  ;;  %v10200_v20 = vrot.slane %v15511_v19, %v10102_v22  ;;  %v10204_v39 = vrot.slane %v15512_v7, %v10102_v22  ;;  %v15514_v28 = vld [vmem:[#allocation126_spill] sm:$0xff]  ;;  %v15516_v59 = vld [vmem:[#allocation135_spill] sm:$0xff]  ;;  %v15520_v48 = vld [vmem:[#allocation133_spill] sm:$0xff] }
 0x58a   : > { %v10211_v51 = vadd.f32 %v1436_v23, %v1371_v45  ;;  %v1369_v29 = vmul.f32 %v15513_v61, %v1345_v62  ;;  %v1474_v24 = vsel %vm1468_vm11, %v15515_v46, %v15514_v28  ;;  %v1403_v43 = vsel %vm1395_vm10, %v15517_v53, %v15516_v59  ;;  %v15519_v23 = vld [vmem:[#allocation137_spill] sm:$0xff]  ;;  %v15522_v27 = vld [vmem:[#allocation132_spill] sm:$0xff] }
 0x58b   : > { %3404 = vrot.lane.b32.xlu1 %v10207_v32, %s7093_s26  ;;  %v10222_v37 = vadd.f32 %v1437_v18, %v1372_v4  ;;  %v1370_v33 = vmul.f32 %v15513_v61, %v1346_v57  ;;  %v1470_v62 = vsel %vm1468_vm11, %v15514_v28, %v15515_v46  ;;  %v1399_v6 = vsel %vm1395_vm10, %v15516_v59, %v15517_v53  ;;  %v10233_v45 = vpop.permute.xlu1 %3302  ;;  %v15521_v18 = vld [vmem:[#allocation128_spill] sm:$0xff]  ;;  %v10249_v28 = vpop.permute.xlu0 %3625  ;;  %v10258_v53 = vld [vmem:[%s7568_s12 + $0x38] sm:$0xff] }
 0x58c   : > { %15518 = vst [vmem:[#allocation54_spill] sm:$0xff] %v10233_v45  ;;  %v10235_v14 = vadd.f32 %v1367_v41, %v1302_v35  ;;  %v1397_v4 = vsel %vm1395_vm10, %v15520_v48, %v15519_v23  ;;  %v1401_v57 = vsel %vm1395_vm10, %v15519_v23, %v15520_v48  ;;  %v1476_v61 = vsel %vm1468_vm11, %v15522_v27, %v15521_v18  ;;  %v15524_v48 = vld [vmem:[#allocation41_spill] sm:$0xff]  ;;  %v15534_v45 = vld [vmem:[#allocation40_spill] sm:$0xff] }
 0x58d   : > { %15523 = vst [vmem:[#allocation50_spill] sm:$0xff] %v10249_v28  ;;  %v14720_v46 = vmov 48   ;;  %v10252_v35 = vadd.f32 %v1368_v2, %v1303_v8  ;;  %v1487_v41 = vmul.f32 %v9859_v31, %v1474_v24  ;;  %v1418_v59 = vmul.f32 %v9772_v34, %v1403_v43 }
 0x58e   : > { %6375 = vset.pattern.permute.xlu0 %v14720_v46  ;;  %v1377_v23 = vadd.f32 %v1369_v29, %v1304_v49  ;;  %v1488_v56 = vmul.f32 %v15524_v48, %v1470_v62  ;;  %v1419_v46 = vmul.f32 %v9776_v13, %v1399_v6  ;;  %v1472_v8 = vsel %vm1468_vm11, %v15521_v18, %v15522_v27  ;;  %v15527_v62 = vld [vmem:[#allocation136_spill] sm:$0xff]  ;;  %v15532_v27 = vld [vmem:[#allocation141_spill] sm:$0xff] }
 0x58f   : > { %3412 = vrot.lane.b32.xlu1 %v10258_v53, %s7093_s26  ;;  %4174 = vperm.xlu0 %6375, %v15392_v3   ;;  %v1378_v2 = vadd.f32 %v1370_v33, %v1305_v52  ;;  %v1414_v24 = vmul.f32 %v9772_v34, %v1401_v57  ;;  %v1415_v43 = vmul.f32 %v9776_v13, %v1397_v4  ;;  %v15528_v6 = vld [vmem:[#allocation140_spill] sm:$0xff]  ;;  %v10286_v52 = vpop.permute.xlu1 %3367  ;;  %v10288_v13 = vpop.permute.xlu0 %3671  ;;  %s7112_s26 = smov 78   ;;  %vm2344_vm9 = vcmp.lt.s32.totalorder %v9272_v10, 1 }
 0x590   : > { %v10272_v47 = vmul.f32 %v9859_v31, %v1476_v61  ;;  %v1469_v49 = vsel %vm1468_vm11, %v15526_v36, %v15525_v50  ;;  %v1473_v29 = vsel %vm1468_vm11, %v15525_v50, %v15526_v36  ;;  %v1546_v34 = vsel %vm1541_vm12, %v15528_v6, %v15527_v62  ;;  %15529 = vst [vmem:[#allocation56_spill] sm:$0xff] %v10286_v52  ;;  %v15531_v33 = vld [vmem:[#allocation124_spill] sm:$0xff]  ;;  %v15566_v52 = vld [vmem:[#allocation157_spill] sm:$0xff] }
 0x591   : > { %15530 = vst [vmem:[#allocation64_spill] sm:$0xff] %v10288_v13  ;;  %v1442_v4 = vmul.f32 %v15531_v33, %v1418_v59  ;;  %v10292_v57 = vmul.f32 %v15524_v48, %v1472_v8  ;;  %v1542_v18 = vsel %vm1541_vm12, %v15527_v62, %v15528_v6  ;;  %v14727_v50 = vmov 47   ;;  %v15533_v8 = vld [vmem:[#allocation134_spill] sm:$0xff] }
 0x592   : > { %v1443_v36 = vmul.f32 %v15531_v33, %v1419_v46  ;;  %v1438_v61 = vmul.f32 %v15532_v27, %v1414_v24  ;;  %v1439_v59 = vmul.f32 %v15532_v27, %v1415_v43  ;;  %v1511_v13 = vmul.f32 %v15533_v8, %v1487_v41  ;;  %v15536_v46 = vld [vmem:[#allocation142_spill] sm:$0xff]  ;;  %v15541_v27 = vld [vmem:[#allocation413_spill] sm:$0xff] }
 0x593   : > { %3483 = vrot.lane.b32.xlu1 %v9498_v54, %s7095_s20  ;;  %6376 = vset.pattern.permute.xlu0 %v14727_v50  ;;  %v1512_v62 = vmul.f32 %v15533_v8, %v1488_v56  ;;  %v1485_v6 = vmul.f32 %v9859_v31, %v1473_v29  ;;  %v1486_v54 = vmul.f32 %v15524_v48, %v1469_v49  ;;  %v15535_v50 = vld [vmem:[#allocation46_spill] sm:$0xff]  ;;  %v15538_v56 = vld [vmem:[#allocation412_spill] sm:$0xff]  ;;  %v10325_v43 = vpop.permute.xlu1 %3112  ;;  %v15540_v49 = vld [vmem:[#allocation153_spill] sm:$0xff]  ;;  %vm2465_vm10 = vcmp.lt.s32.totalorder %v9272_v10, 127 }
 0x594   : > { %4101 = vperm.xlu0 %6376, %v15392_v3   ;;  %v1558_v42 = vmul.f32 %v15534_v45, %v1546_v34  ;;  %v1559_v40 = vmul.f32 %v15535_v50, %v1542_v18  ;;  %v15537_v33 = vld [vmem:[#allocation138_spill] sm:$0xff]  ;;  %v10323_v41 = vrot.slane %v15538_v56, %v10102_v22  ;;  %15539 = vst [vmem:[#allocation60_spill] sm:$0xff] %v10325_v43  ;;  %v15542_v43 = vld [vmem:[#allocation143_spill] sm:$0xff] }
 0x595   : > { %v1544_v24 = vsel %vm1541_vm12, %v15537_v33, %v15536_v46  ;;  %v1548_v3 = vsel %vm1541_vm12, %v15536_v46, %v15537_v33  ;;  %v1509_v29 = vmul.f32 %v15540_v49, %v1485_v6  ;;  %v1510_v34 = vmul.f32 %v15540_v49, %v1486_v54  ;;  %v15548_v49 = vld [vmem:[#allocation148_spill] sm:$0xff] }
 0x596   : > { %v10329_v18 = vadd.f32 %v1442_v4, %v1377_v23  ;;  %v10333_v8 = vrot.slane %v15541_v27, %v10102_v22  ;;  %v1446_v46 = vadd.f32 %v1438_v61, %v10164_v30  ;;  %v1447_v33 = vadd.f32 %v1439_v59, %v10175_v12  ;;  %v10346_v23 = vpop.permute.xlu0 %3736  ;;  %v15544_v12 = vld [vmem:[#allocation144_spill] sm:$0xff] }
 0x597   : > { %3546 = vrot.lane.b32.xlu1 %v10336_v0, %s7097_s16  ;;  %v1440_v6 = vmul.f32 %v15542_v43, %v10190_v9  ;;  %v10344_v11 = vadd.f32 %v1443_v36, %v1378_v2  ;;  %15543 = vst [vmem:[#allocation58_spill] sm:$0xff] %v10346_v23  ;;  %v1441_v4 = vmul.f32 %v15542_v43, %v10193_v5  ;;  %v15545_v9 = vld [vmem:[#allocation147_spill] sm:$0xff]  ;;  %v15551_v23 = vld [vmem:[#allocation154_spill] sm:$0xff] }
 0x598   : > { %3986 = vrot.lane.b32.xlu0 %v9441_v16, %s7109_s25  ;;  %v10353_v54 = vmul.f32 %v15534_v45, %v1548_v3  ;;  %v10356_v30 = vmul.f32 %v15535_v50, %v1544_v24  ;;  %v1582_v61 = vmul.f32 %v15544_v12, %v1558_v42  ;;  %v15546_v2 = vld [vmem:[#allocation151_spill] sm:$0xff]  ;;  %v1583_v59 = vmul.f32 %v15544_v12, %v1559_v40  ;;  %v15547_v16 = vld [vmem:[#allocation152_spill] sm:$0xff]  ;;  %v10372_v3 = vpop.permute.xlu1 %3120  ;;  %v15550_v12 = vld [vmem:[#allocation150_spill] sm:$0xff] }
 0x599   : > { %v1475_v36 = vsel %vm1468_vm11, %v15546_v2, %v15545_v9  ;;  %v1616_v5 = vsel %vm1614_vm13, %v15548_v49, %v15547_v16  ;;  %v1620_v24 = vsel %vm1614_vm13, %v15547_v16, %v15548_v49  ;;  %15549 = vst [vmem:[#allocation63_spill] sm:$0xff] %v10372_v3  ;;  %v1471_v42 = vsel %vm1468_vm11, %v15545_v9, %v15546_v2  ;;  %v15563_v3 = vld [vmem:[#allocation156_spill] sm:$0xff] }
 0x59a   : > { %v1517_v43 = vadd.f32 %v1509_v29, %v10211_v51  ;;  %v1518_v40 = vadd.f32 %v1510_v34, %v10222_v37  ;;  %v1622_v21 = vsel %vm1614_vm13, %v15551_v23, %v15550_v12  ;;  %v10389_v16 = vadd.f32 %v1511_v13, %v1446_v46  ;;  %v10399_v37 = vld [vmem:[%s7568_s12] sm:$0xff] }
 0x59b   : > { %3554 = vrot.lane.b32.xlu1 %v10385_v17, %s7097_s16  ;;  %v10391_v49 = vadd.f32 %v1512_v62, %v1447_v33  ;;  %v1448_v9 = vadd.f32 %v1440_v6, %v10235_v14  ;;  %v1618_v51 = vsel %vm1614_vm13, %v15550_v12, %v15551_v23  ;;  %15552 = vst [vmem:[#allocation71_spill] sm:$0xff] %v10399_v37  ;;  %v15553_v33 = vld [vmem:[#allocation414_spill] sm:$0xff]  ;;  %v15554_v23 = vld [vmem:[#allocation416_spill] sm:$0xff]  ;;  %v15559_v12 = vld [vmem:[#allocation155_spill] sm:$0xff]  ;;  %vm2538_vm11 = vcmp.lt.s32.totalorder %v9272_v10, 126 }
 0x59c   : > { %4055 = vrot.lane.b32.xlu0 %v10399_v37, %s7112_s26  ;;  %v1449_v29 = vadd.f32 %v1441_v4, %v10252_v35  ;;  %v1489_v13 = vmul.f32 %v9859_v31, %v1475_v36  ;;  %v1633_v62 = vmul.f32 %v10030_v55, %v1620_v24  ;;  %v1634_v34 = vmul.f32 %v10034_v63, %v1616_v5  ;;  %v10419_v35 = vpop.permute.xlu1 %3191  ;;  %v10421_v31 = vpop.permute.xlu0 %3621  ;;  %v15558_v5 = vld [vmem:[#allocation163_spill] sm:$0xff] }
 0x59d   : > { %v1490_v14 = vmul.f32 %v15524_v48, %v1471_v42  ;;  %v10409_v46 = vmul.f32 %v10030_v55, %v1622_v21  ;;  %v10413_v6 = vrot.slane %v15553_v33, %v10102_v22  ;;  %v10417_v2 = vrot.slane %v15554_v23, %v10102_v22  ;;  %15555 = vst [vmem:[#allocation67_spill] sm:$0xff] %v10419_v35  ;;  %v15557_v48 = vld [vmem:[#allocation159_spill] sm:$0xff]  ;;  %v10434_v42 = vld [vmem:[#allocation6 + $0x10] sm:$0xff] }
 0x59e   : > { %15556 = vst [vmem:[#allocation65_spill] sm:$0xff] %v10421_v31  ;;  %v10423_v4 = vadd.f32 %v1582_v61, %v1517_v43  ;;  %v10425_v36 = vadd.f32 %v1583_v59, %v1518_v40  ;;  %v1547_v21 = vsel %vm1541_vm12, %v15558_v5, %v15557_v48  ;;  %v10432_v24 = vmul.f32 %v10034_v63, %v1618_v51  ;;  %v15560_v59 = vld [vmem:[#allocation161_spill] sm:$0xff] }
 0x59f   : > { %3667 = vperm.xlu1 %6361, %v10434_v42   ;;  %v1513_v35 = vmul.f32 %v15559_v12, %v1489_v13  ;;  %v1514_v31 = vmul.f32 %v15559_v12, %v1490_v14  ;;  %v1543_v61 = vsel %vm1541_vm12, %v15557_v48, %v15558_v5  ;;  %v15561_v43 = vld [vmem:[#allocation165_spill] sm:$0xff]  ;;  %v10453_v28 = vmul.f32 %v15563_v3, %v1633_v62  ;;  %v15564_v14 = vld [vmem:[#allocation162_spill] sm:$0xff] }
 0x5a0   : > { %v1549_v40 = vsel %vm1541_vm12, %v15561_v43, %v15560_v59  ;;  %v10448_v51 = vld [vmem:[%s7568_s12 + $0x8] sm:$0xff]  ;;  %v10456_v13 = vmul.f32 %v15563_v3, %v1634_v34  ;;  %v15565_v12 = vld [vmem:[#allocation158_spill] sm:$0xff]  ;;  %v1515_v38 = vmul.f32 %v15566_v52, %v10272_v47  ;;  %v1516_v62 = vmul.f32 %v15566_v52, %v10292_v57  ;;  %v10475_v34 = vpop.permute.xlu1 %3254 }
 0x5a1   : > { %15562 = vst [vmem:[#allocation66_spill] sm:$0xff] %v10448_v51  ;;  %4063 = vrot.lane.b32.xlu0 %v10448_v51, %s7112_s26  ;;  %v1688_v48 = vsel %vm1687_vm14, %v15565_v12, %v15564_v14  ;;  %v1692_v5 = vsel %vm1687_vm14, %v15564_v14, %v15565_v12  ;;  %v1560_v23 = vmul.f32 %v15534_v45, %v1547_v21  ;;  %15567 = vst [vmem:[#allocation62_spill] sm:$0xff] %v10475_v34  ;;  %v15568_v14 = vld [vmem:[#allocation164_spill] sm:$0xff]  ;;  %v15570_v57 = vmov 42  }
 0x5a2   : > { %v1545_v3 = vsel %vm1541_vm12, %v15560_v59, %v15561_v43  ;;  %v1561_v33 = vmul.f32 %v15535_v50, %v1543_v61  ;;  %v1564_v51 = vmul.f32 %v15534_v45, %v1549_v40  ;;  %v15569_v12 = vld [vmem:[#allocation160_spill] sm:$0xff]  ;;  %v1521_v21 = vadd.f32 %v1513_v35, %v1448_v9  ;;  %v10494_v61 = vpop.permute.xlu0 %3690  ;;  %v6553_v40 = vld [vmem:[#allocation6 + $0x18] sm:$0xff] }
 0x5a3   : > { %v1690_v47 = vsel %vm1687_vm14, %v15569_v12, %v15568_v14  ;;  %v1694_v52 = vsel %vm1687_vm14, %v15568_v14, %v15569_v12  ;;  %6363 = vset.pattern.permute.xlu1 %v15570_v57  ;;  %v1704_v59 = vmul.f32 %v10135_v44, %v1692_v5  ;;  %v1705_v43 = vmul.f32 %v10142_v60, %v1688_v48  ;;  %v10491_v45 = vld [vmem:[#allocation6] sm:$0xff]  ;;  %v15572_v12 = vld [vmem:[#allocation167_spill] sm:$0xff] }
 0x5a4   : > { %3732 = vperm.xlu1 %6363, %v10491_v45   ;;  %15571 = vst [vmem:[#allocation68_spill] sm:$0xff] %v10494_v61  ;;  %v1522_v34 = vadd.f32 %v1514_v31, %v1449_v29  ;;  %v1565_v14 = vmul.f32 %v15535_v50, %v1545_v3  ;;  %v1584_v57 = vmul.f32 %v15572_v12, %v1560_v23  ;;  %v10507_v61 = vpop.permute.xlu1 %3262  ;;  %v15575_v31 = vld [vmem:[#allocation171_spill] sm:$0xff]  ;;  %v15579_v3 = vld [vmem:[#allocation166_spill] sm:$0xff]  ;;  %vm3925_vm12 = vcmp.lt.s32.totalorder %v9272_v10, 80 }
 0x5a5   : > { %4109 = vperm.xlu0 %6376, %v6553_v40   ;;  %v1585_v9 = vmul.f32 %v15572_v12, %v1561_v33  ;;  %v1523_v35 = vadd.f32 %v1515_v38, %v10329_v18  ;;  %v1524_v48 = vadd.f32 %v1516_v62, %v10344_v11  ;;  %v10502_v5 = vmul.f32 %v10135_v44, %v1694_v52  ;;  %v15574_v40 = vld [vmem:[#allocation146_spill] sm:$0xff]  ;;  %v15576_v50 = vld [vmem:[#allocation175_spill] sm:$0xff]  ;;  %v15577_v33 = vld [vmem:[#allocation417_spill] sm:$0xff] }
 0x5a6   : > { %v10505_v37 = vmul.f32 %v10142_v60, %v1690_v47  ;;  %15573 = vst [vmem:[#allocation74_spill] sm:$0xff] %v10507_v61  ;;  %v1588_v29 = vmul.f32 %v15574_v40, %v1564_v51  ;;  %v1619_v23 = vsel %vm1614_vm13, %v15576_v50, %v15575_v31  ;;  %v10516_v38 = vrot.slane %v15577_v33, %v10102_v22  ;;  %v15578_v11 = vld [vmem:[#allocation419_spill] sm:$0xff]  ;;  %v15583_v33 = vld [vmem:[#allocation170_spill] sm:$0xff] }
 0x5a7   : > { %v10520_v18 = vrot.slane %v15578_v11, %v10102_v22  ;;  %v1615_v62 = vsel %vm1614_vm13, %v15575_v31, %v15576_v50  ;;  %v1728_v51 = vmul.f32 %v15579_v3, %v1704_v59  ;;  %v10528_v47 = vmul.f32 %v15579_v3, %v1705_v43  ;;  %v15580_v11 = vld [vmem:[#allocation169_spill] sm:$0xff]  ;;  %v15582_v3 = vld [vmem:[#allocation174_spill] sm:$0xff] }
 0x5a8   : > { %3477 = vrot.lane.b32.xlu1 %v10207_v32, %s7095_s20  ;;  %v1589_v52 = vmul.f32 %v15574_v40, %v1565_v14  ;;  %v1592_v12 = vadd.f32 %v1584_v57, %v10389_v16  ;;  %v1593_v61 = vadd.f32 %v1585_v9, %v10391_v49  ;;  %v1586_v31 = vmul.f32 %v15580_v11, %v10353_v54  ;;  %v10551_v49 = vpop.permute.xlu1 %3375  ;;  %v10553_v54 = vpop.permute.xlu0 %3698  ;;  %v15587_v40 = vld [vmem:[#allocation172_spill] sm:$0xff] }
 0x5a9   : > { %3996 = vrot.lane.b32.xlu0 %v10258_v53, %s7109_s25  ;;  %v15581_v50 = vmov 0   ;;  %v1587_v59 = vmul.f32 %v15580_v11, %v10356_v30  ;;  %v1631_v43 = vmul.f32 %v10030_v55, %v1619_v23  ;;  %v1762_v14 = vsel %vm1760_vm15, %v15583_v33, %v15582_v3  ;;  %15584 = vst [vmem:[#allocation70_spill] sm:$0xff] %v10551_v49  ;;  %15585 = vst [vmem:[#allocation73_spill] sm:$0xff] %v10553_v54  ;;  %v15586_v30 = vld [vmem:[#allocation176_spill] sm:$0xff]  ;;  %v10579_v49 = vld [vmem:[%s7568_s12 + $0x28] sm:$0xff] }
 0x5aa   : > { %6377 = vset.pattern.permute.xlu0 %v15581_v50  ;;  %v1766_v16 = vsel %vm1760_vm15, %v15582_v3, %v15583_v33  ;;  %v1632_v57 = vmul.f32 %v10034_v63, %v1615_v62  ;;  %v10556_v9 = vadd.f32 %v1588_v29, %v1523_v35  ;;  %v1764_v23 = vsel %vm1760_vm15, %v15587_v40, %v15586_v30  ;;  %v15588_v50 = vld [vmem:[#allocation177_spill] sm:$0xff]  ;;  %v15590_v29 = vld [vmem:[#allocation179_spill] sm:$0xff] }
 0x5ab   : > { %v1768_v11 = vsel %vm1760_vm15, %v15586_v30, %v15587_v40  ;;  %v15589_v33 = vld [vmem:[#allocation173_spill] sm:$0xff]  ;;  %v1655_v62 = vmul.f32 %v15590_v29, %v1631_v43  ;;  %v1597_v40 = vadd.f32 %v1589_v52, %v1524_v48  ;;  %v1779_v54 = vmul.f32 %v10200_v20, %v1766_v16 }
 0x5ac   : > { %v1617_v3 = vsel %vm1614_vm13, %v15589_v33, %v15588_v50  ;;  %v1621_v35 = vsel %vm1614_vm13, %v15588_v50, %v15589_v33  ;;  %3485 = vrot.lane.b32.xlu1 %v10258_v53, %s7095_s20  ;;  %v1656_v30 = vmul.f32 %v15590_v29, %v1632_v57  ;;  %v1780_v27 = vmul.f32 %v10204_v39, %v1762_v14  ;;  %v10592_v7 = vpop.permute.xlu0 %3744  ;;  %v10602_v14 = vpop.permute.xlu1 %3440  ;;  %s7113_s20 = smov 77   ;;  %v15597_v16 = vld [vmem:[#allocation181_spill] sm:$0xff] }
 0x5ad   : > { %4067 = vrot.lane.b32.xlu0 %v10579_v49, %s7112_s26  ;;  %v10587_v50 = vadd.f32 %v10453_v28, %v1592_v12  ;;  %v10590_v43 = vadd.f32 %v10456_v13, %v1593_v61  ;;  %v1594_v33 = vadd.f32 %v1586_v31, %v1521_v21  ;;  %v1595_v56 = vadd.f32 %v1587_v59, %v1522_v34  ;;  %v15593_v13 = vld [vmem:[#allocation191_spill] sm:$0xff]  ;;  %v15596_v31 = vld [vmem:[#allocation420_spill] sm:$0xff]  ;;  %v15602_v29 = vld [vmem:[#allocation185_spill] sm:$0xff] }
 0x5ae   : > { %15591 = vst [vmem:[#allocation69_spill] sm:$0xff] %v10592_v7  ;;  %v1635_v19 = vmul.f32 %v10030_v55, %v1621_v35  ;;  %v1636_v15 = vmul.f32 %v10034_v63, %v1617_v3  ;;  %v10597_v48 = vmul.f32 %v10200_v20, %v1768_v11  ;;  %v10600_v52 = vmul.f32 %v10204_v39, %v1764_v23  ;;  %v15594_v61 = vld [vmem:[#allocation187_spill] sm:$0xff]  ;;  %v15598_v11 = vld [vmem:[#allocation184_spill] sm:$0xff]  ;;  %v15607_v7 = vld [vmem:[#allocation182_spill] sm:$0xff] }
 0x5af   : > { %15592 = vst [vmem:[#allocation75_spill] sm:$0xff] %v10602_v14  ;;  %v1663_v28 = vadd.f32 %v1655_v62, %v10423_v4  ;;  %v1691_v34 = vsel %vm1687_vm14, %v15594_v61, %v15593_v13  ;;  %v1695_v55 = vsel %vm1687_vm14, %v15593_v13, %v15594_v61  ;;  %v1664_v63 = vadd.f32 %v1656_v30, %v10425_v36  ;;  %v15595_v4 = vld [vmem:[#allocation178_spill] sm:$0xff]  ;;  %v15599_v3 = vld [vmem:[#allocation180_spill] sm:$0xff] }
 0x5b0   : > { %3556 = vrot.lane.b32.xlu1 %v10579_v49, %s7097_s16  ;;  %v10619_v21 = vmul.f32 %v15595_v4, %v1779_v54  ;;  %v10622_v12 = vmul.f32 %v15595_v4, %v1780_v27  ;;  %v10626_v59 = vrot.slane %v15596_v31, %v10102_v22  ;;  %v1659_v57 = vmul.f32 %v15597_v16, %v1635_v19  ;;  %v10638_v27 = vpop.permute.xlu0 %3809  ;;  %v15601_v54 = vld [vmem:[#allocation189_spill] sm:$0xff]  ;;  %v10650_v13 = vpop.permute.xlu1 %3185  ;;  %v15604_v4 = vld [vmem:[#allocation183_spill] sm:$0xff] }
 0x5b1   : > { %4130 = vrot.lane.b32.xlu0 %v10336_v0, %s7113_s20  ;;  %v1660_v23 = vmul.f32 %v15597_v16, %v1636_v15  ;;  %v1834_v35 = vsel %vm1833_vm0, %v15599_v3, %v15598_v11  ;;  %v1838_v36 = vsel %vm1833_vm0, %v15598_v11, %v15599_v3  ;;  %15600 = vst [vmem:[#allocation72_spill] sm:$0xff] %v10638_v27  ;;  %15603 = vst [vmem:[#allocation76_spill] sm:$0xff] %v10650_v13  ;;  %v15605_v11 = vld [vmem:[#allocation421_spill] sm:$0xff] }
 0x5b2   : > { %v1689_v62 = vsel %vm1687_vm14, %v15602_v29, %v15601_v54  ;;  %v1693_v15 = vsel %vm1687_vm14, %v15601_v54, %v15602_v29  ;;  %v1710_v19 = vmul.f32 %v10135_v44, %v1695_v55  ;;  %v1711_v30 = vmul.f32 %v10142_v60, %v1691_v34  ;;  %v15606_v29 = vld [vmem:[#allocation186_spill] sm:$0xff]  ;;  %v15611_v13 = vld [vmem:[#allocation193_spill] sm:$0xff] }
 0x5b3   : > { %v10652_v61 = vadd.f32 %v1728_v51, %v1663_v28  ;;  %v1661_v16 = vmul.f32 %v15604_v4, %v10409_v46  ;;  %v10659_v3 = vrot.slane %v15605_v11, %v10102_v22  ;;  %v10666_v34 = vadd.f32 %v10528_v47, %v1664_v63 }
 0x5b4   : > { %3619 = vrot.lane.b32.xlu1 %v10336_v0, %s7099_s19  ;;  %v1662_v51 = vmul.f32 %v15604_v4, %v10432_v24  ;;  %v1850_v46 = vmul.f32 %v10323_v41, %v1838_v36  ;;  %v1851_v28 = vmul.f32 %v10333_v8, %v1834_v35  ;;  %v1706_v55 = vmul.f32 %v10135_v44, %v1693_v15  ;;  %v10682_v63 = vpop.permute.xlu0 %3694  ;;  %v15609_v4 = vld [vmem:[#allocation168_spill] sm:$0xff]  ;;  %v10686_v15 = vpop.permute.xlu1 %3193 }
 0x5b5   : > { %4138 = vrot.lane.b32.xlu0 %v10385_v17, %s7113_s20  ;;  %v1707_v54 = vmul.f32 %v10142_v60, %v1689_v62  ;;  %v1836_v27 = vsel %vm1833_vm0, %v15607_v7, %v15606_v29  ;;  %v1840_v47 = vsel %vm1833_vm0, %v15606_v29, %v15607_v7  ;;  %15608 = vst [vmem:[#allocation77_spill] sm:$0xff] %v10682_v63  ;;  %15610 = vst [vmem:[#allocation78_spill] sm:$0xff] %v10686_v15  ;;  %v4201_v60 = vld [vmem:[#allocation8] sm:$0xff]  ;;  %v15620_v15 = vld [vmem:[#allocation195_spill] sm:$0xff] }
 0x5b6   : > { %v1667_v24 = vadd.f32 %v1659_v57, %v1594_v33  ;;  %v1668_v36 = vadd.f32 %v1660_v23, %v1595_v56  ;;  %v1734_v35 = vmul.f32 %v15609_v4, %v1710_v19  ;;  %v1735_v44 = vmul.f32 %v15609_v4, %v1711_v30  ;;  %v15612_v57 = vld [vmem:[#allocation188_spill] sm:$0xff]  ;;  %v15613_v19 = vld [vmem:[#allocation197_spill] sm:$0xff] }
 0x5b7   : > { %v1669_v62 = vadd.f32 %v1661_v16, %v10556_v9  ;;  %v1730_v14 = vmul.f32 %v15611_v13, %v1706_v55  ;;  %v1731_v11 = vmul.f32 %v15611_v13, %v1707_v54  ;;  %v1670_v7 = vadd.f32 %v1662_v51, %v1597_v40  ;;  %v15614_v9 = vld [vmem:[#allocation201_spill] sm:$0xff]  ;;  %v15615_v16 = vld [vmem:[#allocation192_spill] sm:$0xff] }
 0x5b8   : > { %3627 = vrot.lane.b32.xlu1 %v10385_v17, %s7099_s19  ;;  %v10694_v56 = vmul.f32 %v10323_v41, %v1840_v47  ;;  %v10697_v33 = vmul.f32 %v10333_v8, %v1836_v27  ;;  %v10700_v23 = vmul.f32 %v15612_v57, %v1850_v46  ;;  %v1765_v30 = vsel %vm1760_vm15, %v15614_v9, %v15613_v19  ;;  %v15616_v55 = vld [vmem:[#allocation196_spill] sm:$0xff]  ;;  %v15617_v51 = vld [vmem:[#allocation425_spill] sm:$0xff]  ;;  %v3764_v54 = vpop.permute.xlu0 %3763 }
 0x5b9   : > { %4207 = vperm.xlu0 %6377, %v4201_v60   ;;  %v10707_v13 = vmul.f32 %v15612_v57, %v1851_v28  ;;  %v1912_v40 = vsel %vm1906_vm1, %v15616_v55, %v15615_v16  ;;  %v10715_v27 = vrot.slane %v15617_v51, %v10102_v22  ;;  %v1761_v46 = vsel %vm1760_vm15, %v15613_v19, %v15614_v9  ;;  %v15618_v28 = vld [vmem:[#allocation426_spill] sm:$0xff]  ;;  %v10729_v60 = vpop.permute.xlu1 %3264  ;;  %v15625_v9 = vld [vmem:[#allocation205_spill] sm:$0xff] }
 0x5ba   : > { %v10721_v29 = vadd.f32 %v1734_v35, %v1669_v62  ;;  %v10723_v47 = vadd.f32 %v1735_v44, %v1670_v7  ;;  %v10727_v4 = vrot.slane %v15618_v28, %v10102_v22  ;;  %15619 = vst [vmem:[#allocation81_spill] sm:$0xff] %v10729_v60  ;;  %v1738_v57 = vadd.f32 %v1730_v14, %v10587_v50  ;;  %v15621_v14 = vld [vmem:[#allocation198_spill] sm:$0xff]  ;;  %v15623_v62 = vld [vmem:[#allocation199_spill] sm:$0xff] }
 0x5bb   : > { %v1739_v63 = vadd.f32 %v1731_v11, %v10590_v43  ;;  %v1732_v51 = vmul.f32 %v15620_v15, %v10502_v5  ;;  %v1733_v22 = vmul.f32 %v15620_v15, %v10505_v37  ;;  %v1777_v35 = vmul.f32 %v10200_v20, %v1765_v30  ;;  %v15622_v11 = vld [vmem:[#allocation194_spill] sm:$0xff]  ;;  %v15624_v7 = vld [vmem:[#allocation203_spill] sm:$0xff] }
 0x5bc   : > { %3740 = vperm.xlu1 %6363, %v10434_v42   ;;  %v1908_v50 = vsel %vm1906_vm1, %v15615_v16, %v15616_v55  ;;  %v1925_v43 = vmul.f32 %v10413_v6, %v1912_v40  ;;  %v1778_v5 = vmul.f32 %v10204_v39, %v1761_v46  ;;  %v1910_v44 = vsel %vm1906_vm1, %v15622_v11, %v15621_v14  ;;  %v3772_v15 = vpop.permute.xlu0 %3771 }
 0x5bd   : > { %4069 = vrot.lane.b32.xlu0 %v10258_v53, %s7112_s26  ;;  %v1914_v37 = vsel %vm1906_vm1, %v15621_v14, %v15622_v11  ;;  %v1767_v19 = vsel %vm1760_vm15, %v15624_v7, %v15623_v62  ;;  %v1801_v30 = vmul.f32 %v15625_v9, %v1777_v35  ;;  %v10763_v16 = vpop.permute.xlu1 %3327  ;;  %v10767_v55 = vsel %vm3779_vm3, %v3764_v54, %v3772_v15 }
 0x5be   : > { %15626 = vst [vmem:[#allocation85_spill] sm:$0xff] %v10763_v16  ;;  %15627 = vst [vmem:[#allocation79_spill] sm:$0xff] %v10767_v55  ;;  %v10771_v40 = vsel %vm3779_vm3, %v3772_v15, %v3764_v54  ;;  %v1763_v46 = vsel %vm1760_vm15, %v15623_v62, %v15624_v7  ;;  %v1802_v14 = vmul.f32 %v15625_v9, %v1778_v5  ;;  %v10780_v11 = vsub.s32 3, %v9252_v1  ;;  %v15630_v9 = vld [vmem:[#allocation200_spill] sm:$0xff] }
 0x5bf   : > { %15628 = vst [vmem:[#allocation83_spill] sm:$0xff] %v10771_v40  ;;  %v1926_v35 = vmul.f32 %v10417_v2, %v1908_v50  ;;  %v15629_v16 = vmov 43   ;;  %v10786_v54 = vadd.f32 %v10619_v21, %v1738_v57  ;;  %v10789_v15 = vadd.f32 %v10622_v12, %v1739_v63  ;;  %v15631_v63 = vld [vmem:[#allocation206_spill] sm:$0xff] }
 0x5c0   : > { %6365 = vset.pattern.permute.xlu1 %v15629_v16  ;;  %v1740_v60 = vadd.f32 %v1732_v51, %v1667_v24  ;;  %v1741_v62 = vadd.f32 %v1733_v22, %v1668_v36  ;;  %v1781_v50 = vmul.f32 %v10200_v20, %v1767_v19  ;;  %v10794_v5 = vmul.f32 %v10413_v6, %v1914_v37  ;;  %v15632_v24 = vld [vmem:[#allocation202_spill] sm:$0xff]  ;;  %v15634_v22 = vld [vmem:[#allocation213_spill] sm:$0xff]  ;;  %v15636_v37 = vld [vmem:[#allocation207_spill] sm:$0xff] }
 0x5c1   : > { %4140 = vrot.lane.b32.xlu0 %v10579_v49, %s7113_s20  ;;  %3805 = vperm.xlu1 %6365, %v10491_v45   ;;  %v10797_v7 = vmul.f32 %v10417_v2, %v1910_v44  ;;  %v10800_v16 = vmul.f32 %v15630_v9, %v1925_v43  ;;  %v1782_v21 = vmul.f32 %v10204_v39, %v1763_v46  ;;  %v10812_v51 = vpop.permute.xlu1 %3335  ;;  %v15635_v43 = vld [vmem:[#allocation217_spill] sm:$0xff]  ;;  %v15638_v46 = vld [vmem:[#allocation215_spill] sm:$0xff]  ;;  %vm2611_vm13 = vcmp.lt.s32.totalorder %v9272_v10, 125 }
 0x5c2   : > { %v1809_v12 = vadd.f32 %v1801_v30, %v10652_v61  ;;  %v1980_v36 = vsel %vm1979_vm2, %v15632_v24, %v15631_v63  ;;  %v1984_v20 = vsel %vm1979_vm2, %v15631_v63, %v15632_v24  ;;  %15633 = vst [vmem:[#allocation87_spill] sm:$0xff] %v10812_v51  ;;  %v1810_v57 = vadd.f32 %v1802_v14, %v10666_v34  ;;  %v15637_v30 = vld [vmem:[#allocation211_spill] sm:$0xff]  ;;  %v15639_v24 = vld [vmem:[#allocation204_spill] sm:$0xff] }
 0x5c3   : > { %v1841_v39 = vsel %vm1833_vm0, %v15635_v43, %v15634_v22  ;;  %v10820_v61 = vmul.f32 %v15630_v9, %v1926_v35  ;;  %v10825_v44 = vrot.slane %v9415_v25, %v10780_v11  ;;  %v1805_v19 = vmul.f32 %v15636_v37, %v1781_v50  ;;  %v4204_v9 = vld [vmem:[#allocation8 + $0x18] sm:$0xff] }
 0x5c4   : > { %v1806_v34 = vmul.f32 %v15636_v37, %v1782_v21  ;;  %v1839_v14 = vsel %vm1833_vm0, %v15638_v46, %v15637_v30  ;;  %v1837_v35 = vsel %vm1833_vm0, %v15634_v22, %v15635_v43  ;;  %v1996_v63 = vmul.f32 %v10516_v38, %v1984_v20  ;;  %v15640_v21 = vld [vmem:[#allocation208_spill] sm:$0xff] }
 0x5c5   : > { %4134 = vrot.lane.b32.xlu0 %v10207_v32, %s7113_s20  ;;  %3550 = vrot.lane.b32.xlu1 %v10207_v32, %s7097_s16  ;;  %v1997_v50 = vmul.f32 %v10520_v18, %v1980_v36  ;;  %v1986_v37 = vsel %vm1979_vm2, %v15640_v21, %v15639_v24  ;;  %v10849_v51 = vrot.slane %v9418_v58, %v10780_v11  ;;  %v10863_v43 = vpop.permute.xlu1 %3448  ;;  %vm2684_vm14 = vcmp.lt.s32.totalorder %v9272_v10, 115 }
 0x5c6   : > { %v10852_v40 = vadd.f32 %v10700_v23, %v1809_v12  ;;  %v1835_v22 = vsel %vm1833_vm0, %v15637_v30, %v15638_v46  ;;  %v1856_v20 = vmul.f32 %v10323_v41, %v1841_v39  ;;  %v1982_v36 = vsel %vm1979_vm2, %v15639_v24, %v15640_v21  ;;  %15641 = vst [vmem:[#allocation82_spill] sm:$0xff] %v10863_v43  ;;  %v15642_v23 = vld [vmem:[#allocation209_spill] sm:$0xff]  ;;  %v15649_v21 = vld [vmem:[#allocation210_spill] sm:$0xff] }
 0x5c7   : > { %v10866_v55 = vadd.f32 %v10707_v13, %v1810_v57  ;;  %v1807_v12 = vmul.f32 %v15642_v23, %v10597_v48  ;;  %v1852_v58 = vmul.f32 %v10323_v41, %v1839_v14  ;;  %v1857_v25 = vmul.f32 %v10333_v8, %v1837_v35  ;;  %v15643_v13 = vld [vmem:[#allocation219_spill] sm:$0xff] }
 0x5c8   : > { %v10872_v30 = vadd.f32 %v1805_v19, %v1740_v60  ;;  %v10874_v39 = vadd.f32 %v1806_v34, %v1741_v62  ;;  %v1808_v46 = vmul.f32 %v15642_v23, %v10600_v52  ;;  %v10879_v24 = vmul.f32 %v10516_v38, %v1986_v37  ;;  %v15644_v60 = vld [vmem:[#allocation214_spill] sm:$0xff]  ;;  %v15647_v14 = vld [vmem:[#allocation223_spill] sm:$0xff] }
 0x5c9   : > { %4222 = vperm.xlu0 %6377, %v4204_v9   ;;  %3558 = vrot.lane.b32.xlu1 %v10258_v53, %s7097_s16  ;;  %v1853_v48 = vmul.f32 %v10333_v8, %v1835_v22  ;;  %v1876_v41 = vmul.f32 %v15643_v13, %v1852_v58  ;;  %v10886_v57 = vmul.f32 %v10520_v18, %v1982_v36  ;;  %v15645_v19 = vld [vmem:[#allocation218_spill] sm:$0xff]  ;;  %v15648_v35 = vld [vmem:[#allocation227_spill] sm:$0xff]  ;;  %v10903_v8 = vpop.permute.xlu0 %3817  ;;  %v4242_v22 = vld [vmem:[#allocation12 + $0x8] sm:$0xff]  ;;  %vm2757_vm15 = vcmp.lt.s32.totalorder %v9272_v10, 114  ;;  %s16208_s16 = sshll.u32 %s7562_s17, 6 }
 0x5ca   : > { %v2058_v62 = vsel %vm2052_vm4, %v15645_v19, %v15644_v60  ;;  %v15646_v34 = vld [vmem:[#allocation190_spill] sm:$0xff]  ;;  %v1911_v9 = vsel %vm1906_vm1, %v15648_v35, %v15647_v14  ;;  %v10898_v37 = vmul.f32 %v15649_v21, %v1996_v63  ;;  %v10901_v58 = vmul.f32 %v15649_v21, %v1997_v50  ;;  %15650 = vst [vmem:[#allocation86_spill] sm:$0xff] %v10903_v8  ;;  %v10912_v28 = vpop.permute.xlu1 %3513  ;;  %v4246_v8 = vld [vmem:[#allocation14 + $0x8] sm:$0xff] }
 0x5cb   : > { %v1880_v52 = vmul.f32 %v15646_v34, %v1856_v20  ;;  %v1815_v36 = vadd.f32 %v1807_v12, %v10721_v29  ;;  %v1881_v23 = vmul.f32 %v15646_v34, %v1857_v25  ;;  %v1877_v20 = vmul.f32 %v15643_v13, %v1853_v48  ;;  %15651 = vst [vmem:[#allocation89_spill] sm:$0xff] %v10912_v28  ;;  %v15652_v25 = vld [vmem:[#allocation438_spill] sm:$0xff]  ;;  %v15653_v13 = vld [vmem:[#allocation220_spill] sm:$0xff] }
 0x5cc   : > { %v2054_v43 = vsel %vm2052_vm4, %v15644_v60, %v15645_v19  ;;  %v1816_v63 = vadd.f32 %v1808_v46, %v10723_v47  ;;  %v2071_v50 = vmul.f32 %v10626_v59, %v2058_v62  ;;  %v10918_v21 = vrot.slane %v9425_v26, %v10780_v11  ;;  %v15654_v60 = vld [vmem:[#allocation216_spill] sm:$0xff] }
 0x5cd   : > { %4357 = vperm.xlu0 %6377, %v4242_v22   ;;  %v10922_v29 = vrot.slane %v15652_v25, %v10780_v11  ;;  %3629 = vrot.lane.b32.xlu1 %v10579_v49, %s7099_s19  ;;  %v1884_v12 = vadd.f32 %v1876_v41, %v10786_v54  ;;  %v1923_v48 = vmul.f32 %v10413_v6, %v1911_v9  ;;  %v15655_v41 = vld [vmem:[#allocation224_spill] sm:$0xff]  ;;  %v10948_v22 = vpop.permute.xlu0 %3882  ;;  %vm2830_vm0 = vcmp.lt.s32.totalorder %v9272_v10, 113 }
 0x5ce   : > { %v2056_v47 = vsel %vm2052_vm4, %v15654_v60, %v15653_v13  ;;  %v2060_v46 = vsel %vm2052_vm4, %v15653_v13, %v15654_v60  ;;  %v1907_v19 = vsel %vm1906_vm1, %v15647_v14, %v15648_v35  ;;  %v10940_v62 = vadd.f32 %v1880_v52, %v1815_v36  ;;  %v15656_v34 = vld [vmem:[#allocation228_spill] sm:$0xff]  ;;  %15657 = vst [vmem:[#allocation93_spill] sm:$0xff] %v10948_v22  ;;  %v15658_v60 = vld [vmem:[#allocation231_spill] sm:$0xff]  ;;  %v10958_v52 = vpop.permute.xlu1 %3258  ;;  %v15660_v14 = vld [vmem:[#allocation221_spill] sm:$0xff] }
 0x5cf   : > { %v2072_v54 = vmul.f32 %v10659_v3, %v2054_v43  ;;  %v2130_v9 = vsel %vm2125_vm5, %v15656_v34, %v15655_v41  ;;  %v1885_v13 = vadd.f32 %v1877_v20, %v10789_v15  ;;  %v1947_v28 = vmul.f32 %v15658_v60, %v1923_v48  ;;  %15659 = vst [vmem:[#allocation97_spill] sm:$0xff] %v10958_v52  ;;  %v15662_v48 = vld [vmem:[#allocation229_spill] sm:$0xff] }
 0x5d0   : > { %v10952_v25 = vadd.f32 %v1881_v23, %v1816_v63  ;;  %v2126_v43 = vsel %vm2125_vm5, %v15655_v41, %v15656_v34  ;;  %v1878_v35 = vmul.f32 %v15660_v14, %v10694_v56  ;;  %v1879_v36 = vmul.f32 %v15660_v14, %v10697_v33  ;;  %v15661_v63 = vld [vmem:[#allocation225_spill] sm:$0xff]  ;;  %v15663_v34 = vld [vmem:[#allocation230_spill] sm:$0xff] }
 0x5d1   : > { %4385 = vperm.xlu0 %6377, %v4246_v8   ;;  %v10965_v15 = vmul.f32 %v10626_v59, %v2060_v46  ;;  %v10968_v23 = vmul.f32 %v10659_v3, %v2056_v47  ;;  %3692 = vrot.lane.b32.xlu1 %v10336_v0, %s7101_s13  ;;  %v10973_v20 = vadd.f32 %v10800_v16, %v1884_v12  ;;  %v4244_v46 = vld [vmem:[#allocation12 + $0x18] sm:$0xff]  ;;  %v15664_v16 = vld [vmem:[#allocation226_spill] sm:$0xff]  ;;  %v10994_v14 = vpop.permute.xlu0 %3767 }
 0x5d2   : > { %v1924_v8 = vmul.f32 %v10417_v2, %v1907_v19  ;;  %v1913_v56 = vsel %vm1906_vm1, %v15662_v48, %v15661_v63  ;;  %v2142_v33 = vmul.f32 %v10715_v27, %v2130_v9  ;;  %v1909_v47 = vsel %vm1906_vm1, %v15661_v63, %v15662_v48  ;;  %15665 = vst [vmem:[#allocation84_spill] sm:$0xff] %v10994_v14  ;;  %v11004_v52 = vpop.permute.xlu1 %3266 }
 0x5d3   : > { %v2143_v41 = vmul.f32 %v10727_v4, %v2126_v43  ;;  %v2128_v12 = vsel %vm2125_vm5, %v15664_v16, %v15663_v34  ;;  %v2132_v19 = vsel %vm2125_vm5, %v15663_v34, %v15664_v16  ;;  %v10997_v9 = vadd.f32 %v10820_v61, %v1885_v13  ;;  %v15666_v43 = vld [vmem:[#allocation222_spill] sm:$0xff]  ;;  %15667 = vst [vmem:[#allocation88_spill] sm:$0xff] %v11004_v52  ;;  %v15671_v13 = vld [vmem:[#allocation232_spill] sm:$0xff]  ;;  %v15681_v52 = vld [vmem:[#allocation245_spill] sm:$0xff] }
 0x5d4   : > { %v1948_v22 = vmul.f32 %v15658_v60, %v1924_v8  ;;  %v1955_v63 = vadd.f32 %v1947_v28, %v10852_v40  ;;  %v11002_v48 = vmul.f32 %v15666_v43, %v2071_v50  ;;  %v1886_v26 = vadd.f32 %v1878_v35, %v10872_v30  ;;  %v15668_v30 = vld [vmem:[#allocation444_spill] sm:$0xff]  ;;  %v15672_v35 = vld [vmem:[#allocation445_spill] sm:$0xff] }
 0x5d5   : > { %4367 = vperm.xlu0 %6377, %v4244_v46   ;;  %v1887_v1 = vadd.f32 %v1879_v36, %v10874_v39  ;;  %v1927_v34 = vmul.f32 %v10413_v6, %v1913_v56  ;;  %v11010_v16 = vmul.f32 %v15666_v43, %v2072_v54  ;;  %3700 = vrot.lane.b32.xlu1 %v10385_v17, %s7101_s13  ;;  %v15669_v39 = vld [vmem:[#allocation237_spill] sm:$0xff]  ;;  %v3837_v8 = vpop.permute.xlu0 %3836  ;;  %v4248_v56 = vld [vmem:[#allocation14 + $0x18] sm:$0xff]  ;;  %vm2976_vm1 = vcmp.lt.s32.totalorder %v9272_v10, 111 }
 0x5d6   : > { %v1928_v28 = vmul.f32 %v10417_v2, %v1909_v47  ;;  %v11016_v40 = vmul.f32 %v10715_v27, %v2132_v19  ;;  %v11019_v61 = vmul.f32 %v10727_v4, %v2128_v12  ;;  %v11023_v50 = vrot.slane %v15668_v30, %v10780_v11  ;;  %v15670_v6 = vld [vmem:[#allocation241_spill] sm:$0xff]  ;;  %v15673_v12 = vld [vmem:[#allocation239_spill] sm:$0xff]  ;;  %v11051_v43 = vpop.permute.xlu1 %3337 }
 0x5d7   : > { %v1985_v54 = vsel %vm1979_vm2, %v15670_v6, %v15669_v39  ;;  %v11030_v60 = vmul.f32 %v15671_v13, %v2142_v33  ;;  %v11033_v2 = vmul.f32 %v15671_v13, %v2143_v41  ;;  %v11037_v36 = vrot.slane %v15672_v35, %v10780_v11  ;;  %v15674_v19 = vld [vmem:[#allocation243_spill] sm:$0xff]  ;;  %15675 = vst [vmem:[#allocation92_spill] sm:$0xff] %v11051_v43  ;;  %v15676_v13 = vld [vmem:[#allocation233_spill] sm:$0xff]  ;;  %v15679_v43 = vld [vmem:[#allocation236_spill] sm:$0xff] }
 0x5d8   : > { %v1956_v46 = vadd.f32 %v1948_v22, %v10866_v55  ;;  %v11041_v47 = vadd.f32 %v10898_v37, %v1955_v63  ;;  %v1981_v33 = vsel %vm1979_vm2, %v15669_v39, %v15670_v6  ;;  %v1987_v41 = vsel %vm1979_vm2, %v15674_v19, %v15673_v12  ;;  %v15677_v37 = vld [vmem:[#allocation235_spill] sm:$0xff] }
 0x5d9   : > { %4395 = vperm.xlu0 %6377, %v4248_v56   ;;  %v1951_v14 = vmul.f32 %v15676_v13, %v1927_v34  ;;  %v1952_v55 = vmul.f32 %v15676_v13, %v1928_v28  ;;  %v1953_v22 = vmul.f32 %v15677_v37, %v10794_v5  ;;  %v1983_v63 = vsel %vm1979_vm2, %v15673_v12, %v15674_v19  ;;  %v15678_v56 = vld [vmem:[#allocation240_spill] sm:$0xff]  ;;  %v4250_v28 = vld [vmem:[#allocation17 + $0x8] sm:$0xff]  ;;  %v3845_v13 = vpop.permute.xlu0 %3844 }
 0x5da   : > { %3813 = vperm.xlu1 %6365, %v10434_v42   ;;  %v1954_v39 = vmul.f32 %v15677_v37, %v10797_v7  ;;  %v1998_v6 = vmul.f32 %v10516_v38, %v1985_v54  ;;  %v2200_v34 = vsel %vm2198_vm6, %v15679_v43, %v15678_v56  ;;  %v2204_v5 = vsel %vm2198_vm6, %v15678_v56, %v15679_v43  ;;  %v15680_v7 = vld [vmem:[#allocation412_spill] sm:$0xff]  ;;  %v11083_v30 = vpop.permute.xlu1 %3400 }
 0x5db   : > { %v1999_v12 = vmul.f32 %v10520_v18, %v1981_v33  ;;  %v2002_v19 = vmul.f32 %v10516_v38, %v1987_v41  ;;  %v11078_v54 = vrot.slane %v15680_v7, %v10780_v11  ;;  %v2003_v37 = vmul.f32 %v10520_v18, %v1983_v63  ;;  %15682 = vst [vmem:[#allocation96_spill] sm:$0xff] %v11083_v30  ;;  %v15685_v18 = vld [vmem:[#allocation413_spill] sm:$0xff] }
 0x5dc   : > { %v2022_v35 = vmul.f32 %v15681_v52, %v1998_v6  ;;  %v11087_v43 = vsel %vm3852_vm8, %v3837_v8, %v3845_v13  ;;  %v11091_v38 = vsel %vm3852_vm8, %v3845_v13, %v3837_v8  ;;  %v11094_v33 = vadd.f32 %v10901_v58, %v1956_v46  ;;  %v15687_v8 = vld [vmem:[#allocation238_spill] sm:$0xff]  ;;  %v15690_v46 = vld [vmem:[#allocation212_spill] sm:$0xff] }
 0x5dd   : > { %15683 = vst [vmem:[#allocation80_spill] sm:$0xff] %v11087_v43  ;;  %15684 = vst [vmem:[#allocation90_spill] sm:$0xff] %v11091_v38  ;;  %4433 = vperm.xlu0 %6377, %v4250_v28   ;;  %v1959_v41 = vadd.f32 %v1951_v14, %v1886_v26  ;;  %v2023_v56 = vmul.f32 %v15681_v52, %v1999_v12  ;;  %v11099_v63 = vrot.slane %v15685_v18, %v10780_v11  ;;  %v15686_v6 = vmov 44   ;;  %v15688_v13 = vld [vmem:[#allocation242_spill] sm:$0xff]  ;;  %v15691_v28 = vld [vmem:[#allocation249_spill] sm:$0xff] }
 0x5de   : > { %6367 = vset.pattern.permute.xlu1 %v15686_v6  ;;  %v1960_v30 = vadd.f32 %v1952_v55, %v1887_v1  ;;  %v1961_v43 = vadd.f32 %v1953_v22, %v10940_v62  ;;  %v1962_v7 = vadd.f32 %v1954_v39, %v10952_v25  ;;  %v2206_v58 = vsel %vm2198_vm6, %v15688_v13, %v15687_v8  ;;  %v15689_v62 = vld [vmem:[#allocation71_spill] sm:$0xff]  ;;  %v11126_v12 = vpop.permute.xlu1 %3408  ;;  %v15715_v18 = vld [vmem:[#allocation262_spill] sm:$0xff] }
 0x5df   : > { %3878 = vperm.xlu1 %6367, %v10491_v45   ;;  %v2217_v26 = vmul.f32 %v10825_v44, %v2204_v5  ;;  %v2218_v52 = vmul.f32 %v10849_v51, %v2200_v34  ;;  %v2202_v1 = vsel %vm2198_vm6, %v15687_v8, %v15688_v13  ;;  %v11117_v14 = vmul.f32 %v15689_v62, %v11078_v54  ;;  %v4252_v25 = vld [vmem:[#allocation17 + $0x18] sm:$0xff]  ;;  %v15692_v5 = vld [vmem:[#allocation253_spill] sm:$0xff] }
 0x5e0   : > { %v2026_v55 = vmul.f32 %v15690_v46, %v2002_v19  ;;  %v2027_v22 = vmul.f32 %v15690_v46, %v2003_v37  ;;  %v2030_v39 = vadd.f32 %v2022_v35, %v10973_v20  ;;  %v2057_v34 = vsel %vm2052_vm4, %v15692_v5, %v15691_v28  ;;  %15693 = vst [vmem:[#allocation101_spill] sm:$0xff] %v11126_v12  ;;  %v15694_v20 = vld [vmem:[#allocation66_spill] sm:$0xff]  ;;  %v15695_v37 = vld [vmem:[#allocation247_spill] sm:$0xff]  ;;  %v15697_v46 = vld [vmem:[#allocation244_spill] sm:$0xff] }
 0x5e1   : > { %4443 = vperm.xlu0 %6377, %v4252_v25   ;;  %v2031_v6 = vadd.f32 %v2023_v56, %v10997_v9  ;;  %v2053_v8 = vsel %vm2052_vm4, %v15691_v28, %v15692_v5  ;;  %v11134_v19 = vmul.f32 %v10825_v44, %v2206_v58  ;;  %v11139_v35 = vmul.f32 %v15694_v20, %v11099_v63  ;;  %v11156_v58 = vpop.permute.xlu0 %3890  ;;  %v4254_v25 = vld [vmem:[#allocation17 + $0x28] sm:$0xff] }
 0x5e2   : > { %v2024_v13 = vmul.f32 %v15695_v37, %v10879_v24  ;;  %v11144_v62 = vmul.f32 %v10849_v51, %v2202_v1  ;;  %v11148_v9 = vmul.f32 %v10207_v32, %v11078_v54  ;;  %v11152_v56 = vmul.f32 %v10258_v53, %v11099_v63  ;;  %15696 = vst [vmem:[#allocation91_spill] sm:$0xff] %v11156_v58  ;;  %v11175_v38 = vpop.permute.xlu1 %3521 }
 0x5e3   : > { %3623 = vrot.lane.b32.xlu1 %v10207_v32, %s7099_s19  ;;  %v2025_v24 = vmul.f32 %v15695_v37, %v10886_v57  ;;  %v2069_v1 = vmul.f32 %v10626_v59, %v2057_v34  ;;  %v11162_v28 = vmul.f32 %v15697_v46, %v2217_v26  ;;  %v11165_v5 = vmul.f32 %v15697_v46, %v2218_v52  ;;  %v15699_v26 = vld [vmem:[#allocation257_spill] sm:$0xff]  ;;  %v15700_v37 = vld [vmem:[#allocation250_spill] sm:$0xff] }
 0x5e4   : > { %v11168_v20 = vadd.f32 %v11002_v48, %v2030_v39  ;;  %v2070_v12 = vmul.f32 %v10659_v3, %v2053_v8  ;;  %v11171_v32 = vadd.f32 %v2026_v55, %v1961_v43  ;;  %v11173_v58 = vadd.f32 %v2027_v22, %v1962_v7  ;;  %15698 = vst [vmem:[#allocation95_spill] sm:$0xff] %v11175_v38  ;;  %v15701_v52 = vld [vmem:[#allocation246_spill] sm:$0xff]  ;;  %v15702_v55 = vld [vmem:[#allocation255_spill] sm:$0xff]  ;;  %v15711_v38 = vld [vmem:[#allocation265_spill] sm:$0xff] }
 0x5e5   : > { %4453 = vperm.xlu0 %6377, %v4254_v25   ;;  %v11178_v57 = vadd.f32 %v11010_v16, %v2031_v6  ;;  %v2093_v34 = vmul.f32 %v15699_v26, %v2069_v1  ;;  %v2272_v48 = vsel %vm2271_vm7, %v15701_v52, %v15700_v37  ;;  %v2276_v43 = vsel %vm2271_vm7, %v15700_v37, %v15701_v52  ;;  %v15703_v22 = vld [vmem:[#allocation251_spill] sm:$0xff]  ;;  %v15704_v25 = vld [vmem:[#allocation252_spill] sm:$0xff]  ;;  %v15706_v46 = vld [vmem:[#allocation414_spill] sm:$0xff]  ;;  %v11212_v52 = vpop.permute.xlu0 %3955 }
 0x5e6   : > { %v2032_v7 = vadd.f32 %v2024_v13, %v1959_v41  ;;  %v2055_v39 = vsel %vm2052_vm4, %v15703_v22, %v15702_v55  ;;  %v2059_v16 = vsel %vm2052_vm4, %v15702_v55, %v15703_v22  ;;  %v2094_v6 = vmul.f32 %v15699_v26, %v2070_v12  ;;  %v15705_v1 = vld [vmem:[#allocation248_spill] sm:$0xff]  ;;  %15707 = vst [vmem:[#allocation99_spill] sm:$0xff] %v11212_v52  ;;  %v4256_v12 = vld [vmem:[#allocation17 + $0x38] sm:$0xff] }
 0x5e7   : > { %3631 = vrot.lane.b32.xlu1 %v10258_v53, %s7099_s19  ;;  %v2033_v8 = vadd.f32 %v2025_v24, %v1960_v30  ;;  %v2274_v41 = vsel %vm2271_vm7, %v15705_v1, %v15704_v25  ;;  %v2278_v13 = vsel %vm2271_vm7, %v15704_v25, %v15705_v1  ;;  %v11210_v37 = vrot.slane %v15706_v46, %v10780_v11  ;;  %v15708_v24 = vld [vmem:[#allocation416_spill] sm:$0xff]  ;;  %s14141_s19 = scalar_lea.vmem [#allocation23], %s16208_s16 }
 0x5e8   : > { %v2288_v53 = vmul.f32 %v10918_v21, %v2276_v43  ;;  %v2289_v30 = vmul.f32 %v10922_v29, %v2272_v48  ;;  %v11218_v26 = vrot.slane %v15708_v24, %v10780_v11  ;;  %v11222_v55 = vmul.f32 %v10336_v0, %v11078_v54  ;;  %v11231_v48 = vpop.permute.xlu1 %3586  ;;  %v15712_v24 = vld [vmem:[#allocation269_spill] sm:$0xff] }
 0x5e9   : > { %4463 = vperm.xlu0 %6377, %v4256_v12   ;;  %v2073_v22 = vmul.f32 %v10626_v59, %v2059_v16  ;;  %v2074_v25 = vmul.f32 %v10659_v3, %v2055_v39  ;;  %v2101_v1 = vadd.f32 %v2093_v34, %v11041_v47  ;;  %v11229_v43 = vmul.f32 %v10385_v17, %v11099_v63  ;;  %v15713_v3 = vld [vmem:[#allocation259_spill] sm:$0xff]  ;;  %v6555_v39 = vld [vmem:[%s7568_s12 + $0x20] sm:$0xff] }
 0x5ea   : > { %15710 = vst [vmem:[#allocation98_spill] sm:$0xff] %v11231_v48  ;;  %v2102_v52 = vadd.f32 %v2094_v6, %v11094_v33  ;;  %v2133_v46 = vsel %vm2125_vm5, %v15712_v24, %v15711_v38  ;;  %v11239_v12 = vmul.f32 %v10918_v21, %v2278_v13  ;;  %v11242_v59 = vmul.f32 %v10922_v29, %v2274_v41  ;;  %v4258_v6 = vld [vmem:[#allocation17 + $0x48] sm:$0xff]  ;;  %v15714_v13 = vld [vmem:[#allocation254_spill] sm:$0xff] }
 0x5eb   : > { %15709 = vst [vmem:[#allocation94_spill] sm:$0xff] %v11229_v43  ;;  %3702 = vrot.lane.b32.xlu1 %v10579_v49, %s7101_s13  ;;  %v2097_v47 = vmul.f32 %v15713_v3, %v2073_v22  ;;  %v2098_v34 = vmul.f32 %v15713_v3, %v2074_v25  ;;  %v11250_v33 = vmul.f32 %v6555_v39, %v11078_v54  ;;  %v15716_v43 = vld [vmem:[#allocation258_spill] sm:$0xff]  ;;  %v15719_v25 = vld [vmem:[#allocation263_spill] sm:$0xff]  ;;  %vm2903_vm2 = vcmp.lt.s32.totalorder %v9272_v10, 112 }
 0x5ec   : > { %v11254_v16 = vmul.f32 %v10579_v49, %v11099_v63  ;;  %v11257_v48 = vmul.f32 %v15714_v13, %v2288_v53  ;;  %v11260_v41 = vmul.f32 %v15714_v13, %v2289_v30  ;;  %v2346_v22 = vsel %vm2344_vm9, %v15716_v43, %v15715_v18  ;;  %v11271_v63 = vpop.permute.xlu0 %3840  ;;  %v15718_v30 = vld [vmem:[#allocation267_spill] sm:$0xff] }
 0x5ed   : > { %v2350_v54 = vsel %vm2344_vm9, %v15715_v18, %v15716_v43  ;;  %15717 = vst [vmem:[#allocation100_spill] sm:$0xff] %v11271_v63  ;;  %4473 = vperm.xlu0 %6377, %v4258_v6   ;;  %v11274_v53 = vadd.f32 %v11030_v60, %v2101_v1  ;;  %v2127_v3 = vsel %vm2125_vm5, %v15719_v25, %v15718_v30  ;;  %v11285_v43 = vpop.permute.xlu1 %3331  ;;  %v15721_v60 = vld [vmem:[#allocation261_spill] sm:$0xff]  ;;  %vm3049_vm4 = vcmp.lt.s32.totalorder %v9272_v10, 110 }
 0x5ee   : > { %v2131_v39 = vsel %vm2125_vm5, %v15718_v30, %v15719_v25  ;;  %v2148_v18 = vmul.f32 %v10715_v27, %v2133_v46  ;;  %15720 = vst [vmem:[#allocation103_spill] sm:$0xff] %v11285_v43  ;;  %v11288_v13 = vadd.f32 %v11033_v2, %v2102_v52  ;;  %v2099_v1 = vmul.f32 %v15721_v60, %v10965_v15  ;;  %v4260_v15 = vld [vmem:[#allocation17 + $0x58] sm:$0xff]  ;;  %v15723_v43 = vld [vmem:[#allocation260_spill] sm:$0xff] }
 0x5ef   : > { %v2100_v6 = vmul.f32 %v15721_v60, %v10968_v23  ;;  %v2129_v63 = vsel %vm2125_vm5, %v15711_v38, %v15712_v24  ;;  %3765 = vrot.lane.b32.xlu1 %v10336_v0, %s7103_s28  ;;  %v11300_v46 = vadd.f32 %v2097_v47, %v2032_v7  ;;  %v11302_v30 = vadd.f32 %v2098_v34, %v2033_v8  ;;  %v15722_v60 = vld [vmem:[#allocation264_spill] sm:$0xff]  ;;  %v15724_v8 = vld [vmem:[#allocation234_spill] sm:$0xff]  ;;  %v15725_v47 = vld [vmem:[#allocation417_spill] sm:$0xff] }
 0x5f0   : > { %v2363_v2 = vmul.f32 %v11023_v50, %v2350_v54  ;;  %v2364_v52 = vmul.f32 %v11037_v36, %v2346_v22  ;;  %v2144_v25 = vmul.f32 %v10715_v27, %v2131_v39  ;;  %v2145_v23 = vmul.f32 %v10727_v4, %v2127_v3  ;;  %v15726_v34 = vld [vmem:[#allocation419_spill] sm:$0xff] }
 0x5f1   : > { %v2348_v38 = vsel %vm2344_vm9, %v15723_v43, %v15722_v60  ;;  %v2352_v0 = vsel %vm2344_vm9, %v15722_v60, %v15723_v43  ;;  %4483 = vperm.xlu0 %6377, %v4260_v15   ;;  %v2149_v7 = vmul.f32 %v10727_v4, %v2129_v63  ;;  %v2172_v24 = vmul.f32 %v15724_v8, %v2148_v18  ;;  %v11326_v54 = vpop.permute.xlu1 %3339  ;;  %v15728_v43 = vld [vmem:[#allocation271_spill] sm:$0xff]  ;;  %v3910_v63 = vpop.permute.xlu0 %3909 }
 0x5f2   : > { %v11320_v27 = vrot.slane %v15725_v47, %v10780_v11  ;;  %v11324_v22 = vrot.slane %v15726_v34, %v10780_v11  ;;  %15727 = vst [vmem:[#allocation105_spill] sm:$0xff] %v11326_v54  ;;  %v2107_v3 = vadd.f32 %v2099_v1, %v11171_v32  ;;  %v2108_v39 = vadd.f32 %v2100_v6, %v11173_v58  ;;  %v15729_v18 = vld [vmem:[#allocation279_spill] sm:$0xff]  ;;  %v4262_v6 = vld [vmem:[#allocation17 + $0x68] sm:$0xff]  ;;  %v11683_v47 = vld [vmem:[#allocation6 + $0x10] sm:$0xff] }
 0x5f3   : > { %v2168_v15 = vmul.f32 %v15728_v43, %v2144_v25  ;;  %v2169_v4 = vmul.f32 %v15728_v43, %v2145_v23  ;;  %3773 = vrot.lane.b32.xlu1 %v10385_v17, %s7103_s28  ;;  %v15730_v60 = vld [vmem:[#allocation275_spill] sm:$0xff]  ;;  %v11343_v58 = vmul.f32 %v11023_v50, %v2352_v0  ;;  %v11346_v1 = vmul.f32 %v11037_v36, %v2348_v38  ;;  %v15731_v25 = vld [vmem:[#allocation266_spill] sm:$0xff]  ;;  %v15732_v43 = vld [vmem:[#allocation268_spill] sm:$0xff] }
 0x5f4   : > { %v2199_v34 = vsel %vm2198_vm6, %v15730_v60, %v15729_v18  ;;  %v2203_v32 = vsel %vm2198_vm6, %v15729_v18, %v15730_v60  ;;  %v11349_v17 = vmul.f32 %v15731_v25, %v2363_v2  ;;  %v11352_v23 = vmul.f32 %v15731_v25, %v2364_v52  ;;  %v15733_v60 = vld [vmem:[#allocation270_spill] sm:$0xff]  ;;  %v15737_v25 = vld [vmem:[#allocation272_spill] sm:$0xff] }
 0x5f5   : > { %v11356_v54 = vmul.f32 %v15732_v43, %v11117_v14  ;;  %v11360_v18 = vmul.f32 %v15732_v43, %v11139_v35  ;;  %4493 = vperm.xlu0 %6377, %v4262_v6   ;;  %v2173_v0 = vmul.f32 %v15724_v8, %v2149_v7  ;;  %v11363_v38 = vadd.f32 %v2172_v24, %v2107_v3  ;;  %v11374_v14 = vpop.permute.xlu1 %3410  ;;  %v15736_v3 = vld [vmem:[#allocation276_spill] sm:$0xff] }
 0x5f6   : > { %v11367_v2 = vmul.f32 %v15733_v60, %v11148_v9  ;;  %v11371_v52 = vmul.f32 %v15733_v60, %v11152_v56  ;;  %15734 = vst [vmem:[#allocation107_spill] sm:$0xff] %v11374_v14  ;;  %v2176_v35 = vadd.f32 %v2168_v15, %v11168_v20  ;;  %v2177_v6 = vadd.f32 %v2169_v4, %v11178_v57  ;;  %v15735_v9 = vld [vmem:[#allocation273_spill] sm:$0xff]  ;;  %v4264_v57 = vld [vmem:[#allocation17 + $0x78] sm:$0xff] }
 0x5f7   : > { %v2215_v7 = vmul.f32 %v10825_v44, %v2203_v32  ;;  %v2216_v8 = vmul.f32 %v10849_v51, %v2199_v34  ;;  %3886 = vperm.xlu1 %6367, %v10434_v42   ;;  %v2170_v24 = vmul.f32 %v15735_v9, %v11016_v40  ;;  %v2171_v56 = vmul.f32 %v15735_v9, %v11019_v61  ;;  %v15738_v34 = vld [vmem:[#allocation277_spill] sm:$0xff]  ;;  %v15740_v40 = vld [vmem:[#allocation283_spill] sm:$0xff]  ;;  %v3918_v32 = vpop.permute.xlu0 %3917 }
 0x5f8   : > { %v2467_v43 = vsel %vm2465_vm10, %v15737_v25, %v15736_v3  ;;  %v2471_v20 = vsel %vm2465_vm10, %v15736_v3, %v15737_v25  ;;  %v15739_v15 = vld [vmem:[#allocation281_spill] sm:$0xff]  ;;  %v11404_v9 = vadd.f32 %v2173_v0, %v2108_v39  ;;  %v11410_v25 = vsel %vm3925_vm12, %v3910_v63, %v3918_v32  ;;  %v15745_v39 = vld [vmem:[#allocation274_spill] sm:$0xff] }
 0x5f9   : > { %v2205_v42 = vsel %vm2198_vm6, %v15739_v15, %v15738_v34  ;;  %v2239_v4 = vmul.f32 %v15740_v40, %v2215_v7  ;;  %v2240_v61 = vmul.f32 %v15740_v40, %v2216_v8  ;;  %4503 = vperm.xlu0 %6377, %v4264_v57   ;;  %v2201_v60 = vsel %vm2198_vm6, %v15738_v34, %v15739_v15  ;;  %v11406_v3 = vpop.permute.xlu1 %3473  ;;  %v15744_v34 = vld [vmem:[#allocation278_spill] sm:$0xff] }
 0x5fa   : > { %15741 = vst [vmem:[#allocation111_spill] sm:$0xff] %v11406_v3  ;;  %15742 = vst [vmem:[#allocation108_spill] sm:$0xff] %v11410_v25  ;;  %v11414_v7 = vsel %vm3925_vm12, %v3918_v32, %v3910_v63  ;;  %v11417_v8 = vadd.f32 %v11162_v28, %v2176_v35  ;;  %v2484_v57 = vmul.f32 %v11210_v37, %v2467_v43  ;;  %v15746_v15 = vmov 45   ;;  %v4266_v35 = vld [vmem:[#allocation20 + $0x8] sm:$0xff] }
 0x5fb   : > { %15743 = vst [vmem:[#allocation104_spill] sm:$0xff] %v11414_v7  ;;  %v2485_v40 = vmul.f32 %v11218_v26, %v2471_v20  ;;  %v2469_v0 = vsel %vm2465_vm10, %v15745_v39, %v15744_v34  ;;  %6369 = vset.pattern.permute.xlu1 %v15746_v15  ;;  %v11427_v3 = vadd.f32 %v11165_v5, %v2177_v6  ;;  %vm3122_vm5 = vcmp.lt.s32.totalorder %v9272_v10, 109 }
 0x5fc   : > { %v2178_v63 = vadd.f32 %v2170_v24, %v11300_v46  ;;  %v2219_v32 = vmul.f32 %v10825_v44, %v2205_v42  ;;  %v2473_v28 = vsel %vm2465_vm10, %v15744_v34, %v15745_v39  ;;  %3951 = vperm.xlu1 %6369, %v10491_v45   ;;  %v2179_v43 = vadd.f32 %v2171_v56, %v11302_v30  ;;  %v15747_v46 = vld [vmem:[#allocation285_spill] sm:$0xff]  ;;  %v15750_v56 = vld [vmem:[#allocation280_spill] sm:$0xff] }
 0x5fd   : > { %v2220_v20 = vmul.f32 %v10849_v51, %v2201_v60  ;;  %v2247_v15 = vadd.f32 %v2239_v4, %v11274_v53  ;;  %v2248_v5 = vadd.f32 %v2240_v61, %v11288_v13  ;;  %5575 = vperm.xlu0 %6377, %v4266_v35   ;;  %v11442_v6 = vmul.f32 %v11210_v37, %v2469_v0  ;;  %v15748_v30 = vld [vmem:[#allocation421_spill] sm:$0xff]  ;;  %v11453_v53 = vpop.permute.xlu1 %3481  ;;  %v15753_v0 = vld [vmem:[#allocation295_spill] sm:$0xff] }
 0x5fe   : > { %v2243_v44 = vmul.f32 %v15747_v46, %v2219_v32  ;;  %v11447_v45 = vrot.slane %v15596_v31, %v10780_v11  ;;  %v11451_v51 = vrot.slane %v15748_v30, %v10780_v11  ;;  %15749 = vst [vmem:[#allocation109_spill] sm:$0xff] %v11453_v53  ;;  %v11457_v24 = vmul.f32 %v11218_v26, %v2473_v28  ;;  %v4268_v61 = vld [vmem:[#allocation20 + $0x18] sm:$0xff]  ;;  %v15754_v32 = vld [vmem:[#allocation291_spill] sm:$0xff]  ;;  %v11482_v28 = vld [vmem:[%s7568_s12 + $0x30] sm:$0xff] }
 0x5ff   : > { %v2244_v13 = vmul.f32 %v15747_v46, %v2220_v20  ;;  %v11460_v42 = vmul.f32 %v15750_v56, %v2484_v57  ;;  %v11463_v4 = vmul.f32 %v15750_v56, %v2485_v40  ;;  %v15751_v60 = vld [vmem:[#allocation293_spill] sm:$0xff]  ;;  %v2275_v57 = vsel %vm2271_vm7, %v15754_v32, %v15753_v0  ;;  %v15755_v46 = vld [vmem:[#allocation286_spill] sm:$0xff] }
 0x600   : > { %v15752_v34 = vld [vmem:[#allocation289_spill] sm:$0xff]  ;;  %v2279_v40 = vsel %vm2271_vm7, %v15753_v0, %v15754_v32  ;;  %3696 = vrot.lane.b32.xlu1 %v11482_v28, %s7101_s13  ;;  %v11487_v35 = vadd.f32 %v11257_v48, %v2247_v15  ;;  %v11490_v20 = vadd.f32 %v11260_v41, %v2248_v5  ;;  %v15756_v56 = vld [vmem:[#allocation282_spill] sm:$0xff]  ;;  %v2251_v0 = vadd.f32 %v2243_v44, %v2178_v63  ;;  %v15757_v32 = vld [vmem:[#allocation287_spill] sm:$0xff] }
 0x601   : > { %v2273_v11 = vsel %vm2271_vm7, %v15752_v34, %v15751_v60  ;;  %v2277_v39 = vsel %vm2271_vm7, %v15751_v60, %v15752_v34  ;;  %v2539_v60 = vsel %vm2538_vm11, %v15756_v56, %v15755_v46  ;;  %v2543_v34 = vsel %vm2538_vm11, %v15755_v46, %v15756_v56  ;;  %5585 = vperm.xlu0 %6377, %v4268_v61   ;;  %v15758_v15 = vld [vmem:[#allocation407_spill] sm:$0xff]  ;;  %v11507_v53 = vpop.permute.xlu1 %3594  ;;  %v15766_v30 = vld [vmem:[#allocation305_spill] sm:$0xff] }
 0x602   : > { %v2245_v48 = vmul.f32 %v15757_v32, %v11134_v19  ;;  %v2246_v41 = vmul.f32 %v15757_v32, %v11144_v62  ;;  %v11505_v5 = vsub.s32 4, %v15758_v15  ;;  %15759 = vst [vmem:[#allocation113_spill] sm:$0xff] %v11507_v53  ;;  %v2290_v14 = vmul.f32 %v10918_v21, %v2277_v39  ;;  %v11517_v62 = vld [vmem:[%s7568_s12 + $0x38] sm:$0xff]  ;;  %v15760_v39 = vld [vmem:[#allocation297_spill] sm:$0xff]  ;;  %v15765_v32 = vld [vmem:[#allocation256_spill] sm:$0xff] }
 0x603   : > { %v2291_v7 = vmul.f32 %v10922_v29, %v2273_v11  ;;  %v2294_v25 = vmul.f32 %v10918_v21, %v2279_v40  ;;  %v2295_v61 = vmul.f32 %v10922_v29, %v2275_v57  ;;  %v2252_v63 = vadd.f32 %v2244_v13, %v2179_v43  ;;  %v4270_v46 = vld [vmem:[#allocation21 + $0x8] sm:$0xff]  ;;  %v15761_v21 = vld [vmem:[#allocation288_spill] sm:$0xff]  ;;  %v15767_v31 = vld [vmem:[#allocation301_spill] sm:$0xff] }
 0x604   : > { %v2555_v44 = vmul.f32 %v11320_v27, %v2539_v60  ;;  %v2556_v19 = vmul.f32 %v11324_v22, %v2543_v34  ;;  %3704 = vrot.lane.b32.xlu1 %v11517_v62, %s7101_s13  ;;  %v2314_v56 = vmul.f32 %v15760_v39, %v2290_v14  ;;  %v15762_v40 = vld [vmem:[#allocation284_spill] sm:$0xff]  ;;  %v2253_v13 = vadd.f32 %v2245_v48, %v11363_v38  ;;  %v15763_v60 = vld [vmem:[#allocation425_spill] sm:$0xff]  ;;  %s6016_s13 = sshll.u32 %s14911_s29, 10 }
 0x605   : > { %v2315_v11 = vmul.f32 %v15760_v39, %v2291_v7  ;;  %v2541_v29 = vsel %vm2538_vm11, %v15762_v40, %v15761_v21  ;;  %v2545_v43 = vsel %vm2538_vm11, %v15761_v21, %v15762_v40  ;;  %5660 = vperm.xlu0 %6377, %v4270_v46   ;;  %v2254_v57 = vadd.f32 %v2246_v41, %v11404_v9  ;;  %v15764_v7 = vld [vmem:[#allocation426_spill] sm:$0xff]  ;;  %v4272_v40 = vld [vmem:[#allocation21 + $0x18] sm:$0xff] }
 0x606   : > { %v11535_v14 = vrot.slane %v15763_v60, %v11505_v5  ;;  %v11539_v34 = vrot.slane %v15764_v7, %v11505_v5  ;;  %v2318_v39 = vmul.f32 %v15765_v32, %v2294_v25  ;;  %v2319_v53 = vmul.f32 %v15765_v32, %v2295_v61  ;;  %v11551_v9 = vpop.permute.xlu1 %3659  ;;  %v15769_v25 = vld [vmem:[#allocation290_spill] sm:$0xff]  ;;  %v15774_v7 = vld [vmem:[#allocation296_spill] sm:$0xff] }
 0x607   : > { %v2345_v46 = vsel %vm2344_vm9, %v15767_v31, %v15766_v30  ;;  %v2349_v38 = vsel %vm2344_vm9, %v15766_v30, %v15767_v31  ;;  %15768 = vst [vmem:[#allocation106_spill] sm:$0xff] %v11551_v9  ;;  %v11554_v48 = vmul.f32 %v11320_v27, %v2541_v29  ;;  %v11557_v41 = vmul.f32 %v11324_v22, %v2545_v43  ;;  %v15770_v32 = vld [vmem:[#allocation298_spill] sm:$0xff]  ;;  %v15773_v9 = vld [vmem:[#allocation300_spill] sm:$0xff] }
 0x608   : > { %v11560_v61 = vmul.f32 %v15769_v25, %v2555_v44  ;;  %v11563_v21 = vmul.f32 %v15769_v25, %v2556_v19  ;;  %3775 = vrot.lane.b32.xlu1 %v10579_v49, %s7103_s28  ;;  %v2322_v31 = vadd.f32 %v2314_v56, %v11417_v8  ;;  %v2323_v30 = vadd.f32 %v2315_v11, %v11427_v3  ;;  %v15771_v29 = vld [vmem:[#allocation294_spill] sm:$0xff]  ;;  %v15772_v19 = vld [vmem:[#allocation299_spill] sm:$0xff] }
 0x609   : > { %v2613_v43 = vsel %vm2611_vm13, %v15771_v29, %v15770_v32  ;;  %v2617_v44 = vsel %vm2611_vm13, %v15770_v32, %v15771_v29  ;;  %5670 = vperm.xlu0 %6377, %v4272_v40   ;;  %v2316_v49 = vmul.f32 %v15772_v19, %v11239_v12  ;;  %v2317_v8 = vmul.f32 %v15772_v19, %v11242_v59  ;;  %v15776_v32 = vld [vmem:[#allocation307_spill] sm:$0xff] }
 0x60a   : > { %v2361_v3 = vmul.f32 %v11023_v50, %v2349_v38  ;;  %v2362_v56 = vmul.f32 %v11037_v36, %v2345_v46  ;;  %v2326_v11 = vadd.f32 %v2318_v39, %v2253_v13  ;;  %v2327_v25 = vadd.f32 %v2319_v53, %v2254_v57  ;;  %v11591_v12 = vpop.permute.xlu1 %3404  ;;  %v15777_v59 = vld [vmem:[#allocation303_spill] sm:$0xff]  ;;  %v15778_v13 = vld [vmem:[#allocation309_spill] sm:$0xff]  ;;  %v11604_v46 = vld [vmem:[%s7568_s12 + $0x10] sm:$0xff] }
 0x60b   : > { %v2615_v60 = vsel %vm2611_vm13, %v15774_v7, %v15773_v9  ;;  %v2619_v40 = vsel %vm2611_vm13, %v15773_v9, %v15774_v7  ;;  %15775 = vst [vmem:[#allocation110_spill] sm:$0xff] %v11591_v12  ;;  %v2347_v38 = vsel %vm2344_vm9, %v15777_v59, %v15776_v32  ;;  %v2351_v53 = vsel %vm2344_vm9, %v15776_v32, %v15777_v59 }
 0x60c   : > { %v2385_v57 = vmul.f32 %v15778_v13, %v2361_v3  ;;  %v2386_v39 = vmul.f32 %v15778_v13, %v2362_v56  ;;  %3838 = vrot.lane.b32.xlu1 %v11604_v46, %s7105_s1  ;;  %v2395_v7 = vadd.f32 %v11349_v17, %v2322_v31  ;;  %v2396_v9 = vadd.f32 %v11352_v23, %v2323_v30  ;;  %v15780_v17 = vld [vmem:[#allocation308_spill] sm:$0xff] }
 0x60d   : > { %v2630_v29 = vmul.f32 %v11447_v45, %v2613_v43  ;;  %v2631_v19 = vmul.f32 %v11451_v51, %v2617_v44  ;;  %v2324_v12 = vadd.f32 %v2316_v49, %v2251_v0  ;;  %v2325_v32 = vadd.f32 %v2317_v8, %v2252_v63  ;;  %v15781_v31 = vld [vmem:[#allocation304_spill] sm:$0xff]  ;;  %v11638_v43 = vld [vmem:[%s7568_s12 + $0x18] sm:$0xff] }
 0x60e   : > { %v11613_v3 = vmul.f32 %v11447_v45, %v2615_v60  ;;  %v11616_v56 = vmul.f32 %v11451_v51, %v2619_v40  ;;  %v2365_v59 = vmul.f32 %v11023_v50, %v2351_v53  ;;  %v2366_v13 = vmul.f32 %v11037_v36, %v2347_v38  ;;  %v11628_v63 = vpop.permute.xlu1 %3412  ;;  %v15783_v50 = vld [vmem:[#allocation434_spill] sm:$0xff]  ;;  %v15784_v44 = vld [vmem:[#allocation311_spill] sm:$0xff]  ;;  %v15787_v53 = vld [vmem:[#allocation313_spill] sm:$0xff] }
 0x60f   : > { %v2685_v23 = vsel %vm2684_vm14, %v15781_v31, %v15780_v17  ;;  %v2689_v0 = vsel %vm2684_vm14, %v15780_v17, %v15781_v31  ;;  %15782 = vst [vmem:[#allocation119_spill] sm:$0xff] %v11628_v63  ;;  %v2393_v60 = vadd.f32 %v2385_v57, %v11487_v35  ;;  %v2394_v30 = vadd.f32 %v2386_v39, %v11490_v20  ;;  %v15785_v40 = vld [vmem:[#allocation310_spill] sm:$0xff]  ;;  %v15790_v63 = vld [vmem:[#allocation319_spill] sm:$0xff] }
 0x610   : > { %15779 = vst [vmem:[#allocation115_spill] sm:$0xff] %v11616_v56  ;;  %v11635_v36 = vrot.slane %v15783_v50, %v11505_v5  ;;  %3846 = vrot.lane.b32.xlu1 %v11638_v43, %s7105_s1  ;;  %v2389_v49 = vmul.f32 %v15784_v44, %v2365_v59  ;;  %v2390_v8 = vmul.f32 %v15784_v44, %v2366_v13  ;;  %v15786_v38 = vld [vmem:[#allocation306_spill] sm:$0xff]  ;;  %v15788_v59 = vld [vmem:[#allocation435_spill] sm:$0xff]  ;;  %vm3195_vm6 = vcmp.lt.s32.totalorder %v9272_v10, 99 }
 0x611   : > { %v2687_v35 = vsel %vm2684_vm14, %v15786_v38, %v15785_v40  ;;  %v2691_v20 = vsel %vm2684_vm14, %v15785_v40, %v15786_v38  ;;  %v2391_v57 = vmul.f32 %v15787_v53, %v11343_v58  ;;  %v2701_v39 = vmul.f32 %v11535_v14, %v2685_v23  ;;  %v15789_v44 = vld [vmem:[#allocation323_spill] sm:$0xff]  ;;  %v15791_v40 = vld [vmem:[#allocation302_spill] sm:$0xff] }
 0x612   : > { %v2702_v17 = vmul.f32 %v11539_v34, %v2689_v0  ;;  %v11658_v13 = vrot.slane %v15788_v59, %v11505_v5  ;;  %v2392_v31 = vmul.f32 %v15787_v53, %v11346_v1  ;;  %v2466_v50 = vsel %vm2465_vm10, %v15790_v63, %v15789_v44  ;;  %v11672_v23 = vpop.permute.xlu1 %3483  ;;  %v15793_v0 = vld [vmem:[#allocation315_spill] sm:$0xff] }
 0x613   : > { %v11667_v38 = vmul.f32 %v15791_v40, %v2630_v29  ;;  %v11670_v58 = vmul.f32 %v15791_v40, %v2631_v19  ;;  %15792 = vst [vmem:[#allocation123_spill] sm:$0xff] %v11672_v23  ;;  %v2435_v59 = vmul.f32 %v15793_v0, %v11222_v55  ;;  %v2441_v15 = vadd.f32 %v11356_v54, %v2393_v60  ;;  %v15796_v40 = vld [vmem:[#allocation94_spill] sm:$0xff]  ;;  %v15797_v60 = vld [vmem:[#allocation312_spill] sm:$0xff] }
 0x614   : > { %v11678_v1 = vmul.f32 %v11535_v14, %v2687_v35  ;;  %v11681_v53 = vmul.f32 %v11539_v34, %v2691_v20  ;;  %3959 = vperm.xlu1 %6369, %v11683_v47   ;;  %v2397_v29 = vadd.f32 %v2389_v49, %v2324_v12  ;;  %v2398_v19 = vadd.f32 %v2390_v8, %v2325_v32  ;;  %v15798_v32 = vld [vmem:[#allocation320_spill] sm:$0xff]  ;;  %v15801_v8 = vld [vmem:[#allocation327_spill] sm:$0xff] }
 0x615   : > { %v2436_v23 = vmul.f32 %v15793_v0, %v15796_v40  ;;  %v2442_v56 = vadd.f32 %v11360_v18, %v2394_v30  ;;  %v2399_v55 = vadd.f32 %v2391_v57, %v2326_v11  ;;  %v2482_v54 = vmul.f32 %v11210_v37, %v2466_v50  ;;  %v15799_v49 = vld [vmem:[#allocation316_spill] sm:$0xff]  ;;  %v15802_v57 = vld [vmem:[#allocation437_spill] sm:$0xff]  ;;  %v15806_v40 = vld [vmem:[#allocation438_spill] sm:$0xff] }
 0x616   : > { %15794 = vst [vmem:[#allocation112_spill] sm:$0xff] %v11678_v1  ;;  %15795 = vst [vmem:[#allocation114_spill] sm:$0xff] %v11681_v53  ;;  %v11691_v35 = vmul.f32 %v15797_v60, %v2701_v39  ;;  %v11694_v20 = vmul.f32 %v15797_v60, %v2702_v17  ;;  %v2400_v53 = vadd.f32 %v2392_v31, %v2327_v25  ;;  %v11708_v30 = vpop.permute.xlu1 %3546  ;;  %v15804_v39 = vmov 46   ;;  %v15805_v31 = vld [vmem:[#allocation317_spill] sm:$0xff] }
 0x617   : > { %v2470_v12 = vsel %vm2465_vm10, %v15789_v44, %v15790_v63  ;;  %v2759_v18 = vsel %vm2757_vm15, %v15799_v49, %v15798_v32  ;;  %v2763_v11 = vsel %vm2757_vm15, %v15798_v32, %v15799_v49  ;;  %15800 = vst [vmem:[#allocation118_spill] sm:$0xff] %v11708_v30  ;;  %v2443_v50 = vadd.f32 %v2435_v59, %v2395_v7  ;;  %v11725_v59 = vld [vmem:[#allocation6] sm:$0xff]  ;;  %v15809_v32 = vld [vmem:[#allocation318_spill] sm:$0xff]  ;;  %v15811_v49 = vld [vmem:[#allocation321_spill] sm:$0xff] }
 0x618   : > { %v2506_v25 = vmul.f32 %v15801_v8, %v2482_v54  ;;  %v11714_v63 = vrot.slane %v15802_v57, %v11505_v5  ;;  %6371 = vset.pattern.permute.xlu1 %v15804_v39  ;;  %v2444_v17 = vadd.f32 %v2436_v23, %v2396_v9  ;;  %v2437_v44 = vmul.f32 %v15805_v31, %v11250_v33  ;;  %v15808_v23 = vld [vmem:[#allocation322_spill] sm:$0xff] }
 0x619   : > { %v2438_v0 = vmul.f32 %v15805_v31, %v11254_v16  ;;  %v11723_v7 = vrot.slane %v15806_v40, %v11505_v5  ;;  %4024 = vperm.xlu1 %6371, %v11725_v59   ;;  %v2483_v54 = vmul.f32 %v11218_v26, %v2470_v12  ;;  %v2776_v60 = vmul.f32 %v11635_v36, %v2759_v18  ;;  %v15810_v16 = vld [vmem:[#allocation325_spill] sm:$0xff] }
 0x61a   : > { %15803 = vst [vmem:[#allocation102_spill] sm:$0xff] %v11714_v63  ;;  %v2777_v9 = vmul.f32 %v11658_v13, %v2763_v11  ;;  %v2761_v33 = vsel %vm2757_vm15, %v15809_v32, %v15808_v23  ;;  %v2468_v39 = vsel %vm2465_vm10, %v15811_v49, %v15810_v16  ;;  %v2447_v31 = vadd.f32 %v11367_v2, %v2399_v55  ;;  %v11745_v18 = vpop.permute.xlu1 %3554 }
 0x61b   : > { %15807 = vst [vmem:[#allocation127_spill] sm:$0xff] %v11723_v7  ;;  %v2448_v30 = vadd.f32 %v11371_v52, %v2400_v53  ;;  %v2765_v12 = vsel %vm2757_vm15, %v15808_v23, %v15809_v32  ;;  %15812 = vst [vmem:[#allocation117_spill] sm:$0xff] %v11745_v18  ;;  %v2516_v11 = vadd.f32 %v11460_v42, %v2443_v50  ;;  %v15814_v23 = vld [vmem:[#allocation324_spill] sm:$0xff]  ;;  %vm3268_vm7 = vcmp.lt.s32.totalorder %v9272_v10, 98 }
 0x61c   : > { %v2472_v40 = vsel %vm2465_vm10, %v15810_v16, %v15811_v49  ;;  %v2507_v57 = vmul.f32 %v15801_v8, %v2483_v54  ;;  %v2514_v1 = vadd.f32 %v2506_v25, %v2441_v15  ;;  %v2517_v2 = vadd.f32 %v11463_v4, %v2444_v17  ;;  %v15818_v25 = vld [vmem:[#allocation330_spill] sm:$0xff]  ;;  %v15823_v16 = vld [vmem:[#allocation329_spill] sm:$0xff] }
 0x61d   : > { %v2445_v52 = vadd.f32 %v2437_v44, %v2397_v29  ;;  %v2446_v53 = vadd.f32 %v2438_v0, %v2398_v19  ;;  %v11755_v55 = vmul.f32 %v11635_v36, %v2761_v33  ;;  %3769 = vrot.lane.b32.xlu1 %v11482_v28, %s7103_s28  ;;  %v2486_v42 = vmul.f32 %v11210_v37, %v2468_v39  ;;  %v15816_v29 = vld [vmem:[#allocation337_spill] sm:$0xff]  ;;  %v15819_v17 = vld [vmem:[#allocation326_spill] sm:$0xff] }
 0x61e   : > { %v11761_v50 = vmul.f32 %v11658_v13, %v2765_v12  ;;  %v11764_v32 = vmul.f32 %v15814_v23, %v2776_v60  ;;  %v11767_v15 = vmul.f32 %v15814_v23, %v2777_v9  ;;  %v2487_v4 = vmul.f32 %v11218_v26, %v2472_v40  ;;  %v15817_v19 = vld [vmem:[#allocation333_spill] sm:$0xff]  ;;  %v11782_v0 = vpop.permute.xlu1 %3667  ;;  %v15821_v60 = vld [vmem:[#allocation339_spill] sm:$0xff] }
 0x61f   : > { %v2540_v8 = vsel %vm2538_vm11, %v15817_v19, %v15816_v29  ;;  %v2831_v37 = vsel %vm2830_vm0, %v15819_v17, %v15818_v25  ;;  %v2835_v44 = vsel %vm2830_vm0, %v15818_v25, %v15819_v17  ;;  %15820 = vst [vmem:[#allocation120_spill] sm:$0xff] %v11782_v0  ;;  %v2515_v54 = vadd.f32 %v2507_v57, %v2442_v56  ;;  %v15822_v9 = vld [vmem:[#allocation335_spill] sm:$0xff]  ;;  %v15827_v17 = vld [vmem:[#allocation341_spill] sm:$0xff] }
 0x620   : > { %15813 = vst [vmem:[#allocation121_spill] sm:$0xff] %v11761_v50  ;;  %15815 = vst [vmem:[#allocation125_spill] sm:$0xff] %v11767_v15  ;;  %v2587_v26 = vadd.f32 %v11560_v61, %v2514_v1  ;;  %v2544_v40 = vsel %vm2538_vm11, %v15816_v29, %v15817_v19  ;;  %v2542_v33 = vsel %vm2538_vm11, %v15822_v9, %v15821_v60  ;;  %v15824_v12 = vld [vmem:[#allocation331_spill] sm:$0xff]  ;;  %v15825_v29 = vld [vmem:[#allocation332_spill] sm:$0xff]  ;;  %vm3341_vm9 = vcmp.lt.s32.totalorder %v9272_v10, 97 }
 0x621   : > { %v2510_v49 = vmul.f32 %v15823_v16, %v2486_v42  ;;  %v2511_v39 = vmul.f32 %v15823_v16, %v2487_v4  ;;  %v2512_v23 = vmul.f32 %v15824_v12, %v11442_v6  ;;  %v2546_v61 = vsel %vm2538_vm11, %v15821_v60, %v15822_v9  ;;  %3777 = vrot.lane.b32.xlu1 %v11517_v62, %s7103_s28  ;;  %v15826_v19 = vld [vmem:[#allocation328_spill] sm:$0xff]  ;;  %v15828_v60 = vld [vmem:[#allocation349_spill] sm:$0xff]  ;;  %s5719_s28 = sshll.u32 %s14141_s19, 4  ;;  %s14160_s28 = int_to_ptr.vmem [resolvable:$true] %s5719_s28 }
 0x622   : > { %v2513_v56 = vmul.f32 %v15824_v12, %v11457_v24  ;;  %v2557_v1 = vmul.f32 %v11320_v27, %v2540_v8  ;;  %v2847_v57 = vmul.f32 %v11714_v63, %v2831_v37  ;;  %v2848_v42 = vmul.f32 %v11723_v7, %v2835_v44  ;;  %v15829_v44 = vld [vmem:[#allocation345_spill] sm:$0xff]  ;;  %v15901_v50 = vld [vmem:[#allocation392_spill] sm:$0xff]  ;;  %s6907_s29 = scalar_lea.vmem %s14160_s28, 1024 }
 0x623   : > { %v2558_v6 = vmul.f32 %v11324_v22, %v2544_v40  ;;  %v2561_v4 = vmul.f32 %v11320_v27, %v2542_v33  ;;  %v2833_v25 = vsel %vm2830_vm0, %v15826_v19, %v15825_v29  ;;  %v2837_v24 = vsel %vm2830_vm0, %v15825_v29, %v15826_v19  ;;  %v11828_v9 = vpop.permute.xlu1 %3732  ;;  %p6908_p2 = scmp.ne.s32.totalorder %s14160_s28, %s6907_s29 }
 0x624   : > { %v2562_v8 = vmul.f32 %v11324_v22, %v2546_v61  ;;  %v2581_v37 = vmul.f32 %v15827_v17, %v2557_v1  ;;  %v2612_v40 = vsel %vm2611_vm13, %v15829_v44, %v15828_v60  ;;  %v2616_v27 = vsel %vm2611_vm13, %v15828_v60, %v15829_v44  ;;  %v11832_v22 = vld [vmem:[%s7568_s12 + $0x28] sm:$0xff]  ;;  %v15832_v44 = vld [vmem:[#allocation292_spill] sm:$0xff] }
 0x625   : > { %v2588_v33 = vadd.f32 %v11563_v21, %v2515_v54  ;;  %v2518_v16 = vadd.f32 %v2510_v49, %v2445_v52  ;;  %v2519_v12 = vadd.f32 %v2511_v39, %v2446_v53  ;;  %v2520_v29 = vadd.f32 %v2512_v23, %v2447_v31  ;;  %3848 = vrot.lane.b32.xlu1 %v11832_v22, %s7105_s1  ;;  %v15833_v52 = vld [vmem:[#allocation334_spill] sm:$0xff]  ;;  %v15835_v23 = vld [vmem:[#allocation351_spill] sm:$0xff]  ;;  %p6909_p6 = pnand %p6908_p2, %p16210_p8 }
 0x626   : > { %v2521_v61 = vadd.f32 %v2513_v56, %v2448_v30  ;;  %v2582_v1 = vmul.f32 %v15827_v17, %v2558_v6  ;;  %v11838_v19 = vmul.f32 %v11714_v63, %v2833_v25  ;;  %v11841_v60 = vmul.f32 %v11723_v7, %v2837_v24  ;;  %v15836_v56 = vld [vmem:[#allocation347_spill] sm:$0xff]  ;;  %v15838_v24 = vld [vmem:[#allocation412_spill] sm:$0xff]  ;;  %v15887_v63 = vld [vmem:[#allocation114_spill] sm:$0xff] }
 0x627   : > { %v2585_v0 = vmul.f32 %v15832_v44, %v2561_v4  ;;  %v2628_v21 = vmul.f32 %v11447_v45, %v2612_v40  ;;  %v2629_v31 = vmul.f32 %v11451_v51, %v2616_v27  ;;  %v11847_v53 = vmul.f32 %v15833_v52, %v2847_v57  ;;  %v11854_v39 = vpop.permute.xlu1 %3477  ;;  %v15837_v4 = vld [vmem:[#allocation352_spill] sm:$0xff]  ;;  %v15841_v40 = vld [vmem:[#allocation413_spill] sm:$0xff]  ;;  %p6910_p10 = pneg %p6909_p6 }
 0x628   : > { %15830 = vst [vmem:[#allocation116_spill] sm:$0xff] %v11838_v19  ;;  %15831 = vst [vmem:[#allocation122_spill] sm:$0xff] %v11841_v60  ;;  %v2586_v54 = vmul.f32 %v15832_v44, %v2562_v8  ;;  %v2589_v30 = vadd.f32 %v2581_v37, %v2516_v11  ;;  %v11851_v49 = vmul.f32 %v15833_v52, %v2848_v42  ;;  %v15840_v42 = vld [vmem:[#allocation343_spill] sm:$0xff]  ;;  %v15883_v60 = vld [vmem:[#allocation369_spill] sm:$0xff]  ;;  %vm3414_vm10 = vcmp.lt.s32.totalorder %v9272_v10, 96 }
 0x629   : > { %15834 = vst [vmem:[#allocation129_spill] sm:$0xff] %v11854_v39  ;;  %v2614_v6 = vsel %vm2611_vm13, %v15836_v56, %v15835_v23  ;;  %v2652_v25 = vmul.f32 %v15837_v4, %v2628_v21  ;;  %v2653_v57 = vmul.f32 %v15837_v4, %v2629_v31  ;;  %v11864_v8 = vrot.slane %v15838_v24, %v11505_v5  ;;  %v15843_v31 = vld [vmem:[#allocation444_spill] sm:$0xff]  ;;  %v15848_v39 = vld [vmem:[#allocation346_spill] sm:$0xff]  ;;  %v15884_v19 = vld [vmem:[#allocation367_spill] sm:$0xff] }
 0x62a   : > { %3911 = vrot.lane.b32.xlu1 %v11604_v46, %s7107_s30  ;;  %v2590_v11 = vadd.f32 %v2582_v1, %v2517_v2  ;;  %v2583_v17 = vmul.f32 %v15840_v42, %v11554_v48  ;;  %v2618_v37 = vsel %vm2611_vm13, %v15835_v23, %v15836_v56  ;;  %v11876_v27 = vrot.slane %v15841_v40, %v11505_v5  ;;  %v15845_v2 = vld [vmem:[#allocation445_spill] sm:$0xff]  ;;  %v15847_v4 = vld [vmem:[#allocation348_spill] sm:$0xff] }
 0x62b   : > { %15839 = vst [vmem:[#allocation131_spill] sm:$0xff] %v11864_v8  ;;  %v2584_v44 = vmul.f32 %v15840_v42, %v11557_v41  ;;  %v2593_v21 = vadd.f32 %v2585_v0, %v2520_v29  ;;  %v11882_v52 = vrot.slane %v15843_v31, %v11505_v5  ;;  %v11886_v48 = vrot.slane %v15845_v2, %v11505_v5  ;;  %v11897_v0 = vpop.permute.xlu1 %3485 }
 0x62c   : > { %15842 = vst [vmem:[#allocation126_spill] sm:$0xff] %v11876_v27  ;;  %v11889_v1 = vadd.f32 %v11667_v38, %v2589_v30  ;;  %v2632_v23 = vmul.f32 %v11447_v45, %v2614_v6  ;;  %v2594_v56 = vadd.f32 %v2586_v54, %v2521_v61  ;;  %v2977_v41 = vsel %vm2976_vm1, %v15848_v39, %v15847_v4  ;;  %v15850_v54 = vld [vmem:[#allocation354_spill] sm:$0xff] }
 0x62d   : > { %15844 = vst [vmem:[#allocation130_spill] sm:$0xff] %v11882_v52  ;;  %15846 = vst [vmem:[#allocation135_spill] sm:$0xff] %v11886_v48  ;;  %v2633_v29 = vmul.f32 %v11451_v51, %v2618_v37  ;;  %v2660_v42 = vadd.f32 %v2652_v25, %v2587_v26  ;;  %v2661_v18 = vadd.f32 %v2653_v57, %v2588_v33  ;;  %v15851_v26 = vld [vmem:[#allocation414_spill] sm:$0xff]  ;;  %v15853_v25 = vld [vmem:[#allocation416_spill] sm:$0xff]  ;;  %vm3487_vm11 = vcmp.lt.s32.totalorder %v9272_v10, 95 }
 0x62e   : > { %15849 = vst [vmem:[#allocation139_spill] sm:$0xff] %v11897_v0  ;;  %v2981_v38 = vsel %vm2976_vm1, %v15847_v4, %v15848_v39  ;;  %3919 = vrot.lane.b32.xlu1 %v11638_v43, %s7107_s30  ;;  %v2663_v45 = vadd.f32 %v11670_v58, %v2590_v11  ;;  %v2591_v61 = vadd.f32 %v2583_v17, %v2518_v16  ;;  %v15855_v57 = vld [vmem:[#allocation356_spill] sm:$0xff]  ;;  %v15856_v58 = vld [vmem:[#allocation115_spill] sm:$0xff]  ;;  %v15858_v4 = vld [vmem:[#allocation362_spill] sm:$0xff]  ;;  %vm3560_vm13 = vcmp.lt.s32.totalorder %v9272_v10, 94 }
 0x62f   : > { %v2656_v30 = vmul.f32 %v15850_v54, %v2632_v23  ;;  %v2592_v6 = vadd.f32 %v2584_v44, %v2519_v12  ;;  %v2657_v51 = vmul.f32 %v15850_v54, %v2633_v29  ;;  %v11912_v33 = vrot.slane %v15851_v26, %v11505_v5  ;;  %v11928_v17 = vpop.permute.xlu1 %3556  ;;  %v15859_v29 = vld [vmem:[#allocation358_spill] sm:$0xff]  ;;  %v15860_v54 = vld [vmem:[#allocation359_spill] sm:$0xff]  ;;  %v15861_v0 = vld [vmem:[#allocation357_spill] sm:$0xff] }
 0x630   : > { %v11916_v39 = vrot.slane %v15853_v25, %v11505_v5  ;;  %v2658_v37 = vmul.f32 %v15855_v57, %v11613_v3  ;;  %v2659_v16 = vmul.f32 %v15855_v57, %v15856_v58  ;;  %v11923_v11 = vmul.f32 %v11864_v8, %v2977_v41  ;;  %15857 = vst [vmem:[#allocation128_spill] sm:$0xff] %v11928_v17  ;;  %v15865_v17 = vld [vmem:[#allocation370_spill] sm:$0xff] }
 0x631   : > { %15852 = vst [vmem:[#allocation137_spill] sm:$0xff] %v11912_v33  ;;  %v11926_v12 = vmul.f32 %v11876_v27, %v2981_v38  ;;  %v2733_v44 = vadd.f32 %v11691_v35, %v2660_v42  ;;  %v2734_v23 = vadd.f32 %v11694_v20, %v2661_v18  ;;  %v2686_v3 = vsel %vm2684_vm14, %v15859_v29, %v15858_v4  ;;  %v15862_v42 = vld [vmem:[#allocation364_spill] sm:$0xff] }
 0x632   : > { %15854 = vst [vmem:[#allocation133_spill] sm:$0xff] %v11916_v39  ;;  %v3050_v41 = vsel %vm3049_vm4, %v15861_v0, %v15860_v54  ;;  %4032 = vperm.xlu1 %6371, %v11683_v47   ;;  %v2664_v38 = vadd.f32 %v2656_v30, %v2591_v61  ;;  %v2690_v35 = vsel %vm2684_vm14, %v15858_v4, %v15859_v29  ;;  %v15863_v20 = vld [vmem:[#allocation360_spill] sm:$0xff]  ;;  %v15864_v30 = vld [vmem:[#allocation374_spill] sm:$0xff] }
 0x633   : > { %v2688_v18 = vsel %vm2684_vm14, %v15863_v20, %v15862_v42  ;;  %v3054_v57 = vsel %vm3049_vm4, %v15860_v54, %v15861_v0  ;;  %v11953_v58 = vadd.f32 %v2657_v51, %v2592_v6  ;;  %v2692_v61 = vsel %vm2684_vm14, %v15862_v42, %v15863_v20  ;;  %v11975_v54 = vpop.permute.xlu1 %3619 }
 0x634   : > { %v2758_v4 = vsel %vm2757_vm15, %v15865_v17, %v15864_v30  ;;  %v2762_v29 = vsel %vm2757_vm15, %v15864_v30, %v15865_v17  ;;  %v11967_v27 = vadd.f32 %v2658_v37, %v2593_v21  ;;  %v11969_v0 = vadd.f32 %v2659_v16, %v2594_v56  ;;  %15868 = vst [vmem:[#allocation149_spill] sm:$0xff] %v11975_v54  ;;  %v15870_v37 = vld [vmem:[#allocation366_spill] sm:$0xff] }
 0x635   : > { %v2703_v6 = vmul.f32 %v11535_v14, %v2686_v3  ;;  %v11973_v51 = vmul.f32 %v11912_v33, %v3050_v41  ;;  %v2704_v42 = vmul.f32 %v11539_v34, %v2690_v35  ;;  %v2707_v20 = vmul.f32 %v11535_v14, %v2688_v18  ;;  %v15871_v14 = vld [vmem:[#allocation112_spill] sm:$0xff]  ;;  %v15874_v30 = vld [vmem:[#allocation398_spill] sm:$0xff] }
 0x636   : > { %15866 = vst [vmem:[#allocation132_spill] sm:$0xff] %v11967_v27  ;;  %15867 = vst [vmem:[#allocation41_spill] sm:$0xff] %v11969_v0  ;;  %v11980_v8 = vmul.f32 %v11916_v39, %v3054_v57  ;;  %v15869_v21 = vmov 47   ;;  %v2708_v56 = vmul.f32 %v11539_v34, %v2692_v61  ;;  %v2774_v17 = vmul.f32 %v11635_v36, %v2758_v4  ;;  %v15872_v35 = vld [vmem:[#allocation368_spill] sm:$0xff]  ;;  %v15875_v61 = vld [vmem:[#allocation377_spill] sm:$0xff] }
 0x637   : > { %6373 = vset.pattern.permute.xlu1 %v15869_v21  ;;  %v2727_v16 = vmul.f32 %v15870_v37, %v2703_v6  ;;  %v2775_v3 = vmul.f32 %v11658_v13, %v2762_v29  ;;  %v2728_v41 = vmul.f32 %v15870_v37, %v2704_v42  ;;  %v2729_v18 = vmul.f32 %v15872_v35, %v15871_v14  ;;  %v15873_v57 = vld [vmem:[#allocation340_spill] sm:$0xff]  ;;  %v15876_v6 = vld [vmem:[#allocation417_spill] sm:$0xff]  ;;  %v15878_v37 = vld [vmem:[#allocation419_spill] sm:$0xff]  ;;  %v12010_v54 = vpop.permute.xlu1 %3627 }
 0x638   : > { %4097 = vperm.xlu1 %6373, %v11725_v59   ;;  %v2904_v21 = vsel %vm2903_vm2, %v15874_v30, %v15873_v57  ;;  %v2908_v34 = vsel %vm2903_vm2, %v15873_v57, %v15874_v30  ;;  %v2798_v4 = vmul.f32 %v15875_v61, %v2774_v17  ;;  %v12004_v42 = vrot.slane %v15876_v6, %v11505_v5  ;;  %v15881_v39 = vld [vmem:[#allocation314_spill] sm:$0xff]  ;;  %v15885_v57 = vld [vmem:[#allocation407_spill] sm:$0xff] }
 0x639   : > { %v2799_v29 = vmul.f32 %v15875_v61, %v2775_v3  ;;  %v12008_v14 = vrot.slane %v15878_v37, %v11505_v5  ;;  %15880 = vst [vmem:[#allocation140_spill] sm:$0xff] %v12010_v54  ;;  %v12013_v33 = vmul.f32 %v15881_v39, %v2707_v20  ;;  %v3123_v17 = vsel %vm3122_vm5, %v15884_v19, %v15883_v60 }
 0x63a   : > { %15877 = vst [vmem:[#allocation145_spill] sm:$0xff] %v12004_v42  ;;  %v3127_v3 = vsel %vm3122_vm5, %v15883_v60, %v15884_v19  ;;  %v12024_v30 = vsub.s32 5, %v15885_v57  ;;  %v12027_v5 = vmul.f32 %v15881_v39, %v2708_v56  ;;  %v12030_v61 = vadd.f32 %v2727_v16, %v11889_v1 }
 0x63b   : > { %15879 = vst [vmem:[#allocation136_spill] sm:$0xff] %v12008_v14  ;;  %15882 = vst [vmem:[#allocation124_spill] sm:$0xff] %v12013_v33  ;;  %v2920_v20 = vmul.f32 %v11882_v52, %v2904_v21  ;;  %v2921_v54 = vmul.f32 %v11886_v48, %v2908_v34  ;;  %v12036_v7 = vadd.f32 %v2728_v41, %v2663_v45  ;;  %v12047_v21 = vpop.permute.xlu1 %3740  ;;  %v15890_v34 = vld [vmem:[#allocation375_spill] sm:$0xff]  ;;  %v15891_v48 = vld [vmem:[#allocation372_spill] sm:$0xff]  ;;  %vm3633_vm14 = vcmp.lt.s32.totalorder %v9272_v10, 93 }
 0x63c   : > { %15886 = vst [vmem:[#allocation141_spill] sm:$0xff] %v12027_v5  ;;  %3842 = vrot.lane.b32.xlu1 %v11482_v28, %s7105_s1  ;;  %v12040_v19 = vmul.f32 %v15872_v35, %v15887_v63  ;;  %v12042_v60 = vadd.f32 %v2729_v18, %v2664_v38  ;;  %v2806_v39 = vadd.f32 %v2798_v4, %v2733_v44  ;;  %15889 = vst [vmem:[#allocation40_spill] sm:$0xff] %v12047_v21  ;;  %v15892_v63 = vld [vmem:[#allocation420_spill] sm:$0xff]  ;;  %v15894_v41 = vld [vmem:[#allocation421_spill] sm:$0xff] }
 0x63d   : > { %v2807_v1 = vadd.f32 %v2799_v29, %v2734_v23  ;;  %v3139_v56 = vmul.f32 %v12004_v42, %v3123_v17  ;;  %v3140_v16 = vmul.f32 %v12008_v14, %v3127_v3  ;;  %v12053_v45 = vsel %vm2757_vm15, %v15891_v48, %v15890_v34  ;;  %v15895_v23 = vld [vmem:[#allocation336_spill] sm:$0xff]  ;;  %v15896_v4 = vld [vmem:[#allocation381_spill] sm:$0xff]  ;;  %v15897_v29 = vld [vmem:[#allocation378_spill] sm:$0xff] }
 0x63e   : > { %15888 = vst [vmem:[#allocation134_spill] sm:$0xff] %v12042_v60  ;;  %v12057_v38 = vrot.slane %v15892_v63, %v12024_v30  ;;  %v12061_v44 = vrot.slane %v15894_v41, %v12024_v30  ;;  %v2944_v35 = vmul.f32 %v15895_v23, %v2920_v20  ;;  %v2945_v18 = vmul.f32 %v15895_v23, %v2921_v54  ;;  %v15898_v20 = vld [vmem:[#allocation425_spill] sm:$0xff]  ;;  %v15900_v21 = vld [vmem:[#allocation426_spill] sm:$0xff] }
 0x63f   : > { %v3196_v17 = vsel %vm3195_vm6, %v15897_v29, %v15896_v4  ;;  %v12077_v3 = vsel %vm2757_vm15, %v15890_v34, %v15891_v48  ;;  %v3200_v54 = vsel %vm3195_vm6, %v15896_v4, %v15897_v29  ;;  %v12085_v23 = vrot.slane %v15898_v20, %v12024_v30  ;;  %v15902_v48 = vld [vmem:[#allocation390_spill] sm:$0xff] }
 0x640   : > { %15893 = vst [vmem:[#allocation46_spill] sm:$0xff] %v12057_v38  ;;  %3850 = vrot.lane.b32.xlu1 %v11517_v62, %s7105_s1  ;;  %v12089_v14 = vrot.slane %v15900_v21, %v12024_v30  ;;  %v2879_v42 = vadd.f32 %v11847_v53, %v2806_v39  ;;  %v2880_v52 = vadd.f32 %v11851_v49, %v2807_v1  ;;  %v15903_v60 = vld [vmem:[#allocation434_spill] sm:$0xff]  ;;  %v15905_v53 = vld [vmem:[#allocation435_spill] sm:$0xff]  ;;  %v15907_v49 = vld [vmem:[#allocation404_spill] sm:$0xff]  ;;  %v12114_v33 = vpop.permute.xlu1 %3805  ;;  %vm3706_vm15 = vcmp.lt.s32.totalorder %v9272_v10, 83 }
 0x641   : > { %15899 = vst [vmem:[#allocation142_spill] sm:$0xff] %v12085_v23  ;;  %v3269_v34 = vsel %vm3268_vm7, %v15902_v48, %v15901_v50  ;;  %v3273_v4 = vsel %vm3268_vm7, %v15901_v50, %v15902_v48  ;;  %v3212_v29 = vmul.f32 %v12057_v38, %v3196_v17  ;;  %v12104_v5 = vrot.slane %v15903_v60, %v12024_v30  ;;  %v15908_v1 = vld [vmem:[#allocation401_spill] sm:$0xff] }
 0x642   : > { %v12108_v39 = vrot.slane %v15905_v53, %v12024_v30  ;;  %v3342_v0 = vsel %vm3341_vm9, %v15908_v1, %v15907_v49  ;;  %v2952_v27 = vadd.f32 %v2944_v35, %v2879_v42  ;;  %v2953_v15 = vadd.f32 %v2945_v18, %v2880_v52  ;;  %v15909_v17 = vld [vmem:[#allocation397_spill] sm:$0xff] }
 0x643   : > { %15904 = vst [vmem:[#allocation138_spill] sm:$0xff] %v12104_v5  ;;  %v3346_v50 = vsel %vm3341_vm9, %v15907_v49, %v15908_v1  ;;  %v3017_v48 = vmul.f32 %v15909_v17, %v11923_v11  ;;  %v3213_v38 = vmul.f32 %v12061_v44, %v3200_v54  ;;  %v3285_v53 = vmul.f32 %v12085_v23, %v3269_v34  ;;  %v15910_v35 = vld [vmem:[#allocation405_spill] sm:$0xff]  ;;  %v15912_v34 = vld [vmem:[#allocation440_spill] sm:$0xff] }
 0x644   : > { %15906 = vst [vmem:[#allocation153_spill] sm:$0xff] %v12108_v39  ;;  %3921 = vrot.lane.b32.xlu1 %v11832_v22, %s7107_s30  ;;  %v3286_v42 = vmul.f32 %v12089_v14, %v3273_v4  ;;  %v3018_v52 = vmul.f32 %v15909_v17, %v11926_v12  ;;  %v3090_v18 = vmul.f32 %v15910_v35, %v11973_v51  ;;  %v15911_v1 = vld [vmem:[#allocation437_spill] sm:$0xff]  ;;  %v15913_v23 = vld [vmem:[#allocation436_spill] sm:$0xff]  ;;  %v12145_v12 = vpop.permute.xlu1 %3550 }
 0x645   : > { %v3091_v49 = vmul.f32 %v15910_v35, %v11980_v8  ;;  %v12136_v60 = vrot.slane %v15911_v1, %v12024_v30  ;;  %v3358_v11 = vmul.f32 %v12104_v5, %v3342_v0  ;;  %v3359_v54 = vmul.f32 %v12108_v39, %v3346_v50  ;;  %15914 = vst [vmem:[#allocation143_spill] sm:$0xff] %v12145_v12  ;;  %v15915_v8 = vld [vmem:[#allocation438_spill] sm:$0xff]  ;;  %v15917_v50 = vld [vmem:[#allocation441_spill] sm:$0xff] }
 0x646   : > { %v3415_v4 = vsel %vm3414_vm10, %v15913_v23, %v15912_v34  ;;  %v3025_v51 = vadd.f32 %v3017_v48, %v2952_v27  ;;  %v3026_v17 = vadd.f32 %v3018_v52, %v2953_v15  ;;  %v12149_v35 = vrot.slane %v15915_v8, %v12024_v30  ;;  %v15918_v12 = vld [vmem:[#allocation418_spill] sm:$0xff] }
 0x647   : > { %v3419_v0 = vsel %vm3414_vm10, %v15912_v34, %v15913_v23  ;;  %v3163_v1 = vmul.f32 %v15917_v50, %v3139_v56  ;;  %v3164_v39 = vmul.f32 %v15917_v50, %v3140_v16  ;;  %v12161_v27 = vrot.slane %v15843_v31, %v12024_v30  ;;  %v15919_v8 = vld [vmem:[#allocation42_spill] sm:$0xff]  ;;  %v15920_v34 = vld [vmem:[#allocation37_spill] sm:$0xff] }
 0x648   : > { %15916 = vst [vmem:[#allocation144_spill] sm:$0xff] %v12149_v35  ;;  %3984 = vrot.lane.b32.xlu1 %v11604_v46, %s7109_s25  ;;  %v3098_v15 = vadd.f32 %v3090_v18, %v3025_v51  ;;  %v3099_v48 = vadd.f32 %v3091_v49, %v3026_v17  ;;  %v3431_v52 = vmul.f32 %v12136_v60, %v3415_v4  ;;  %v12179_v18 = vpop.permute.xlu1 %3558  ;;  %v15923_v51 = vld [vmem:[#allocation44_spill] sm:$0xff] }
 0x649   : > { %v3488_v23 = vsel %vm3487_vm11, %v15919_v8, %v15918_v12  ;;  %v3236_v5 = vmul.f32 %v15920_v34, %v3212_v29  ;;  %v3237_v56 = vmul.f32 %v15920_v34, %v3213_v38  ;;  %v12173_v16 = vrot.slane %v15845_v2, %v12024_v30  ;;  %15921 = vst [vmem:[#allocation147_spill] sm:$0xff] %v12179_v18  ;;  %v15922_v29 = vld [vmem:[#allocation49_spill] sm:$0xff] }
 0x64a   : > { %v12177_v50 = vrot.slane %v15838_v24, %v12024_v30  ;;  %v3432_v49 = vmul.f32 %v12149_v35, %v3419_v0  ;;  %v3492_v4 = vsel %vm3487_vm11, %v15918_v12, %v15919_v8  ;;  %v12188_v38 = vrot.slane %v15841_v40, %v12024_v30  ;;  %v15924_v8 = vld [vmem:[#allocation52_spill] sm:$0xff] }
 0x64b   : > { %v3561_v17 = vsel %vm3560_vm13, %v15923_v51, %v15922_v29  ;;  %v3171_v34 = vadd.f32 %v3163_v1, %v3098_v15  ;;  %v3172_v24 = vadd.f32 %v3164_v39, %v3099_v48  ;;  %v3504_v0 = vmul.f32 %v12161_v27, %v3488_v23  ;;  %v15927_v23 = vld [vmem:[#allocation50_spill] sm:$0xff] }
 0x64c   : > { %3992 = vrot.lane.b32.xlu1 %v11638_v43, %s7109_s25  ;;  %v3565_v12 = vsel %vm3560_vm13, %v15922_v29, %v15923_v51  ;;  %v3309_v40 = vmul.f32 %v15924_v8, %v3285_v53  ;;  %v3310_v18 = vmul.f32 %v15924_v8, %v3286_v42  ;;  %v12205_v2 = vsub.s32 6, %v15885_v57  ;;  %v12209_v15 = vpop.permute.xlu1 %3629 }
 0x64d   : > { %v3244_v31 = vadd.f32 %v3236_v5, %v3171_v34  ;;  %v3245_v35 = vadd.f32 %v3237_v56, %v3172_v24  ;;  %v3505_v39 = vmul.f32 %v12173_v16, %v3492_v4  ;;  %v3577_v1 = vmul.f32 %v12177_v50, %v3561_v17  ;;  %15925 = vst [vmem:[#allocation151_spill] sm:$0xff] %v12209_v15  ;;  %v15926_v24 = vld [vmem:[#allocation56_spill] sm:$0xff]  ;;  %v15928_v56 = vld [vmem:[#allocation59_spill] sm:$0xff]  ;;  %v15930_v34 = vld [vmem:[#allocation73_spill] sm:$0xff] }
 0x64e   : > { %v3578_v48 = vmul.f32 %v12188_v38, %v3565_v12  ;;  %v12214_v53 = vrot.slane %v15851_v26, %v12024_v30  ;;  %v12218_v42 = vrot.slane %v15853_v25, %v12024_v30  ;;  %v3382_v57 = vmul.f32 %v15926_v24, %v3358_v11  ;;  %v15931_v12 = vld [vmem:[#allocation68_spill] sm:$0xff] }
 0x64f   : > { %v3383_v5 = vmul.f32 %v15926_v24, %v3359_v54  ;;  %v3634_v4 = vsel %vm3633_vm14, %v15928_v56, %v15927_v23  ;;  %v3638_v26 = vsel %vm3633_vm14, %v15927_v23, %v15928_v56  ;;  %v3317_v25 = vadd.f32 %v3309_v40, %v3244_v31  ;;  %v15929_v54 = vld [vmem:[#allocation75_spill] sm:$0xff]  ;;  %v15933_v23 = vld [vmem:[#allocation89_spill] sm:$0xff] }
 0x650   : > { %4105 = vperm.xlu1 %6373, %v11683_v47   ;;  %v3318_v30 = vadd.f32 %v3310_v18, %v3245_v35  ;;  %v12234_v29 = vrot.slane %v15876_v6, %v12205_v2  ;;  %v12238_v11 = vrot.slane %v15878_v37, %v12205_v2  ;;  %v3455_v51 = vmul.f32 %v15929_v54, %v3431_v52  ;;  %v12250_v31 = vpop.permute.xlu1 %3692 }
 0x651   : > { %v3456_v17 = vmul.f32 %v15929_v54, %v3432_v49  ;;  %v3707_v8 = vsel %vm3706_vm15, %v15931_v12, %v15930_v34  ;;  %v3711_v40 = vsel %vm3706_vm15, %v15930_v34, %v15931_v12  ;;  %v3650_v6 = vmul.f32 %v12214_v53, %v3634_v4 }
 0x652   : > { %v3651_v37 = vmul.f32 %v12218_v42, %v3638_v26  ;;  %v12256_v35 = vrot.slane %v15892_v63, %v12205_v2  ;;  %v12260_v52 = vrot.slane %v15894_v41, %v12205_v2  ;;  %v15932_v18 = vmov 48  }
 0x653   : > { %v3390_v49 = vadd.f32 %v3382_v57, %v3317_v25  ;;  %v3391_v24 = vadd.f32 %v3383_v5, %v3318_v30  ;;  %v3528_v56 = vmul.f32 %v15933_v23, %v3504_v0  ;;  %v3529_v54 = vmul.f32 %v15933_v23, %v3505_v39  ;;  %v15934_v57 = vld [vmem:[#allocation98_spill] sm:$0xff]  ;;  %v15935_v39 = vld [vmem:[#allocation79_spill] sm:$0xff] }
 0x654   : > { %6374 = vset.pattern.permute.xlu1 %v15932_v18  ;;  %v2778_v4 = vmul.f32 %v11635_v36, %v12053_v45  ;;  %v2779_v63 = vmul.f32 %v11658_v13, %v12077_v3  ;;  %v3723_v26 = vmul.f32 %v12234_v29, %v3707_v8  ;;  %v3724_v41 = vmul.f32 %v12238_v11, %v3711_v40  ;;  %v12274_v25 = vpop.permute.xlu1 %3700  ;;  %v15936_v30 = vld [vmem:[#allocation83_spill] sm:$0xff] }
 0x655   : > { %4170 = vperm.xlu1 %6374, %v11725_v59   ;;  %v3463_v34 = vadd.f32 %v3455_v51, %v3390_v49  ;;  %v3464_v12 = vadd.f32 %v3456_v17, %v3391_v24  ;;  %v3601_v5 = vmul.f32 %v15934_v57, %v3577_v1  ;;  %v3602_v0 = vmul.f32 %v15934_v57, %v3578_v48  ;;  %v15937_v51 = vld [vmem:[#allocation106_spill] sm:$0xff]  ;;  %v15938_v40 = vld [vmem:[#allocation379_spill] sm:$0xff]  ;;  %v15939_v49 = vld [vmem:[#allocation380_spill] sm:$0xff] }
 0x656   : > { %v3796_v59 = vmul.f32 %v12256_v35, %v15935_v39  ;;  %v3797_v36 = vmul.f32 %v12260_v52, %v15936_v30  ;;  %v12282_v13 = vrot.slane %v15898_v20, %v12205_v2  ;;  %v12286_v45 = vrot.slane %v15900_v21, %v12205_v2  ;;  %v15946_v30 = vld [vmem:[#allocation132_spill] sm:$0xff] }
 0x657   : > { %v3536_v3 = vadd.f32 %v3528_v56, %v3463_v34  ;;  %v3537_v1 = vadd.f32 %v3529_v54, %v3464_v12  ;;  %v3674_v48 = vmul.f32 %v15937_v51, %v3650_v6  ;;  %v3675_v17 = vmul.f32 %v15937_v51, %v3651_v37  ;;  %v15941_v54 = vld [vmem:[#allocation386_spill] sm:$0xff]  ;;  %v15948_v51 = vld [vmem:[#allocation41_spill] sm:$0xff] }
 0x658   : > { %v2738_v8 = vadd.f32 %v12040_v19, %v11953_v58  ;;  %v2802_v18 = vmul.f32 %v15938_v40, %v2778_v4  ;;  %v2803_v20 = vmul.f32 %v15938_v40, %v2779_v63  ;;  %v2804_v21 = vmul.f32 %v15939_v49, %v11755_v55  ;;  %v15942_v34 = vld [vmem:[#allocation382_spill] sm:$0xff]  ;;  %v15943_v4 = vld [vmem:[#allocation80_spill] sm:$0xff]  ;;  %v15949_v40 = vld [vmem:[#allocation141_spill] sm:$0xff] }
 0x659   : > { %3915 = vrot.lane.b32.xlu1 %v11482_v28, %s7107_s30  ;;  %v3609_v24 = vadd.f32 %v3601_v5, %v3536_v3  ;;  %v3610_v23 = vadd.f32 %v3602_v0, %v3537_v1  ;;  %v3747_v56 = vmul.f32 %v11828_v9, %v3723_v26  ;;  %v3748_v6 = vmul.f32 %v11828_v9, %v3724_v41  ;;  %v12300_v37 = vpop.permute.xlu1 %3813  ;;  %v15944_v63 = vld [vmem:[#allocation90_spill] sm:$0xff]  ;;  %v15945_v0 = vld [vmem:[#allocation125_spill] sm:$0xff]  ;;  %v15947_v3 = vld [vmem:[#allocation124_spill] sm:$0xff] }
 0x65a   : > { %15940 = vst [vmem:[#allocation152_spill] sm:$0xff] %v12300_v37  ;;  %v2832_v58 = vsel %vm2830_vm0, %v15942_v34, %v15941_v54  ;;  %v2836_v19 = vsel %vm2830_vm0, %v15941_v54, %v15942_v34  ;;  %v3869_v55 = vmul.f32 %v12282_v13, %v15943_v4  ;;  %v3870_v26 = vmul.f32 %v12286_v45, %v15944_v63  ;;  %v15952_v34 = vld [vmem:[#allocation102_spill] sm:$0xff] }
 0x65b   : > { %v3682_v12 = vadd.f32 %v3674_v48, %v3609_v24  ;;  %v3683_v9 = vadd.f32 %v3675_v17, %v3610_v23  ;;  %v3820_v41 = vmul.f32 %v12114_v33, %v3796_v59  ;;  %v3821_v57 = vmul.f32 %v12114_v33, %v3797_v36  ;;  %v15950_v17 = vld [vmem:[#allocation134_spill] sm:$0xff]  ;;  %v15951_v36 = vld [vmem:[#allocation121_spill] sm:$0xff] }
 0x65c   : > { %v2808_v5 = vadd.f32 %v11764_v32, %v12030_v61  ;;  %v2809_v39 = vadd.f32 %v15945_v0, %v12036_v7  ;;  %v2739_v1 = vadd.f32 %v15947_v3, %v15946_v30  ;;  %v2740_v48 = vadd.f32 %v15949_v40, %v15948_v51  ;;  %v15953_v61 = vld [vmem:[#allocation127_spill] sm:$0xff]  ;;  %v15961_v51 = vld [vmem:[#allocation116_spill] sm:$0xff] }
 0x65d   : > { %3923 = vrot.lane.b32.xlu1 %v11517_v62, %s7107_s30  ;;  %v2810_v24 = vadd.f32 %v2802_v18, %v15950_v17  ;;  %v2811_v59 = vadd.f32 %v2803_v20, %v2738_v8  ;;  %v3755_v23 = vadd.f32 %v3747_v56, %v3682_v12  ;;  %v3756_v33 = vadd.f32 %v3748_v6, %v3683_v9  ;;  %v15954_v18 = vld [vmem:[#allocation387_spill] sm:$0xff]  ;;  %v15955_v8 = vld [vmem:[#allocation384_spill] sm:$0xff]  ;;  %v15957_v6 = vld [vmem:[#allocation402_spill] sm:$0xff] }
 0x65e   : > { %v2805_v62 = vmul.f32 %v15939_v49, %v15951_v36  ;;  %v2812_v54 = vadd.f32 %v2804_v21, %v2739_v1  ;;  %v2849_v32 = vmul.f32 %v15952_v34, %v2832_v58  ;;  %v2850_v4 = vmul.f32 %v15953_v61, %v2836_v19  ;;  %v3879_v7 = vpop.permute.xlu1 %3878  ;;  %v15956_v21 = vld [vmem:[#allocation389_spill] sm:$0xff]  ;;  %v15958_v58 = vld [vmem:[#allocation400_spill] sm:$0xff]  ;;  %v15962_v40 = vld [vmem:[#allocation391_spill] sm:$0xff] }
 0x65f   : > { %v3828_v63 = vadd.f32 %v3820_v41, %v3755_v23  ;;  %v3829_v0 = vadd.f32 %v3821_v57, %v3756_v33  ;;  %v3893_v30 = vmul.f32 %v3879_v7, %v3869_v55  ;;  %v3894_v3 = vmul.f32 %v3879_v7, %v3870_v26  ;;  %v15959_v55 = vld [vmem:[#allocation415_spill] sm:$0xff]  ;;  %v15960_v26 = vld [vmem:[#allocation408_spill] sm:$0xff] }
 0x660   : > { %v2834_v20 = vsel %vm2830_vm0, %v15955_v8, %v15954_v18  ;;  %v2838_v49 = vsel %vm2830_vm0, %v15954_v18, %v15955_v8  ;;  %v2873_v56 = vmul.f32 %v15956_v21, %v2849_v32  ;;  %v2905_v19 = vsel %vm2903_vm2, %v15958_v58, %v15957_v6  ;;  %v15964_v32 = vld [vmem:[#allocation122_spill] sm:$0xff]  ;;  %v15968_v18 = vld [vmem:[#allocation135_spill] sm:$0xff] }
 0x661   : > { %3994 = vrot.lane.b32.xlu1 %v11832_v22, %s7109_s25  ;;  %v2909_v22 = vsel %vm2903_vm2, %v15957_v6, %v15958_v58  ;;  %v2906_v12 = vsel %vm2903_vm2, %v15960_v26, %v15959_v55  ;;  %v12354_v9 = vadd.f32 %v3893_v30, %v3828_v63  ;;  %v12356_v41 = vadd.f32 %v3894_v3, %v3829_v0  ;;  %v15965_v63 = vld [vmem:[#allocation130_spill] sm:$0xff]  ;;  %v15970_v58 = vld [vmem:[#allocation443_spill] sm:$0xff] }
 0x662   : > { %v2813_v57 = vadd.f32 %v2805_v62, %v2740_v48  ;;  %v2874_v1 = vmul.f32 %v15956_v21, %v2850_v4  ;;  %v2875_v17 = vmul.f32 %v15962_v40, %v15961_v51  ;;  %v2910_v23 = vsel %vm2903_vm2, %v15959_v55, %v15960_v26  ;;  %v12365_v33 = vpop.permute.xlu1 %3623  ;;  %v15966_v48 = vld [vmem:[#allocation430_spill] sm:$0xff]  ;;  %v15967_v62 = vld [vmem:[#allocation423_spill] sm:$0xff]  ;;  %v12400_v51 = vpop.permute.xlu0 %3963 }
 0x663   : > { %15963 = vst [vmem:[#allocation148_spill] sm:$0xff] %v12365_v33  ;;  %v2853_v36 = vmul.f32 %v15952_v34, %v2834_v20  ;;  %v2876_v7 = vmul.f32 %v15962_v40, %v15964_v32  ;;  %v2922_v0 = vmul.f32 %v15965_v63, %v2905_v19  ;;  %v2978_v4 = vsel %vm2976_vm1, %v15967_v62, %v15966_v48  ;;  %v15969_v6 = vld [vmem:[#allocation446_spill] sm:$0xff]  ;;  %v15973_v55 = vld [vmem:[#allocation355_spill] sm:$0xff] }
 0x664   : > { %v2854_v30 = vmul.f32 %v15953_v61, %v2838_v49  ;;  %v2881_v3 = vadd.f32 %v2873_v56, %v2808_v5  ;;  %v2923_v8 = vmul.f32 %v15968_v18, %v2909_v22  ;;  %v2924_v34 = vmul.f32 %v15965_v63, %v2906_v12  ;;  %v15971_v49 = vld [vmem:[#allocation131_spill] sm:$0xff]  ;;  %v15972_v22 = vld [vmem:[#allocation409_spill] sm:$0xff]  ;;  %15975 = vst [vmem:[#allocation154_spill] sm:$0xff] %v12400_v51 }
 0x665   : > { %4057 = vrot.lane.b32.xlu1 %v11604_v46, %s7112_s26  ;;  %v2925_v20 = vmul.f32 %v15968_v18, %v2910_v23  ;;  %v2982_v21 = vsel %vm2976_vm1, %v15966_v48, %v15967_v62  ;;  %v2907_v19 = vsel %vm2903_vm2, %v15970_v58, %v15969_v6  ;;  %v2911_v46 = vsel %vm2903_vm2, %v15969_v6, %v15970_v58  ;;  %v15976_v23 = vld [vmem:[#allocation395_spill] sm:$0xff]  ;;  %v15977_v62 = vld [vmem:[#allocation393_spill] sm:$0xff] }
 0x666   : > { %v2882_v5 = vadd.f32 %v2874_v1, %v2809_v39  ;;  %v2883_v61 = vadd.f32 %v2875_v17, %v2810_v24  ;;  %v2995_v56 = vmul.f32 %v15971_v49, %v2978_v4  ;;  %v2979_v26 = vsel %vm2976_vm1, %v15973_v55, %v15972_v22  ;;  %v12398_v12 = vpop.permute.xlu1 %3631  ;;  %v15978_v39 = vld [vmem:[#allocation126_spill] sm:$0xff]  ;;  %v12442_v51 = vpop.permute.xlu0 %4028 }
 0x667   : > { %15974 = vst [vmem:[#allocation150_spill] sm:$0xff] %v12398_v12  ;;  %v2884_v40 = vadd.f32 %v2876_v7, %v2811_v59  ;;  %v2877_v32 = vmul.f32 %v15976_v23, %v2853_v36  ;;  %v2878_v48 = vmul.f32 %v15976_v23, %v2854_v30  ;;  %v2946_v6 = vmul.f32 %v15977_v62, %v2922_v0  ;;  %v15979_v7 = vld [vmem:[#allocation338_spill] sm:$0xff]  ;;  %v15982_v23 = vld [vmem:[#allocation411_spill] sm:$0xff]  ;;  %v6565_v12 = vld [vmem:[%s7568_s12 + $0x8] sm:$0xff] }
 0x668   : > { %v2996_v24 = vmul.f32 %v15978_v39, %v2982_v21  ;;  %v2926_v1 = vmul.f32 %v15965_v63, %v2907_v19  ;;  %v2927_v17 = vmul.f32 %v15968_v18, %v2911_v46  ;;  %v2983_v59 = vsel %vm2976_vm1, %v15972_v22, %v15973_v55  ;;  %v15981_v21 = vld [vmem:[#allocation36_spill] sm:$0xff]  ;;  %v15983_v19 = vld [vmem:[#allocation429_spill] sm:$0xff]  ;;  %15987 = vst [vmem:[#allocation163_spill] sm:$0xff] %v12442_v51 }
 0x669   : > { %4065 = vrot.lane.b32.xlu1 %v11638_v43, %s7112_s26  ;;  %v2947_v36 = vmul.f32 %v15977_v62, %v2923_v8  ;;  %v2948_v4 = vmul.f32 %v15979_v7, %v2924_v34  ;;  %v2949_v0 = vmul.f32 %v15979_v7, %v2925_v20  ;;  %v2997_v30 = vmul.f32 %v15971_v49, %v2979_v26  ;;  %v15980_v43 = vld [vmem:[#allocation344_spill] sm:$0xff]  ;;  %v15984_v8 = vld [vmem:[#allocation427_spill] sm:$0xff]  ;;  %v15986_v62 = vld [vmem:[#allocation342_spill] sm:$0xff] }
 0x66a   : > { %v3019_v58 = vmul.f32 %v15980_v43, %v2995_v56  ;;  %v3051_v63 = vsel %vm3049_vm4, %v15982_v23, %v15981_v21  ;;  %v3055_v18 = vsel %vm3049_vm4, %v15981_v21, %v15982_v23  ;;  %v2980_v34 = vsel %vm2976_vm1, %v15984_v8, %v15983_v19  ;;  %v12431_v20 = vpop.permute.xlu1 %3702  ;;  %v15992_v51 = vld [vmem:[#allocation365_spill] sm:$0xff] }
 0x66b   : > { %15985 = vst [vmem:[#allocation159_spill] sm:$0xff] %v12431_v20  ;;  %v2885_v46 = vadd.f32 %v2877_v32, %v2812_v54  ;;  %v2886_v22 = vadd.f32 %v2878_v48, %v2813_v57  ;;  %v2954_v56 = vadd.f32 %v2946_v6, %v2881_v3  ;;  %v2998_v55 = vmul.f32 %v15978_v39, %v2983_v59  ;;  %v15988_v54 = vld [vmem:[#allocation403_spill] sm:$0xff]  ;;  %v15989_v3 = vld [vmem:[#allocation137_spill] sm:$0xff] }
 0x66c   : > { %v3020_v26 = vmul.f32 %v15980_v43, %v2996_v24  ;;  %v2950_v7 = vmul.f32 %v15986_v62, %v2926_v1  ;;  %v2951_v21 = vmul.f32 %v15986_v62, %v2927_v17  ;;  %v2984_v23 = vsel %vm2976_vm1, %v15983_v19, %v15984_v8  ;;  %v15990_v48 = vld [vmem:[#allocation133_spill] sm:$0xff]  ;;  %v16010_v20 = vld [vmem:[#allocation363_spill] sm:$0xff] }
 0x66d   : > { %4178 = vperm.xlu1 %6374, %v11683_v47   ;;  %v3021_v57 = vmul.f32 %v15988_v54, %v2997_v30  ;;  %v3068_v32 = vmul.f32 %v15989_v3, %v3051_v63  ;;  %v3069_v6 = vmul.f32 %v15990_v48, %v3055_v18  ;;  %v2999_v47 = vmul.f32 %v15971_v49, %v2980_v34  ;;  %v15991_v8 = vld [vmem:[#allocation45_spill] sm:$0xff]  ;;  %v15996_v34 = vld [vmem:[#allocation350_spill] sm:$0xff] }
 0x66e   : > { %v2955_v24 = vadd.f32 %v2947_v36, %v2882_v5  ;;  %v2956_v59 = vadd.f32 %v2948_v4, %v2883_v61  ;;  %v2957_v1 = vadd.f32 %v2949_v0, %v2884_v40  ;;  %v3027_v43 = vadd.f32 %v3019_v58, %v2954_v56  ;;  %v12448_v17 = vpop.permute.xlu1 %3765  ;;  %v15993_v36 = vld [vmem:[#allocation428_spill] sm:$0xff]  ;;  %v15994_v4 = vld [vmem:[#allocation43_spill] sm:$0xff]  ;;  %v15995_v58 = vld [vmem:[#allocation353_spill] sm:$0xff] }
 0x66f   : > { %v3022_v62 = vmul.f32 %v15988_v54, %v2998_v55  ;;  %v3000_v19 = vmul.f32 %v15978_v39, %v2984_v23  ;;  %v3052_v30 = vsel %vm3049_vm4, %v15992_v51, %v15991_v8  ;;  %v3056_v49 = vsel %vm3049_vm4, %v15991_v8, %v15992_v51  ;;  %v15998_v55 = vld [vmem:[#allocation61_spill] sm:$0xff] }
 0x670   : > { %v3028_v5 = vadd.f32 %v3020_v26, %v2955_v24  ;;  %v2958_v61 = vadd.f32 %v2950_v7, %v2885_v46  ;;  %v2959_v40 = vadd.f32 %v2951_v21, %v2886_v22  ;;  %v3124_v39 = vsel %vm3122_vm5, %v15994_v4, %v15993_v36  ;;  %v15997_v22 = vld [vmem:[#allocation51_spill] sm:$0xff]  ;;  %v12481_v21 = vpop.permute.xlu0 %3913 }
 0x671   : > { %3988 = vrot.lane.b32.xlu1 %v11482_v28, %s7109_s25  ;;  %v3029_v0 = vadd.f32 %v3021_v57, %v2956_v59  ;;  %v3092_v63 = vmul.f32 %v15995_v58, %v3068_v32  ;;  %v3093_v18 = vmul.f32 %v15995_v58, %v3069_v6  ;;  %v3023_v56 = vmul.f32 %v15996_v34, %v2999_v47  ;;  %v16000_v57 = vld [vmem:[#allocation145_spill] sm:$0xff]  ;;  %v12490_v47 = vld [vmem:[%s7568_s12 + $0x20] sm:$0xff]  ;;  %v16001_v24 = vld [vmem:[#allocation431_spill] sm:$0xff]  ;;  %s16209_s25 = sld [smem:[#allocation450_spill]] }
 0x672   : > { %v3070_v51 = vmul.f32 %v15989_v3, %v3052_v30  ;;  %v3071_v28 = vmul.f32 %v15990_v48, %v3056_v49  ;;  %v3128_v46 = vsel %vm3122_vm5, %v15993_v36, %v15994_v4  ;;  %v3053_v26 = vsel %vm3049_vm4, %v15998_v55, %v15997_v22  ;;  %v12479_v7 = vpop.permute.xlu1 %3773  ;;  %15999 = vst [vmem:[#allocation155_spill] sm:$0xff] %v12481_v21  ;;  %v16002_v59 = vld [vmem:[#allocation376_spill] sm:$0xff]  ;;  %v16005_v30 = vld [vmem:[#allocation435_spill] sm:$0xff] }
 0x673   : > { %v3030_v23 = vadd.f32 %v3022_v62, %v2957_v1  ;;  %v3024_v54 = vmul.f32 %v15996_v34, %v3000_v19  ;;  %v3141_v32 = vmul.f32 %v16000_v57, %v3124_v39  ;;  %v3057_v6 = vsel %vm3049_vm4, %v15997_v22, %v15998_v55  ;;  %v16003_v62 = vld [vmem:[#allocation434_spill] sm:$0xff]  ;;  %v16007_v39 = vld [vmem:[#allocation136_spill] sm:$0xff]  ;;  %v16008_v55 = vld [vmem:[#allocation439_spill] sm:$0xff] }
 0x674   : > { %v3125_v8 = vsel %vm3122_vm5, %v16002_v59, %v16001_v24  ;;  %v3129_v1 = vsel %vm3122_vm5, %v16001_v24, %v16002_v59  ;;  %v12504_v19 = vrot.slane %v16003_v62, %v12205_v2  ;;  %v12508_v49 = vrot.slane %v16005_v30, %v12205_v2 }
 0x675   : > { %4059 = vrot.lane.b32.xlu1 %v12490_v47, %s7112_s26  ;;  %v3100_v36 = vadd.f32 %v3092_v63, %v3027_v43  ;;  %v3101_v4 = vadd.f32 %v3093_v18, %v3028_v5  ;;  %v3142_v58 = vmul.f32 %v16007_v39, %v3128_v46  ;;  %v3072_v34 = vmul.f32 %v15989_v3, %v3053_v26  ;;  %v6564_v5 = vld [vmem:[%s7568_s12] sm:$0xff]  ;;  %v16011_v3 = vld [vmem:[#allocation55_spill] sm:$0xff]  ;;  %v16015_v26 = vld [vmem:[#allocation361_spill] sm:$0xff] }
 0x676   : > { %16004 = vst [vmem:[#allocation161_spill] sm:$0xff] %v12504_v19  ;;  %16006 = vst [vmem:[#allocation165_spill] sm:$0xff] %v12508_v49  ;;  %v3031_v22 = vadd.f32 %v3023_v56, %v2958_v61  ;;  %v3094_v21 = vmul.f32 %v16008_v55, %v3070_v51  ;;  %v3095_v24 = vmul.f32 %v16008_v55, %v3071_v28  ;;  %v12515_v37 = vpop.permute.xlu1 %3886  ;;  %v16012_v61 = vld [vmem:[#allocation53_spill] sm:$0xff]  ;;  %v16014_v56 = vld [vmem:[#allocation104_spill] sm:$0xff]  ;;  %v12534_v28 = vpop.permute.xlu0 %3982  ;;  %vm3998_vm0 = vcmp.lt.s32.totalorder %v9272_v10, 79 }
 0x677   : > { %v3073_v59 = vmul.f32 %v15990_v48, %v3057_v6  ;;  %16009 = vst [vmem:[#allocation156_spill] sm:$0xff] %v12515_v37  ;;  %v3032_v62 = vadd.f32 %v3024_v54, %v2959_v40  ;;  %v3165_v33 = vmul.f32 %v16010_v20, %v3141_v32  ;;  %v3143_v30 = vmul.f32 %v16000_v57, %v3125_v8  ;;  %v16013_v40 = vld [vmem:[#allocation108_spill] sm:$0xff]  ;;  %v16016_v32 = vld [vmem:[#allocation63_spill] sm:$0xff]  ;;  %v16021_v37 = vld [vmem:[#allocation46_spill] sm:$0xff] }
 0x678   : > { %v3144_v43 = vmul.f32 %v16007_v39, %v3129_v1  ;;  %v3197_v63 = vsel %vm3195_vm6, %v16012_v61, %v16011_v3  ;;  %v3201_v48 = vsel %vm3195_vm6, %v16011_v3, %v16012_v61  ;;  %v3942_v18 = vmul.f32 %v12504_v19, %v16013_v40  ;;  %v16017_v6 = vld [vmem:[#allocation60_spill] sm:$0xff]  ;;  %v16018_v61 = vld [vmem:[#allocation67_spill] sm:$0xff] }
 0x679   : > { %4128 = vrot.lane.b32.xlu1 %v6564_v5, %s7113_s20  ;;  %v3943_v51 = vmul.f32 %v12508_v49, %v16014_v56  ;;  %v3166_v46 = vmul.f32 %v16010_v20, %v3142_v58  ;;  %v3096_v54 = vmul.f32 %v16015_v26, %v3072_v34  ;;  %v3126_v8 = vsel %vm3122_vm5, %v16017_v6, %v16016_v32  ;;  %v16019_v40 = vld [vmem:[#allocation388_spill] sm:$0xff]  ;;  %v16020_v58 = vld [vmem:[#allocation38_spill] sm:$0xff] }
 0x67a   : > { %v3130_v1 = vsel %vm3122_vm5, %v16016_v32, %v16017_v6  ;;  %v3102_v55 = vadd.f32 %v3094_v21, %v3029_v0  ;;  %v3103_v5 = vadd.f32 %v3095_v24, %v3030_v23  ;;  %v3097_v3 = vmul.f32 %v16015_v26, %v3073_v59 }
 0x67b   : > { %v3198_v20 = vsel %vm3195_vm6, %v16019_v40, %v16018_v61  ;;  %v3167_v34 = vmul.f32 %v16020_v58, %v3143_v30  ;;  %v3168_v56 = vmul.f32 %v16020_v58, %v3144_v43  ;;  %v3214_v49 = vmul.f32 %v16021_v37, %v3197_v63  ;;  %v3952_v0 = vpop.permute.xlu1 %3951  ;;  %v4202_v58 = vld [vmem:[#allocation8 + $0x8] sm:$0xff] }
 0x67c   : > { %v3215_v19 = vmul.f32 %v12061_v44, %v3201_v48  ;;  %v3145_v21 = vmul.f32 %v16000_v57, %v3126_v8  ;;  %v3146_v23 = vmul.f32 %v16007_v39, %v3130_v1  ;;  %v3966_v24 = vmul.f32 %v3952_v0, %v3942_v18  ;;  %v12570_v39 = vpop.permute.xlu0 %3990  ;;  %v6566_v18 = vld [vmem:[#allocation6 + $0x18] sm:$0xff] }
 0x67d   : > { %4136 = vrot.lane.b32.xlu1 %v6565_v12, %s7113_s20  ;;  %v3967_v59 = vmul.f32 %v3952_v0, %v3943_v51  ;;  %v3173_v26 = vadd.f32 %v3165_v33, %v3100_v36  ;;  %v3174_v32 = vadd.f32 %v3166_v46, %v3101_v4  ;;  %v3104_v6 = vadd.f32 %v3096_v54, %v3031_v22  ;;  %v16022_v36 = vld [vmem:[#allocation74_spill] sm:$0xff]  ;;  %v16026_v54 = vld [vmem:[#allocation371_spill] sm:$0xff]  ;;  %v16031_v0 = vld [vmem:[#allocation81_spill] sm:$0xff] }
 0x67e   : > { %v3216_v30 = vmul.f32 %v16021_v37, %v3198_v20  ;;  %v3105_v43 = vadd.f32 %v3097_v3, %v3032_v62  ;;  %v3202_v63 = vsel %vm3195_vm6, %v16018_v61, %v16019_v40  ;;  %v12565_v12 = vadd.f32 %v3966_v24, %v12354_v9  ;;  %v16023_v4 = vld [vmem:[#allocation62_spill] sm:$0xff]  ;;  %v16029_v40 = vld [vmem:[#allocation76_spill] sm:$0xff] }
 0x67f   : > { %v12568_v57 = vadd.f32 %v3967_v59, %v12356_v41  ;;  %v3175_v48 = vadd.f32 %v3167_v34, %v3102_v55  ;;  %v3176_v33 = vadd.f32 %v3168_v56, %v3103_v5  ;;  %v3270_v22 = vsel %vm3268_vm7, %v16023_v4, %v16022_v36  ;;  %v12580_v9 = vpop.permute.xlu1 %3696  ;;  %v16025_v41 = vld [vmem:[#allocation373_spill] sm:$0xff]  ;;  %v16028_v61 = vld [vmem:[#allocation78_spill] sm:$0xff]  ;;  %v16033_v59 = vld [vmem:[#allocation87_spill] sm:$0xff] }
 0x680   : > { %v3274_v62 = vsel %vm3268_vm7, %v16022_v36, %v16023_v4  ;;  %16024 = vst [vmem:[#allocation162_spill] sm:$0xff] %v12580_v9  ;;  %v3238_v51 = vmul.f32 %v16025_v41, %v3214_v49  ;;  %v3239_v46 = vmul.f32 %v16025_v41, %v3215_v19  ;;  %v3169_v8 = vmul.f32 %v16026_v54, %v3145_v21  ;;  %v16027_v5 = vld [vmem:[#allocation433_spill] sm:$0xff]  ;;  %v16030_v19 = vld [vmem:[#allocation142_spill] sm:$0xff]  ;;  %v16032_v21 = vld [vmem:[#allocation399_spill] sm:$0xff] }
 0x681   : > { %4182 = vperm.xlu1 %6374, %v6566_v18   ;;  %v3170_v1 = vmul.f32 %v16026_v54, %v3146_v23  ;;  %v3217_v55 = vmul.f32 %v12061_v44, %v3202_v63  ;;  %v3240_v3 = vmul.f32 %v16027_v5, %v3216_v30  ;;  %v3199_v20 = vsel %vm3195_vm6, %v16029_v40, %v16028_v61  ;;  %v16034_v30 = vld [vmem:[#allocation85_spill] sm:$0xff]  ;;  %v16035_v4 = vld [vmem:[#allocation88_spill] sm:$0xff] }
 0x682   : > { %v3203_v49 = vsel %vm3195_vm6, %v16028_v61, %v16029_v40  ;;  %v3287_v34 = vmul.f32 %v16030_v19, %v3270_v22  ;;  %v3288_v56 = vmul.f32 %v12089_v14, %v3274_v62  ;;  %v3271_v23 = vsel %vm3268_vm7, %v16032_v21, %v16031_v0  ;;  %v16036_v22 = vld [vmem:[#allocation97_spill] sm:$0xff] }
 0x683   : > { %v3275_v24 = vsel %vm3268_vm7, %v16031_v0, %v16032_v21  ;;  %v3343_v63 = vsel %vm3341_vm9, %v16034_v30, %v16033_v59  ;;  %v3347_v36 = vsel %vm3341_vm9, %v16033_v59, %v16034_v30  ;;  %v3272_v62 = vsel %vm3268_vm7, %v16036_v22, %v16035_v4  ;;  %v12623_v54 = vpop.permute.xlu1 %3704  ;;  %v12627_v59 = vpop.permute.xlu0 %4036 }
 0x684   : > { %v3276_v18 = vsel %vm3268_vm7, %v16035_v4, %v16036_v22  ;;  %v16037_v41 = vmov 0   ;;  %16038 = vst [vmem:[#allocation158_spill] sm:$0xff] %v12623_v54  ;;  %v3246_v61 = vadd.f32 %v3238_v51, %v3173_v26  ;;  %v3247_v40 = vadd.f32 %v3239_v46, %v3174_v32  ;;  %16039 = vst [vmem:[#allocation157_spill] sm:$0xff] %v12627_v59  ;;  %v16040_v22 = vld [vmem:[#allocation138_spill] sm:$0xff]  ;;  %v16041_v54 = vld [vmem:[#allocation153_spill] sm:$0xff] }
 0x685   : > { %6378 = vset.pattern.permute.xlu1 %v16037_v41  ;;  %v3218_v0 = vmul.f32 %v16021_v37, %v3199_v20  ;;  %v3219_v21 = vmul.f32 %v12061_v44, %v3203_v49  ;;  %v3177_v30 = vadd.f32 %v3169_v8, %v3104_v6  ;;  %v3241_v9 = vmul.f32 %v16027_v5, %v3217_v55  ;;  %v16042_v46 = vld [vmem:[#allocation385_spill] sm:$0xff]  ;;  %v16043_v55 = vld [vmem:[#allocation383_spill] sm:$0xff]  ;;  %v16070_v59 = vld [vmem:[#allocation406_spill] sm:$0xff] }
 0x686   : > { %4212 = vperm.xlu1 %6378, %v4202_v58   ;;  %v3289_v15 = vmul.f32 %v16030_v19, %v3271_v23  ;;  %v3290_v4 = vmul.f32 %v12089_v14, %v3275_v24  ;;  %v3360_v41 = vmul.f32 %v16040_v22, %v3343_v63  ;;  %v3361_v26 = vmul.f32 %v16041_v54, %v3347_v36  ;;  %v16044_v58 = vld [vmem:[#allocation92_spill] sm:$0xff] }
 0x687   : > { %v3291_v32 = vmul.f32 %v16030_v19, %v3272_v62  ;;  %v3292_v37 = vmul.f32 %v12089_v14, %v3276_v18  ;;  %v3178_v44 = vadd.f32 %v3170_v1, %v3105_v43  ;;  %v3248_v51 = vadd.f32 %v3240_v3, %v3175_v48  ;;  %v12638_v8 = vpop.permute.xlu1 %3775  ;;  %v16045_v23 = vld [vmem:[#allocation424_spill] sm:$0xff]  ;;  %v6567_v43 = vld [vmem:[%s7568_s12 + $0x30] sm:$0xff] }
 0x688   : > { %v3311_v20 = vmul.f32 %v16042_v46, %v3287_v34  ;;  %v3312_v6 = vmul.f32 %v16042_v46, %v3288_v56  ;;  %v3242_v5 = vmul.f32 %v16043_v55, %v3218_v0  ;;  %v3243_v49 = vmul.f32 %v16043_v55, %v3219_v21  ;;  %v16046_v1 = vld [vmem:[#allocation54_spill] sm:$0xff]  ;;  %v16047_v34 = vld [vmem:[#allocation101_spill] sm:$0xff]  ;;  %v16048_v56 = vld [vmem:[#allocation96_spill] sm:$0xff]  ;;  %v12662_v55 = vpop.permute.xlu0 %4174 }
 0x689   : > { %v3344_v24 = vsel %vm3341_vm9, %v16045_v23, %v16044_v58  ;;  %v3348_v14 = vsel %vm3341_vm9, %v16044_v58, %v16045_v23  ;;  %v3249_v48 = vadd.f32 %v3241_v9, %v3176_v33  ;;  %v3313_v3 = vmul.f32 %v16046_v1, %v3289_v15  ;;  %v16049_v36 = vld [vmem:[#allocation396_spill] sm:$0xff]  ;;  %v16050_v0 = vld [vmem:[#allocation394_spill] sm:$0xff]  ;;  %16051 = vst [vmem:[#allocation164_spill] sm:$0xff] %v12662_v55 }
 0x68a   : > { %4061 = vrot.lane.b32.xlu1 %v6567_v43, %s7112_s26  ;;  %v3314_v19 = vmul.f32 %v16046_v1, %v3290_v4  ;;  %v3416_v63 = vsel %vm3414_vm10, %v16048_v56, %v16047_v34  ;;  %v3384_v62 = vmul.f32 %v16049_v36, %v3360_v41  ;;  %v3385_v18 = vmul.f32 %v16049_v36, %v3361_v26  ;;  %v16058_v36 = vld [vmem:[#allocation35_spill] sm:$0xff]  ;;  %s14157_s26 = scalar_lea.hbm %s16209_s25, %s6016_s13 }
 0x68b   : > { %v3315_v21 = vmul.f32 %v16050_v0, %v3291_v32  ;;  %v3316_v46 = vmul.f32 %v16050_v0, %v3292_v37  ;;  %v3319_v33 = vadd.f32 %v3311_v20, %v3246_v61  ;;  %v3320_v9 = vadd.f32 %v3312_v6, %v3247_v40  ;;  %v12666_v58 = vpop.permute.xlu1 %3838  ;;  %v16052_v32 = vld [vmem:[#allocation105_spill] sm:$0xff]  ;;  %v16053_v37 = vld [vmem:[#allocation103_spill] sm:$0xff]  ;;  %v4203_v6 = vld [vmem:[#allocation8 + $0x10] sm:$0xff] }
 0x68c   : > { %v3362_v15 = vmul.f32 %v16040_v22, %v3344_v24  ;;  %v3363_v4 = vmul.f32 %v16041_v54, %v3348_v14  ;;  %v3250_v23 = vadd.f32 %v3242_v5, %v3177_v30  ;;  %v3251_v43 = vadd.f32 %v3243_v49, %v3178_v44  ;;  %v16054_v24 = vld [vmem:[#allocation70_spill] sm:$0xff] }
 0x68d   : > { %v3420_v41 = vsel %vm3414_vm10, %v16047_v34, %v16048_v56  ;;  %v3433_v26 = vmul.f32 %v12136_v60, %v3416_v63  ;;  %v3321_v61 = vadd.f32 %v3313_v3, %v3248_v51  ;;  %v3322_v40 = vadd.f32 %v3314_v19, %v3249_v48  ;;  %v16055_v34 = vld [vmem:[#allocation144_spill] sm:$0xff]  ;;  %v16056_v51 = vld [vmem:[#allocation410_spill] sm:$0xff]  ;;  %v16057_v63 = vld [vmem:[#allocation107_spill] sm:$0xff] }
 0x68e   : > { %4132 = vrot.lane.b32.xlu1 %v12490_v47, %s7113_s20  ;;  %v3345_v20 = vsel %vm3341_vm9, %v16053_v37, %v16052_v32  ;;  %v3392_v30 = vadd.f32 %v3384_v62, %v3319_v33  ;;  %v3393_v44 = vadd.f32 %v3385_v18, %v3320_v9  ;;  %v3323_v5 = vadd.f32 %v3315_v21, %v3250_v23  ;;  %v12697_v18 = vpop.permute.xlu0 %4101  ;;  %v16060_v21 = vld [vmem:[#allocation109_spill] sm:$0xff] }
 0x68f   : > { %v12679_v49 = vadd.f32 %v3316_v46, %v3251_v43  ;;  %v3386_v14 = vmul.f32 %v16054_v24, %v3362_v15  ;;  %v3387_v1 = vmul.f32 %v16054_v24, %v3363_v4  ;;  %v3434_v56 = vmul.f32 %v16055_v34, %v3420_v41  ;;  %v12685_v47 = vpop.permute.xlu1 %3846  ;;  %16059 = vst [vmem:[#allocation160_spill] sm:$0xff] %v12697_v18  ;;  %v16061_v46 = vld [vmem:[#allocation111_spill] sm:$0xff]  ;;  %v16064_v15 = vld [vmem:[#allocation438_spill] sm:$0xff] }
 0x690   : > { %v3457_v48 = vmul.f32 %v16056_v51, %v3433_v26  ;;  %v3349_v3 = vsel %vm3341_vm9, %v16052_v32, %v16053_v37  ;;  %v3364_v19 = vmul.f32 %v16040_v22, %v3345_v20  ;;  %v3417_v62 = vsel %vm3414_vm10, %v16058_v36, %v16057_v63  ;;  %v16062_v22 = vld [vmem:[#allocation437_spill] sm:$0xff]  ;;  %v16066_v43 = vld [vmem:[#allocation119_spill] sm:$0xff]  ;;  %v16067_v41 = vld [vmem:[#allocation110_spill] sm:$0xff] }
 0x691   : > { %v3421_v0 = vsel %vm3414_vm10, %v16057_v63, %v16058_v36  ;;  %v3489_v33 = vsel %vm3487_vm11, %v16061_v46, %v16060_v21  ;;  %v12709_v9 = vrot.slane %v16062_v22, %v12205_v2  ;;  %v12713_v4 = vrot.slane %v16064_v15, %v12205_v2  ;;  %v16068_v24 = vld [vmem:[#allocation123_spill] sm:$0xff] }
 0x692   : > { %4217 = vperm.xlu1 %6378, %v4203_v6   ;;  %v3493_v23 = vsel %vm3487_vm11, %v16060_v21, %v16061_v46  ;;  %v3418_v26 = vsel %vm3414_vm10, %v16067_v41, %v16066_v43  ;;  %v3999_v32 = vsel %vm3998_vm0, %v12534_v28, %v12570_v39  ;;  %v4003_v37 = vsel %vm3998_vm0, %v12570_v39, %v12534_v28  ;;  %v16069_v63 = vld [vmem:[#allocation47_spill] sm:$0xff] }
 0x693   : > { %16063 = vst [vmem:[#allocation167_spill] sm:$0xff] %v12709_v9  ;;  %16065 = vst [vmem:[#allocation146_spill] sm:$0xff] %v12713_v4  ;;  %v3458_v20 = vmul.f32 %v16056_v51, %v3434_v56  ;;  %v3422_v6 = vsel %vm3414_vm10, %v16066_v43, %v16067_v41  ;;  %v3490_v36 = vsel %vm3487_vm11, %v16069_v63, %v16068_v24  ;;  %v12744_v46 = vpop.permute.xlu1 %3959  ;;  %v6568_v22 = vld [vmem:[%s7568_s12 + $0x38] sm:$0xff]  ;;  %vm4071_vm1 = vcmp.lt.s32.totalorder %v9272_v10, 78 }
 0x694   : > { %v3494_v21 = vsel %vm3487_vm11, %v16068_v24, %v16069_v63  ;;  %v3365_v28 = vmul.f32 %v16041_v54, %v3349_v3  ;;  %v3435_v39 = vmul.f32 %v12136_v60, %v3417_v62  ;;  %v3436_v56 = vmul.f32 %v16055_v34, %v3421_v0  ;;  %v4241_v63 = vld [vmem:[#allocation12] sm:$0xff] }
 0x695   : > { %v3506_v51 = vmul.f32 %v12161_v27, %v3489_v33  ;;  %v3507_v15 = vmul.f32 %v12173_v16, %v3493_v23  ;;  %v3437_v43 = vmul.f32 %v12136_v60, %v3418_v26  ;;  %v4015_v41 = vmul.f32 %v12709_v9, %v3999_v32  ;;  %v12760_v33 = vpop.permute.xlu0 %3986  ;;  %v16072_v26 = vld [vmem:[#allocation82_spill] sm:$0xff] }
 0x696   : > { %4142 = vrot.lane.b32.xlu1 %v6568_v22, %s7113_s20  ;;  %v4016_v24 = vmul.f32 %v12713_v4, %v4003_v37  ;;  %v3388_v54 = vmul.f32 %v16070_v59, %v3364_v19  ;;  %v3438_v3 = vmul.f32 %v16055_v34, %v3422_v6  ;;  %v3508_v62 = vmul.f32 %v12161_v27, %v3490_v36  ;;  %v16073_v4 = vld [vmem:[#allocation34_spill] sm:$0xff]  ;;  %s7114_s20 = smov [#allocation23]  }
 0x697   : > { %v3509_v0 = vmul.f32 %v12173_v16, %v3494_v21  ;;  %16071 = vst [vmem:[#allocation171_spill] sm:$0xff] %v12760_v33  ;;  %v3394_v22 = vadd.f32 %v3386_v14, %v3321_v61  ;;  %v3395_v55 = vadd.f32 %v3387_v1, %v3322_v40  ;;  %v3465_v23 = vadd.f32 %v3457_v48, %v3392_v30  ;;  %v16074_v36 = vld [vmem:[#allocation442_spill] sm:$0xff]  ;;  %v4245_v61 = vld [vmem:[#allocation14] sm:$0xff]  ;;  %v16076_v1 = vld [vmem:[#allocation117_spill] sm:$0xff]  ;;  %s6911_s16 = sshll.u32 %s7114_s20, 4  ;;  %s6912_s16 = int_to_ptr.vmem [resolvable:$false] %s6911_s16 }
 0x698   : > { %v3466_v18 = vadd.f32 %v3458_v20, %v3393_v44  ;;  %v3389_v60 = vmul.f32 %v16070_v59, %v3365_v28  ;;  %v3459_v32 = vmul.f32 %v16072_v26, %v3435_v39  ;;  %v3460_v37 = vmul.f32 %v16072_v26, %v3436_v56  ;;  %v4025_v34 = vpop.permute.xlu1 %4024  ;;  %v16075_v44 = vld [vmem:[#allocation95_spill] sm:$0xff]  ;;  %v16077_v48 = vld [vmem:[#allocation118_spill] sm:$0xff]  ;;  %v16082_v26 = vld [vmem:[#allocation444_spill] sm:$0xff]  ;;  %s6913_s13 = scalar_lea.vmem %s6912_s16, 2048  ;;  %p6914_p11 = scmp.lt.s32.totalorder %s14160_s28, %s6912_s16 }
 0x699   : > { %v3530_v19 = vmul.f32 %v16073_v4, %v3506_v51  ;;  %v3531_v6 = vmul.f32 %v16073_v4, %v3507_v15  ;;  %v3461_v21 = vmul.f32 %v16074_v36, %v3437_v43  ;;  %v4039_v9 = vmul.f32 %v4025_v34, %v4015_v41  ;;  %v4056_v51 = vpop.permute.xlu0 %4055  ;;  %p6915_p3 = scmp.lt.s32.totalorder %s6913_s13, %s6907_s29 }
 0x69a   : > { %4352 = vperm.xlu1 %6378, %v4241_v63   ;;  %v4040_v33 = vmul.f32 %v4025_v34, %v4016_v24  ;;  %v3396_v40 = vadd.f32 %v3388_v54, %v3323_v5  ;;  %v3462_v30 = vmul.f32 %v16074_v36, %v3438_v3  ;;  %v3532_v59 = vmul.f32 %v16075_v44, %v3508_v62  ;;  %v4243_v54 = vld [vmem:[#allocation12 + $0x10] sm:$0xff] }
 0x69b   : > { %v3533_v14 = vmul.f32 %v16075_v44, %v3509_v0  ;;  %v3562_v20 = vsel %vm3560_vm13, %v16077_v48, %v16076_v1  ;;  %v3566_v4 = vsel %vm3560_vm13, %v16076_v1, %v16077_v48  ;;  %v12780_v28 = vadd.f32 %v4039_v9, %v12565_v12  ;;  %v16079_v0 = vld [vmem:[#allocation149_spill] sm:$0xff]  ;;  %p6916_p5 = por %p6915_p3, %p6914_p11 }
 0x69c   : > { %v12783_v5 = vadd.f32 %v4040_v33, %v12568_v57  ;;  %v3397_v39 = vadd.f32 %v3389_v60, %v12679_v49  ;;  %v3467_v56 = vadd.f32 %v3459_v32, %v3394_v22  ;;  %v3770_v15 = vpop.permute.xlu1 %3769  ;;  %v3468_v43 = vadd.f32 %v3460_v37, %v3395_v55  ;;  %v16078_v49 = vld [vmem:[#allocation140_spill] sm:$0xff]  ;;  %v16080_v33 = vld [vmem:[#allocation139_spill] sm:$0xff]  ;;  %v16081_v22 = vld [vmem:[#allocation129_spill] sm:$0xff] }
 0x69d   : > { %v3538_v41 = vadd.f32 %v3530_v19, %v3465_v23  ;;  %v3539_v24 = vadd.f32 %v3531_v6, %v3466_v18  ;;  %v12786_v63 = vadd.f32 %v3461_v21, %v3396_v40  ;;  %v3579_v12 = vmul.f32 %v12177_v50, %v3562_v20  ;;  %v16083_v37 = vld [vmem:[#allocation445_spill] sm:$0xff]  ;;  %v4247_v40 = vld [vmem:[#allocation14 + $0x10] sm:$0xff]  ;;  %v4064_v48 = vpop.permute.xlu0 %4063  ;;  %p6917_p9 = pnand %p6916_p5, %p6910_p10 }
 0x69e   : > { %4380 = vperm.xlu1 %6378, %v4245_v61   ;;  %v12788_v3 = vadd.f32 %v3462_v30, %v3397_v39  ;;  %v12790_v62 = vadd.f32 %v3532_v59, %v3467_v56  ;;  %v3580_v57 = vmul.f32 %v12188_v38, %v3566_v4  ;;  %v12794_v9 = vadd.f32 %v3533_v14, %v3468_v43  ;;  %v16084_v30 = vld [vmem:[#allocation39_spill] sm:$0xff] }
 0x69f   : > { %v3635_v55 = vsel %vm3633_vm14, %v16079_v0, %v16078_v49  ;;  %v3639_v18 = vsel %vm3633_vm14, %v16078_v49, %v16079_v0  ;;  %v3491_v23 = vsel %vm3487_vm11, %v16081_v22, %v16080_v33  ;;  %v3495_v60 = vsel %vm3487_vm11, %v16080_v33, %v16081_v22  ;;  %v16087_v49 = vld [vmem:[#allocation57_spill] sm:$0xff] }
 0x6a0   : > { %v12815_v32 = vrot.slane %v16082_v26, %v12205_v2  ;;  %v12819_v19 = vrot.slane %v16083_v37, %v12205_v2  ;;  %v3778_v34 = vpop.permute.xlu1 %3777  ;;  %v3708_v6 = vsel %vm3706_vm15, %v12250_v31, %v12274_v25  ;;  %v3712_v36 = vsel %vm3706_vm15, %v12274_v25, %v12250_v31  ;;  %v16088_v37 = vld [vmem:[#allocation58_spill] sm:$0xff] }
 0x6a1   : > { %v12831_v21 = vsel %vm3779_vm3, %v3770_v15, %v3778_v34  ;;  %v12835_v61 = vsel %vm3779_vm3, %v3778_v34, %v3770_v15  ;;  %v3603_v44 = vmul.f32 %v16084_v30, %v3579_v12  ;;  %v3604_v59 = vmul.f32 %v16084_v30, %v3580_v57  ;;  %v16085_v12 = vld [vmem:[#allocation128_spill] sm:$0xff] }
 0x6a2   : > { %4362 = vperm.xlu1 %6378, %v4243_v54   ;;  %v3652_v14 = vmul.f32 %v12214_v53, %v3635_v55  ;;  %v3653_v1 = vmul.f32 %v12218_v42, %v3639_v18  ;;  %v3781_v31 = vsel %vm3779_vm3, %v12448_v17, %v12479_v7  ;;  %v3785_v25 = vsel %vm3779_vm3, %v12479_v7, %v12448_v17  ;;  %v16086_v57 = vld [vmem:[#allocation432_spill] sm:$0xff] }
 0x6a3   : > { %v4072_v20 = vsel %vm4071_vm1, %v4056_v51, %v4064_v48  ;;  %v4076_v4 = vsel %vm4071_vm1, %v4064_v48, %v4056_v51  ;;  %v3510_v39 = vmul.f32 %v12161_v27, %v3491_v23  ;;  %v3511_v56 = vmul.f32 %v12173_v16, %v3495_v60  ;;  %v4249_v51 = vld [vmem:[#allocation17] sm:$0xff] }
 0x6a4   : > { %v3725_v15 = vmul.f32 %v12234_v29, %v3708_v6  ;;  %v3726_v43 = vmul.f32 %v12238_v11, %v3712_v36  ;;  %v12857_v54 = vpop.permute.xlu1 %3848  ;;  %v3563_v17 = vsel %vm3560_vm13, %v16086_v57, %v16085_v12  ;;  %v3567_v7 = vsel %vm3560_vm13, %v16085_v12, %v16086_v57  ;;  %v16090_v48 = vld [vmem:[#allocation72_spill] sm:$0xff] }
 0x6a5   : > { %v3854_v27 = vsel %vm3852_vm8, %v12666_v58, %v12685_v47  ;;  %v3858_v16 = vsel %vm3852_vm8, %v12685_v47, %v12666_v58  ;;  %v3676_v0 = vmul.f32 %v16087_v49, %v3652_v14  ;;  %v3677_v55 = vmul.f32 %v16087_v49, %v3653_v1 }
 0x6a6   : > { %4390 = vperm.xlu1 %6378, %v4247_v40   ;;  %v3798_v18 = vmul.f32 %v12256_v35, %v3781_v31  ;;  %v3799_v33 = vmul.f32 %v12260_v52, %v3785_v25  ;;  %v3611_v22 = vadd.f32 %v3603_v44, %v3538_v41  ;;  %v3612_v23 = vadd.f32 %v3604_v59, %v3539_v24  ;;  %v16089_v40 = vld [vmem:[#allocation422_spill] sm:$0xff] }
 0x6a7   : > { %v12880_v60 = vmul.f32 %v12815_v32, %v4072_v20  ;;  %v12883_v26 = vmul.f32 %v12819_v19, %v4076_v4  ;;  %v3749_v34 = vmul.f32 %v16088_v37, %v3725_v15  ;;  %v3750_v58 = vmul.f32 %v16088_v37, %v3726_v43  ;;  %v4251_v59 = vld [vmem:[#allocation17 + $0x10] sm:$0xff]  ;;  %v16091_v20 = vld [vmem:[#allocation147_spill] sm:$0xff]  ;;  %v16094_v43 = vld [vmem:[#allocation65_spill] sm:$0xff] }
 0x6a8   : > { %v3871_v47 = vmul.f32 %v12282_v13, %v3854_v27  ;;  %v3872_v6 = vmul.f32 %v12286_v45, %v3858_v16  ;;  %v3912_v36 = vpop.permute.xlu1 %3911  ;;  %v3534_v30 = vmul.f32 %v16089_v40, %v3510_v39  ;;  %v3535_v41 = vmul.f32 %v16089_v40, %v3511_v56  ;;  %v16092_v4 = vld [vmem:[#allocation143_spill] sm:$0xff]  ;;  %v16095_v27 = vld [vmem:[#allocation93_spill] sm:$0xff]  ;;  %v4253_v37 = vld [vmem:[#allocation17 + $0x20] sm:$0xff] }
 0x6a9   : > { %v3581_v24 = vmul.f32 %v12177_v50, %v3563_v17  ;;  %v3582_v44 = vmul.f32 %v12188_v38, %v3567_v7  ;;  %v3684_v14 = vadd.f32 %v3676_v0, %v3611_v22  ;;  %v3685_v1 = vadd.f32 %v3677_v55, %v3612_v23  ;;  %v16093_v56 = vld [vmem:[#allocation151_spill] sm:$0xff]  ;;  %v16096_v0 = vld [vmem:[#allocation150_spill] sm:$0xff]  ;;  %v16097_v55 = vld [vmem:[#allocation148_spill] sm:$0xff] }
 0x6aa   : > { %4428 = vperm.xlu1 %6378, %v4249_v51   ;;  %v3822_v31 = vmul.f32 %v16090_v48, %v3798_v18  ;;  %v3823_v25 = vmul.f32 %v16090_v48, %v3799_v33  ;;  %v3564_v15 = vsel %vm3560_vm13, %v16092_v4, %v16091_v20  ;;  %v3568_v39 = vsel %vm3560_vm13, %v16091_v20, %v16092_v4  ;;  %v16099_v40 = vld [vmem:[#allocation165_spill] sm:$0xff] }
 0x6ab   : > { %v3636_v12 = vsel %vm3633_vm14, %v16094_v43, %v16093_v56  ;;  %v3640_v57 = vsel %vm3633_vm14, %v16093_v56, %v16094_v43  ;;  %v3757_v17 = vadd.f32 %v3749_v34, %v3684_v14  ;;  %v3758_v7 = vadd.f32 %v3750_v58, %v3685_v1  ;;  %v16100_v14 = vld [vmem:[#allocation113_spill] sm:$0xff] }
 0x6ac   : > { %v3895_v16 = vmul.f32 %v16095_v27, %v3871_v47  ;;  %v3896_v51 = vmul.f32 %v16095_v27, %v3872_v6  ;;  %v3920_v49 = vpop.permute.xlu1 %3919  ;;  %v3637_v18 = vsel %vm3633_vm14, %v16097_v55, %v16096_v0  ;;  %v3641_v33 = vsel %vm3633_vm14, %v16096_v0, %v16097_v55  ;;  %v16098_v47 = vld [vmem:[#allocation161_spill] sm:$0xff]  ;;  %v16101_v27 = vld [vmem:[#allocation99_spill] sm:$0xff] }
 0x6ad   : > { %v3927_v22 = vsel %vm3925_vm12, %v3912_v36, %v3920_v49  ;;  %v3931_v23 = vsel %vm3925_vm12, %v3920_v49, %v3912_v36  ;;  %v3830_v34 = vadd.f32 %v3822_v31, %v3757_v17  ;;  %v3831_v58 = vadd.f32 %v3823_v25, %v3758_v7  ;;  %v16104_v49 = vld [vmem:[#allocation48_spill] sm:$0xff] }
 0x6ae   : > { %4438 = vperm.xlu1 %6378, %v4251_v59   ;;  %v3944_v6 = vmul.f32 %v16098_v47, %v3927_v22  ;;  %v3945_v59 = vmul.f32 %v16099_v40, %v3931_v23  ;;  %v3605_v1 = vmul.f32 %v16100_v14, %v3581_v24  ;;  %v3606_v48 = vmul.f32 %v16100_v14, %v3582_v44  ;;  %v16106_v22 = vld [vmem:[#allocation77_spill] sm:$0xff] }
 0x6af   : > { %v3583_v20 = vmul.f32 %v12177_v50, %v3564_v15  ;;  %v3584_v4 = vmul.f32 %v12188_v38, %v3568_v39  ;;  %v3903_v56 = vadd.f32 %v3895_v16, %v3830_v34  ;;  %v3904_v43 = vadd.f32 %v3896_v51, %v3831_v58  ;;  %v4255_v50 = vld [vmem:[#allocation17 + $0x30] sm:$0xff]  ;;  %v4257_v34 = vld [vmem:[#allocation17 + $0x40] sm:$0xff] }
 0x6b0   : > { %v3968_v0 = vmul.f32 %v16101_v27, %v3944_v6  ;;  %v3969_v36 = vmul.f32 %v16101_v27, %v3945_v59  ;;  %v3654_v25 = vmul.f32 %v12214_v53, %v3636_v12  ;;  %v3655_v17 = vmul.f32 %v12218_v42, %v3640_v57  ;;  %v16102_v15 = vld [vmem:[#allocation158_spill] sm:$0xff]  ;;  %v16108_v58 = vld [vmem:[#allocation64_spill] sm:$0xff] }
 0x6b1   : > { %v12933_v31 = vpop.permute.xlu1 %4032  ;;  %v3656_v24 = vmul.f32 %v12214_v53, %v3637_v18  ;;  %v3657_v44 = vmul.f32 %v12218_v42, %v3641_v33  ;;  %v16103_v38 = vld [vmem:[#allocation162_spill] sm:$0xff]  ;;  %v3542_v57 = vadd.f32 %v3534_v30, %v12786_v63  ;;  %v3543_v53 = vadd.f32 %v3535_v41, %v12788_v3  ;;  %v16105_v33 = vld [vmem:[#allocation159_spill] sm:$0xff]  ;;  %v16107_v3 = vld [vmem:[#allocation120_spill] sm:$0xff] }
 0x6b2   : > { %4448 = vperm.xlu1 %6378, %v4253_v37   ;;  %v3710_v39 = vsel %vm3706_vm15, %v16103_v38, %v16102_v15  ;;  %v3714_v7 = vsel %vm3706_vm15, %v16102_v15, %v16103_v38  ;;  %v12947_v16 = vadd.f32 %v3968_v0, %v3903_v56  ;;  %v12949_v12 = vadd.f32 %v3969_v36, %v3904_v43  ;;  %v16110_v36 = vld [vmem:[#allocation69_spill] sm:$0xff] }
 0x6b3   : > { %v3613_v42 = vadd.f32 %v3605_v1, %v12790_v62  ;;  %v3614_v51 = vadd.f32 %v3606_v48, %v12794_v9  ;;  %v3607_v55 = vmul.f32 %v16104_v49, %v3583_v20  ;;  %v3608_v18 = vmul.f32 %v16104_v49, %v3584_v4  ;;  %v16109_v4 = vld [vmem:[#allocation84_spill] sm:$0xff] }
 0x6b4   : > { %v3709_v23 = vsel %vm3706_vm15, %v16106_v22, %v16105_v33  ;;  %v3713_v63 = vsel %vm3706_vm15, %v16105_v33, %v16106_v22  ;;  %v3678_v30 = vmul.f32 %v16107_v3, %v3654_v25  ;;  %v3679_v62 = vmul.f32 %v16107_v3, %v3655_v17 }
 0x6b5   : > { %v3729_v9 = vmul.f32 %v12234_v29, %v3710_v39  ;;  %v3730_v41 = vmul.f32 %v12238_v11, %v3714_v7  ;;  %v3680_v6 = vmul.f32 %v16108_v58, %v3656_v24  ;;  %v3681_v59 = vmul.f32 %v16108_v58, %v3657_v44  ;;  %v4259_v24 = vld [vmem:[#allocation17 + $0x50] sm:$0xff]  ;;  %v16112_v7 = vld [vmem:[#allocation40_spill] sm:$0xff] }
 0x6b6   : > { %4458 = vperm.xlu1 %6378, %v4255_v50   ;;  %v3727_v48 = vmul.f32 %v12234_v29, %v3709_v23  ;;  %v3728_v20 = vmul.f32 %v12238_v11, %v3713_v63  ;;  %v3782_v56 = vsel %vm3779_vm3, %v16109_v4, %v12638_v8  ;;  %v3786_v43 = vsel %vm3779_vm3, %v12638_v8, %v16109_v4 }
 0x6b7   : > { %v4098_v37 = vpop.permute.xlu1 %4097  ;;  %v3802_v27 = vmul.f32 %v12256_v35, %v12831_v21  ;;  %v3616_v0 = vadd.f32 %v3608_v18, %v3543_v53  ;;  %v3753_v25 = vmul.f32 %v16110_v36, %v3729_v9  ;;  %v3754_v17 = vmul.f32 %v16110_v36, %v3730_v41  ;;  %v16113_v53 = vld [vmem:[#allocation86_spill] sm:$0xff] }
 0x6b8   : > { %v4112_v14 = vmul.f32 %v4098_v37, %v12880_v60  ;;  %v4113_v1 = vmul.f32 %v4098_v37, %v12883_v26  ;;  %v3803_v60 = vmul.f32 %v12260_v52, %v12835_v61  ;;  %v3615_v26 = vadd.f32 %v3607_v55, %v3542_v57  ;;  %v16111_v61 = vld [vmem:[#allocation100_spill] sm:$0xff] }
 0x6b9   : > { %v3800_v21 = vmul.f32 %v12256_v35, %v3782_v56  ;;  %v3801_v44 = vmul.f32 %v12260_v52, %v3786_v43  ;;  %v3686_v50 = vadd.f32 %v3678_v30, %v3613_v42  ;;  %v3687_v15 = vadd.f32 %v3679_v62, %v3614_v51  ;;  %v4261_v42 = vld [vmem:[#allocation17 + $0x60] sm:$0xff]  ;;  %v4263_v56 = vld [vmem:[#allocation17 + $0x70] sm:$0xff] }
 0x6ba   : > { %v12988_v29 = vadd.f32 %v4112_v14, %v12780_v28  ;;  %v12991_v11 = vadd.f32 %v4113_v1, %v12783_v5  ;;  %4468 = vperm.xlu1 %6378, %v4257_v34   ;;  %v3855_v28 = vsel %vm3852_vm8, %v16111_v61, %v12857_v54  ;;  %v3859_v5 = vsel %vm3852_vm8, %v12857_v54, %v16111_v61  ;;  %v16114_v51 = vld [vmem:[#allocation152_spill] sm:$0xff]  ;;  %v16116_v1 = vld [vmem:[#allocation91_spill] sm:$0xff]  ;;  %v4265_v61 = vld [vmem:[#allocation20] sm:$0xff] }
 0x6bb   : > { %v3843_v8 = vpop.permute.xlu1 %3842  ;;  %v3688_v38 = vadd.f32 %v3680_v6, %v3615_v26  ;;  %v3689_v39 = vadd.f32 %v3681_v59, %v3616_v0  ;;  %v3751_v57 = vmul.f32 %v16112_v7, %v3727_v48  ;;  %v3752_v35 = vmul.f32 %v16112_v7, %v3728_v20  ;;  %v16115_v6 = vld [vmem:[#allocation156_spill] sm:$0xff]  ;;  %v16118_v7 = vld [vmem:[#allocation167_spill] sm:$0xff] }
 0x6bc   : > { %v3826_v52 = vmul.f32 %v16113_v53, %v3802_v27  ;;  %v3827_v49 = vmul.f32 %v16113_v53, %v3803_v60  ;;  %v3873_v33 = vmul.f32 %v12282_v13, %v3855_v28  ;;  %v3874_v22 = vmul.f32 %v12286_v45, %v3859_v5 }
 0x6bd   : > { %v3761_v55 = vadd.f32 %v3753_v25, %v3688_v38  ;;  %v3762_v18 = vadd.f32 %v3754_v17, %v3689_v39  ;;  %v3824_v23 = vmul.f32 %v16114_v51, %v3800_v21  ;;  %v3825_v63 = vmul.f32 %v16114_v51, %v3801_v44 }
 0x6be   : > { %4478 = vperm.xlu1 %6378, %v4259_v24   ;;  %v3759_v41 = vadd.f32 %v3751_v57, %v3686_v50  ;;  %v3760_v37 = vadd.f32 %v3752_v35, %v3687_v15  ;;  %v3897_v59 = vmul.f32 %v16115_v6, %v3873_v33  ;;  %v3898_v14 = vmul.f32 %v16115_v6, %v3874_v22  ;;  %v4267_v15 = vld [vmem:[#allocation20 + $0x10] sm:$0xff]  ;;  %v16119_v35 = vld [vmem:[#allocation146_spill] sm:$0xff] }
 0x6bf   : > { %v3851_v54 = vpop.permute.xlu1 %3850  ;;  %v3834_v34 = vadd.f32 %v3826_v52, %v3761_v55  ;;  %v3835_v58 = vadd.f32 %v3827_v49, %v3762_v18  ;;  %v16120_v52 = vld [vmem:[#allocation163_spill] sm:$0xff]  ;;  %v4269_v18 = vld [vmem:[#allocation21] sm:$0xff]  ;;  %vm4144_vm3 = vcmp.lt.s32.totalorder %v9272_v10, 77 }
 0x6c0   : > { %v3856_v3 = vsel %vm3852_vm8, %v3843_v8, %v3851_v54  ;;  %v3860_v30 = vsel %vm3852_vm8, %v3851_v54, %v3843_v8  ;;  %v3832_v43 = vadd.f32 %v3824_v23, %v3759_v41  ;;  %v3833_v27 = vadd.f32 %v3825_v63, %v3760_v37  ;;  %v4271_v54 = vld [vmem:[#allocation21 + $0x10] sm:$0xff] }
 0x6c1   : > { %v3875_v62 = vmul.f32 %v12282_v13, %v3856_v3  ;;  %v3876_v9 = vmul.f32 %v12286_v45, %v3860_v30  ;;  %v16117_v13 = vld [vmem:[#allocation155_spill] sm:$0xff]  ;;  %vm4546_vm8 = vcmask 261120  }
 0x6c2   : > { %4488 = vperm.xlu1 %6378, %v4261_v42   ;;  %v3905_v17 = vadd.f32 %v3897_v59, %v3832_v43  ;;  %v3906_v8 = vadd.f32 %v3898_v14, %v3833_v27  ;;  %v16121_v3 = vld [vmem:[#allocation171_spill] sm:$0xff] }
 0x6c3   : > { %v3899_v48 = vmul.f32 %v16116_v1, %v3875_v62  ;;  %v3900_v20 = vmul.f32 %v16116_v1, %v3876_v9  ;;  %v3922_v4 = vpop.permute.xlu1 %3921 }
 0x6c4   : > { %v3928_v45 = vsel %vm3925_vm12, %v16117_v13, %v3922_v4  ;;  %v3932_v60 = vsel %vm3925_vm12, %v3922_v4, %v16117_v13 }
 0x6c5   : > { %v13029_v26 = vadd.f32 %v3899_v48, %v3834_v34  ;;  %v13031_v0 = vadd.f32 %v3900_v20, %v3835_v58  ;;  %v3946_v36 = vmul.f32 %v16098_v47, %v3928_v45  ;;  %v3947_v25 = vmul.f32 %v16099_v40, %v3932_v60 }
 0x6c6   : > { %4498 = vperm.xlu1 %6378, %v4263_v56  }
 0x6c7   : > { %v3970_v24 = vmul.f32 %v12744_v46, %v3946_v36  ;;  %v3971_v21 = vmul.f32 %v12744_v46, %v3947_v25  ;;  %v3985_v44 = vpop.permute.xlu1 %3984 }
 0x6c9   : > { %v3978_v28 = vadd.f32 %v3970_v24, %v3905_v17  ;;  %v3979_v5 = vadd.f32 %v3971_v21, %v3906_v8  ;;  %v16122_v21 = vld [vmem:[#allocation412_spill] sm:$0xff] }
 0x6ca   : > { %5570 = vperm.xlu1 %6378, %v4265_v61   ;;  %v16123_v61 = vld [vmem:[#allocation413_spill] sm:$0xff] }
 0x6cb   : > { %v3993_v50 = vpop.permute.xlu1 %3992 }
 0x6cc   : > { %v4000_v38 = vsel %vm3998_vm0, %v3985_v44, %v3993_v50  ;;  %v4004_v39 = vsel %vm3998_vm0, %v3993_v50, %v3985_v44  ;;  %v13080_v44 = vrot.slane %v16122_v21, %v12205_v2 }
 0x6cd   : > { %v4017_v57 = vmul.f32 %v16118_v7, %v4000_v38  ;;  %v4018_v53 = vmul.f32 %v16119_v35, %v4004_v39 }
 0x6ce   : > { %5580 = vperm.xlu1 %6378, %v4267_v15  }
 0x6cf   : > { %v4041_v46 = vmul.f32 %v16120_v52, %v4017_v57  ;;  %v4042_v49 = vmul.f32 %v16120_v52, %v4018_v53  ;;  %v4106_v55 = vpop.permute.xlu1 %4105  ;;  %v16124_v57 = vld [vmem:[#allocation160_spill] sm:$0xff] }
 0x6d1   : > { %v4049_v33 = vadd.f32 %v4041_v46, %v12947_v16  ;;  %v4050_v22 = vadd.f32 %v4042_v49, %v12949_v12  ;;  %v13057_v16 = vpop.permute.xlu0 %4109 }
 0x6d2   : > { %5655 = vperm.xlu1 %6378, %v4269_v18  }
 0x6d4   : > { %v4171_v42 = vpop.permute.xlu1 %4170 }
 0x6d5   : > { %v3997_v59 = vpop.permute.xlu0 %3996 }
 0x6d6   : > { %5665 = vperm.xlu1 %6378, %v4271_v54  }
 0x6d8   : > { %v13047_v51 = vpop.permute.xlu1 %3915 }
 0x6d9   : > { %v4068_v48 = vpop.permute.xlu0 %4067 }
 0x6dc   : > { %v13049_v23 = vpop.permute.xlu1 %3923 }
 0x6dd   : > { %v4131_v4 = vpop.permute.xlu0 %4130 }
 0x6e0   : > { %v3995_v63 = vpop.permute.xlu1 %3994 }
 0x6e1   : > { %v4001_v30 = vsel %vm3998_vm0, %v16121_v3, %v3995_v63  ;;  %v4005_v62 = vsel %vm3998_vm0, %v3995_v63, %v16121_v3 }
 0x6e2   : > { %v4019_v12 = vmul.f32 %v16118_v7, %v4001_v30  ;;  %v4020_v9 = vmul.f32 %v16119_v35, %v4005_v62 }
 0x6e4   : > { %v4043_v41 = vmul.f32 %v12933_v31, %v4019_v12  ;;  %v4044_v37 = vmul.f32 %v12933_v31, %v4020_v9  ;;  %v4058_v34 = vpop.permute.xlu1 %4057 }
 0x6e6   : > { %v4051_v58 = vadd.f32 %v4043_v41, %v3978_v28  ;;  %v4052_v6 = vadd.f32 %v4044_v37, %v3979_v5  ;;  %v13084_v28 = vrot.slane %v16123_v61, %v12205_v2  ;;  %v4139_v5 = vpop.permute.xlu0 %4138  ;;  %v16125_v37 = vld [vmem:[#allocation164_spill] sm:$0xff] }
 0x6e7   : > { %v4146_v38 = vsel %vm4144_vm3, %v4131_v4, %v4139_v5  ;;  %v4150_v39 = vsel %vm4144_vm3, %v4139_v5, %v4131_v4 }
 0x6e8   : > { %v4066_v14 = vpop.permute.xlu1 %4065  ;;  %v4164_v18 = vmul.f32 %v13084_v28, %v4150_v39 }
 0x6e9   : > { %v4073_v43 = vsel %vm4071_vm1, %v4058_v34, %v4066_v14  ;;  %v4077_v27 = vsel %vm4071_vm1, %v4066_v14, %v4058_v34 }
 0x6ea   : > { %v4090_v36 = vmul.f32 %v12815_v32, %v4073_v43  ;;  %v4091_v25 = vmul.f32 %v12819_v19, %v4077_v27  ;;  %v4208_v41 = vpop.permute.xlu0 %4207 }
 0x6ec   : > { %v13063_v1 = vpop.permute.xlu1 %4178  ;;  %v4114_v53 = vmul.f32 %v16124_v57, %v4090_v36  ;;  %v4115_v52 = vmul.f32 %v16124_v57, %v4091_v25 }
 0x6ee   : > { %v4122_v12 = vadd.f32 %v4114_v53, %v4049_v33  ;;  %v4123_v9 = vadd.f32 %v4115_v52, %v4050_v22  ;;  %v4070_v22 = vpop.permute.xlu0 %4069 }
 0x6f0   : > { %v3989_v20 = vpop.permute.xlu1 %3988 }
 0x6f1   : > { %v4006_v36 = vsel %vm3998_vm0, %v3997_v59, %v3989_v20 }
 0x6f2   : > { %v4022_v21 = vmul.f32 %v16119_v35, %v4006_v36 }
 0x6f4   : > { %v4060_v56 = vpop.permute.xlu1 %4059 }
 0x6f5   : > { %v4074_v31 = vsel %vm4071_vm1, %v4060_v56, %v4068_v48  ;;  %v4078_v13 = vsel %vm4071_vm1, %v4068_v48, %v4060_v56 }
 0x6f6   : > { %v4092_v45 = vmul.f32 %v12815_v32, %v4074_v31  ;;  %v4093_v60 = vmul.f32 %v12819_v19, %v4078_v13  ;;  %v3933_v13 = vsel %vm3925_vm12, %v13049_v23, %v13047_v51 }
 0x6f8   : > { %v4116_v17 = vmul.f32 %v4106_v55, %v4092_v45  ;;  %v4117_v8 = vmul.f32 %v4106_v55, %v4093_v60  ;;  %v4129_v24 = vpop.permute.xlu1 %4128  ;;  %v4163_v55 = vmul.f32 %v13080_v44, %v4146_v38  ;;  %v4002_v60 = vsel %vm3998_vm0, %v3989_v20, %v3997_v59 }
 0x6fa   : > { %v4124_v50 = vadd.f32 %v4116_v17, %v4051_v58  ;;  %v4125_v15 = vadd.f32 %v4117_v8, %v4052_v6  ;;  %v4187_v34 = vmul.f32 %v16125_v37, %v4163_v55  ;;  %v4188_v58 = vmul.f32 %v16125_v37, %v4164_v18  ;;  %v4141_v8 = vpop.permute.xlu0 %4140 }
 0x6fb   : > { %v3949_v17 = vmul.f32 %v16099_v40, %v3933_v13 }
 0x6fc   : > { %v4137_v46 = vpop.permute.xlu1 %4136  ;;  %v4195_v48 = vadd.f32 %v4187_v34, %v4122_v12  ;;  %v4196_v4 = vadd.f32 %v4188_v58, %v4123_v9 }
 0x6fd   : > { %v4145_v49 = vsel %vm4144_vm3, %v4129_v24, %v4137_v46  ;;  %v4149_v2 = vsel %vm4144_vm3, %v4137_v46, %v4129_v24  ;;  %v4021_v24 = vmul.f32 %v16118_v7, %v4002_v60  ;;  %v16126_v7 = vld [vmem:[#allocation154_spill] sm:$0xff]  ;;  %v16127_v46 = vld [vmem:[#allocation157_spill] sm:$0xff] }
 0x6fe   : > { %v4161_v54 = vmul.f32 %v13080_v44, %v4145_v49  ;;  %v4162_v63 = vmul.f32 %v13084_v28, %v4149_v2  ;;  %v3973_v35 = vmul.f32 %v16126_v7, %v3949_v17  ;;  %v4046_v2 = vmul.f32 %v16127_v46, %v4022_v21 }
 0x6ff   : > { %v4045_v49 = vmul.f32 %v16127_v46, %v4021_v24 }
 0x700   : > { %v4185_v3 = vmul.f32 %v4171_v42, %v4161_v54  ;;  %v4186_v30 = vmul.f32 %v4171_v42, %v4162_v63  ;;  %v13100_v62 = vpop.permute.xlu1 %4182  ;;  %v3981_v63 = vadd.f32 %v3973_v35, %v13031_v0 }
 0x702   : > { %v4193_v6 = vadd.f32 %v4185_v3, %v12988_v29  ;;  %v4194_v14 = vadd.f32 %v4186_v30, %v12991_v11  ;;  %v3929_v11 = vsel %vm3925_vm12, %v13047_v51, %v13049_v23  ;;  %v4135_v3 = vpop.permute.xlu0 %4134 }
 0x703   : > { %v3948_v25 = vmul.f32 %v16098_v47, %v3929_v11 }
 0x704   : > { %v13106_v43 = vadd.f32 %v4208_v41, %v4193_v6  ;;  %v13108_v27 = vadd.f32 %v4208_v41, %v4194_v14  ;;  %v4054_v41 = vadd.f32 %v4046_v2, %v3981_v63 }
 0x705   : > { %v4213_v56 = vpop.permute.xlu1 %4212  ;;  %v3972_v20 = vmul.f32 %v16126_v7, %v3948_v25 }
 0x706   : > { %v13110_v42 = vadd.f32 %v4213_v56, %v4195_v48  ;;  %v13112_v33 = vadd.f32 %v4213_v56, %v4196_v4  ;;  %v4223_v56 = vpop.permute.xlu0 %4222 }
 0x707   : > { %v3980_v54 = vadd.f32 %v3972_v20, %v13029_v26 }
 0x708   : > { %v4281_v31 = vadd.f32 %v13110_v42, %v13106_v43  ;;  %v4290_v29 = vadd.f32 %v13112_v33, %v13108_v27 }
 0x709   : > { %v4062_v45 = vpop.permute.xlu1 %4061 }
 0x70a   : > { %v4075_v51 = vsel %vm4071_vm1, %v4062_v45, %v4070_v22  ;;  %v4079_v23 = vsel %vm4071_vm1, %v4070_v22, %v4062_v45 }
 0x70b   : > { %v4094_v38 = vmul.f32 %v12815_v32, %v4075_v51  ;;  %v4095_v39 = vmul.f32 %v12819_v19, %v4079_v23 }
 0x70d   : > { %v4133_v61 = vpop.permute.xlu1 %4132  ;;  %v4118_v32 = vmul.f32 %v13057_v16, %v4094_v38  ;;  %v4119_v19 = vmul.f32 %v13057_v16, %v4095_v39 }
 0x70e   : > { %v4147_v5 = vsel %vm4144_vm3, %v4133_v61, %v4141_v8  ;;  %v4151_v47 = vsel %vm4144_vm3, %v4141_v8, %v4133_v61 }
 0x70f   : > { %v4165_v40 = vmul.f32 %v13080_v44, %v4147_v5  ;;  %v4166_v59 = vmul.f32 %v13084_v28, %v4151_v47  ;;  %v4127_v6 = vadd.f32 %v4119_v19, %v4054_v41 }
 0x711   : > { %v4189_v57 = vmul.f32 %v13063_v1, %v4165_v40  ;;  %v4190_v53 = vmul.f32 %v13063_v1, %v4166_v59  ;;  %v4218_v52 = vpop.permute.xlu1 %4217  ;;  %v4053_v1 = vadd.f32 %v4045_v49, %v3980_v54 }
 0x713   : > { %v4197_v55 = vadd.f32 %v4189_v57, %v4124_v50  ;;  %v4198_v18 = vadd.f32 %v4190_v53, %v4125_v15  ;;  %v4126_v58 = vadd.f32 %v4118_v32, %v4053_v1 }
 0x715   : > { %v4229_v30 = vadd.f32 %v4218_v52, %v4197_v55  ;;  %v4230_v12 = vadd.f32 %v4218_v52, %v4198_v18  ;;  %v4143_v9 = vpop.permute.xlu1 %4142 }
 0x716   : > { %v4148_v37 = vsel %vm4144_vm3, %v4135_v3, %v4143_v9  ;;  %v4152_v50 = vsel %vm4144_vm3, %v4143_v9, %v4135_v3 }
 0x717   : > { %v4282_v15 = vadd.f32 %v4281_v31, %v4229_v30  ;;  %v4291_v26 = vadd.f32 %v4290_v29, %v4230_v12  ;;  %v4167_v0 = vmul.f32 %v13080_v44, %v4148_v37  ;;  %v4168_v34 = vmul.f32 %v13084_v28, %v4152_v50  ;;  %v4358_v50 = vpop.permute.xlu0 %4357 }
 0x719   : > { %v4191_v16 = vmul.f32 %v13100_v62, %v4167_v0  ;;  %v4192_v14 = vmul.f32 %v13100_v62, %v4168_v34 }
 0x71b   : > { %v4199_v48 = vadd.f32 %v4191_v16, %v4126_v58  ;;  %v4200_v4 = vadd.f32 %v4192_v14, %v4127_v6  ;;  %v4386_v6 = vpop.permute.xlu0 %4385 }
 0x71d   : > { %v4231_v22 = vadd.f32 %v4223_v56, %v4199_v48  ;;  %v4232_v11 = vadd.f32 %v4223_v56, %v4200_v4 }
 0x71f   : > { %v4283_v13 = vadd.f32 %v4282_v15, %v4231_v22  ;;  %v4292_v10 = vadd.f32 %v4291_v26, %v4232_v11  ;;  %v4353_v15 = vpop.permute.xlu1 %4352  ;;  %v4368_v14 = vpop.permute.xlu0 %4367 }
 0x721   : > { %v4284_v45 = vrot.slane %v4283_v13, 4  ;;  %v4293_v31 = vrot.slane %v4292_v10, 4 }
 0x723   : > { %v4285_v29 = vadd.f32 %v4284_v45, %v4283_v13  ;;  %v4294_v60 = vadd.f32 %v4293_v31, %v4292_v10  ;;  %v4381_v16 = vpop.permute.xlu1 %4380 }
 0x725   : > { %v4286_v44 = vrot.slane %v4285_v29, 2  ;;  %v4295_v36 = vrot.slane %v4294_v60, 2 }
 0x727   : > { %v4287_v28 = vadd.f32 %v4286_v44, %v4285_v29  ;;  %v4296_v25 = vadd.f32 %v4295_v36, %v4294_v60  ;;  %v4363_v48 = vpop.permute.xlu1 %4362 }
 0x729   : > { %v4288_v17 = vrot.slane %v4287_v28, 1  ;;  %v4297_v8 = vrot.slane %v4296_v25, 1 }
 0x72b   : > { %v4289_v24 = vadd.f32 %v4288_v17, %v4287_v28  ;;  %v4298_v21 = vadd.f32 %v4297_v8, %v4296_v25  ;;  %v4396_v17 = vpop.permute.xlu0 %4395 }
 0x72d   : > { %v4300_v62 = vmul.f32 0.03125, %v4289_v24  ;;  %v4301_v61 = vmul.f32 0.03125, %v4298_v21  ;;  %v4391_v21 = vpop.permute.xlu1 %4390 }
 0x72f   : > { %v4304_v51 = vsub.f32 %v13110_v42, %v4300_v62  ;;  %v4305_v23 = vsub.f32 %v13112_v33, %v4301_v61  ;;  %v4306_v5 = vsub.f32 %v4229_v30, %v4300_v62  ;;  %v4307_v47 = vsub.f32 %v4230_v12, %v4301_v61 }
 0x730   : > { %v4308_v40 = vsub.f32 %v4231_v22, %v4300_v62  ;;  %v4309_v59 = vsub.f32 %v4232_v11, %v4301_v61  ;;  %v4302_v7 = vsub.f32 %v13106_v43, %v4300_v62  ;;  %v4303_v20 = vsub.f32 %v13108_v27, %v4301_v61 }
 0x731   : > { %v4312_v35 = vmul.f32 %v4304_v51, %v4304_v51  ;;  %v4313_v38 = vmul.f32 %v4305_v23, %v4305_v23  ;;  %v4314_v53 = vmul.f32 %v4306_v5, %v4306_v5  ;;  %v4315_v52 = vmul.f32 %v4307_v47, %v4307_v47 }
 0x732   : > { %v4310_v39 = vmul.f32 %v4302_v7, %v4302_v7  ;;  %v4311_v57 = vmul.f32 %v4303_v20, %v4303_v20  ;;  %v4316_v2 = vmul.f32 %v4308_v40, %v4308_v40  ;;  %v4317_v42 = vmul.f32 %v4309_v59, %v4309_v59 }
 0x734   : > { %v4318_v46 = vadd.f32 %v4312_v35, %v4310_v39  ;;  %v4327_v49 = vadd.f32 %v4313_v38, %v4311_v57 }
 0x736   : > { %v4319_v55 = vadd.f32 %v4318_v46, %v4314_v53  ;;  %v4328_v33 = vadd.f32 %v4327_v49, %v4315_v52  ;;  %v6379_v53 = vld [vmem:[#allocation15] sm:$0xff]   ;;  %v16128_v52 = vmov 0   ;;  %v6380_v46 = vld [vmem:[#allocation15 + $0x8] sm:$0xff]   ;;  %v6381_v49 = vld [vmem:[#allocation15 + $0x10] sm:$0xff]  }
 0x738   : > { %v4320_v18 = vadd.f32 %v4319_v55, %v4316_v2  ;;  %v4329_v54 = vadd.f32 %v4328_v33, %v4317_v42  ;;  %v6382_v2 = vld [vmem:[#allocation15 + $0x18] sm:$0xff]   ;;  %v6383_v42 = vld [vmem:[#allocation15 + $0x20] sm:$0xff]   ;;  %v6384_v55 = vld [vmem:[#allocation15 + $0x28] sm:$0xff]  }
 0x739   : > { %v6385_v33 = vld [vmem:[#allocation15 + $0x30] sm:$0xff]  }
 0x73a   : > { %v4321_v63 = vrot.slane %v4320_v18, 4  ;;  %v4330_v3 = vrot.slane %v4329_v54, 4 }
 0x73c   : > { %v4322_v32 = vadd.f32 %v4321_v63, %v4320_v18  ;;  %v4331_v43 = vadd.f32 %v4330_v3, %v4329_v54  ;;  %v6386_v18 = vld [vmem:[#allocation15 + $0x38] sm:$0xff]  }
 0x73e   : > { %v4323_v19 = vrot.slane %v4322_v32, 2  ;;  %v4332_v27 = vrot.slane %v4331_v43, 2 }
 0x740   : > { %v4324_v30 = vadd.f32 %v4323_v19, %v4322_v32  ;;  %v4333_v12 = vadd.f32 %v4332_v27, %v4331_v43  ;;  %v4429_v43 = vpop.permute.xlu1 %4428  ;;  %v4434_v19 = vpop.permute.xlu0 %4433 }
 0x742   : > { %v4325_v9 = vrot.slane %v4324_v30, 1  ;;  %v4334_v1 = vrot.slane %v4333_v12, 1 }
 0x744   : > { %v4326_v41 = vadd.f32 %v4325_v9, %v4324_v30  ;;  %v4335_v37 = vadd.f32 %v4334_v1, %v4333_v12  ;;  %v4439_v9 = vpop.permute.xlu1 %4438 }
 0x746   : > { %v4336_v26 = vmul.f32 0.03125, %v4326_v41  ;;  %v4337_v0 = vmul.f32 0.03125, %v4335_v37  ;;  %v4444_v37 = vpop.permute.xlu0 %4443 }
 0x748   : > { %v4338_v34 = vadd.f32 1e-06, %v4336_v26  ;;  %v4339_v58 = vadd.f32 1e-06, %v4337_v0 }
 0x74a   : > { %6389 = vrsqrt.f32 %v4338_v34 }
 0x74b   : > { %6391 = vrsqrt.f32 %v4339_v58 }
 0x754   : > { %v6390_v4 = vpop.eup %6389 }
 0x755   : > { %v6392_v56 = vpop.eup %6391  ;;  %v4342_v22 = vmul.f32 %v6390_v4, %v4302_v7  ;;  %v4346_v11 = vmul.f32 %v6390_v4, %v4306_v5  ;;  %v4348_v13 = vmul.f32 %v6390_v4, %v4308_v40  ;;  %v4344_v10 = vmul.f32 %v6390_v4, %v4304_v51 }
 0x756   : > { %v4343_v45 = vmul.f32 %v6392_v56, %v4303_v20  ;;  %v4347_v31 = vmul.f32 %v6392_v56, %v4307_v47  ;;  %v4349_v29 = vmul.f32 %v6392_v56, %v4309_v59  ;;  %v4345_v60 = vmul.f32 %v6392_v56, %v4305_v23 }
 0x757   : > { %v4370_v44 = vmul.f32 %v4353_v15, %v4342_v22  ;;  %v4374_v36 = vmul.f32 %v4363_v48, %v4346_v11  ;;  %v4376_v28 = vmul.f32 %v4368_v14, %v4348_v13  ;;  %v4372_v25 = vmul.f32 %v4358_v50, %v4344_v10 }
 0x758   : > { %v4371_v8 = vmul.f32 %v4353_v15, %v4343_v45  ;;  %v4375_v24 = vmul.f32 %v4363_v48, %v4347_v31  ;;  %v4377_v62 = vmul.f32 %v4368_v14, %v4349_v29  ;;  %v4373_v61 = vmul.f32 %v4358_v50, %v4345_v60 }
 0x759   : > { %v4398_v35 = vadd.f32 %v4381_v16, %v4370_v44  ;;  %v4402_v38 = vadd.f32 %v4391_v21, %v4374_v36  ;;  %v4404_v7 = vadd.f32 %v4396_v17, %v4376_v28  ;;  %v4400_v5 = vadd.f32 %v4386_v6, %v4372_v25 }
 0x75a   : > { %v4399_v40 = vadd.f32 %v4381_v16, %v4371_v8  ;;  %v4403_v51 = vadd.f32 %v4391_v21, %v4375_v24  ;;  %v4405_v20 = vadd.f32 %v4396_v17, %v4377_v62  ;;  %v4401_v47 = vadd.f32 %v4386_v6, %v4373_v61  ;;  %v4449_v24 = vpop.permute.xlu1 %4448 }
 0x75b   : > { %v4424_v59 = vpack.c.bf16 %v4404_v7, %v4402_v38  ;;  %v4422_v23 = vpack.c.bf16 %v4400_v5, %v4398_v35 }
 0x75c   : > { %v4425_v39 = vpack.c.bf16 %v4405_v20, %v4403_v51  ;;  %v4423_v57 = vpack.c.bf16 %v4401_v47, %v4399_v40  ;;  %v4454_v51 = vpop.permute.xlu0 %4453 }
 0x75e   : > { %4571 = vmatprep.subr.bf16.mxu0 %v4423_v57 }
 0x75f   : > { %4572 = vmatpush1.bf16.msra.mxu0 %v4422_v23 }
 0x760   : > { %4573 = vmatprep.subr.bf16.mxu0 %v4425_v39 }
 0x763   : > { %4574 = vmatpush1.bf16.msra.mxu0 %v4424_v59 }
 0x766   : > { %5936 = vmatmul.mubr.msk.bf16.vlgmr.msra.gmra.mrb[0].mxu0 %vm4546_vm8, %v6379_v53 }
 0x767   : > { %4613 = vmatprep.mubr.bf16.mxu0 %v16128_v52 }
 0x76e   : > { %5937 = vmatmul.mubr.msk.bf16.gmra.mrb[4].mxu0 %vm4546_vm8, %v6380_v46 }
 0x76f   : > { %4623 = vmatprep.mubr.bf16.mxu0 %v16128_v52 }
 0x776   : > { %5938 = vmatmul.mubr.msk.bf16.gmra.mrb[8].mxu0 %vm4546_vm8, %v6381_v49 }
 0x777   : > { %4633 = vmatprep.mubr.bf16.mxu0 %v16128_v52 }
 0x77e   : > { %5939 = vmatmul.mubr.msk.bf16.gmra.mrb[12].mxu0 %vm4546_vm8, %v6382_v2 }
 0x77f   : > { %4643 = vmatprep.mubr.bf16.mxu0 %v16128_v52 }
 0x786   : > { %5940 = vmatmul.mubr.msk.bf16.gmra.mrb[16].mxu0 %vm4546_vm8, %v6383_v42 }
 0x787   : > { %4653 = vmatprep.mubr.bf16.mxu0 %v16128_v52 }
 0x78e   : > { %5941 = vmatmul.mubr.msk.bf16.gmra.mrb[20].mxu0 %vm4546_vm8, %v6384_v55 }
 0x78f   : > { %4663 = vmatprep.mubr.bf16.mxu0 %v16128_v52 }
 0x796   : > { %5942 = vmatmul.mubr.msk.bf16.gmra.mrb[24].mxu0 %vm4546_vm8, %v6385_v33 }
 0x797   : > { %4673 = vmatprep.mubr.bf16.mxu0 %v16128_v52 }
 0x79e   : > { %5943 = vmatmul.mubr.msk.bf16.gmra.mrb[28].mxu0 %vm4546_vm8, %v6386_v18 }
 0x839   : > { %v4605_v54 = vpop.f32.mrb[0].mxu0 }
 0x83a   : > { %v4607_v63 = vpop.f32.mrb[1].mxu0  ;;  %v13183_v1 = vadd.f32 %v4605_v54, %v4429_v43 }
 0x83b   : > { %v4609_v3 = vpop.f32.mrb[2].mxu0  ;;  %v4608_v26 = vadd.f32 %v4607_v63, %v4429_v43 }
 0x83c   : > { %v4611_v32 = vpop.f32.mrb[3].mxu0  ;;  %16129 = vst [vmem:[#allocation175_spill] sm:$0xff] %v13183_v1  ;;  %v13198_v6 = vmul.f32 0.70710677, %v13183_v1  ;;  %v13213_v13 = vadd.f32 %v4609_v3, %v4434_v19 }
 0x83d   : > { %v13211_v11 = vmul.f32 0.70710677, %v4608_v26  ;;  %v13220_v60 = vadd.f32 %v4611_v32, %v4434_v19 }
 0x83e   : > { %16130 = vst [vmem:[#allocation166_spill] sm:$0xff] %v13198_v6  ;;  %16132 = vst [vmem:[#allocation174_spill] sm:$0xff] %v13213_v13  ;;  %v4716_v28 = vand.u32 2147483647, %v13198_v6  ;;  %v13229_v62 = vmul.f32 0.70710677, %v13213_v13 }
 0x83f   : > { %16131 = vst [vmem:[#allocation169_spill] sm:$0xff] %v13211_v11  ;;  %v4717_v21 = vand.u32 2147483647, %v13211_v11  ;;  %v13237_v7 = vmul.f32 0.70710677, %v13220_v60 }
 0x840   : > { %16133 = vst [vmem:[#allocation170_spill] sm:$0xff] %v13229_v62  ;;  %v4748_v20 = vmul.f32 0.3275911, %v4716_v28  ;;  %v5164_v47 = vsub.f32 0.0, %v4716_v28  ;;  %v4718_v53 = vand.u32 2147483647, %v13229_v62 }
 0x841   : > { %v4615_v27 = vpop.f32.mrb[4].mxu0  ;;  %16134 = vst [vmem:[#allocation176_spill] sm:$0xff] %v13237_v7  ;;  %v4749_v57 = vmul.f32 0.3275911, %v4717_v21  ;;  %v5165_v18 = vsub.f32 0.0, %v4717_v21 }
 0x842   : > { %v4617_v30 = vpop.f32.mrb[5].mxu0  ;;  %v13185_v50 = vadd.f32 %v4615_v27, %v4439_v9  ;;  %v4719_v54 = vand.u32 2147483647, %v13237_v7  ;;  %v5196_v3 = vmul.f32 %v5164_v47, %v4716_v28  ;;  %v4780_v19 = vadd.f32 1.0, %v4748_v20 }
 0x843   : > { %v4619_v12 = vpop.f32.mrb[6].mxu0  ;;  %v13187_v15 = vadd.f32 %v4617_v30, %v4439_v9  ;;  %v13268_v27 = vmul.f32 0.5, %v4608_v26  ;;  %v4750_v30 = vmul.f32 0.3275911, %v4718_v53  ;;  %v4781_v9 = vadd.f32 1.0, %v4749_v57 }
 0x844   : > { %v4621_v41 = vpop.f32.mrb[7].mxu0  ;;  %v13189_v0 = vadd.f32 %v4619_v12, %v4444_v37  ;;  %v13192_v34 = vmul.f32 0.70710677, %v13185_v50  ;;  %v5228_v26 = vmul.f32 1.442695, %v5196_v3 }
 0x845   : > { %v13195_v58 = vmul.f32 0.70710677, %v13187_v15  ;;  %v13203_v14 = vadd.f32 %v4621_v41, %v4444_v37  ;;  %16135 = vst [vmem:[#allocation172_spill] sm:$0xff] %v13268_v27  ;;  %v5166_v41 = vsub.f32 0.0, %v4718_v53 }
 0x846   : > { %v13201_v16 = vmul.f32 0.70710677, %v13189_v0  ;;  %v13206_v4 = vand.u32 2147483647, %v13192_v34  ;;  %vm5360_vm12 = vcmp.ge.f32.partialorder %v13192_v34, 0.0 }
 0x847   : > { %v13209_v56 = vand.u32 2147483647, %v13195_v58  ;;  %v13224_v36 = vmul.f32 0.70710677, %v13203_v14  ;;  %v5198_v47 = vmul.f32 %v5166_v41, %v4718_v53  ;;  %vm5361_vm2 = vcmp.ge.f32.partialorder %v13195_v58, 0.0 }
 0x848   : > { %v13216_v10 = vand.u32 2147483647, %v13201_v16  ;;  %v4752_v31 = vmul.f32 0.3275911, %v13206_v4  ;;  %vm5362_vm4 = vcmp.ge.f32.partialorder %v13201_v16, 0.0 }
 0x849   : > { %v4625_v48 = vpop.f32.mrb[8].mxu0  ;;  %v4753_v29 = vmul.f32 0.3275911, %v13209_v56  ;;  %v13232_v61 = vand.u32 2147483647, %v13224_v36  ;;  %vm5363_vm5 = vcmp.ge.f32.partialorder %v13224_v36, 0.0 }
 0x84a   : > { %v4627_v22 = vpop.f32.mrb[9].mxu0  ;;  %v4754_v44 = vmul.f32 0.3275911, %v13216_v10  ;;  %v4784_v25 = vadd.f32 1.0, %v4752_v31  ;;  %v13234_v38 = vadd.f32 %v4625_v48, %v4449_v24 }
 0x84b   : > { %v4629_v45 = vpop.f32.mrb[10].mxu0  ;;  %v4785_v17 = vadd.f32 1.0, %v4753_v29  ;;  %v4755_v5 = vmul.f32 0.3275911, %v13232_v61  ;;  %v13243_v23 = vadd.f32 %v4627_v22, %v4449_v24  ;;  %v5197_v22 = vmul.f32 %v5165_v18, %v4717_v21  ;;  %v13294_v18 = vpop.permute.xlu1 %4458 }
 0x84c   : > { %v4631_v8 = vpop.f32.mrb[11].mxu0  ;;  %6393 = vrcp.f32 %v4784_v25  ;;  %v4786_v35 = vadd.f32 1.0, %v4754_v44  ;;  %v13241_v59 = vmul.f32 0.70710677, %v13234_v38  ;;  %v13248_v49 = vadd.f32 %v4629_v45, %v4454_v51 }
 0x84d   : > { %6395 = vrcp.f32 %v4785_v17  ;;  %v4787_v46 = vadd.f32 1.0, %v4755_v5  ;;  %v13256_v55 = vmul.f32 0.70710677, %v13243_v23  ;;  %v4751_v45 = vmul.f32 0.3275911, %v4719_v54 }
 0x84e   : > { %6397 = vrcp.f32 %v4786_v35  ;;  %v13253_v42 = vand.u32 2147483647, %v13241_v59  ;;  %v13262_v63 = vmul.f32 0.70710677, %v13248_v49  ;;  %v13275_v29 = vadd.f32 %v4631_v8, %v4454_v51 }
 0x84f   : > { %6399 = vrcp.f32 %v4787_v46  ;;  %v13266_v43 = vand.u32 2147483647, %v13256_v55  ;;  %v5167_v25 = vsub.f32 0.0, %v4719_v54  ;;  %v4782_v51 = vadd.f32 1.0, %v4750_v30 }
 0x850   : > { %v4756_v32 = vmul.f32 0.3275911, %v13253_v42  ;;  %v13271_v12 = vand.u32 2147483647, %v13262_v63  ;;  %v13287_v20 = vmul.f32 0.70710677, %v13275_v29 }
 0x851   : > { %v4635_v40 = vpop.f32.mrb[12].mxu0  ;;  %v4757_v48 = vmul.f32 0.3275911, %v13266_v43  ;;  %v5199_v52 = vmul.f32 %v5167_v25, %v4719_v54  ;;  %v13324_v25 = vmul.f32 1.442695, %v5198_v47  ;;  %vm5364_vm6 = vcmp.ge.f32.partialorder %v13241_v59, 0.0 }
 0x852   : > { %v13245_v39 = vpop.f32.mrb[13].mxu0  ;;  %v4788_v37 = vadd.f32 1.0, %v4756_v32  ;;  %v4758_v31 = vmul.f32 0.3275911, %v13271_v12  ;;  %16136 = vst [vmem:[#allocation177_spill] sm:$0xff] %v13287_v20  ;;  %v5168_v32 = vsub.f32 0.0, %v13206_v4  ;;  %v13305_v53 = vadd.f32 %v4635_v40, %v13294_v18 }
 0x853   : > { %v13250_v2 = vpop.f32.mrb[14].mxu0  ;;  %v4789_v17 = vadd.f32 1.0, %v4757_v48  ;;  %v5230_v48 = vmul.f32 1.442695, %v5197_v22  ;;  %v5169_v22 = vsub.f32 0.0, %v13209_v56  ;;  %vm5365_vm7 = vcmp.ge.f32.partialorder %v13256_v55, 0.0 }
 0x854   : > { %v13258_v33 = vpop.f32.mrb[15].mxu0  ;;  %6401 = vrcp.f32 %v4788_v37  ;;  %v4790_v5 = vadd.f32 1.0, %v4758_v31  ;;  %v13302_v31 = vadd.f32 1.0, %v4751_v45  ;;  %v13315_v45 = vmul.f32 0.70710677, %v13305_v53 }
 0x855   : > { %6403 = vrcp.f32 %v4780_v19  ;;  %v13298_v19 = vand.u32 2147483647, %v13287_v20  ;;  %v5200_v40 = vmul.f32 %v5168_v32, %v13206_v4  ;;  %vm5366_vm9 = vcmp.ge.f32.partialorder %v13262_v63, 0.0 }
 0x856   : > { %v13279_v28 = vpop.eup %6393  ;;  %6405 = vrcp.f32 %v4781_v9  ;;  %16138 = vst [vmem:[#allocation179_spill] sm:$0xff] %v13315_v45  ;;  %v13320_v6 = vand.u32 2147483647, %v13315_v45 }
 0x857   : > { %v13283_v35 = vpop.eup %6395  ;;  %v4880_v21 = vmul.f32 1.0614054, %v13279_v28  ;;  %6407 = vrcp.f32 %v4789_v17 }
 0x858   : > { %v4881_v57 = vmul.f32 1.0614054, %v13283_v35  ;;  %v13300_v37 = vpop.eup %6397  ;;  %6409 = vrcp.f32 %v4790_v5  ;;  %v4760_v32 = vmul.f32 0.3275911, %v13320_v6 }
 0x859   : > { %v13277_v44 = vpop.f32.mrb[16].mxu0  ;;  %v5948_v3 = vadd.f32 -1.4531521, %v4880_v21  ;;  %v4882_v41 = vmul.f32 1.0614054, %v13300_v37  ;;  %v13310_v17 = vpop.eup %6399  ;;  %6411 = vpow2.f32 %v5228_v26  ;;  %v5201_v26 = vmul.f32 %v5169_v22, %v13209_v56 }
 0x85a   : > { %v13281_v24 = vpop.f32.mrb[17].mxu0  ;;  %v5949_v30 = vadd.f32 -1.4531521, %v4881_v57  ;;  %v4759_v21 = vmul.f32 0.3275911, %v13298_v19 }
 0x85b   : > { %v13289_v8 = vpop.f32.mrb[18].mxu0  ;;  %v4944_v9 = vmul.f32 %v13279_v28, %v5948_v3  ;;  %v5950_v1 = vadd.f32 -1.4531521, %v4882_v41  ;;  %v4883_v3 = vmul.f32 1.0614054, %v13310_v17 }
 0x85c   : > { %v13292_v46 = vpop.f32.mrb[19].mxu0  ;;  %v4945_v13 = vmul.f32 %v13283_v35, %v5949_v30  ;;  %v4791_v62 = vadd.f32 1.0, %v4759_v21  ;;  %v5236_v21 = vmul.f32 1.442695, %v5200_v40 }
 0x85d   : > { %16137 = vst [vmem:[#allocation173_spill] sm:$0xff] %v13292_v46  ;;  %v4976_v57 = vadd.f32 1.4214138, %v4944_v9  ;;  %v4946_v27 = vmul.f32 %v13300_v37, %v5950_v1  ;;  %v5951_v9 = vadd.f32 -1.4531521, %v4883_v3  ;;  %v5173_v46 = vsub.f32 0.0, %v13266_v43 }
 0x85e   : > { %v4977_v5 = vadd.f32 1.4214138, %v4945_v13  ;;  %v13330_v4 = vpop.eup %6401  ;;  %v5170_v13 = vsub.f32 0.0, %v13216_v10  ;;  %6413 = vrcp.f32 %v4791_v62  ;;  %v5171_v62 = vsub.f32 0.0, %v13232_v61 }
 0x85f   : > { %v5008_v30 = vmul.f32 %v13279_v28, %v4976_v57  ;;  %v13337_v47 = vpop.eup %6403  ;;  %v4978_v57 = vadd.f32 1.4214138, %v4946_v27  ;;  %v4947_v1 = vmul.f32 %v13310_v17, %v5951_v9  ;;  %v4884_v3 = vmul.f32 1.0614054, %v13330_v4 }
 0x860   : > { %16142 = vst [vmem:[#allocation181_spill] sm:$0xff] %v13337_v47  ;;  %v13341_v11 = vpop.eup %6405  ;;  %6415 = vpow2.f32 %v5230_v48  ;;  %v5009_v56 = vmul.f32 %v13283_v35, %v4977_v5  ;;  %v5172_v9 = vsub.f32 0.0, %v13253_v42  ;;  %v4792_v48 = vadd.f32 1.0, %v4760_v32 }
 0x861   : > { %v13322_v54 = vpop.f32.mrb[20].mxu0  ;;  %16143 = vst [vmem:[#allocation184_spill] sm:$0xff] %v13341_v11  ;;  %6417 = vrcp.f32 %v4782_v51  ;;  %v5980_v40 = vadd.f32 -0.28449672, %v5008_v30  ;;  %v5952_v27 = vadd.f32 -1.4531521, %v4884_v3  ;;  %v5010_v47 = vmul.f32 %v13300_v37, %v4978_v57 }
 0x862   : > { %16139 = vst [vmem:[#allocation191_spill] sm:$0xff] %v13322_v54  ;;  %v13328_v7 = vpop.f32.mrb[21].mxu0  ;;  %v5202_v11 = vmul.f32 %v5170_v13, %v13216_v10  ;;  %6419 = vpow2.f32 %v5236_v21  ;;  %v5238_v5 = vmul.f32 1.442695, %v5201_v26  ;;  %v4979_v20 = vadd.f32 1.4214138, %v4947_v1 }
 0x863   : > { %16140 = vst [vmem:[#allocation187_spill] sm:$0xff] %v13328_v7  ;;  %v13335_v41 = vpop.f32.mrb[22].mxu0  ;;  %v13343_v7 = vmul.f32 1.442695, %v5199_v52  ;;  %v5981_v51 = vadd.f32 -0.28449672, %v5009_v56  ;;  %v5203_v30 = vmul.f32 %v5171_v62, %v13232_v61  ;;  %v5072_v10 = vmul.f32 %v13279_v28, %v5980_v40 }
 0x864   : > { %16141 = vst [vmem:[#allocation178_spill] sm:$0xff] %v13335_v41  ;;  %v13347_v22 = vpop.f32.mrb[23].mxu0  ;;  %v13349_v41 = vpop.eup %6407  ;;  %v5204_v32 = vmul.f32 %v5172_v9, %v13253_v42  ;;  %v5982_v1 = vadd.f32 -0.28449672, %v5010_v47  ;;  %6421 = vrcp.f32 %v4792_v48  ;;  %v5240_v62 = vmul.f32 1.442695, %v5202_v11 }
 0x865   : > { %16144 = vst [vmem:[#allocation180_spill] sm:$0xff] %v13347_v22  ;;  %v4885_v52 = vmul.f32 1.0614054, %v13349_v41  ;;  %v13355_v45 = vpop.eup %6409  ;;  %v4948_v22 = vmul.f32 %v13330_v4, %v5952_v27  ;;  %6423 = vpow2.f32 %v5238_v5  ;;  %v5011_v40 = vmul.f32 %v13310_v17, %v4979_v20 }
 0x866   : > { %v4886_v57 = vmul.f32 1.0614054, %v13355_v45  ;;  %v13367_v26 = vpop.eup %6411  ;;  %v5104_v48 = vadd.f32 0.2548296, %v5072_v10  ;;  %v5205_v11 = vmul.f32 %v5173_v46, %v13266_v43  ;;  %v5074_v20 = vmul.f32 %v13300_v37, %v5982_v1 }
 0x867   : > { %v5953_v3 = vadd.f32 -1.4531521, %v4885_v52  ;;  %v4980_v13 = vadd.f32 1.4214138, %v4948_v22  ;;  %16146 = vst [vmem:[#allocation185_spill] sm:$0xff] %v13367_v26  ;;  %v5073_v52 = vmul.f32 %v13283_v35, %v5981_v51  ;;  %6425 = vpow2.f32 %v5240_v62 }
 0x868   : > { %v5954_v56 = vadd.f32 -1.4531521, %v4886_v57  ;;  %v13376_v9 = vpop.eup %6413  ;;  %v5242_v57 = vmul.f32 1.442695, %v5203_v30  ;;  %v5983_v10 = vadd.f32 -0.28449672, %v5011_v40  ;;  %6427 = vpow2.f32 %v13324_v25 }
 0x869   : > { %v13358_v54 = vpop.f32.mrb[24].mxu0  ;;  %v4949_v27 = vmul.f32 %v13349_v41, %v5953_v3  ;;  %v5012_v22 = vmul.f32 %v13330_v4, %v4980_v13  ;;  %v5174_v3 = vsub.f32 0.0, %v13271_v12  ;;  %v5105_v43 = vadd.f32 0.2548296, %v5073_v52 }
 0x86a   : > { %v13365_v21 = vpop.f32.mrb[25].mxu0  ;;  %v4950_v47 = vmul.f32 %v13355_v45, %v5954_v56  ;;  %v13382_v5 = vpop.eup %6415  ;;  %6429 = vrcp.f32 %v13302_v31  ;;  %v5136_v62 = vmul.f32 %v13279_v28, %v5104_v48  ;;  %v13403_v40 = vmul.f32 0.5, %v13187_v15 }
 0x86b   : > { %16145 = vst [vmem:[#allocation189_spill] sm:$0xff] %v13365_v21  ;;  %v13370_v61 = vpop.f32.mrb[26].mxu0  ;;  %v4981_v26 = vadd.f32 1.4214138, %v4949_v27  ;;  %v4887_v21 = vmul.f32 1.0614054, %v13376_v9  ;;  %v13387_v51 = vpop.eup %6417  ;;  %v5206_v1 = vmul.f32 %v5174_v3, %v13271_v12  ;;  %6431 = vpow2.f32 %v5242_v57 }
 0x86c   : > { %16147 = vst [vmem:[#allocation183_spill] sm:$0xff] %v13370_v61  ;;  %v13374_v42 = vpop.f32.mrb[27].mxu0  ;;  %v5244_v61 = vmul.f32 1.442695, %v5204_v32  ;;  %16149 = vst [vmem:[#allocation182_spill] sm:$0xff] %v13387_v51  ;;  %v13390_v27 = vmul.f32 0.5, %v13220_v60  ;;  %v13415_v48 = vadd.f32 %v13245_v39, %v13294_v18 }
 0x86d   : > { %16148 = vst [vmem:[#allocation186_spill] sm:$0xff] %v13374_v42  ;;  %v5013_v13 = vmul.f32 %v13349_v41, %v4981_v26  ;;  %v4982_v42 = vadd.f32 1.4214138, %v4950_v47  ;;  %v5984_v30 = vadd.f32 -0.28449672, %v5012_v22  ;;  %v6420_v26 = vpop.eup %6419  ;;  %v13398_v47 = vmul.f32 0.5, %v13185_v50 }
 0x86e   : > { %v5246_v51 = vmul.f32 1.442695, %v5205_v11  ;;  %v5955_v60 = vadd.f32 -1.4531521, %v4887_v21  ;;  %v5106_v22 = vadd.f32 0.2548296, %v5074_v20  ;;  %v13407_v25 = vpop.eup %6421  ;;  %v5137_v50 = vmul.f32 %v13283_v35, %v5105_v43 }
 0x86f   : > { %v5985_v46 = vadd.f32 -0.28449672, %v5013_v13  ;;  %v5014_v56 = vmul.f32 %v13355_v45, %v4982_v42  ;;  %v5075_v42 = vmul.f32 %v13310_v17, %v5983_v10  ;;  %v5076_v12 = vmul.f32 %v13330_v4, %v5984_v30  ;;  %v6424_v3 = vpop.eup %6423  ;;  %v13431_v30 = vpop.permute.xlu0 %4463 }
 0x870   : > { %6433 = vpow2.f32 %v5244_v61  ;;  %v5248_v31 = vmul.f32 1.442695, %v5206_v1  ;;  %v4951_v15 = vmul.f32 %v13376_v9, %v5955_v60  ;;  %v5175_v28 = vsub.f32 0.0, %v13298_v19 }
 0x871   : > { %v13392_v32 = vpop.f32.mrb[28].mxu0  ;;  %v5986_v52 = vadd.f32 -0.28449672, %v5014_v56  ;;  %v5077_v21 = vmul.f32 %v13349_v41, %v5985_v46  ;;  %6435 = vpow2.f32 %v5246_v51  ;;  %v13418_v57 = vmul.f32 %v6420_v26, %v5136_v62 }
 0x872   : > { %6437 = vpow2.f32 %v13343_v7  ;;  %v5138_v35 = vmul.f32 %v13300_v37, %v5106_v22  ;;  %v13422_v61 = vmul.f32 0.5, %v13189_v0  ;;  %v5107_v11 = vadd.f32 0.2548296, %v5075_v42  ;;  %v6426_v7 = vpop.eup %6425 }
 0x873   : > { %v5108_v20 = vadd.f32 0.2548296, %v5076_v12  ;;  %v5078_v13 = vmul.f32 %v13355_v45, %v5986_v52  ;;  %v4888_v51 = vmul.f32 1.0614054, %v13407_v25  ;;  %v13426_v10 = vmul.f32 %v6424_v3, %v5137_v50  ;;  %v13446_v60 = vpop.eup %6427 }
 0x874   : > { %v13429_v39 = vmul.f32 0.5, %v13203_v14  ;;  %v5109_v18 = vadd.f32 0.2548296, %v5077_v21  ;;  %6439 = vpow2.f32 %v5248_v31  ;;  %v4983_v37 = vadd.f32 1.4214138, %v4951_v15  ;;  %16150 = vst [vmem:[#allocation168_spill] sm:$0xff] %v13446_v60  ;;  %v13454_v12 = vpop.eup %6429 }
 0x875   : > { %v5207_v0 = vmul.f32 %v5175_v28, %v13298_v19  ;;  %v5956_v43 = vadd.f32 -1.4531521, %v4888_v51  ;;  %v13435_v46 = vmul.f32 0.70710677, %v13415_v48  ;;  %v5328_v56 = vsub.f32 1.0, %v13418_v57  ;;  %v6432_v31 = vpop.eup %6431  ;;  %v13468_v28 = vpop.f32.mrb[29].mxu0 }
 0x876   : > { %v13439_v1 = vmul.f32 %v6426_v7, %v5138_v35  ;;  %v5176_v14 = vsub.f32 0.0, %v13320_v6  ;;  %v13444_v26 = vadd.f32 %v13250_v2, %v13431_v30  ;;  %v5139_v19 = vmul.f32 %v13310_v17, %v5107_v11 }
 0x877   : > { %v5140_v62 = vmul.f32 %v13330_v4, %v5108_v20  ;;  %v5110_v22 = vadd.f32 0.2548296, %v5078_v13  ;;  %v13452_v42 = vand.u32 2147483647, %v13435_v46  ;;  %v5329_v52 = vsub.f32 1.0, %v13426_v10 }
 0x878   : > { %v13458_v50 = vmul.f32 0.5, %v13234_v38  ;;  %v5141_v2 = vmul.f32 %v13349_v41, %v5109_v18  ;;  %v13462_v21 = vmul.f32 0.5, %v13243_v23  ;;  %v5015_v17 = vmul.f32 %v13376_v9, %v4983_v37 }
 0x879   : > { %v5250_v4 = vmul.f32 1.442695, %v5207_v0  ;;  %v4952_v3 = vmul.f32 %v13407_v25, %v5956_v43  ;;  %v4761_v15 = vmul.f32 0.3275911, %v13452_v42  ;;  %v5392_v38 = vsub.f32 0.0, %v5328_v56 }
 0x87a   : > { %v6434_v57 = vpop.eup %6433  ;;  %v5330_v35 = vsub.f32 1.0, %v13439_v1  ;;  %v5208_v41 = vmul.f32 %v5176_v14, %v13320_v6  ;;  %v13473_v23 = vmul.f32 0.70710677, %v13444_v26  ;;  %v5299_v20 = vmul.f32 %v6432_v31, %v5139_v19 }
 0x87b   : > { %v6436_v11 = vpop.eup %6435  ;;  %v5300_v13 = vmul.f32 %v6434_v57, %v5140_v62  ;;  %v5142_v51 = vmul.f32 %v13355_v45, %v5110_v22  ;;  %v4793_v10 = vadd.f32 1.0, %v4761_v15  ;;  %v5393_v7 = vsub.f32 0.0, %v5329_v52 }
 0x87c   : > { %v13476_v18 = vpop.eup %6437  ;;  %v5301_v37 = vmul.f32 %v6436_v11, %v5141_v2  ;;  %v13479_v0 = vmul.f32 0.5, %v13248_v49  ;;  %v13482_v43 = vand.u32 2147483647, %v13473_v23  ;;  %v5987_v6 = vadd.f32 -0.28449672, %v5015_v17  ;;  %v4469_v17 = vpop.permute.xlu1 %4468 }
 0x87d   : > { %6441 = vpow2.f32 %v5250_v4  ;;  %v13485_v1 = vmul.f32 0.5, %v13275_v29  ;;  %v4984_v14 = vadd.f32 1.4214138, %v4952_v3  ;;  %v5394_v62 = vsub.f32 0.0, %v5330_v35 }
 0x87e   : > { %v6440_v19 = vpop.eup %6439  ;;  %v5252_v45 = vmul.f32 1.442695, %v5208_v41  ;;  %6443 = vrcp.f32 %v4793_v10  ;;  %v4762_v49 = vmul.f32 0.3275911, %v13482_v43  ;;  %v5424_v22 = vsel %vm5360_vm12, %v5328_v56, %v5392_v38 }
 0x87f   : > { %v5331_v2 = vsub.f32 1.0, %v5299_v20  ;;  %v5332_v31 = vsub.f32 1.0, %v5300_v13  ;;  %v5302_v29 = vmul.f32 %v6440_v19, %v5142_v51  ;;  %v5425_v4 = vsel %vm5361_vm2, %v5329_v52, %v5393_v7 }
 0x880   : > { %v5333_v3 = vsub.f32 1.0, %v5301_v37  ;;  %v4794_v15 = vadd.f32 1.0, %v4762_v49  ;;  %v13497_v57 = vadd.f32 %v13258_v33, %v13431_v30  ;;  %v5079_v41 = vmul.f32 %v13376_v9, %v5987_v6 }
 0x881   : > { %v5016_v34 = vmul.f32 %v13407_v25, %v4984_v14  ;;  %v13502_v56 = vadd.f32 %v13277_v44, %v4469_v17  ;;  %v13505_v38 = vadd.f32 %v13281_v24, %v4469_v17  ;;  %v5488_v11 = vadd.f32 1.0, %v5424_v22 }
 0x882   : > { %v5426_v58 = vsel %vm5362_vm4, %v5330_v35, %v5394_v62  ;;  %6445 = vrcp.f32 %v4794_v15  ;;  %v13511_v33 = vmul.f32 0.70710677, %v13497_v57  ;;  %v5395_v30 = vsub.f32 0.0, %v5331_v2 }
 0x883   : > { %v5396_v52 = vsub.f32 0.0, %v5332_v31  ;;  %v5334_v20 = vsub.f32 1.0, %v5302_v29  ;;  %v13514_v13 = vmul.f32 0.70710677, %v13502_v56  ;;  %v5489_v44 = vadd.f32 1.0, %v5425_v4 }
 0x884   : > { %v5397_v51 = vsub.f32 0.0, %v5333_v3  ;;  %v13517_v24 = vand.u32 2147483647, %v13511_v33  ;;  %v13520_v16 = vmul.f32 0.70710677, %v13505_v38  ;;  %6447 = vpow2.f32 %v5252_v45 }
 0x885   : > { %v5111_v35 = vadd.f32 0.2548296, %v5079_v41  ;;  %v5988_v10 = vadd.f32 -0.28449672, %v5016_v34  ;;  %v13523_v7 = vand.u32 2147483647, %v13514_v13  ;;  %v13526_v37 = vmul.f32 %v5488_v11, %v13398_v47 }
 0x886   : > { %v5490_v6 = vadd.f32 1.0, %v5426_v58  ;;  %v4763_v14 = vmul.f32 0.3275911, %v13517_v24  ;;  %v13530_v19 = vand.u32 2147483647, %v13520_v16  ;;  %v5427_v49 = vsel %vm5363_vm5, %v5331_v2, %v5395_v30 }
 0x887   : > { %16151 = vst [vmem:[#allocation193_spill] sm:$0xff] %v13526_v37  ;;  %v6442_v62 = vpop.eup %6441  ;;  %v5428_v22 = vsel %vm5364_vm6, %v5332_v31, %v5396_v52  ;;  %v5398_v45 = vsub.f32 0.0, %v5334_v20  ;;  %v4764_v29 = vmul.f32 0.3275911, %v13523_v7  ;;  %v5429_v47 = vsel %vm5365_vm7, %v5333_v3, %v5397_v51  ;;  %v4474_v52 = vpop.permute.xlu0 %4473  ;;  %v16163_v37 = vld [vmem:[#allocation187_spill] sm:$0xff] }
 0x888   : > { %v13537_v17 = vpop.eup %6443  ;;  %v5177_v4 = vsub.f32 0.0, %v13452_v42  ;;  %v4795_v15 = vadd.f32 1.0, %v4763_v14  ;;  %v4765_v41 = vmul.f32 0.3275911, %v13530_v19  ;;  %v5143_v34 = vmul.f32 %v13376_v9, %v5111_v35 }
 0x889   : > { %v5080_v36 = vmul.f32 %v13407_v25, %v5988_v10  ;;  %v4889_v59 = vmul.f32 1.0614054, %v13537_v17  ;;  %v4796_v2 = vadd.f32 1.0, %v4764_v29  ;;  %v13547_v31 = vmul.f32 %v5489_v44, %v13403_v40 }
 0x88a   : > { %v13550_v11 = vmul.f32 0.5, %v13305_v53  ;;  %6449 = vrcp.f32 %v4795_v15  ;;  %v4797_v55 = vadd.f32 1.0, %v4765_v41  ;;  %v13553_v3 = vmul.f32 %v5490_v6, %v13422_v61  ;;  %v13564_v6 = vpop.permute.xlu1 %4478  ;;  %v16157_v15 = vld [vmem:[#allocation177_spill] sm:$0xff] }
 0x88b   : > { %16152 = vst [vmem:[#allocation188_spill] sm:$0xff] %v13547_v31  ;;  %v5430_v58 = vsel %vm5366_vm9, %v5334_v20, %v5398_v45  ;;  %v5957_v9 = vadd.f32 -1.4531521, %v4889_v59  ;;  %6451 = vrcp.f32 %v4796_v2  ;;  %v5491_v51 = vadd.f32 1.0, %v5427_v49  ;;  %v16154_v45 = vld [vmem:[#allocation173_spill] sm:$0xff]  ;;  %v13588_v59 = vpop.f32.mrb[30].mxu0 }
 0x88c   : > { %16153 = vst [vmem:[#allocation197_spill] sm:$0xff] %v13553_v3  ;;  %v13557_v30 = vpop.eup %6445  ;;  %v5492_v35 = vadd.f32 1.0, %v5428_v22  ;;  %v5493_v40 = vadd.f32 1.0, %v5429_v47  ;;  %v5209_v44 = vmul.f32 %v5177_v4, %v13452_v42  ;;  %v5303_v53 = vmul.f32 %v6442_v62, %v5143_v34  ;;  %v16155_v47 = vld [vmem:[#allocation191_spill] sm:$0xff] }
 0x88d   : > { %v5112_v10 = vadd.f32 0.2548296, %v5080_v36  ;;  %v4890_v14 = vmul.f32 1.0614054, %v13557_v30  ;;  %v13562_v61 = vadd.f32 %v13289_v8, %v4474_v52  ;;  %v5494_v63 = vadd.f32 1.0, %v5430_v58 }
 0x88e   : > { %v4953_v20 = vmul.f32 %v13537_v17, %v5957_v9  ;;  %6453 = vrcp.f32 %v4797_v55  ;;  %v13568_v29 = vadd.f32 %v16154_v45, %v4474_v52  ;;  %v6448_v49 = vpop.eup %6447  ;;  %v5178_v42 = vsub.f32 0.0, %v13482_v43 }
 0x88f   : > { %v5958_v22 = vadd.f32 -1.4531521, %v4890_v14  ;;  %v13572_v62 = vmul.f32 0.70710677, %v13562_v61  ;;  %v13576_v8 = vadd.f32 %v16155_v47, %v13564_v6  ;;  %v13579_v4 = vmul.f32 %v5491_v51, %v13429_v39 }
 0x890   : > { %vm5367_vm10 = vcmp.ge.f32.partialorder %v16157_v15, 0.0  ;;  %v5254_v41 = vmul.f32 1.442695, %v5209_v44  ;;  %v13583_v34 = vmul.f32 0.5, %v13415_v48  ;;  %v13586_v36 = vmul.f32 0.70710677, %v13568_v29 }
 0x891   : > { %16156 = vst [vmem:[#allocation201_spill] sm:$0xff] %v13579_v4  ;;  %v5335_v2 = vsub.f32 1.0, %v5303_v53  ;;  %v5144_v55 = vmul.f32 %v13407_v25, %v5112_v10  ;;  %v4954_v58 = vmul.f32 %v13557_v30, %v5958_v22  ;;  %v13593_v9 = vand.u32 2147483647, %v13572_v62 }
 0x892   : > { %v13596_v39 = vmul.f32 %v5492_v35, %v13458_v50  ;;  %v4985_v52 = vadd.f32 1.4214138, %v4953_v20  ;;  %v13599_v48 = vand.u32 2147483647, %v13586_v36  ;;  %v13602_v51 = vmul.f32 0.70710677, %v13576_v8 }
 0x893   : > { %v13605_v44 = vmul.f32 %v5493_v40, %v13462_v21  ;;  %v13608_v25 = vmul.f32 %v5494_v63, %v13479_v0  ;;  %v5210_v53 = vmul.f32 %v5178_v42, %v13482_v43  ;;  %v4766_v10 = vmul.f32 0.3275911, %v13593_v9  ;;  %v13623_v43 = vpop.f32.mrb[31].mxu0 }
 0x894   : > { %16158 = vst [vmem:[#allocation192_spill] sm:$0xff] %v13596_v39  ;;  %v13612_v14 = vpop.eup %6449  ;;  %6455 = vpow2.f32 %v5254_v41  ;;  %v4986_v50 = vadd.f32 1.4214138, %v4954_v58  ;;  %v13615_v35 = vmul.f32 0.5, %v13444_v26  ;;  %v4767_v20 = vmul.f32 0.3275911, %v13599_v48 }
 0x895   : > { %16159 = vst [vmem:[#allocation196_spill] sm:$0xff] %v13605_v44  ;;  %16160 = vst [vmem:[#allocation195_spill] sm:$0xff] %v13608_v25  ;;  %v13618_v45 = vpop.eup %6451  ;;  %v5399_v21 = vsub.f32 0.0, %v5335_v2  ;;  %v13620_v40 = vmul.f32 %v6448_v49, %v5144_v55  ;;  %v4891_v0 = vmul.f32 1.0614054, %v13612_v14  ;;  %v4798_v63 = vadd.f32 1.0, %v4766_v10 }
 0x896   : > { %16161 = vst [vmem:[#allocation198_spill] sm:$0xff] %v13623_v43  ;;  %v5017_v22 = vmul.f32 %v13537_v17, %v4985_v52  ;;  %v4892_v42 = vmul.f32 1.0614054, %v13618_v45  ;;  %v4799_v47 = vadd.f32 1.0, %v4767_v20  ;;  %v13628_v26 = vand.u32 2147483647, %v13602_v51 }
 0x897   : > { %v5256_v41 = vmul.f32 1.442695, %v5210_v53  ;;  %v5959_v58 = vadd.f32 -1.4531521, %v4891_v0  ;;  %v5179_v60 = vsub.f32 0.0, %v13517_v24  ;;  %6457 = vrcp.f32 %v4798_v63  ;;  %v16162_v39 = vld [vmem:[#allocation179_spill] sm:$0xff] }
 0x898   : > { %v13631_v49 = vpop.eup %6453  ;;  %v5018_v55 = vmul.f32 %v13557_v30, %v4986_v50  ;;  %v13635_v10 = vmul.f32 0.5, %v13497_v57  ;;  %v5960_v25 = vadd.f32 -1.4531521, %v4892_v42  ;;  %6459 = vrcp.f32 %v4799_v47 }
 0x899   : > { %v5431_v52 = vsel %vm5367_vm10, %v5335_v2, %v5399_v21  ;;  %v4955_v20 = vmul.f32 %v13612_v14, %v5959_v58  ;;  %v5180_v53 = vsub.f32 0.0, %v13523_v7  ;;  %v4893_v0 = vmul.f32 1.0614054, %v13631_v49 }
 0x89a   : > { %v5336_v63 = vsub.f32 1.0, %v13620_v40  ;;  %vm5368_vm11 = vcmp.ge.f32.partialorder %v16162_v39, 0.0  ;;  %v5989_v44 = vadd.f32 -0.28449672, %v5017_v22  ;;  %v4956_v50 = vmul.f32 %v13618_v45, %v5960_v25 }
 0x89b   : > { %v4768_v57 = vmul.f32 0.3275911, %v13628_v26  ;;  %v4987_v42 = vadd.f32 1.4214138, %v4955_v20  ;;  %v5211_v47 = vmul.f32 %v5179_v60, %v13517_v24  ;;  %v5961_v15 = vadd.f32 -1.4531521, %v4893_v0 }
 0x89c   : > { %v5181_v2 = vsub.f32 0.0, %v13530_v19  ;;  %v5990_v21 = vadd.f32 -0.28449672, %v5018_v55  ;;  %v4988_v58 = vadd.f32 1.4214138, %v4956_v50  ;;  %v13650_v4 = vadd.f32 %v16163_v37, %v13564_v6 }
 0x89d   : > { %v4800_v3 = vadd.f32 1.0, %v4768_v57  ;;  %v5495_v40 = vadd.f32 1.0, %v5431_v52  ;;  %v5019_v22 = vmul.f32 %v13612_v14, %v4987_v42  ;;  %v5212_v25 = vmul.f32 %v5180_v53, %v13523_v7 }
 0x89e   : > { %v4957_v31 = vmul.f32 %v13631_v49, %v5961_v15  ;;  %v6456_v20 = vpop.eup %6455  ;;  %v5081_v60 = vmul.f32 %v13537_v17, %v5989_v44  ;;  %v5020_v24 = vmul.f32 %v13618_v45, %v4988_v58  ;;  %v13658_v55 = vmul.f32 0.5, %v13502_v56 }
 0x89f   : > { %6461 = vrcp.f32 %v4800_v3  ;;  %v5400_v0 = vsub.f32 0.0, %v5336_v63  ;;  %v5258_v50 = vmul.f32 1.442695, %v5211_v47  ;;  %v5213_v6 = vmul.f32 %v5181_v2, %v13530_v19 }
 0x8a0   : > { %v4989_v37 = vadd.f32 1.4214138, %v4957_v31  ;;  %v5082_v52 = vmul.f32 %v13557_v30, %v5990_v21  ;;  %6463 = vpow2.f32 %v5256_v41  ;;  %v5991_v7 = vadd.f32 -0.28449672, %v5019_v22 }
 0x8a1   : > { %v13663_v53 = vmul.f32 0.70710677, %v13650_v4  ;;  %v13665_v57 = vpop.eup %6457  ;;  %v13668_v44 = vmul.f32 %v5495_v40, %v13485_v1  ;;  %v5992_v56 = vadd.f32 -0.28449672, %v5020_v24  ;;  %v5260_v42 = vmul.f32 1.442695, %v5212_v25 }
 0x8a2   : > { %v5182_v3 = vsub.f32 0.0, %v13593_v9  ;;  %v13671_v47 = vpop.eup %6459  ;;  %v5113_v31 = vadd.f32 0.2548296, %v5081_v60  ;;  %v5021_v19 = vmul.f32 %v13631_v49, %v4989_v37  ;;  %v4894_v41 = vmul.f32 1.0614054, %v13665_v57 }
 0x8a3   : > { %16164 = vst [vmem:[#allocation194_spill] sm:$0xff] %v13668_v44  ;;  %v13676_v15 = vand.u32 2147483647, %v13663_v53  ;;  %v5432_v2 = vsel %vm5368_vm11, %v5336_v63, %v5400_v0  ;;  %6465 = vpow2.f32 %v5258_v50  ;;  %v5262_v1 = vmul.f32 1.442695, %v5213_v6 }
 0x8a4   : > { %v5183_v21 = vsub.f32 0.0, %v13599_v48  ;;  %v5114_v58 = vadd.f32 0.2548296, %v5082_v52  ;;  %v5083_v40 = vmul.f32 %v13612_v14, %v5991_v7  ;;  %v5962_v22 = vadd.f32 -1.4531521, %v4894_v41 }
 0x8a5   : > { %v4895_v25 = vmul.f32 1.0614054, %v13671_v47  ;;  %v5084_v60 = vmul.f32 %v13618_v45, %v5992_v56  ;;  %6467 = vpow2.f32 %v5260_v42  ;;  %v5214_v24 = vmul.f32 %v5182_v3, %v13593_v9 }
 0x8a6   : > { %v4769_v37 = vmul.f32 0.3275911, %v13676_v15  ;;  %v5145_v39 = vmul.f32 %v13537_v17, %v5113_v31  ;;  %v5993_v63 = vadd.f32 -0.28449672, %v5021_v19  ;;  %v4958_v0 = vmul.f32 %v13665_v57, %v5962_v22  ;;  %v4484_v19 = vpop.permute.xlu0 %4483 }
 0x8a7   : > { %v5963_v50 = vadd.f32 -1.4531521, %v4895_v25  ;;  %v5496_v6 = vadd.f32 1.0, %v5432_v2  ;;  %6469 = vpow2.f32 %v5262_v1  ;;  %v5215_v52 = vmul.f32 %v5183_v21, %v13599_v48 }
 0x8a8   : > { %v4801_v7 = vadd.f32 1.0, %v4769_v37  ;;  %v5146_v56 = vmul.f32 %v13557_v30, %v5114_v58  ;;  %v5115_v42 = vadd.f32 0.2548296, %v5083_v40  ;;  %v4990_v44 = vadd.f32 1.4214138, %v4958_v0  ;;  %v16165_v58 = vld [vmem:[#allocation178_spill] sm:$0xff] }
 0x8a9   : > { %v13689_v41 = vpop.eup %6461  ;;  %v4959_v9 = vmul.f32 %v13671_v47, %v5963_v50  ;;  %v5116_v3 = vadd.f32 0.2548296, %v5084_v60  ;;  %v5264_v43 = vmul.f32 1.442695, %v5214_v24  ;;  %v5305_v2 = vmul.f32 %v6456_v20, %v5145_v39 }
 0x8aa   : > { %v4896_v17 = vmul.f32 1.0614054, %v13689_v41  ;;  %6471 = vrcp.f32 %v4801_v7  ;;  %v6464_v31 = vpop.eup %6463  ;;  %v5085_v1 = vmul.f32 %v13631_v49, %v5993_v63  ;;  %v5022_v48 = vmul.f32 %v13665_v57, %v4990_v44 }
 0x8ab   : > { %v4991_v21 = vadd.f32 1.4214138, %v4959_v9  ;;  %v5266_v22 = vmul.f32 1.442695, %v5215_v52  ;;  %v5184_v30 = vsub.f32 0.0, %v13628_v26  ;;  %v13698_v40 = vadd.f32 %v16165_v58, %v4484_v19 }
 0x8ac   : > { %v5964_v25 = vadd.f32 -1.4531521, %v4896_v17  ;;  %v5306_v60 = vmul.f32 %v6464_v31, %v5146_v56  ;;  %v5147_v24 = vmul.f32 %v13612_v14, %v5115_v42  ;;  %v5994_v37 = vadd.f32 -0.28449672, %v5022_v48 }
 0x8ad   : > { %v5023_v0 = vmul.f32 %v13671_v47, %v4991_v21  ;;  %v6466_v50 = vpop.eup %6465  ;;  %vm5369_vm13 = vcmp.ge.f32.partialorder %v13435_v46, 0.0  ;;  %v5148_v20 = vmul.f32 %v13618_v45, %v5116_v3  ;;  %6473 = vpow2.f32 %v5264_v43 }
 0x8ae   : > { %v4960_v44 = vmul.f32 %v13689_v41, %v5964_v25  ;;  %v13706_v39 = vmul.f32 0.70710677, %v13698_v40  ;;  %v5337_v63 = vsub.f32 1.0, %v5305_v2  ;;  %v5117_v52 = vadd.f32 0.2548296, %v5085_v1 }
 0x8af   : > { %v5086_v7 = vmul.f32 %v13665_v57, %v5994_v37  ;;  %v5995_v56 = vadd.f32 -0.28449672, %v5023_v0  ;;  %v6468_v14 = vpop.eup %6467  ;;  %vm5370_vm14 = vcmp.ge.f32.partialorder %v13473_v23, 0.0  ;;  %v13711_v42 = vmul.f32 0.5, %v13505_v38 }
 0x8b0   : > { %6475 = vpow2.f32 %v5266_v22  ;;  %v4992_v9 = vadd.f32 1.4214138, %v4960_v44  ;;  %v5216_v45 = vmul.f32 %v5184_v30, %v13628_v26  ;;  %v5338_v43 = vsub.f32 1.0, %v5306_v60 }
 0x8b1   : > { %v5307_v3 = vmul.f32 %v6466_v50, %v5147_v24  ;;  %v5087_v17 = vmul.f32 %v13671_v47, %v5995_v56  ;;  %v13716_v31 = vand.u32 2147483647, %v13706_v39  ;;  %v6470_v2 = vpop.eup %6469  ;;  %v13719_v1 = vmul.f32 %v5496_v6, %v13550_v11  ;;  %v16166_v24 = vld [vmem:[#allocation180_spill] sm:$0xff] }
 0x8b2   : > { %v5308_v48 = vmul.f32 %v6468_v14, %v5148_v20  ;;  %v13722_v21 = vmul.f32 0.5, %v13562_v61  ;;  %v5024_v38 = vmul.f32 %v13689_v41, %v4992_v9  ;;  %v5401_v22 = vsub.f32 0.0, %v5337_v63 }
 0x8b3   : > { %v5149_v26 = vmul.f32 %v13631_v49, %v5117_v52  ;;  %v5118_v25 = vadd.f32 0.2548296, %v5086_v7  ;;  %v4770_v30 = vmul.f32 0.3275911, %v13716_v31  ;;  %vm5371_vm15 = vcmp.ge.f32.partialorder %v13511_v33, 0.0 }
 0x8b4   : > { %v13727_v58 = vpop.eup %6471  ;;  %v5119_v60 = vadd.f32 0.2548296, %v5087_v17  ;;  %v13731_v11 = vmul.f32 0.5, %v13568_v29  ;;  %v5268_v6 = vmul.f32 1.442695, %v5216_v45  ;;  %v13734_v61 = vadd.f32 %v16166_v24, %v4484_v19 }
 0x8b5   : > { %v5402_v37 = vsub.f32 0.0, %v5338_v43  ;;  %v5339_v0 = vsub.f32 1.0, %v5307_v3  ;;  %vm5372_vm0 = vcmp.ge.f32.partialorder %v13514_v13, 0.0  ;;  %v4897_v49 = vmul.f32 1.0614054, %v13727_v58 }
 0x8b6   : > { %v5185_v50 = vsub.f32 0.0, %v13676_v15  ;;  %v5340_v20 = vsub.f32 1.0, %v5308_v48  ;;  %v5996_v44 = vadd.f32 -0.28449672, %v5024_v38  ;;  %v4802_v52 = vadd.f32 1.0, %v4770_v30 }
 0x8b7   : > { %v13740_v7 = vmul.f32 0.70710677, %v13734_v61  ;;  %v5433_v29 = vsel %vm5369_vm13, %v5337_v63, %v5401_v22  ;;  %v5309_v56 = vmul.f32 %v6470_v2, %v5149_v26  ;;  %v5150_v19 = vmul.f32 %v13665_v57, %v5118_v25  ;;  %v6474_v9 = vpop.eup %6473  ;;  %v4489_v2 = vpop.permute.xlu1 %4488 }
 0x8b8   : > { %v5965_v14 = vadd.f32 -1.4531521, %v4897_v49  ;;  %v5151_v45 = vmul.f32 %v13671_v47, %v5119_v60  ;;  %v13747_v3 = vmul.f32 0.5, %v13576_v8  ;;  %6477 = vrcp.f32 %v4802_v52 }
 0x8b9   : > { %v13750_v17 = vand.u32 2147483647, %v13740_v7  ;;  %v5434_v48 = vsel %vm5370_vm14, %v5338_v43, %v5402_v37  ;;  %v5403_v38 = vsub.f32 0.0, %v5339_v0  ;;  %v5217_v63 = vmul.f32 %v5185_v50, %v13676_v15 }
 0x8ba   : > { %v4961_v46 = vmul.f32 %v13727_v58, %v5965_v14  ;;  %v6476_v57 = vpop.eup %6475  ;;  %v5497_v22 = vadd.f32 1.0, %v5433_v29  ;;  %v5404_v26 = vsub.f32 0.0, %v5340_v20  ;;  %vm5373_vm1 = vcmp.ge.f32.partialorder %v13520_v16, 0.0  ;;  %v13775_v29 = vpop.permute.xlu0 %4493  ;;  %v16168_v14 = vld [vmem:[#allocation183_spill] sm:$0xff] }
 0x8bb   : > { %v5088_v8 = vmul.f32 %v13689_v41, %v5996_v44  ;;  %v4771_v47 = vmul.f32 0.3275911, %v13750_v17  ;;  %v5341_v25 = vsub.f32 1.0, %v5309_v56  ;;  %v5310_v30 = vmul.f32 %v6474_v9, %v5150_v19 }
 0x8bc   : > { %6479 = vpow2.f32 %v5268_v6  ;;  %v13760_v23 = vadd.f32 %v13358_v54, %v4489_v2  ;;  %v5498_v43 = vadd.f32 1.0, %v5434_v48  ;;  %v5311_v60 = vmul.f32 %v6476_v57, %v5151_v45 }
 0x8bd   : > { %v13763_v15 = vmul.f32 0.5, %v13650_v4  ;;  %v4803_v24 = vadd.f32 1.0, %v4771_v47  ;;  %v5435_v37 = vsel %vm5371_vm15, %v5339_v0, %v5403_v38  ;;  %v4993_v49 = vadd.f32 1.4214138, %v4961_v46  ;;  %v16167_v0 = vld [vmem:[#allocation189_spill] sm:$0xff] }
 0x8be   : > { %v5270_v50 = vmul.f32 1.442695, %v5217_v63  ;;  %v13768_v44 = vmul.f32 0.70710677, %v13760_v23  ;;  %v13771_v52 = vmul.f32 %v5497_v22, %v13583_v34  ;;  %v5436_v54 = vsel %vm5372_vm0, %v5340_v20, %v5404_v26 }
 0x8bf   : > { %v5120_v6 = vadd.f32 0.2548296, %v5088_v8  ;;  %6481 = vrcp.f32 %v4803_v24  ;;  %v5405_v4 = vsub.f32 0.0, %v5341_v25  ;;  %v5342_v56 = vsub.f32 1.0, %v5310_v30 }
 0x8c0   : > { %vm5374_vm3 = vcmp.ge.f32.partialorder %v13572_v62, 0.0  ;;  %vm5375_vm8 = vcmp.ge.f32.partialorder %v13586_v36, 0.0  ;;  %v13780_v33 = vand.u32 2147483647, %v13768_v44  ;;  %v13783_v19 = vadd.f32 %v16167_v0, %v4489_v2  ;;  %v13840_v36 = vpop.permute.xlu1 %4498 }
 0x8c1   : > { %v13786_v34 = vmul.f32 %v5498_v43, %v13615_v35  ;;  %v5499_v13 = vadd.f32 1.0, %v5435_v37  ;;  %v5343_v20 = vsub.f32 1.0, %v5311_v60  ;;  %v13790_v9 = vadd.f32 %v16168_v14, %v13775_v29 }
 0x8c2   : > { %v5500_v45 = vadd.f32 1.0, %v5436_v54  ;;  %v5025_v48 = vmul.f32 %v13727_v58, %v4993_v49  ;;  %6483 = vpow2.f32 %v5270_v50  ;;  %v4772_v38 = vmul.f32 0.3275911, %v13780_v33  ;;  %v13794_v46 = vpop.eup %6477 }
 0x8c3   : > { %v5152_v63 = vmul.f32 %v13689_v41, %v5120_v6  ;;  %v5186_v57 = vsub.f32 0.0, %v13716_v31  ;;  %v13799_v35 = vmul.f32 0.70710677, %v13783_v19  ;;  %v13802_v2 = vmul.f32 0.70710677, %v13790_v9 }
 0x8c4   : > { %v5437_v22 = vsel %vm5373_vm1, %v5341_v25, %v5405_v4  ;;  %v5406_v26 = vsub.f32 0.0, %v5342_v56  ;;  %v4898_v8 = vmul.f32 1.0614054, %v13794_v46  ;;  %v4804_v47 = vadd.f32 1.0, %v4772_v38 }
 0x8c5   : > { %v5407_v30 = vsub.f32 0.0, %v5343_v20  ;;  %v5187_v43 = vsub.f32 0.0, %v13750_v17  ;;  %v13809_v41 = vand.u32 2147483647, %v13799_v35  ;;  %v13812_v60 = vand.u32 2147483647, %v13802_v2 }
 0x8c6   : > { %v6480_v24 = vpop.eup %6479  ;;  %v13815_v37 = vmul.f32 %v5499_v13, %v13635_v10  ;;  %v5997_v49 = vadd.f32 -0.28449672, %v5025_v48  ;;  %v5966_v16 = vadd.f32 -1.4531521, %v4898_v8  ;;  %6485 = vrcp.f32 %v4804_v47 }
 0x8c7   : > { %v5501_v25 = vadd.f32 1.0, %v5437_v22  ;;  %v5312_v50 = vmul.f32 %v6480_v24, %v5152_v63  ;;  %v5218_v54 = vmul.f32 %v5186_v57, %v13716_v31  ;;  %v4773_v6 = vmul.f32 0.3275911, %v13809_v41 }
 0x8c8   : > { %v13820_v4 = vmul.f32 %v5500_v45, %v13658_v55  ;;  %v4962_v0 = vmul.f32 %v13794_v46, %v5966_v16  ;;  %v13824_v14 = vmul.f32 0.5, %v13698_v40  ;;  %v4774_v10 = vmul.f32 0.3275911, %v13812_v60 }
 0x8c9   : > { %v13827_v13 = vpop.eup %6481  ;;  %v5438_v48 = vsel %vm5374_vm3, %v5342_v56, %v5406_v26  ;;  %v5439_v31 = vsel %vm5375_vm8, %v5343_v20, %v5407_v30  ;;  %v5219_v38 = vmul.f32 %v5187_v43, %v13750_v17  ;;  %v4805_v63 = vadd.f32 1.0, %v4773_v6  ;;  %v16170_v43 = vld [vmem:[#allocation186_spill] sm:$0xff] }
 0x8ca   : > { %16169 = vst [vmem:[#allocation199_spill] sm:$0xff] %v13820_v4  ;;  %vm5376_vm12 = vcmp.ge.f32.partialorder %v13602_v51, 0.0  ;;  %v5089_v55 = vmul.f32 %v13727_v58, %v5997_v49  ;;  %v4994_v45 = vadd.f32 1.4214138, %v4962_v0  ;;  %v4899_v40 = vmul.f32 1.0614054, %v13827_v13 }
 0x8cb   : > { %v4806_v57 = vadd.f32 1.0, %v4774_v10  ;;  %v13838_v22 = vmul.f32 %v5501_v25, %v13711_v42  ;;  %v5344_v8 = vsub.f32 1.0, %v5312_v50  ;;  %v5272_v62 = vmul.f32 1.442695, %v5218_v54 }
 0x8cc   : > { %6487 = vrcp.f32 %v4805_v63  ;;  %v6484_v56 = vpop.eup %6483  ;;  %v5502_v20 = vadd.f32 1.0, %v5438_v48  ;;  %v5967_v17 = vadd.f32 -1.4531521, %v4899_v40  ;;  %v5188_v26 = vsub.f32 0.0, %v13780_v33 }
 0x8cd   : > { %6489 = vrcp.f32 %v4806_v57  ;;  %v5503_v47 = vadd.f32 1.0, %v5439_v31  ;;  %v5026_v30 = vmul.f32 %v13794_v46, %v4994_v45  ;;  %v13846_v24 = vadd.f32 %v16170_v43, %v13775_v29  ;;  %v16174_v57 = vld [vmem:[#allocation184_spill] sm:$0xff] }
 0x8ce   : > { %v13850_v42 = vadd.f32 %v13392_v32, %v13840_v36  ;;  %v5121_v49 = vadd.f32 0.2548296, %v5089_v55  ;;  %v4963_v16 = vmul.f32 %v13827_v13, %v5967_v17  ;;  %v5274_v25 = vmul.f32 1.442695, %v5219_v38 }
 0x8cf   : > { %v13854_v50 = vmul.f32 0.5, %v13734_v61  ;;  %v5408_v54 = vsub.f32 0.0, %v5344_v8  ;;  %6491 = vpow2.f32 %v5272_v62  ;;  %v13857_v6 = vmul.f32 0.70710677, %v13846_v24 }
 0x8d0   : > { %16171 = vst [vmem:[#allocation203_spill] sm:$0xff] %v13850_v42  ;;  %v13860_v0 = vmul.f32 0.70710677, %v13850_v42  ;;  %v13862_v29 = vpop.eup %6485  ;;  %v13865_v32 = vmul.f32 %v5502_v20, %v13722_v21  ;;  %v4995_v10 = vadd.f32 1.4214138, %v4963_v16  ;;  %v5220_v48 = vmul.f32 %v5188_v26, %v13780_v33 }
 0x8d1   : > { %v13869_v31 = vmul.f32 0.5, %v13760_v23  ;;  %v13872_v61 = vmul.f32 %v5503_v47, %v13731_v11  ;;  %v5998_v38 = vadd.f32 -0.28449672, %v5026_v30  ;;  %v4900_v63 = vmul.f32 1.0614054, %v13862_v29 }
 0x8d2   : > { %16172 = vst [vmem:[#allocation205_spill] sm:$0xff] %v13860_v0  ;;  %16173 = vst [vmem:[#allocation200_spill] sm:$0xff] %v13865_v32  ;;  %v13876_v55 = vand.u32 2147483647, %v13857_v6  ;;  %v5153_v45 = vmul.f32 %v13727_v58, %v5121_v49  ;;  %v5027_v21 = vmul.f32 %v13827_v13, %v4995_v10  ;;  %6493 = vpow2.f32 %v5274_v25 }
 0x8d3   : > { %v13881_v40 = vand.u32 2147483647, %v13860_v0  ;;  %v5440_v23 = vsel %vm5376_vm12, %v5344_v8, %v5408_v54  ;;  %v5968_v33 = vadd.f32 -1.4531521, %v4900_v63  ;;  %v4877_v62 = vmul.f32 1.0614054, %v16174_v57 }
 0x8d4   : > { %v4775_v11 = vmul.f32 0.3275911, %v13876_v55  ;;  %v5276_v20 = vmul.f32 1.442695, %v5220_v48  ;;  %v5189_v17 = vsub.f32 0.0, %v13809_v41  ;;  %v13889_v26 = vmul.f32 0.5, %v13783_v19 }
 0x8d5   : > { %v4776_v58 = vmul.f32 0.3275911, %v13881_v40  ;;  %v5090_v30 = vmul.f32 %v13794_v46, %v5998_v38  ;;  %v4964_v51 = vmul.f32 %v13862_v29, %v5968_v33  ;;  %v5190_v8 = vsub.f32 0.0, %v13812_v60 }
 0x8d6   : > { %v13892_v47 = vpop.eup %6487  ;;  %v4807_v43 = vadd.f32 1.0, %v4775_v11  ;;  %v13899_v16 = vmul.f32 %v6484_v56, %v5153_v45  ;;  %v5999_v25 = vadd.f32 -0.28449672, %v5027_v21  ;;  %v4879_v19 = vmul.f32 1.0614054, %v13454_v12 }
 0x8d7   : > { %v13897_v49 = vpop.eup %6489  ;;  %v4901_v54 = vmul.f32 1.0614054, %v13892_v47  ;;  %v4996_v10 = vadd.f32 1.4214138, %v4964_v51  ;;  %v5945_v63 = vadd.f32 -1.4531521, %v4877_v62  ;;  %v5221_v33 = vmul.f32 %v5189_v17, %v13809_v41 }
 0x8d8   : > { %v4902_v48 = vmul.f32 1.0614054, %v13897_v49  ;;  %6495 = vrcp.f32 %v4807_v43  ;;  %v4808_v42 = vadd.f32 1.0, %v4776_v58  ;;  %v5122_v0 = vadd.f32 0.2548296, %v5090_v30 }
 0x8d9   : > { %6497 = vpow2.f32 %v5276_v20  ;;  %v5969_v38 = vadd.f32 -1.4531521, %v4901_v54  ;;  %v6492_v11 = vpop.eup %6491  ;;  %v5028_v56 = vmul.f32 %v13862_v29, %v4996_v10  ;;  %v5222_v21 = vmul.f32 %v5190_v8, %v13812_v60 }
 0x8da   : > { %v5970_v45 = vadd.f32 -1.4531521, %v4902_v48  ;;  %v5345_v32 = vsub.f32 1.0, %v13899_v16  ;;  %v5091_v51 = vmul.f32 %v13827_v13, %v5999_v25  ;;  %v5947_v43 = vadd.f32 -1.4531521, %v4879_v19 }
 0x8db   : > { %v4965_v4 = vmul.f32 %v13892_v47, %v5969_v38  ;;  %v6000_v62 = vadd.f32 -0.28449672, %v5028_v56  ;;  %v4941_v41 = vmul.f32 %v16174_v57, %v5945_v63  ;;  %v13914_v17 = vadd.f32 %v13468_v28, %v13840_v36 }
 0x8dc   : > { %v4966_v20 = vmul.f32 %v13897_v49, %v5970_v45  ;;  %v6494_v58 = vpop.eup %6493  ;;  %vm5377_vm2 = vcmp.ge.f32.partialorder %v13663_v53, 0.0  ;;  %v5278_v30 = vmul.f32 1.442695, %v5221_v33  ;;  %6499 = vrcp.f32 %v4808_v42 }
 0x8dd   : > { %v4997_v60 = vadd.f32 1.4214138, %v4965_v4  ;;  %v4943_v8 = vmul.f32 %v13454_v12, %v5947_v43  ;;  %v5154_v16 = vmul.f32 %v13794_v46, %v5122_v0  ;;  %v5092_v25 = vmul.f32 %v13862_v29, %v6000_v62 }
 0x8de   : > { %v4998_v54 = vadd.f32 1.4214138, %v4966_v20  ;;  %v5191_v19 = vsub.f32 0.0, %v13876_v55  ;;  %v5123_v10 = vadd.f32 0.2548296, %v5091_v51  ;;  %v5504_v63 = vadd.f32 1.0, %v5440_v23 }
 0x8df   : > { %v5029_v48 = vmul.f32 %v13892_v47, %v4997_v60  ;;  %v4973_v28 = vadd.f32 1.4214138, %v4941_v41  ;;  %v4975_v36 = vadd.f32 1.4214138, %v4943_v8  ;;  %v5280_v4 = vmul.f32 1.442695, %v5222_v21 }
 0x8e0   : > { %v5030_v38 = vmul.f32 %v13897_v49, %v4998_v54  ;;  %v13924_v42 = vmul.f32 0.70710677, %v13914_v17  ;;  %v5124_v33 = vadd.f32 0.2548296, %v5092_v25  ;;  %v5409_v51 = vsub.f32 0.0, %v5345_v32 }
 0x8e1   : > { %v6001_v56 = vadd.f32 -0.28449672, %v5029_v48  ;;  %v5005_v46 = vmul.f32 %v16174_v57, %v4973_v28  ;;  %v5007_v0 = vmul.f32 %v13454_v12, %v4975_v36  ;;  %v5314_v43 = vmul.f32 %v6492_v11, %v5154_v16 }
 0x8e2   : > { %v13928_v45 = vpop.eup %6495  ;;  %v6002_v62 = vadd.f32 -0.28449672, %v5030_v38  ;;  %v5223_v20 = vmul.f32 %v5191_v19, %v13876_v55  ;;  %v5155_v41 = vmul.f32 %v13827_v13, %v5123_v10  ;;  %6501 = vpow2.f32 %v5278_v30 }
 0x8e3   : > { %v6498_v23 = vpop.eup %6497  ;;  %v4903_v21 = vmul.f32 1.0614054, %v13928_v45  ;;  %v5977_v60 = vadd.f32 -0.28449672, %v5005_v46  ;;  %v5093_v8 = vmul.f32 %v13892_v47, %v6001_v56  ;;  %6503 = vpow2.f32 %v5280_v4  ;;  %v16175_v46 = vld [vmem:[#allocation169_spill] sm:$0xff] }
 0x8e4   : > { %v5094_v25 = vmul.f32 %v13897_v49, %v6002_v62  ;;  %v13936_v54 = vand.u32 2147483647, %v13924_v42  ;;  %v5156_v11 = vmul.f32 %v13862_v29, %v5124_v33  ;;  %v5979_v48 = vadd.f32 -0.28449672, %v5007_v0 }
 0x8e5   : > { %v5971_v16 = vadd.f32 -1.4531521, %v4903_v21  ;;  %v5069_v55 = vmul.f32 %v16174_v57, %v5977_v60  ;;  %v5441_v13 = vsel %vm5377_vm2, %v5345_v32, %v5409_v51  ;;  %v5346_v30 = vsub.f32 1.0, %v5314_v43 }
 0x8e6   : > { %vm5378_vm4 = vcmp.ge.f32.partialorder %v13706_v39, 0.0  ;;  %v5282_v19 = vmul.f32 1.442695, %v5223_v20  ;;  %v5192_v10 = vsub.f32 0.0, %v13881_v40  ;;  %v13944_v28 = vpop.eup %6499  ;;  %v5315_v36 = vmul.f32 %v6494_v58, %v5155_v41  ;;  %v16176_v58 = vld [vmem:[#allocation176_spill] sm:$0xff] }
 0x8e7   : > { %v4967_v38 = vmul.f32 %v13928_v45, %v5971_v16  ;;  %v5071_v29 = vmul.f32 %v13454_v12, %v5979_v48  ;;  %v5101_v4 = vadd.f32 0.2548296, %v5069_v55  ;;  %v13949_v33 = vmul.f32 %v5504_v63, %v13747_v3 }
 0x8e8   : > { %v5125_v56 = vadd.f32 0.2548296, %v5093_v8  ;;  %v5126_v53 = vadd.f32 0.2548296, %v5094_v25  ;;  %v4777_v32 = vmul.f32 0.3275911, %v13936_v54  ;;  %v5316_v0 = vmul.f32 %v6498_v23, %v5156_v11 }
 0x8e9   : > { %vm5357_vm5 = vcmp.ge.f32.partialorder %v16175_v46, 0.0  ;;  %v4999_v51 = vadd.f32 1.4214138, %v4967_v38  ;;  %v5103_v43 = vadd.f32 0.2548296, %v5071_v29  ;;  %v5133_v62 = vmul.f32 %v16174_v57, %v5101_v4 }
 0x8ea   : > { %vm5359_vm6 = vcmp.ge.f32.partialorder %v16176_v58, 0.0  ;;  %v5505_v20 = vadd.f32 1.0, %v5441_v13  ;;  %vm5379_vm7 = vcmp.ge.f32.partialorder %v13740_v7, 0.0  ;;  %6505 = vpow2.f32 %v5282_v19 }
 0x8eb   : > { %v4904_v3 = vmul.f32 1.0614054, %v13944_v28  ;;  %v4809_v63 = vadd.f32 1.0, %v4777_v32  ;;  %v5410_v41 = vsub.f32 0.0, %v5346_v30  ;;  %v5347_v21 = vsub.f32 1.0, %v5315_v36 }
 0x8ec   : > { %v5031_v60 = vmul.f32 %v13928_v45, %v4999_v51  ;;  %v5135_v8 = vmul.f32 %v13454_v12, %v5103_v43  ;;  %vm5380_vm9 = vcmp.ge.f32.partialorder %v13768_v44, 0.0  ;;  %v5157_v23 = vmul.f32 %v13892_v47, %v5125_v56  ;;  %v6502_v11 = vpop.eup %6501 }
 0x8ed   : > { %v5158_v57 = vmul.f32 %v13897_v49, %v5126_v53  ;;  %v5293_v25 = vmul.f32 %v13382_v5, %v5133_v62  ;;  %6507 = vrcp.f32 %v4809_v63  ;;  %v5348_v16 = vsub.f32 1.0, %v5316_v0  ;;  %v6504_v19 = vpop.eup %6503 }
 0x8ee   : > { %v6003_v48 = vadd.f32 -0.28449672, %v5031_v60  ;;  %v5224_v55 = vmul.f32 %v5192_v10, %v13881_v40  ;;  %v5295_v13 = vmul.f32 %v13476_v18, %v5135_v8  ;;  %v13966_v36 = vmul.f32 0.5, %v13790_v9 }
 0x8ef   : > { %v13969_v12 = vmul.f32 0.5, %v13846_v24  ;;  %v5972_v47 = vadd.f32 -1.4531521, %v4904_v3  ;;  %v5325_v38 = vsub.f32 1.0, %v5293_v25  ;;  %v5442_v5 = vsel %vm5378_vm4, %v5346_v30, %v5410_v41  ;;  %v16177_v30 = vld [vmem:[#allocation181_spill] sm:$0xff]  ;;  %v4504_v41 = vpop.permute.xlu0 %4503 }
 0x8f0   : > { %v5411_v49 = vsub.f32 0.0, %v5347_v21  ;;  %v5095_v29 = vmul.f32 %v13928_v45, %v6003_v48  ;;  %v5327_v4 = vsub.f32 1.0, %v5295_v13  ;;  %v13975_v40 = vmul.f32 %v5505_v20, %v13763_v15  ;;  %v16179_v48 = vld [vmem:[#allocation172_spill] sm:$0xff] }
 0x8f1   : > { %v5317_v18 = vmul.f32 %v6502_v11, %v5157_v23  ;;  %v5318_v10 = vmul.f32 %v6504_v19, %v5158_v57  ;;  %v5389_v56 = vsub.f32 0.0, %v5325_v38  ;;  %v5412_v9 = vsub.f32 0.0, %v5348_v16  ;;  %v16178_v23 = vld [vmem:[#allocation182_spill] sm:$0xff] }
 0x8f2   : > { %v5127_v53 = vadd.f32 0.2548296, %v5095_v29  ;;  %v13977_v32 = vmul.f32 1.442695, %v5224_v55  ;;  %v5391_v24 = vsub.f32 0.0, %v5327_v4  ;;  %v5506_v0 = vadd.f32 1.0, %v5442_v5 }
 0x8f3   : > { %v4968_v51 = vmul.f32 %v13944_v28, %v5972_v47  ;;  %v5421_v39 = vsel %vm5357_vm5, %v5325_v38, %v5389_v56  ;;  %v4876_v43 = vmul.f32 1.0614054, %v16177_v30  ;;  %v5443_v15 = vsel %vm5379_vm7, %v5347_v21, %v5411_v49 }
 0x8f4   : > { %vm5381_vm10 = vcmp.ge.f32.partialorder %v13799_v35, 0.0  ;;  %vm5382_vm11 = vcmp.ge.f32.partialorder %v13802_v2, 0.0  ;;  %v5159_v62 = vmul.f32 %v13928_v45, %v5127_v53  ;;  %v5423_v20 = vsel %vm5359_vm6, %v5327_v4, %v5391_v24  ;;  %v6506_v63 = vpop.eup %6505  ;;  %v16180_v53 = vld [vmem:[#allocation198_spill] sm:$0xff] }
 0x8f5   : > { %v5485_v3 = vadd.f32 1.0, %v5421_v39  ;;  %v5349_v60 = vsub.f32 1.0, %v5317_v18  ;;  %v5350_v46 = vsub.f32 1.0, %v5318_v10  ;;  %v5487_v8 = vadd.f32 1.0, %v5423_v20  ;;  %v16182_v20 = vld [vmem:[#allocation201_spill] sm:$0xff] }
 0x8f6   : > { %v4878_v57 = vmul.f32 1.0614054, %v16178_v23  ;;  %v5444_v7 = vsel %vm5380_vm9, %v5348_v16, %v5412_v9  ;;  %v5319_v21 = vmul.f32 %v6506_v63, %v5159_v62  ;;  %v5944_v25 = vadd.f32 -1.4531521, %v4876_v43  ;;  %v16181_v62 = vld [vmem:[#allocation188_spill] sm:$0xff] }
 0x8f7   : > { %v13994_v11 = vadd.f32 %v13588_v59, %v4504_v41  ;;  %v13996_v45 = vpop.eup %6507  ;;  %v5000_v58 = vadd.f32 1.4214138, %v4968_v51  ;;  %v5517_v55 = vmul.f32 %v5485_v3, %v16179_v48  ;;  %v5519_v13 = vmul.f32 %v5487_v8, %v13390_v27 }
 0x8f8   : > { %v5946_v19 = vadd.f32 -1.4531521, %v4878_v57  ;;  %v5351_v47 = vsub.f32 1.0, %v5319_v21  ;;  %v4905_v38 = vmul.f32 1.0614054, %v13996_v45  ;;  %v4940_v5 = vmul.f32 %v16177_v30, %v5944_v25 }
 0x8f9   : > { %v14003_v44 = vmul.f32 0.70710677, %v13994_v11  ;;  %v5413_v16 = vsub.f32 0.0, %v5349_v60  ;;  %v5414_v49 = vsub.f32 0.0, %v5350_v46  ;;  %v5553_v59 = vpack.c.bf16 %v5519_v13, %v5517_v55 }
 0x8fa   : > { %v4942_v29 = vmul.f32 %v16178_v23, %v5946_v19  ;;  %vm5383_vm13 = vcmp.ge.f32.partialorder %v13857_v6, 0.0  ;;  %v5415_v4 = vsub.f32 0.0, %v5351_v47  ;;  %v5973_v18 = vadd.f32 -1.4531521, %v4905_v38 }
 0x8fb   : > { %v4972_v10 = vadd.f32 1.4214138, %v4940_v5  ;;  %v14008_v27 = vmul.f32 %v5506_v0, %v13824_v14  ;;  %5600 = vmatprep.subr.bf16.mxu1 %v5553_v59  ;;  %v14011_v9 = vand.u32 2147483647, %v14003_v44  ;;  %v14014_v24 = vadd.f32 %v16180_v53, %v4504_v41  ;;  %v16183_v5 = vld [vmem:[#allocation193_spill] sm:$0xff]  ;;  %v16186_v53 = vld [vmem:[#allocation194_spill] sm:$0xff] }
 0x8fc   : > { %v4974_v56 = vadd.f32 1.4214138, %v4942_v29  ;;  %v5507_v51 = vadd.f32 1.0, %v5443_v15  ;;  %v5508_v39 = vadd.f32 1.0, %v5444_v7  ;;  %v5555_v3 = vpack.c.bf16 %v16182_v20, %v16181_v62 }
 0x8fd   : > { %v5004_v43 = vmul.f32 %v16177_v30, %v4972_v10  ;;  %v5445_v63 = vsel %vm5381_vm10, %v5349_v60, %v5413_v16  ;;  %v5446_v14 = vsel %vm5382_vm11, %v5350_v46, %v5414_v49  ;;  %v4778_v8 = vmul.f32 0.3275911, %v14011_v9  ;;  %v16184_v16 = vld [vmem:[#allocation197_spill] sm:$0xff] }
 0x8fe   : > { %v5006_v0 = vmul.f32 %v16178_v23, %v4974_v56  ;;  %v5447_v41 = vsel %vm5383_vm13, %v5351_v47, %v5415_v4  ;;  %v5032_v15 = vmul.f32 %v13944_v28, %v5000_v58  ;;  %v4969_v57 = vmul.f32 %v13996_v45, %v5973_v18 }
 0x8ff   : > { %v5976_v7 = vadd.f32 -0.28449672, %v5004_v43  ;;  %v5193_v21 = vsub.f32 0.0, %v13936_v54  ;;  %v4810_v35 = vadd.f32 1.0, %v4778_v8  ;;  %v14031_v60 = vmul.f32 0.70710677, %v14014_v24 }
 0x900   : > { %v5978_v25 = vadd.f32 -0.28449672, %v5006_v0  ;;  %v14034_v2 = vmul.f32 %v5507_v51, %v13854_v50  ;;  %v5509_v46 = vadd.f32 1.0, %v5445_v63  ;;  %v5510_v48 = vadd.f32 1.0, %v5446_v14  ;;  %v16188_v14 = vld [vmem:[#allocation195_spill] sm:$0xff]  ;;  %v16189_v8 = vld [vmem:[#allocation185_spill] sm:$0xff] }
 0x901   : > { %v5068_v6 = vmul.f32 %v16177_v30, %v5976_v7  ;;  %v5511_v55 = vadd.f32 1.0, %v5447_v41  ;;  %6509 = vrcp.f32 %v4810_v35  ;;  %v4747_v13 = vand.u32 2147483647, %v14031_v60  ;;  %v16192_v35 = vld [vmem:[#allocation200_spill] sm:$0xff] }
 0x902   : > { %v5070_v58 = vmul.f32 %v16178_v23, %v5978_v25  ;;  %v14040_v19 = vmul.f32 %v5508_v39, %v13869_v31  ;;  %v5001_v47 = vadd.f32 1.4214138, %v4969_v57  ;;  %v5554_v49 = vpack.c.bf16 %v16184_v16, %v16183_v5  ;;  %v16185_v31 = vld [vmem:[#allocation196_spill] sm:$0xff]  ;;  %v16191_v25 = vld [vmem:[#allocation199_spill] sm:$0xff] }
 0x903   : > { %v5100_v38 = vadd.f32 0.2548296, %v5068_v6  ;;  %v6004_v50 = vadd.f32 -0.28449672, %v5032_v15  ;;  %v5225_v59 = vmul.f32 %v5193_v21, %v13936_v54  ;;  %v4779_v4 = vmul.f32 0.3275911, %v4747_v13 }
 0x904   : > { %v5102_v29 = vadd.f32 0.2548296, %v5070_v58  ;;  %v14046_v18 = vmul.f32 %v5509_v46, %v13889_v26  ;;  %v14049_v10 = vmul.f32 %v5510_v48, %v13966_v36  ;;  %v5557_v51 = vpack.c.bf16 %v16186_v53, %v16185_v31  ;;  %v16187_v54 = vld [vmem:[#allocation192_spill] sm:$0xff]  ;;  %v16196_v46 = vld [vmem:[#allocation174_spill] sm:$0xff]  ;;  %v16198_v31 = vld [vmem:[#allocation205_spill] sm:$0xff] }
 0x905   : > { %v5132_v56 = vmul.f32 %v16177_v30, %v5100_v38  ;;  %v14055_v39 = vmul.f32 %v5511_v55, %v13969_v12  ;;  %v4811_v63 = vadd.f32 1.0, %v4779_v4  ;;  %v5556_v0 = vpack.c.bf16 %v16188_v14, %v16187_v54  ;;  %v16190_v15 = vld [vmem:[#allocation168_spill] sm:$0xff]  ;;  %v16193_v4 = vld [vmem:[#allocation166_spill] sm:$0xff] }
 0x906   : > { %v5134_v43 = vmul.f32 %v16178_v23, %v5102_v29  ;;  %v5033_v26 = vmul.f32 %v13996_v45, %v5001_v47  ;;  %v5194_v12 = vsub.f32 0.0, %v14011_v9  ;;  %v5096_v7 = vmul.f32 %v13944_v28, %v6004_v50 }
 0x907   : > { %v5292_v41 = vmul.f32 %v16189_v8, %v5132_v56  ;;  %6511 = vrcp.f32 %v4811_v63  ;;  %vm5356_vm14 = vcmp.ge.f32.partialorder %v16193_v4, 0.0  ;;  %v5286_v56 = vmul.f32 1.442695, %v5225_v59 }
 0x908   : > { %v5294_v57 = vmul.f32 %v16190_v15, %v5134_v43  ;;  %6513 = vpow2.f32 %v13977_v32  ;;  %v6005_v47 = vadd.f32 -0.28449672, %v5033_v26  ;;  %v5226_v63 = vmul.f32 %v5194_v12, %v14011_v9  ;;  %v16194_v32 = vld [vmem:[#allocation170_spill] sm:$0xff] }
 0x909   : > { %v5324_v21 = vsub.f32 1.0, %v5292_v41  ;;  %vm5358_vm15 = vcmp.ge.f32.partialorder %v16194_v32, 0.0  ;;  %v5128_v8 = vadd.f32 0.2548296, %v5096_v7  ;;  %v5195_v48 = vsub.f32 0.0, %v4747_v13 }
 0x90a   : > { %v5326_v6 = vsub.f32 1.0, %v5294_v57  ;;  %v16195_v57 = vld [vmem:[#allocation175_spill] sm:$0xff]  ;;  %v5454_v23 = vmul.f32 0.5, %v16196_v46  ;;  %v5097_v50 = vmul.f32 %v13996_v45, %v6005_v47  ;;  %6515 = vpow2.f32 %v5286_v56 }
 0x90b   : > { %v5388_v38 = vsub.f32 0.0, %v5324_v21  ;;  %v6510_v29 = vpop.eup %6509  ;;  %v5452_v55 = vmul.f32 0.5, %v16195_v57  ;;  %v5288_v59 = vmul.f32 1.442695, %v5226_v63  ;;  %v5160_v9 = vmul.f32 %v13944_v28, %v5128_v8 }
 0x90c   : > { %v5390_v43 = vsub.f32 0.0, %v5326_v6  ;;  %v4906_v15 = vmul.f32 1.0614054, %v6510_v29  ;;  %v5129_v36 = vadd.f32 0.2548296, %v5097_v50  ;;  %v16197_v5 = vpack.c.bf16 %v13815_v37, %v13771_v52 }
 0x90d   : > { %v5420_v41 = vsel %vm5356_vm14, %v5324_v21, %v5388_v38  ;;  %v5227_v38 = vmul.f32 %v5195_v48, %v4747_v13  ;;  %6517 = vpow2.f32 %v5288_v59  ;;  %vm5384_vm0 = vcmp.ge.f32.partialorder %v16198_v31, 0.0 }
 0x90e   : > { %v5422_v58 = vsel %vm5358_vm15, %v5326_v6, %v5390_v43  ;;  %v5484_v26 = vadd.f32 1.0, %v5420_v41  ;;  %v5974_v4 = vadd.f32 -1.4531521, %v4906_v15  ;;  %v5161_v28 = vmul.f32 %v13996_v45, %v5129_v36 }
 0x90f   : > { %v5486_v30 = vadd.f32 1.0, %v5422_v58  ;;  %v5290_v15 = vmul.f32 1.442695, %v5227_v38  ;;  %v16200_v54 = vpack.c.bf16 %v13872_v61, %v13838_v22  ;;  %vm5386_vm1 = vcmp.ge.f32.partialorder %v14003_v44, 0.0 }
 0x910   : > { %v5516_v12 = vmul.f32 %v5484_v26, %v5452_v55  ;;  %v4970_v7 = vmul.f32 %v6510_v29, %v5974_v4  ;;  %vm5385_vm3 = vcmp.ge.f32.partialorder %v13924_v42, 0.0  ;;  %v16203_v61 = vpack.c.bf16 %v14034_v2, %v13975_v40 }
 0x911   : > { %v5518_v32 = vmul.f32 %v5486_v30, %v5454_v23  ;;  %v6512_v21 = vpop.eup %6511  ;;  %6519 = vpow2.f32 %v5290_v15  ;;  %vm5387_vm8 = vcmp.ge.f32.partialorder %v14031_v60, 0.0  ;;  %v16205_v42 = vpack.c.bf16 %v14055_v39, %v14046_v18  ;;  %v6387_v60 = vld [vmem:[#allocation18] sm:$0xff]   ;;  %v6388_v39 = vld [vmem:[#allocation18 + $0x8] sm:$0xff]  }
 0x912   : > { %v5002_v6 = vadd.f32 1.4214138, %v4970_v7  ;;  %v4907_v43 = vmul.f32 1.0614054, %v6512_v21  ;;  %v6514_v41 = vpop.eup %6513  ;;  %v5481_v40 = vmul.f32 0.5, %v13914_v17  ;;  %v5483_v2 = vmul.f32 0.5, %v14014_v24  ;;  %v5571_v17 = vpop.permute.xlu1 %5570 }
 0x913   : > { %v5552_v57 = vpack.c.bf16 %v5518_v32, %v5516_v12  ;;  %v5320_v46 = vmul.f32 %v6514_v41, %v5160_v9  ;;  %v16201_v12 = vpack.c.bf16 %v16192_v35, %v16191_v25  ;;  %v16202_v32 = vld [vmem:[#allocation203_spill] sm:$0xff]  ;;  %v16204_v25 = vpack.c.bf16 %v14008_v27, %v13949_v33  ;;  %v5576_v24 = vpop.permute.xlu0 %5575 }
 0x914   : > { %v5034_v47 = vmul.f32 %v6510_v29, %v5002_v6  ;;  %v5975_v58 = vadd.f32 -1.4531521, %v4907_v43  ;;  %v6516_v50 = vpop.eup %6515  ;;  %v16206_v41 = vpack.c.bf16 %v14049_v10, %v14040_v19  ;;  %v16207_v18 = vmov 0  }
 0x915   : > { %5601 = vmatpush1.bf16.msra.mxu1 %v5552_v57  ;;  %v5352_v13 = vsub.f32 1.0, %v5320_v46  ;;  %v5321_v56 = vmul.f32 %v6516_v50, %v5161_v28 }
 0x916   : > { %5602 = vmatprep.subr.bf16.mxu1 %v5555_v3  ;;  %v6006_v30 = vadd.f32 -0.28449672, %v5034_v47  ;;  %v4971_v23 = vmul.f32 %v6512_v21, %v5975_v58  ;;  %v5581_v47 = vpop.permute.xlu1 %5580 }
 0x917   : > { %v5416_v3 = vsub.f32 0.0, %v5352_v13  ;;  %v6518_v63 = vpop.eup %6517  ;;  %v5353_v16 = vsub.f32 1.0, %v5321_v56  ;;  %v5586_v58 = vpop.permute.xlu0 %5585 }
 0x918   : > { %v5098_v48 = vmul.f32 %v6510_v29, %v6006_v30  ;;  %v5003_v55 = vadd.f32 1.4214138, %v4971_v23  ;;  %v5681_v30 = vld [vmem:[%s7568_s12] sm:$0xff] }
 0x919   : > { %5603 = vmatpush1.bf16.msra.mxu1 %v5554_v49  ;;  %v5448_v53 = vsel %vm5384_vm0, %v5352_v13, %v5416_v3  ;;  %v5417_v14 = vsub.f32 0.0, %v5353_v16  ;;  %v5683_v3 = vld [vmem:[%s7568_s12 + $0x10] sm:$0xff] }
 0x91a   : > { %5604 = vmatprep.subr.bf16.mxu1 %v5557_v51  ;;  %v5130_v62 = vadd.f32 0.2548296, %v5098_v48  ;;  %v5035_v20 = vmul.f32 %v6512_v21, %v5003_v55  ;;  %v5512_v4 = vadd.f32 1.0, %v5448_v53  ;;  %v5656_v28 = vpop.permute.xlu1 %5655  ;;  %v5682_v55 = vld [vmem:[%s7568_s12 + $0x8] sm:$0xff] }
 0x91b   : > { %v6520_v37 = vpop.eup %6519  ;;  %v5449_v7 = vsel %vm5385_vm3, %v5353_v16, %v5417_v14 }
 0x91c   : > { %v5162_v45 = vmul.f32 %v6510_v29, %v5130_v62  ;;  %v6007_v36 = vadd.f32 -0.28449672, %v5035_v20  ;;  %v16199_v29 = vpack.c.bf16 %v13786_v34, %v13719_v1  ;;  %v5480_v1 = vmul.f32 0.5, %v16202_v32  ;;  %v5661_v62 = vpop.permute.xlu0 %5660  ;;  %v5687_v32 = vld [vmem:[%s7568_s12 + $0x30] sm:$0xff] }
 0x91d   : > { %5605 = vmatpush1.bf16.msra.mxu1 %v5556_v0  ;;  %v5482_v34 = vmul.f32 0.5, %v13994_v11  ;;  %v5513_v35 = vadd.f32 1.0, %v5449_v7 }
 0x91e   : > { %5606 = vmatprep.subr.bf16.mxu1 %v16197_v5  ;;  %v5322_v49 = vmul.f32 %v6518_v63, %v5162_v45  ;;  %v5099_v8 = vmul.f32 %v6512_v21, %v6007_v36  ;;  %v5544_v44 = vmul.f32 %v5512_v4, %v5480_v1  ;;  %v5684_v5 = vld [vmem:[%s7568_s12 + $0x18] sm:$0xff] }
 0x91f   : > { %v5545_v33 = vmul.f32 %v5513_v35, %v5481_v40 }
 0x920   : > { %v5354_v51 = vsub.f32 1.0, %v5322_v49  ;;  %v5131_v26 = vadd.f32 0.2548296, %v5099_v8 }
 0x921   : > { %5607 = vmatpush1.bf16.msra.mxu1 %v16199_v29  ;;  %v5666_v29 = vpop.permute.xlu1 %5665 }
 0x922   : > { %5608 = vmatprep.subr.bf16.mxu1 %v16200_v54  ;;  %v5418_v0 = vsub.f32 0.0, %v5354_v51  ;;  %v5163_v52 = vmul.f32 %v6512_v21, %v5131_v26  ;;  %v5685_v54 = vld [vmem:[%s7568_s12 + $0x20] sm:$0xff] }
 0x924   : > { %v5450_v59 = vsel %vm5386_vm1, %v5354_v51, %v5418_v0  ;;  %v5323_v9 = vmul.f32 %v6520_v37, %v5163_v52  ;;  %v5686_v37 = vld [vmem:[%s7568_s12 + $0x28] sm:$0xff] }
 0x925   : > { %5609 = vmatpush1.bf16.msra.mxu1 %v16201_v12  ;;  %v5514_v22 = vadd.f32 1.0, %v5450_v59 }
 0x926   : > { %5610 = vmatprep.subr.bf16.mxu1 %v16203_v61  ;;  %v5355_v21 = vsub.f32 1.0, %v5323_v9  ;;  %v5671_v9 = vpop.permute.xlu0 %5670  ;;  %v5688_v61 = vld [vmem:[%s7568_s12 + $0x38] sm:$0xff] }
 0x927   : > { %v5546_v38 = vmul.f32 %v5514_v22, %v5482_v34 }
 0x928   : > { %v5419_v57 = vsub.f32 0.0, %v5355_v21 }
 0x929   : > { %5611 = vmatpush1.bf16.msra.mxu1 %v16204_v25  ;;  %v5566_v11 = vpack.c.bf16 %v5546_v38, %v5544_v44 }
 0x92a   : > { %5612 = vmatprep.subr.bf16.mxu1 %v16205_v42  ;;  %v5451_v6 = vsel %vm5387_vm8, %v5355_v21, %v5419_v57 }
 0x92b   : > { %v5515_v43 = vadd.f32 1.0, %v5451_v6 }
 0x92d   : > { %5613 = vmatpush1.bf16.msra.mxu1 %v16206_v41  ;;  %v5547_v27 = vmul.f32 %v5515_v43, %v5483_v2 }
 0x92f   : > { %v5567_v46 = vpack.c.bf16 %v5547_v27, %v5545_v33 }
 0x931   : > { %5614 = vmatprep.subr.bf16.mxu1 %v5567_v46 }
 0x932   : > { %5615 = vmatpush1.bf16.msra.mxu1 %v5566_v11 }
 0x935   : > { %5633 = vmatmul.mubr.bf16.vlgmr.msra.gmra.mrb[0].mxu1 %v6387_v60 }
 0x936   : > { %5642 = vmatprep.mubr.bf16.mxu1 %v16207_v18 }
 0x93d   : > { %5643 = vmatmul.mubr.bf16.gmra.mrb[4].mxu1 %v6388_v39 }
 0xa08   : > { %v5634_v19 = vpop.f32.mrb[0].mxu1 }
 0xa09   : > { %v5635_v10 = vadd.f32 %v5634_v19, %v5571_v17  ;;  %v5636_v15 = vpop.f32.mrb[1].mxu1 }
 0xa0a   : > { %v5637_v23 = vadd.f32 %v5636_v15, %v5571_v17  ;;  %v5638_v13 = vpop.f32.mrb[2].mxu1 }
 0xa0b   : > { %v5673_v48 = vmul.f32 %v5656_v28, %v5635_v10  ;;  %v5639_v50 = vadd.f32 %v5638_v13, %v5576_v24  ;;  %v5640_v56 = vpop.f32.mrb[3].mxu1 }
 0xa0c   : > { %v5674_v20 = vmul.f32 %v5656_v28, %v5637_v23  ;;  %v5641_v45 = vadd.f32 %v5640_v56, %v5576_v24 }
 0xa0d   : > { %v5689_v36 = vadd.f32 %v5681_v30, %v5673_v48  ;;  %v5675_v63 = vmul.f32 %v5661_v62, %v5639_v50 }
 0xa0e   : > { %v5690_v16 = vadd.f32 %v5682_v55, %v5674_v20  ;;  %v5676_v49 = vmul.f32 %v5661_v62, %v5641_v45 }
 0xa0f   : > { %5697 = vst [vmem:[%s14141_s19] sm:$0xff] %v5689_v36  ;;  %v5691_v8 = vadd.f32 %v5683_v3, %v5675_v63 }
 0xa10   : > { %5698 = vst [vmem:[%s14141_s19 + $0x8] sm:$0xff] %v5690_v16  ;;  %v5692_v31 = vadd.f32 %v5684_v5, %v5676_v49  ;;  %v5644_v53 = vpop.f32.mrb[4].mxu1 }
 0xa11   : > { %5699 = vst [vmem:[%s14141_s19 + $0x10] sm:$0xff] %v5691_v8  ;;  %v5645_v51 = vadd.f32 %v5644_v53, %v5581_v47  ;;  %v5646_v26 = vpop.f32.mrb[5].mxu1 }
 0xa12   : > { %5700 = vst [vmem:[%s14141_s19 + $0x18] sm:$0xff] %v5692_v31  ;;  %v5647_v14 = vadd.f32 %v5646_v26, %v5581_v47  ;;  %v5648_v0 = vpop.f32.mrb[6].mxu1 }
 0xa13   : > { %v5677_v52 = vmul.f32 %v5666_v29, %v5645_v51  ;;  %v5649_v4 = vadd.f32 %v5648_v0, %v5586_v58  ;;  %v5650_v59 = vpop.f32.mrb[7].mxu1 }
 0xa14   : > { %v5678_v12 = vmul.f32 %v5666_v29, %v5647_v14  ;;  %v5651_v1 = vadd.f32 %v5650_v59, %v5586_v58 }
 0xa15   : > { %v5693_v34 = vadd.f32 %v5685_v54, %v5677_v52  ;;  %v5679_v22 = vmul.f32 %v5671_v9, %v5649_v4 }
 0xa16   : > { %v5694_v7 = vadd.f32 %v5686_v37, %v5678_v12  ;;  %v5680_v21 = vmul.f32 %v5671_v9, %v5651_v1 }
 0xa17   : > { %5701 = vst [vmem:[%s14141_s19 + $0x20] sm:$0xff] %v5693_v34  ;;  %v5695_v44 = vadd.f32 %v5687_v32, %v5679_v22 }
 0xa18   : > { %5702 = vst [vmem:[%s14141_s19 + $0x28] sm:$0xff] %v5694_v7  ;;  %v5696_v38 = vadd.f32 %v5688_v61, %v5680_v21 }
 0xa19   : > { %5703 = vst [vmem:[%s14141_s19 + $0x30] sm:$0xff] %v5695_v44 }
 0xa1a   : > { %5704 = vst [vmem:[%s14141_s19 + $0x38] sm:$0xff] %v5696_v38 }
 0xa1b   : > { %6920 = shalt.err (!%p6917_p9)
}
 0xa1c   : > { %s6921_s19 = scalar_lea.hbm %s14157_s26, 1024  ;;  %s6925_s20 = scalar_lea.hbm %s16209_s25, 2048 }
 0xa1d   : > { %p6922_p7 = scmp.ne.s32.totalorder %s14157_s26, %s6921_s19  ;;  %p6926_p1 = scmp.lt.u32.totalorder %s14157_s26, %s16209_s25 }
 0xa1e   : > { %p6927_p13 = scmp.lt.u32.totalorder %s6925_s20, %s6921_s19  ;;  %p6929_p2 = scmp.lt.u32.totalorder %s6921_s19, %s14157_s26 }
 0xa1f   : > { %p6923_p4 = pnand %p6922_p7, %p16210_p8 }
 0xa20   : > { %p6928_p0 = por %p6927_p13, %p6926_p1 }
 0xa21   : > { %p6924_p12 = pneg %p6923_p4 }
 0xa22   : > { %p6930_p6 = por %p6929_p2, %p6928_p0 }
 0xa24   : > { %p6931_p10 = pnand %p6930_p6, %p6924_p12 }
 0xa26   : > { %6934 = shalt.err (!%p6931_p10)
}
 0xa27   : > { %s7115_s29 = smov 256   ;;  %s16211_s13 = smov 16  }
 0xa28   : > { %s16212_s2 = scalar_lea.sflag [#allocation5], %s7562_s17 }
 0xa29   : > { %6063 = dma.vmem_to_hbm [thread:$0]  (%p16210_p8), %s14160_s28, 1024, %s14157_s26, %s16212_s2, %s7115_s29, %s7115_s29, %s16211_s13  }
 0xa2a PF: > { %s5734_s12 = sand.u32 1, %s6985_s21   ;;  %p16213_p11 = scmp.ne.s32.totalorder %s14906_s27, 0 }
 0xa2b   : > { %p16214_p3 = scmp.ge.s32.totalorder %s6997_s24, 2  ;;  %s5735_s19 = scalar_lea.sflag [#allocation5], %s5734_s12 }
 0xa2d   : > { %p6104_p5 = pnand %p16214_p3, %p16213_p11 }
 0xa2f   : > { %6980 = dma.done.wait (!%p6104_p5), %s5735_s19, 1024  }
 0xa30   : > { %6982 = vsyncadd (!%p6104_p5), %s5735_s19, 4294966272  ;;  %p31_p9 = scmp.ge.s32.totalorder %s7489_s15, 4   ;;  %s16215_s21 = smov %s6989_s22 }
 0xa31   : > { %s16216_s22 = smov %s6993_s23  ;;  %s16217_s23 = smov %s7501_s14 }
 0xa32   : > { %s16218_s24 = smov %s7489_s15  ;;  %33 = sbr.rel (!%p31_p9) target bundleno = 16 (0x10), region = 157 }
 0xa39   :  { %5740 = vsyncpa [#allocation4], 1 }
 0xa3a   :  { %5742 = vsyncpa [#allocation4 + $0x1], 1 }
 0xa3b   :  { %5743 = vsyncpa [#allocation7], 1 }
 0xa3c   :  { %5744 = vsyncpa [#allocation10], 1 }
 0xa3d   :  { %5745 = vsyncpa [#allocation13], 1 }
 0xa3e   :  { %5746 = vsyncpa [#allocation16], 1 }
 0xa3f   :  { %5747 = vsyncpa [#allocation19], 1 }
 0xa40   :  { %5748 = vsyncpa [#allocation22], 1 }
 0xa41   :  { %5749 = vsyncpa [#allocation5], 1 }
 0xa42   :  { %5751 = vsyncpa [#allocation5 + $0x1], 1 }

</bundles_post_ra>
